<compile_context>
chip_gen: v6e
topology: v6e:2x2x1
jax: 0.10.0
libtpu: 0.0.40
codegen_flags: <defaults>
</compile_context>

<pallas_src>
import numpy as np

import jax
import jax.numpy as jnp
from jax.experimental import pallas as pl
from jax.experimental.pallas import tpu as pltpu


# Architecture constants (view(-1, 320) == 20*4*4 implies 28x28 input).
H0 = 28              # input spatial size
KSZ = 5              # conv kernel size
C1, C2 = 10, 20      # conv1 / conv2 output channels
H1 = H0 - KSZ + 1    # 24  conv1 output spatial size
Q1 = H1 // 2         # 12  pool1 output spatial size
H2 = Q1 - KSZ + 1    # 8   conv2 output spatial size
Q2 = H2 // 2         # 4   pool2 output spatial size
NHID = 50
NCLS = 10

CHUNK = 8            # samples per in-kernel sub-chunk (keeps vregs in budget)
BLOCK_B = 32         # samples per grid step (multiple of CHUNK)
assert BLOCK_B % CHUNK == 0
_R1 = CHUNK * Q1     # 96 stacked activation rows per chunk


# ---------------------------------------------------------------------------
# The fused Pallas kernel (one grid step == BLOCK_B samples)
# ---------------------------------------------------------------------------
def _net_fused_kernel(xe_ref, xo_ref, w1e_ref, w1o_ref, b1_ref,
                      wb2e_ref, wb2o_ref, b2_ref, gall_ref, vf1_ref,
                      bf1_ref, wf2_ref, bf2_ref, o_ref):
    def dot32(a, b):
        return jnp.dot(a, b, preferred_element_type=jnp.float32)

    def roll_up(v, i):
        # result[r] = v[(r + i) % rows]   (sublane rotation on the XLU)
        return pltpu.roll(v, v.shape[0] - i, axis=0)

    w1e = w1e_ref[...]           # (140, 120) bf16
    w1o = w1o_ref[...]
    gall = gall_ref[...]         # (4*CHUNK, 12*CHUNK) bf16
    wf2 = wf2_ref[...]           # (50, 10) bf16

    for c in range(BLOCK_B // CHUNK):
        r0 = c * _R1
        xe = xe_ref[pl.ds(r0, _R1), :]            # (96, 140) bf16
        xo = xo_ref[pl.ds(r0, _R1), :]

        # conv1 + 2x2 max-pool + bias + relu (pooling folded into 4 matmuls).
        m1 = jnp.maximum(dot32(xe, w1e), dot32(xe, w1o))
        m1 = jnp.maximum(m1, dot32(xo, w1e))
        m1 = jnp.maximum(m1, dot32(xo, w1o))
        a1 = jnp.maximum(m1 + b1_ref[...], 0.0)   # (96, 120) f32, rows=(b, j)

        # conv2 as banded matmuls; kernel-row shifts via sublane rolls.
        # Valid conv2 rows are local rows 0..7 of each 12-row sample block;
        # rows 8..11 hold cross-sample garbage and are discarded below.
        # TODO(synk): Dropout2d / F.dropout are identity (eval-mode only).
        o2e = None
        o2o = None
        for i in range(KSZ):
            a1i = a1 if i == 0 else roll_up(a1, i)
            a1b = a1i.astype(jnp.bfloat16)
            pe = dot32(a1b, wb2e_ref[i])          # (96, 80) f32
            po = dot32(a1b, wb2o_ref[i])
            o2e = pe if o2e is None else o2e + pe
            o2o = po if o2o is None else o2o + po

        # 2x2 max-pool + bias + relu (column parity already split across e/o).
        p2 = jnp.maximum(jnp.maximum(o2e, roll_up(o2e, 1)),
                         jnp.maximum(o2o, roll_up(o2o, 1)))
        a2 = jnp.maximum(p2 + b2_ref[...], 0.0)   # (96, 80) f32; valid rows 2j

        # Gather the 4 valid pooled rows per sample -> (4*CHUNK, 80), then fc1.
        z = dot32(gall, a2.astype(jnp.bfloat16))  # rows ordered (j, b)
        y = bf1_ref[...]                          # (1, 50) f32, broadcasts
        for j in range(Q2):
            zj = z[j * CHUNK:(j + 1) * CHUNK, :].astype(jnp.bfloat16)
            y = y + dot32(zj, vf1_ref[j])         # (CHUNK, 50)
        y = jnp.maximum(y, 0.0)

        # fc2 + log_softmax (f32).
        logits = dot32(y.astype(jnp.bfloat16), wf2) + bf2_ref[...]
        zl = logits - jnp.max(logits, axis=-1, keepdims=True)
        out = zl - jnp.log(jnp.sum(jnp.exp(zl), axis=-1, keepdims=True))
        o_ref[pl.ds(c * CHUNK, CHUNK), :] = out


_CONST_ORDER = ("w1e", "w1o", "b1r", "wb2e", "wb2o", "b2r",
                "gall", "vf1", "bf1r", "wf2", "bf2r")


def net_forward(consts, x):
    """x: (N, 1, 28, 28) float32 -> (N, 10) log-probabilities."""
    n = x.shape[0]
    npad = ((n + BLOCK_B - 1) // BLOCK_B) * BLOCK_B
    if npad != n:
        x = jnp.pad(x, ((0, npad - n), (0, 0), (0, 0), (0, 0)))

    # Layout plumbing (hoisted out of the kernel): im2row over the 5 conv1
    # kernel rows and even/odd output-row split for the 2x2 pool, stacked as
    # (npad*12, 140) with rows = (sample, pooled row); cast to bf16.
    xs = x[:, 0].astype(jnp.float32)
    xr = jnp.concatenate([xs[:, i:i + H1, :] for i in range(KSZ)], axis=-1)
    xe = xr[:, 0::2, :].reshape(npad * Q1, KSZ * H0).astype(jnp.bfloat16)
    xo = xr[:, 1::2, :].reshape(npad * Q1, KSZ * H0).astype(jnp.bfloat16)

    weights = [consts[k] for k in _CONST_ORDER]

    def _full(a):
        nd = a.ndim
        return pl.BlockSpec(a.shape, lambda g, _nd=nd: (0,) * _nd)

    out = pl.pallas_call(
        _net_fused_kernel,
        grid=(npad // BLOCK_B,),
        in_specs=[pl.BlockSpec((BLOCK_B * Q1, KSZ * H0), lambda g: (g, 0)),
                  pl.BlockSpec((BLOCK_B * Q1, KSZ * H0), lambda g: (g, 0))]
        + [_full(w) for w in weights],
        out_specs=pl.BlockSpec((BLOCK_B, NCLS), lambda g: (g, 0)),
        out_shape=jax.ShapeDtypeStruct((npad, NCLS), jnp.float32),
        compiler_params=pltpu.CompilerParams(
            dimension_semantics=("parallel",),
            vmem_limit_bytes=32 * 1024 * 1024),
    )(xe, xo, *weights)
    return out[:n]


# ---------------------------------------------------------------------------
# One-time weight re-layout (hoisted out of the forward pass)
# ---------------------------------------------------------------------------
def prepare_params(params):
    w1 = np.asarray(params["conv1_w"], np.float32)   # (10, 1, 5, 5)
    b1 = np.asarray(params["conv1_b"], np.float32)
    w2 = np.asarray(params["conv2_w"], np.float32)   # (20, 10, 5, 5)
    b2 = np.asarray(params["conv2_b"], np.float32)
    fw1 = np.asarray(params["fc1_w"], np.float32)    # (50, 320)
    fb1 = np.asarray(params["fc1_b"], np.float32)
    fw2 = np.asarray(params["fc2_w"], np.float32)    # (10, 50)
    fb2 = np.asarray(params["fc2_b"], np.float32)

    # conv1 banded weight for pool-column parity q:
    # rows = (kernel row i, input col w), cols = (channel c1, pooled col k).
    def conv1_banded(q):
        w = np.zeros((KSZ * H0, C1 * Q1), np.float32)
        for c1 in range(C1):
            for i in range(KSZ):
                for j in range(KSZ):
                    for k in range(Q1):
                        w[i * H0 + 2 * k + q + j, c1 * Q1 + k] = w1[c1, 0, i, j]
        return w

    # conv2 banded weight for kernel row i, pool-column parity q:
    # rows = (channel c1, conv1 pooled col), cols = (channel c2, pooled col k2).
    def conv2_banded(i, q):
        w = np.zeros((C1 * Q1, C2 * Q2), np.float32)
        for c2 in range(C2):
            for c1 in range(C1):
                for j in range(KSZ):
                    for k2 in range(Q2):
                        w[c1 * Q1 + 2 * k2 + q + j, c2 * Q2 + k2] = w2[c2, c1, i, j]
        return w

    # Row gather feeding fc1: pooled row j of sample b (stride-12 stacked rows,
    # valid rows at local offset 2j) -> output row j*CHUNK + b.
    gall = np.zeros((Q2 * CHUNK, Q1 * CHUNK), np.float32)
    for j in range(Q2):
        for b in range(CHUNK):
            gall[j * CHUNK + b, b * Q1 + 2 * j] = 1.0

    # fc1 weight regrouped per pooled row j (NCHW view(-1, 320) order).
    vf1 = np.zeros((Q2, C2 * Q2, NHID), np.float32)
    for j in range(Q2):
        for c2 in range(C2):
            for k2 in range(Q2):
                vf1[j, c2 * Q2 + k2, :] = fw1[:, c2 * Q2 * Q2 + j * Q2 + k2]

    bf16 = jnp.bfloat16
    consts = {
        "w1e": jnp.asarray(conv1_banded(0), bf16),                      # (140, 120)
        "w1o": jnp.asarray(conv1_banded(1), bf16),                      # (140, 120)
        "b1r": jnp.asarray(np.repeat(b1, Q1)[None, :], jnp.float32),    # (1, 120)
        "wb2e": jnp.asarray(np.stack([conv2_banded(i, 0)
                                      for i in range(KSZ)]), bf16),     # (5, 120, 80)
        "wb2o": jnp.asarray(np.stack([conv2_banded(i, 1)
                                      for i in range(KSZ)]), bf16),     # (5, 120, 80)
        "b2r": jnp.asarray(np.repeat(b2, Q2)[None, :], jnp.float32),    # (1, 80)
        "gall": jnp.asarray(gall, bf16),                                # (32, 96)
        "vf1": jnp.asarray(vf1, bf16),                                  # (4, 80, 50)
        "bf1r": jnp.asarray(fb1[None, :], jnp.float32),                 # (1, 50)
        "wf2": jnp.asarray(np.ascontiguousarray(fw2.T), bf16),          # (50, 10)
        "bf2r": jnp.asarray(fb2[None, :], jnp.float32),                 # (1, 10)
    }
    return consts


# ---------------------------------------------------------------------------
# Plain-JAX reference (eval-mode PyTorch semantics) for the correctness check
# ---------------------------------------------------------------------------
def net_reference(params, x):
    dn = ("NCHW", "OIHW", "NCHW")
    y = jax.lax.conv_general_dilated(x, params["conv1_w"], (1, 1), "VALID",
                                     dimension_numbers=dn)
    y = y + params["conv1_b"][None, :, None, None]
    y = jax.lax.reduce_window(y, -jnp.inf, jax.lax.max,
                              (1, 1, 2, 2), (1, 1, 2, 2), "VALID")
    y = jnp.maximum(y, 0.0)
    y = jax.lax.conv_general_dilated(y, params["conv2_w"], (1, 1), "VALID",
                                     dimension_numbers=dn)
    y = y + params["conv2_b"][None, :, None, None]
    y = jax.lax.reduce_window(y, -jnp.inf, jax.lax.max,
                              (1, 1, 2, 2), (1, 1, 2, 2), "VALID")
    y = jnp.maximum(y, 0.0)
    y = y.reshape(x.shape[0], -1)
    y = jnp.maximum(y @ params["fc1_w"].T + params["fc1_b"], 0.0)
    y = y @ params["fc2_w"].T + params["fc2_b"]
    return jax.nn.log_softmax(y, axis=-1)


def init_params(key):
    ks = jax.random.split(key, 8)

    def u(k, shape, fan_in):
        bound = 1.0 / jnp.sqrt(jnp.float32(fan_in))
        return jax.random.uniform(k, shape, jnp.float32, -bound, bound)

    return {
        "conv1_w": u(ks[0], (C1, 1, KSZ, KSZ), 1 * KSZ * KSZ),
        "conv1_b": u(ks[1], (C1,), 1 * KSZ * KSZ),
        "conv2_w": u(ks[2], (C2, C1, KSZ, KSZ), C1 * KSZ * KSZ),
        "conv2_b": u(ks[3], (C2,), C1 * KSZ * KSZ),
        "fc1_w": u(ks[4], (NHID, C2 * Q2 * Q2), C2 * Q2 * Q2),
        "fc1_b": u(ks[5], (NHID,), C2 * Q2 * Q2),
        "fc2_w": u(ks[6], (NCLS, NHID), NHID),
        "fc2_b": u(ks[7], (NCLS,), NHID),
    }


if __name__ == "__main__":
    key = jax.random.PRNGKey(0)
    k_param, k_x = jax.random.split(key)
    params = init_params(k_param)
    consts = prepare_params(params)          # one-time weight re-layout

    # MNIST-style input; 2 grid blocks of 32 samples => both v7x cores busy.
    n = 2 * BLOCK_B
    x = jax.random.normal(k_x, (n, 1, H0, H0), dtype=jnp.float32)

    out = jax.jit(net_forward)(consts, x)
    out = jax.block_until_ready(out)

    assert out.shape == (n, NCLS)
    assert bool(jnp.all(jnp.isfinite(out)))
    # log_softmax rows exponentiate-sum to ~1
    assert bool(jnp.allclose(jnp.sum(jnp.exp(out), axis=1), 1.0, atol=1e-3))
    # matches the plain-XLA f32 reference (bf16 matmul operands => ~1e-3 err)
    ref = net_reference(params, x)
    assert bool(jnp.allclose(out, ref, atol=2e-2, rtol=0.0))
    print("KERNEL_OK")
</pallas_src>

<mosaic_0001>
module attributes {stable_mosaic.version = 11 : i64} {
  func.func @_net_fused_kernel(%arg0: i32, %arg1: memref<384x140xbf16, #tpu.memory_space<vmem>>, %arg2: memref<384x140xbf16, #tpu.memory_space<vmem>>, %arg3: memref<140x120xbf16, #tpu.memory_space<vmem>>, %arg4: memref<140x120xbf16, #tpu.memory_space<vmem>>, %arg5: memref<1x120xf32, #tpu.memory_space<vmem>>, %arg6: memref<5x120x80xbf16, #tpu.memory_space<vmem>>, %arg7: memref<5x120x80xbf16, #tpu.memory_space<vmem>>, %arg8: memref<1x80xf32, #tpu.memory_space<vmem>>, %arg9: memref<32x96xbf16, #tpu.memory_space<vmem>>, %arg10: memref<4x80x50xbf16, #tpu.memory_space<vmem>>, %arg11: memref<1x50xf32, #tpu.memory_space<vmem>>, %arg12: memref<50x10xbf16, #tpu.memory_space<vmem>>, %arg13: memref<1x10xf32, #tpu.memory_space<vmem>>, %arg14: memref<32x10xf32, #tpu.memory_space<vmem>>) attributes {dimension_semantics = [#tpu.dimension_semantics<parallel>], iteration_bounds = array<i64: 2>, scalar_prefetch = 0 : i64, scratch_operands = 0 : i64, tpu.core_type = #tpu.core_type<tc>, window_params = [{transform_indices = @transform_0, window_bounds = array<i64: 384, 140>}, {transform_indices = @transform_1, window_bounds = array<i64: 384, 140>}, {pipeline_mode = #tpu.pipeline_mode<synchronous>, transform_indices = @transform_2, window_bounds = array<i64: 140, 120>}, {pipeline_mode = #tpu.pipeline_mode<synchronous>, transform_indices = @transform_3, window_bounds = array<i64: 140, 120>}, {pipeline_mode = #tpu.pipeline_mode<synchronous>, transform_indices = @transform_4, window_bounds = array<i64: 1, 120>}, {pipeline_mode = #tpu.pipeline_mode<synchronous>, transform_indices = @transform_5, window_bounds = array<i64: 5, 120, 80>}, {pipeline_mode = #tpu.pipeline_mode<synchronous>, transform_indices = @transform_6, window_bounds = array<i64: 5, 120, 80>}, {pipeline_mode = #tpu.pipeline_mode<synchronous>, transform_indices = @transform_7, window_bounds = array<i64: 1, 80>}, {pipeline_mode = #tpu.pipeline_mode<synchronous>, transform_indices = @transform_8, window_bounds = array<i64: 32, 96>}, {pipeline_mode = #tpu.pipeline_mode<synchronous>, transform_indices = @transform_9, window_bounds = array<i64: 4, 80, 50>}, {pipeline_mode = #tpu.pipeline_mode<synchronous>, transform_indices = @transform_10, window_bounds = array<i64: 1, 50>}, {pipeline_mode = #tpu.pipeline_mode<synchronous>, transform_indices = @transform_11, window_bounds = array<i64: 50, 10>}, {pipeline_mode = #tpu.pipeline_mode<synchronous>, transform_indices = @transform_12, window_bounds = array<i64: 1, 10>}, {transform_indices = @transform_13, window_bounds = array<i64: 32, 10>}]} {
    %c0 = arith.constant 0 : index
    %c0_0 = arith.constant 0 : index
    %0 = vector.load %arg3[%c0, %c0_0] : memref<140x120xbf16, #tpu.memory_space<vmem>>, vector<140x120xbf16>
    %c0_1 = arith.constant 0 : index
    %c0_2 = arith.constant 0 : index
    %1 = vector.load %arg4[%c0_1, %c0_2] : memref<140x120xbf16, #tpu.memory_space<vmem>>, vector<140x120xbf16>
    %c0_3 = arith.constant 0 : index
    %c0_4 = arith.constant 0 : index
    %2 = vector.load %arg9[%c0_3, %c0_4] : memref<32x96xbf16, #tpu.memory_space<vmem>>, vector<32x96xbf16>
    %c0_5 = arith.constant 0 : index
    %c0_6 = arith.constant 0 : index
    %3 = vector.load %arg12[%c0_5, %c0_6] : memref<50x10xbf16, #tpu.memory_space<vmem>>, vector<50x10xbf16>
    %c0_7 = arith.constant 0 : index
    %c0_8 = arith.constant 0 : index
    %4 = vector.load %arg1[%c0_7, %c0_8] : memref<384x140xbf16, #tpu.memory_space<vmem>>, vector<96x140xbf16>
    %c0_9 = arith.constant 0 : index
    %c0_10 = arith.constant 0 : index
    %5 = vector.load %arg2[%c0_9, %c0_10] : memref<384x140xbf16, #tpu.memory_space<vmem>>, vector<96x140xbf16>
    %cst = arith.constant dense<0.000000e+00> : vector<96x120xf32>
    %6 = tpu.matmul %4, %0, %cst {dimension_numbers = #tpu.dot_dimension_numbers<[1], [0], [0], [1], [0, 0, 1, 1], [], []>} : vector<96x140xbf16>, vector<140x120xbf16>, vector<96x120xf32> -> vector<96x120xf32>
    %cst_11 = arith.constant dense<0.000000e+00> : vector<96x120xf32>
    %7 = tpu.matmul %4, %1, %cst_11 {dimension_numbers = #tpu.dot_dimension_numbers<[1], [0], [0], [1], [0, 0, 1, 1], [], []>} : vector<96x140xbf16>, vector<140x120xbf16>, vector<96x120xf32> -> vector<96x120xf32>
    %8 = arith.maximumf %6, %7 : vector<96x120xf32>
    %cst_12 = arith.constant dense<0.000000e+00> : vector<96x120xf32>
    %9 = tpu.matmul %5, %0, %cst_12 {dimension_numbers = #tpu.dot_dimension_numbers<[1], [0], [0], [1], [0, 0, 1, 1], [], []>} : vector<96x140xbf16>, vector<140x120xbf16>, vector<96x120xf32> -> vector<96x120xf32>
    %10 = arith.maximumf %8, %9 : vector<96x120xf32>
    %cst_13 = arith.constant dense<0.000000e+00> : vector<96x120xf32>
    %11 = tpu.matmul %5, %1, %cst_13 {dimension_numbers = #tpu.dot_dimension_numbers<[1], [0], [0], [1], [0, 0, 1, 1], [], []>} : vector<96x140xbf16>, vector<140x120xbf16>, vector<96x120xf32> -> vector<96x120xf32>
    %12 = arith.maximumf %10, %11 : vector<96x120xf32>
    %c0_14 = arith.constant 0 : index
    %c0_15 = arith.constant 0 : index
    %13 = vector.load %arg5[%c0_14, %c0_15] : memref<1x120xf32, #tpu.memory_space<vmem>>, vector<1x120xf32>
    %14 = vector.broadcast %13 : vector<1x120xf32> to vector<96x120xf32>
    %15 = arith.addf %12, %14 : vector<96x120xf32>
    %cst_16 = arith.constant 0.000000e+00 : f32
    %16 = vector.broadcast %cst_16 : f32 to vector<96x120xf32>
    %17 = arith.maximumf %15, %16 : vector<96x120xf32>
    %18 = arith.truncf %17 : vector<96x120xf32> to vector<96x120xbf16>
    %c0_17 = arith.constant 0 : index
    %c0_18 = arith.constant 0 : index
    %c0_19 = arith.constant 0 : index
    %19 = vector.load %arg6[%c0_17, %c0_18, %c0_19] : memref<5x120x80xbf16, #tpu.memory_space<vmem>>, vector<1x120x80xbf16>
    %20 = vector.shape_cast %19 : vector<1x120x80xbf16> to vector<120x80xbf16>
    %cst_20 = arith.constant dense<0.000000e+00> : vector<96x80xf32>
    %21 = tpu.matmul %18, %20, %cst_20 {dimension_numbers = #tpu.dot_dimension_numbers<[1], [0], [0], [1], [0, 0, 1, 1], [], []>} : vector<96x120xbf16>, vector<120x80xbf16>, vector<96x80xf32> -> vector<96x80xf32>
    %c0_21 = arith.constant 0 : index
    %c0_22 = arith.constant 0 : index
    %c0_23 = arith.constant 0 : index
    %22 = vector.load %arg7[%c0_21, %c0_22, %c0_23] : memref<5x120x80xbf16, #tpu.memory_space<vmem>>, vector<1x120x80xbf16>
    %23 = vector.shape_cast %22 : vector<1x120x80xbf16> to vector<120x80xbf16>
    %cst_24 = arith.constant dense<0.000000e+00> : vector<96x80xf32>
    %24 = tpu.matmul %18, %23, %cst_24 {dimension_numbers = #tpu.dot_dimension_numbers<[1], [0], [0], [1], [0, 0, 1, 1], [], []>} : vector<96x120xbf16>, vector<120x80xbf16>, vector<96x80xf32> -> vector<96x80xf32>
    %c95_i32 = arith.constant 95 : i32
    %25 = tpu.dynamic_rotate %17 by %c95_i32 dim 0 : vector<96x120xf32>, i32 -> vector<96x120xf32>
    %26 = arith.truncf %25 : vector<96x120xf32> to vector<96x120xbf16>
    %c1 = arith.constant 1 : index
    %c0_25 = arith.constant 0 : index
    %c0_26 = arith.constant 0 : index
    %27 = vector.load %arg6[%c1, %c0_25, %c0_26] : memref<5x120x80xbf16, #tpu.memory_space<vmem>>, vector<1x120x80xbf16>
    %28 = vector.shape_cast %27 : vector<1x120x80xbf16> to vector<120x80xbf16>
    %cst_27 = arith.constant dense<0.000000e+00> : vector<96x80xf32>
    %29 = tpu.matmul %26, %28, %cst_27 {dimension_numbers = #tpu.dot_dimension_numbers<[1], [0], [0], [1], [0, 0, 1, 1], [], []>} : vector<96x120xbf16>, vector<120x80xbf16>, vector<96x80xf32> -> vector<96x80xf32>
    %c1_28 = arith.constant 1 : index
    %c0_29 = arith.constant 0 : index
    %c0_30 = arith.constant 0 : index
    %30 = vector.load %arg7[%c1_28, %c0_29, %c0_30] : memref<5x120x80xbf16, #tpu.memory_space<vmem>>, vector<1x120x80xbf16>
    %31 = vector.shape_cast %30 : vector<1x120x80xbf16> to vector<120x80xbf16>
    %cst_31 = arith.constant dense<0.000000e+00> : vector<96x80xf32>
    %32 = tpu.matmul %26, %31, %cst_31 {dimension_numbers = #tpu.dot_dimension_numbers<[1], [0], [0], [1], [0, 0, 1, 1], [], []>} : vector<96x120xbf16>, vector<120x80xbf16>, vector<96x80xf32> -> vector<96x80xf32>
    %33 = arith.addf %21, %29 : vector<96x80xf32>
    %34 = arith.addf %24, %32 : vector<96x80xf32>
    %c94_i32 = arith.constant 94 : i32
    %35 = tpu.dynamic_rotate %17 by %c94_i32 dim 0 : vector<96x120xf32>, i32 -> vector<96x120xf32>
    %36 = arith.truncf %35 : vector<96x120xf32> to vector<96x120xbf16>
    %c2 = arith.constant 2 : index
    %c0_32 = arith.constant 0 : index
    %c0_33 = arith.constant 0 : index
    %37 = vector.load %arg6[%c2, %c0_32, %c0_33] : memref<5x120x80xbf16, #tpu.memory_space<vmem>>, vector<1x120x80xbf16>
    %38 = vector.shape_cast %37 : vector<1x120x80xbf16> to vector<120x80xbf16>
    %cst_34 = arith.constant dense<0.000000e+00> : vector<96x80xf32>
    %39 = tpu.matmul %36, %38, %cst_34 {dimension_numbers = #tpu.dot_dimension_numbers<[1], [0], [0], [1], [0, 0, 1, 1], [], []>} : vector<96x120xbf16>, vector<120x80xbf16>, vector<96x80xf32> -> vector<96x80xf32>
    %c2_35 = arith.constant 2 : index
    %c0_36 = arith.constant 0 : index
    %c0_37 = arith.constant 0 : index
    %40 = vector.load %arg7[%c2_35, %c0_36, %c0_37] : memref<5x120x80xbf16, #tpu.memory_space<vmem>>, vector<1x120x80xbf16>
    %41 = vector.shape_cast %40 : vector<1x120x80xbf16> to vector<120x80xbf16>
    %cst_38 = arith.constant dense<0.000000e+00> : vector<96x80xf32>
    %42 = tpu.matmul %36, %41, %cst_38 {dimension_numbers = #tpu.dot_dimension_numbers<[1], [0], [0], [1], [0, 0, 1, 1], [], []>} : vector<96x120xbf16>, vector<120x80xbf16>, vector<96x80xf32> -> vector<96x80xf32>
    %43 = arith.addf %33, %39 : vector<96x80xf32>
    %44 = arith.addf %34, %42 : vector<96x80xf32>
    %c93_i32 = arith.constant 93 : i32
    %45 = tpu.dynamic_rotate %17 by %c93_i32 dim 0 : vector<96x120xf32>, i32 -> vector<96x120xf32>
    %46 = arith.truncf %45 : vector<96x120xf32> to vector<96x120xbf16>
    %c3 = arith.constant 3 : index
    %c0_39 = arith.constant 0 : index
    %c0_40 = arith.constant 0 : index
    %47 = vector.load %arg6[%c3, %c0_39, %c0_40] : memref<5x120x80xbf16, #tpu.memory_space<vmem>>, vector<1x120x80xbf16>
    %48 = vector.shape_cast %47 : vector<1x120x80xbf16> to vector<120x80xbf16>
    %cst_41 = arith.constant dense<0.000000e+00> : vector<96x80xf32>
    %49 = tpu.matmul %46, %48, %cst_41 {dimension_numbers = #tpu.dot_dimension_numbers<[1], [0], [0], [1], [0, 0, 1, 1], [], []>} : vector<96x120xbf16>, vector<120x80xbf16>, vector<96x80xf32> -> vector<96x80xf32>
    %c3_42 = arith.constant 3 : index
    %c0_43 = arith.constant 0 : index
    %c0_44 = arith.constant 0 : index
    %50 = vector.load %arg7[%c3_42, %c0_43, %c0_44] : memref<5x120x80xbf16, #tpu.memory_space<vmem>>, vector<1x120x80xbf16>
    %51 = vector.shape_cast %50 : vector<1x120x80xbf16> to vector<120x80xbf16>
    %cst_45 = arith.constant dense<0.000000e+00> : vector<96x80xf32>
    %52 = tpu.matmul %46, %51, %cst_45 {dimension_numbers = #tpu.dot_dimension_numbers<[1], [0], [0], [1], [0, 0, 1, 1], [], []>} : vector<96x120xbf16>, vector<120x80xbf16>, vector<96x80xf32> -> vector<96x80xf32>
    %53 = arith.addf %43, %49 : vector<96x80xf32>
    %54 = arith.addf %44, %52 : vector<96x80xf32>
    %c92_i32 = arith.constant 92 : i32
    %55 = tpu.dynamic_rotate %17 by %c92_i32 dim 0 : vector<96x120xf32>, i32 -> vector<96x120xf32>
    %56 = arith.truncf %55 : vector<96x120xf32> to vector<96x120xbf16>
    %c4 = arith.constant 4 : index
    %c0_46 = arith.constant 0 : index
    %c0_47 = arith.constant 0 : index
    %57 = vector.load %arg6[%c4, %c0_46, %c0_47] : memref<5x120x80xbf16, #tpu.memory_space<vmem>>, vector<1x120x80xbf16>
    %58 = vector.shape_cast %57 : vector<1x120x80xbf16> to vector<120x80xbf16>
    %cst_48 = arith.constant dense<0.000000e+00> : vector<96x80xf32>
    %59 = tpu.matmul %56, %58, %cst_48 {dimension_numbers = #tpu.dot_dimension_numbers<[1], [0], [0], [1], [0, 0, 1, 1], [], []>} : vector<96x120xbf16>, vector<120x80xbf16>, vector<96x80xf32> -> vector<96x80xf32>
    %c4_49 = arith.constant 4 : index
    %c0_50 = arith.constant 0 : index
    %c0_51 = arith.constant 0 : index
    %60 = vector.load %arg7[%c4_49, %c0_50, %c0_51] : memref<5x120x80xbf16, #tpu.memory_space<vmem>>, vector<1x120x80xbf16>
    %61 = vector.shape_cast %60 : vector<1x120x80xbf16> to vector<120x80xbf16>
    %cst_52 = arith.constant dense<0.000000e+00> : vector<96x80xf32>
    %62 = tpu.matmul %56, %61, %cst_52 {dimension_numbers = #tpu.dot_dimension_numbers<[1], [0], [0], [1], [0, 0, 1, 1], [], []>} : vector<96x120xbf16>, vector<120x80xbf16>, vector<96x80xf32> -> vector<96x80xf32>
    %63 = arith.addf %53, %59 : vector<96x80xf32>
    %64 = arith.addf %54, %62 : vector<96x80xf32>
    %c95_i32_53 = arith.constant 95 : i32
    %65 = tpu.dynamic_rotate %63 by %c95_i32_53 dim 0 : vector<96x80xf32>, i32 -> vector<96x80xf32>
    %66 = arith.maximumf %63, %65 : vector<96x80xf32>
    %c95_i32_54 = arith.constant 95 : i32
    %67 = tpu.dynamic_rotate %64 by %c95_i32_54 dim 0 : vector<96x80xf32>, i32 -> vector<96x80xf32>
    %68 = arith.maximumf %64, %67 : vector<96x80xf32>
    %69 = arith.maximumf %66, %68 : vector<96x80xf32>
    %c0_55 = arith.constant 0 : index
    %c0_56 = arith.constant 0 : index
    %70 = vector.load %arg8[%c0_55, %c0_56] : memref<1x80xf32, #tpu.memory_space<vmem>>, vector<1x80xf32>
    %71 = vector.broadcast %70 : vector<1x80xf32> to vector<96x80xf32>
    %72 = arith.addf %69, %71 : vector<96x80xf32>
    %cst_57 = arith.constant 0.000000e+00 : f32
    %73 = vector.broadcast %cst_57 : f32 to vector<96x80xf32>
    %74 = arith.maximumf %72, %73 : vector<96x80xf32>
    %75 = arith.truncf %74 : vector<96x80xf32> to vector<96x80xbf16>
    %cst_58 = arith.constant dense<0.000000e+00> : vector<32x80xf32>
    %76 = tpu.matmul %2, %75, %cst_58 {dimension_numbers = #tpu.dot_dimension_numbers<[1], [0], [0], [1], [0, 0, 1, 1], [], []>} : vector<32x96xbf16>, vector<96x80xbf16>, vector<32x80xf32> -> vector<32x80xf32>
    %c0_59 = arith.constant 0 : index
    %c0_60 = arith.constant 0 : index
    %77 = vector.load %arg11[%c0_59, %c0_60] : memref<1x50xf32, #tpu.memory_space<vmem>>, vector<1x50xf32>
    %78 = vector.extract_strided_slice %76 {offsets = [0, 0], sizes = [8, 80], strides = [1, 1]} : vector<32x80xf32> to vector<8x80xf32>
    %79 = arith.truncf %78 : vector<8x80xf32> to vector<8x80xbf16>
    %c0_61 = arith.constant 0 : index
    %c0_62 = arith.constant 0 : index
    %c0_63 = arith.constant 0 : index
    %80 = vector.load %arg10[%c0_61, %c0_62, %c0_63] : memref<4x80x50xbf16, #tpu.memory_space<vmem>>, vector<1x80x50xbf16>
    %81 = vector.shape_cast %80 : vector<1x80x50xbf16> to vector<80x50xbf16>
    %cst_64 = arith.constant dense<0.000000e+00> : vector<8x50xf32>
    %82 = tpu.matmul %79, %81, %cst_64 {dimension_numbers = #tpu.dot_dimension_numbers<[1], [0], [0], [1], [0, 0, 1, 1], [], []>} : vector<8x80xbf16>, vector<80x50xbf16>, vector<8x50xf32> -> vector<8x50xf32>
    %83 = vector.broadcast %77 : vector<1x50xf32> to vector<8x50xf32>
    %84 = arith.addf %83, %82 : vector<8x50xf32>
    %85 = vector.extract_strided_slice %76 {offsets = [8, 0], sizes = [8, 80], strides = [1, 1]} : vector<32x80xf32> to vector<8x80xf32>
    %86 = arith.truncf %85 : vector<8x80xf32> to vector<8x80xbf16>
    %c1_65 = arith.constant 1 : index
    %c0_66 = arith.constant 0 : index
    %c0_67 = arith.constant 0 : index
    %87 = vector.load %arg10[%c1_65, %c0_66, %c0_67] : memref<4x80x50xbf16, #tpu.memory_space<vmem>>, vector<1x80x50xbf16>
    %88 = vector.shape_cast %87 : vector<1x80x50xbf16> to vector<80x50xbf16>
    %cst_68 = arith.constant dense<0.000000e+00> : vector<8x50xf32>
    %89 = tpu.matmul %86, %88, %cst_68 {dimension_numbers = #tpu.dot_dimension_numbers<[1], [0], [0], [1], [0, 0, 1, 1], [], []>} : vector<8x80xbf16>, vector<80x50xbf16>, vector<8x50xf32> -> vector<8x50xf32>
    %90 = arith.addf %84, %89 : vector<8x50xf32>
    %91 = vector.extract_strided_slice %76 {offsets = [16, 0], sizes = [8, 80], strides = [1, 1]} : vector<32x80xf32> to vector<8x80xf32>
    %92 = arith.truncf %91 : vector<8x80xf32> to vector<8x80xbf16>
    %c2_69 = arith.constant 2 : index
    %c0_70 = arith.constant 0 : index
    %c0_71 = arith.constant 0 : index
    %93 = vector.load %arg10[%c2_69, %c0_70, %c0_71] : memref<4x80x50xbf16, #tpu.memory_space<vmem>>, vector<1x80x50xbf16>
    %94 = vector.shape_cast %93 : vector<1x80x50xbf16> to vector<80x50xbf16>
    %cst_72 = arith.constant dense<0.000000e+00> : vector<8x50xf32>
    %95 = tpu.matmul %92, %94, %cst_72 {dimension_numbers = #tpu.dot_dimension_numbers<[1], [0], [0], [1], [0, 0, 1, 1], [], []>} : vector<8x80xbf16>, vector<80x50xbf16>, vector<8x50xf32> -> vector<8x50xf32>
    %96 = arith.addf %90, %95 : vector<8x50xf32>
    %97 = vector.extract_strided_slice %76 {offsets = [24, 0], sizes = [8, 80], strides = [1, 1]} : vector<32x80xf32> to vector<8x80xf32>
    %98 = arith.truncf %97 : vector<8x80xf32> to vector<8x80xbf16>
    %c3_73 = arith.constant 3 : index
    %c0_74 = arith.constant 0 : index
    %c0_75 = arith.constant 0 : index
    %99 = vector.load %arg10[%c3_73, %c0_74, %c0_75] : memref<4x80x50xbf16, #tpu.memory_space<vmem>>, vector<1x80x50xbf16>
    %100 = vector.shape_cast %99 : vector<1x80x50xbf16> to vector<80x50xbf16>
    %cst_76 = arith.constant dense<0.000000e+00> : vector<8x50xf32>
    %101 = tpu.matmul %98, %100, %cst_76 {dimension_numbers = #tpu.dot_dimension_numbers<[1], [0], [0], [1], [0, 0, 1, 1], [], []>} : vector<8x80xbf16>, vector<80x50xbf16>, vector<8x50xf32> -> vector<8x50xf32>
    %102 = arith.addf %96, %101 : vector<8x50xf32>
    %cst_77 = arith.constant 0.000000e+00 : f32
    %103 = vector.broadcast %cst_77 : f32 to vector<8x50xf32>
    %104 = arith.maximumf %102, %103 : vector<8x50xf32>
    %105 = arith.truncf %104 : vector<8x50xf32> to vector<8x50xbf16>
    %cst_78 = arith.constant dense<0.000000e+00> : vector<8x10xf32>
    %106 = tpu.matmul %105, %3, %cst_78 {dimension_numbers = #tpu.dot_dimension_numbers<[1], [0], [0], [1], [0, 0, 1, 1], [], []>} : vector<8x50xbf16>, vector<50x10xbf16>, vector<8x10xf32> -> vector<8x10xf32>
    %c0_79 = arith.constant 0 : index
    %c0_80 = arith.constant 0 : index
    %107 = vector.load %arg13[%c0_79, %c0_80] : memref<1x10xf32, #tpu.memory_space<vmem>>, vector<1x10xf32>
    %108 = vector.broadcast %107 : vector<1x10xf32> to vector<8x10xf32>
    %109 = arith.addf %106, %108 : vector<8x10xf32>
    %cst_81 = arith.constant dense<0xFF800000> : vector<8xf32>
    %110 = vector.multi_reduction <maximumf>, %109, %cst_81 [1] : vector<8x10xf32> to vector<8xf32>
    %111 = vector.shape_cast %110 : vector<8xf32> to vector<8x1xf32>
    %112 = vector.broadcast %111 : vector<8x1xf32> to vector<8x10xf32>
    %113 = arith.subf %109, %112 : vector<8x10xf32>
    %114 = math.exp %113 : vector<8x10xf32>
    %cst_82 = arith.constant dense<0.000000e+00> : vector<8xf32>
    %115 = vector.multi_reduction <add>, %114, %cst_82 [1] : vector<8x10xf32> to vector<8xf32>
    %116 = vector.shape_cast %115 : vector<8xf32> to vector<8x1xf32>
    %117 = math.log %116 : vector<8x1xf32>
    %118 = vector.broadcast %117 : vector<8x1xf32> to vector<8x10xf32>
    %119 = arith.subf %113, %118 : vector<8x10xf32>
    %c0_83 = arith.constant 0 : index
    %c0_84 = arith.constant 0 : index
    %120 = vector.load %arg14[%c0_83, %c0_84] : memref<32x10xf32, #tpu.memory_space<vmem>>, vector<8x10xf32>
    tpu.vector_store %arg14[%c0_83, %c0_84], %119 {strides = array<i32>} : memref<32x10xf32, #tpu.memory_space<vmem>>, vector<8x10xf32>,
    %c96 = arith.constant 96 : index
    %c0_85 = arith.constant 0 : index
    %121 = vector.load %arg1[%c96, %c0_85] : memref<384x140xbf16, #tpu.memory_space<vmem>>, vector<96x140xbf16>
    %c96_86 = arith.constant 96 : index
    %c0_87 = arith.constant 0 : index
    %122 = vector.load %arg2[%c96_86, %c0_87] : memref<384x140xbf16, #tpu.memory_space<vmem>>, vector<96x140xbf16>
    %cst_88 = arith.constant dense<0.000000e+00> : vector<96x120xf32>
    %123 = tpu.matmul %121, %0, %cst_88 {dimension_numbers = #tpu.dot_dimension_numbers<[1], [0], [0], [1], [0, 0, 1, 1], [], []>} : vector<96x140xbf16>, vector<140x120xbf16>, vector<96x120xf32> -> vector<96x120xf32>
    %cst_89 = arith.constant dense<0.000000e+00> : vector<96x120xf32>
    %124 = tpu.matmul %121, %1, %cst_89 {dimension_numbers = #tpu.dot_dimension_numbers<[1], [0], [0], [1], [0, 0, 1, 1], [], []>} : vector<96x140xbf16>, vector<140x120xbf16>, vector<96x120xf32> -> vector<96x120xf32>
    %125 = arith.maximumf %123, %124 : vector<96x120xf32>
    %cst_90 = arith.constant dense<0.000000e+00> : vector<96x120xf32>
    %126 = tpu.matmul %122, %0, %cst_90 {dimension_numbers = #tpu.dot_dimension_numbers<[1], [0], [0], [1], [0, 0, 1, 1], [], []>} : vector<96x140xbf16>, vector<140x120xbf16>, vector<96x120xf32> -> vector<96x120xf32>
    %127 = arith.maximumf %125, %126 : vector<96x120xf32>
    %cst_91 = arith.constant dense<0.000000e+00> : vector<96x120xf32>
    %128 = tpu.matmul %122, %1, %cst_91 {dimension_numbers = #tpu.dot_dimension_numbers<[1], [0], [0], [1], [0, 0, 1, 1], [], []>} : vector<96x140xbf16>, vector<140x120xbf16>, vector<96x120xf32> -> vector<96x120xf32>
    %129 = arith.maximumf %127, %128 : vector<96x120xf32>
    %c0_92 = arith.constant 0 : index
    %c0_93 = arith.constant 0 : index
    %130 = vector.load %arg5[%c0_92, %c0_93] : memref<1x120xf32, #tpu.memory_space<vmem>>, vector<1x120xf32>
    %131 = vector.broadcast %130 : vector<1x120xf32> to vector<96x120xf32>
    %132 = arith.addf %129, %131 : vector<96x120xf32>
    %cst_94 = arith.constant 0.000000e+00 : f32
    %133 = vector.broadcast %cst_94 : f32 to vector<96x120xf32>
    %134 = arith.maximumf %132, %133 : vector<96x120xf32>
    %135 = arith.truncf %134 : vector<96x120xf32> to vector<96x120xbf16>
    %c0_95 = arith.constant 0 : index
    %c0_96 = arith.constant 0 : index
    %c0_97 = arith.constant 0 : index
    %136 = vector.load %arg6[%c0_95, %c0_96, %c0_97] : memref<5x120x80xbf16, #tpu.memory_space<vmem>>, vector<1x120x80xbf16>
    %137 = vector.shape_cast %136 : vector<1x120x80xbf16> to vector<120x80xbf16>
    %cst_98 = arith.constant dense<0.000000e+00> : vector<96x80xf32>
    %138 = tpu.matmul %135, %137, %cst_98 {dimension_numbers = #tpu.dot_dimension_numbers<[1], [0], [0], [1], [0, 0, 1, 1], [], []>} : vector<96x120xbf16>, vector<120x80xbf16>, vector<96x80xf32> -> vector<96x80xf32>
    %c0_99 = arith.constant 0 : index
    %c0_100 = arith.constant 0 : index
    %c0_101 = arith.constant 0 : index
    %139 = vector.load %arg7[%c0_99, %c0_100, %c0_101] : memref<5x120x80xbf16, #tpu.memory_space<vmem>>, vector<1x120x80xbf16>
    %140 = vector.shape_cast %139 : vector<1x120x80xbf16> to vector<120x80xbf16>
    %cst_102 = arith.constant dense<0.000000e+00> : vector<96x80xf32>
    %141 = tpu.matmul %135, %140, %cst_102 {dimension_numbers = #tpu.dot_dimension_numbers<[1], [0], [0], [1], [0, 0, 1, 1], [], []>} : vector<96x120xbf16>, vector<120x80xbf16>, vector<96x80xf32> -> vector<96x80xf32>
    %c95_i32_103 = arith.constant 95 : i32
    %142 = tpu.dynamic_rotate %134 by %c95_i32_103 dim 0 : vector<96x120xf32>, i32 -> vector<96x120xf32>
    %143 = arith.truncf %142 : vector<96x120xf32> to vector<96x120xbf16>
    %c1_104 = arith.constant 1 : index
    %c0_105 = arith.constant 0 : index
    %c0_106 = arith.constant 0 : index
    %144 = vector.load %arg6[%c1_104, %c0_105, %c0_106] : memref<5x120x80xbf16, #tpu.memory_space<vmem>>, vector<1x120x80xbf16>
    %145 = vector.shape_cast %144 : vector<1x120x80xbf16> to vector<120x80xbf16>
    %cst_107 = arith.constant dense<0.000000e+00> : vector<96x80xf32>
    %146 = tpu.matmul %143, %145, %cst_107 {dimension_numbers = #tpu.dot_dimension_numbers<[1], [0], [0], [1], [0, 0, 1, 1], [], []>} : vector<96x120xbf16>, vector<120x80xbf16>, vector<96x80xf32> -> vector<96x80xf32>
    %c1_108 = arith.constant 1 : index
    %c0_109 = arith.constant 0 : index
    %c0_110 = arith.constant 0 : index
    %147 = vector.load %arg7[%c1_108, %c0_109, %c0_110] : memref<5x120x80xbf16, #tpu.memory_space<vmem>>, vector<1x120x80xbf16>
    %148 = vector.shape_cast %147 : vector<1x120x80xbf16> to vector<120x80xbf16>
    %cst_111 = arith.constant dense<0.000000e+00> : vector<96x80xf32>
    %149 = tpu.matmul %143, %148, %cst_111 {dimension_numbers = #tpu.dot_dimension_numbers<[1], [0], [0], [1], [0, 0, 1, 1], [], []>} : vector<96x120xbf16>, vector<120x80xbf16>, vector<96x80xf32> -> vector<96x80xf32>
    %150 = arith.addf %138, %146 : vector<96x80xf32>
    %151 = arith.addf %141, %149 : vector<96x80xf32>
    %c94_i32_112 = arith.constant 94 : i32
    %152 = tpu.dynamic_rotate %134 by %c94_i32_112 dim 0 : vector<96x120xf32>, i32 -> vector<96x120xf32>
    %153 = arith.truncf %152 : vector<96x120xf32> to vector<96x120xbf16>
    %c2_113 = arith.constant 2 : index
    %c0_114 = arith.constant 0 : index
    %c0_115 = arith.constant 0 : index
    %154 = vector.load %arg6[%c2_113, %c0_114, %c0_115] : memref<5x120x80xbf16, #tpu.memory_space<vmem>>, vector<1x120x80xbf16>
    %155 = vector.shape_cast %154 : vector<1x120x80xbf16> to vector<120x80xbf16>
    %cst_116 = arith.constant dense<0.000000e+00> : vector<96x80xf32>
    %156 = tpu.matmul %153, %155, %cst_116 {dimension_numbers = #tpu.dot_dimension_numbers<[1], [0], [0], [1], [0, 0, 1, 1], [], []>} : vector<96x120xbf16>, vector<120x80xbf16>, vector<96x80xf32> -> vector<96x80xf32>
    %c2_117 = arith.constant 2 : index
    %c0_118 = arith.constant 0 : index
    %c0_119 = arith.constant 0 : index
    %157 = vector.load %arg7[%c2_117, %c0_118, %c0_119] : memref<5x120x80xbf16, #tpu.memory_space<vmem>>, vector<1x120x80xbf16>
    %158 = vector.shape_cast %157 : vector<1x120x80xbf16> to vector<120x80xbf16>
    %cst_120 = arith.constant dense<0.000000e+00> : vector<96x80xf32>
    %159 = tpu.matmul %153, %158, %cst_120 {dimension_numbers = #tpu.dot_dimension_numbers<[1], [0], [0], [1], [0, 0, 1, 1], [], []>} : vector<96x120xbf16>, vector<120x80xbf16>, vector<96x80xf32> -> vector<96x80xf32>
    %160 = arith.addf %150, %156 : vector<96x80xf32>
    %161 = arith.addf %151, %159 : vector<96x80xf32>
    %c93_i32_121 = arith.constant 93 : i32
    %162 = tpu.dynamic_rotate %134 by %c93_i32_121 dim 0 : vector<96x120xf32>, i32 -> vector<96x120xf32>
    %163 = arith.truncf %162 : vector<96x120xf32> to vector<96x120xbf16>
    %c3_122 = arith.constant 3 : index
    %c0_123 = arith.constant 0 : index
    %c0_124 = arith.constant 0 : index
    %164 = vector.load %arg6[%c3_122, %c0_123, %c0_124] : memref<5x120x80xbf16, #tpu.memory_space<vmem>>, vector<1x120x80xbf16>
    %165 = vector.shape_cast %164 : vector<1x120x80xbf16> to vector<120x80xbf16>
    %cst_125 = arith.constant dense<0.000000e+00> : vector<96x80xf32>
    %166 = tpu.matmul %163, %165, %cst_125 {dimension_numbers = #tpu.dot_dimension_numbers<[1], [0], [0], [1], [0, 0, 1, 1], [], []>} : vector<96x120xbf16>, vector<120x80xbf16>, vector<96x80xf32> -> vector<96x80xf32>
    %c3_126 = arith.constant 3 : index
    %c0_127 = arith.constant 0 : index
    %c0_128 = arith.constant 0 : index
    %167 = vector.load %arg7[%c3_126, %c0_127, %c0_128] : memref<5x120x80xbf16, #tpu.memory_space<vmem>>, vector<1x120x80xbf16>
    %168 = vector.shape_cast %167 : vector<1x120x80xbf16> to vector<120x80xbf16>
    %cst_129 = arith.constant dense<0.000000e+00> : vector<96x80xf32>
    %169 = tpu.matmul %163, %168, %cst_129 {dimension_numbers = #tpu.dot_dimension_numbers<[1], [0], [0], [1], [0, 0, 1, 1], [], []>} : vector<96x120xbf16>, vector<120x80xbf16>, vector<96x80xf32> -> vector<96x80xf32>
    %170 = arith.addf %160, %166 : vector<96x80xf32>
    %171 = arith.addf %161, %169 : vector<96x80xf32>
    %c92_i32_130 = arith.constant 92 : i32
    %172 = tpu.dynamic_rotate %134 by %c92_i32_130 dim 0 : vector<96x120xf32>, i32 -> vector<96x120xf32>
    %173 = arith.truncf %172 : vector<96x120xf32> to vector<96x120xbf16>
    %c4_131 = arith.constant 4 : index
    %c0_132 = arith.constant 0 : index
    %c0_133 = arith.constant 0 : index
    %174 = vector.load %arg6[%c4_131, %c0_132, %c0_133] : memref<5x120x80xbf16, #tpu.memory_space<vmem>>, vector<1x120x80xbf16>
    %175 = vector.shape_cast %174 : vector<1x120x80xbf16> to vector<120x80xbf16>
    %cst_134 = arith.constant dense<0.000000e+00> : vector<96x80xf32>
    %176 = tpu.matmul %173, %175, %cst_134 {dimension_numbers = #tpu.dot_dimension_numbers<[1], [0], [0], [1], [0, 0, 1, 1], [], []>} : vector<96x120xbf16>, vector<120x80xbf16>, vector<96x80xf32> -> vector<96x80xf32>
    %c4_135 = arith.constant 4 : index
    %c0_136 = arith.constant 0 : index
    %c0_137 = arith.constant 0 : index
    %177 = vector.load %arg7[%c4_135, %c0_136, %c0_137] : memref<5x120x80xbf16, #tpu.memory_space<vmem>>, vector<1x120x80xbf16>
    %178 = vector.shape_cast %177 : vector<1x120x80xbf16> to vector<120x80xbf16>
    %cst_138 = arith.constant dense<0.000000e+00> : vector<96x80xf32>
    %179 = tpu.matmul %173, %178, %cst_138 {dimension_numbers = #tpu.dot_dimension_numbers<[1], [0], [0], [1], [0, 0, 1, 1], [], []>} : vector<96x120xbf16>, vector<120x80xbf16>, vector<96x80xf32> -> vector<96x80xf32>
    %180 = arith.addf %170, %176 : vector<96x80xf32>
    %181 = arith.addf %171, %179 : vector<96x80xf32>
    %c95_i32_139 = arith.constant 95 : i32
    %182 = tpu.dynamic_rotate %180 by %c95_i32_139 dim 0 : vector<96x80xf32>, i32 -> vector<96x80xf32>
    %183 = arith.maximumf %180, %182 : vector<96x80xf32>
    %c95_i32_140 = arith.constant 95 : i32
    %184 = tpu.dynamic_rotate %181 by %c95_i32_140 dim 0 : vector<96x80xf32>, i32 -> vector<96x80xf32>
    %185 = arith.maximumf %181, %184 : vector<96x80xf32>
    %186 = arith.maximumf %183, %185 : vector<96x80xf32>
    %c0_141 = arith.constant 0 : index
    %c0_142 = arith.constant 0 : index
    %187 = vector.load %arg8[%c0_141, %c0_142] : memref<1x80xf32, #tpu.memory_space<vmem>>, vector<1x80xf32>
    %188 = vector.broadcast %187 : vector<1x80xf32> to vector<96x80xf32>
    %189 = arith.addf %186, %188 : vector<96x80xf32>
    %cst_143 = arith.constant 0.000000e+00 : f32
    %190 = vector.broadcast %cst_143 : f32 to vector<96x80xf32>
    %191 = arith.maximumf %189, %190 : vector<96x80xf32>
    %192 = arith.truncf %191 : vector<96x80xf32> to vector<96x80xbf16>
    %cst_144 = arith.constant dense<0.000000e+00> : vector<32x80xf32>
    %193 = tpu.matmul %2, %192, %cst_144 {dimension_numbers = #tpu.dot_dimension_numbers<[1], [0], [0], [1], [0, 0, 1, 1], [], []>} : vector<32x96xbf16>, vector<96x80xbf16>, vector<32x80xf32> -> vector<32x80xf32>
    %c0_145 = arith.constant 0 : index
    %c0_146 = arith.constant 0 : index
    %194 = vector.load %arg11[%c0_145, %c0_146] : memref<1x50xf32, #tpu.memory_space<vmem>>, vector<1x50xf32>
    %195 = vector.extract_strided_slice %193 {offsets = [0, 0], sizes = [8, 80], strides = [1, 1]} : vector<32x80xf32> to vector<8x80xf32>
    %196 = arith.truncf %195 : vector<8x80xf32> to vector<8x80xbf16>
    %c0_147 = arith.constant 0 : index
    %c0_148 = arith.constant 0 : index
    %c0_149 = arith.constant 0 : index
    %197 = vector.load %arg10[%c0_147, %c0_148, %c0_149] : memref<4x80x50xbf16, #tpu.memory_space<vmem>>, vector<1x80x50xbf16>
    %198 = vector.shape_cast %197 : vector<1x80x50xbf16> to vector<80x50xbf16>
    %cst_150 = arith.constant dense<0.000000e+00> : vector<8x50xf32>
    %199 = tpu.matmul %196, %198, %cst_150 {dimension_numbers = #tpu.dot_dimension_numbers<[1], [0], [0], [1], [0, 0, 1, 1], [], []>} : vector<8x80xbf16>, vector<80x50xbf16>, vector<8x50xf32> -> vector<8x50xf32>
    %200 = vector.broadcast %194 : vector<1x50xf32> to vector<8x50xf32>
    %201 = arith.addf %200, %199 : vector<8x50xf32>
    %202 = vector.extract_strided_slice %193 {offsets = [8, 0], sizes = [8, 80], strides = [1, 1]} : vector<32x80xf32> to vector<8x80xf32>
    %203 = arith.truncf %202 : vector<8x80xf32> to vector<8x80xbf16>
    %c1_151 = arith.constant 1 : index
    %c0_152 = arith.constant 0 : index
    %c0_153 = arith.constant 0 : index
    %204 = vector.load %arg10[%c1_151, %c0_152, %c0_153] : memref<4x80x50xbf16, #tpu.memory_space<vmem>>, vector<1x80x50xbf16>
    %205 = vector.shape_cast %204 : vector<1x80x50xbf16> to vector<80x50xbf16>
    %cst_154 = arith.constant dense<0.000000e+00> : vector<8x50xf32>
    %206 = tpu.matmul %203, %205, %cst_154 {dimension_numbers = #tpu.dot_dimension_numbers<[1], [0], [0], [1], [0, 0, 1, 1], [], []>} : vector<8x80xbf16>, vector<80x50xbf16>, vector<8x50xf32> -> vector<8x50xf32>
    %207 = arith.addf %201, %206 : vector<8x50xf32>
    %208 = vector.extract_strided_slice %193 {offsets = [16, 0], sizes = [8, 80], strides = [1, 1]} : vector<32x80xf32> to vector<8x80xf32>
    %209 = arith.truncf %208 : vector<8x80xf32> to vector<8x80xbf16>
    %c2_155 = arith.constant 2 : index
    %c0_156 = arith.constant 0 : index
    %c0_157 = arith.constant 0 : index
    %210 = vector.load %arg10[%c2_155, %c0_156, %c0_157] : memref<4x80x50xbf16, #tpu.memory_space<vmem>>, vector<1x80x50xbf16>
    %211 = vector.shape_cast %210 : vector<1x80x50xbf16> to vector<80x50xbf16>
    %cst_158 = arith.constant dense<0.000000e+00> : vector<8x50xf32>
    %212 = tpu.matmul %209, %211, %cst_158 {dimension_numbers = #tpu.dot_dimension_numbers<[1], [0], [0], [1], [0, 0, 1, 1], [], []>} : vector<8x80xbf16>, vector<80x50xbf16>, vector<8x50xf32> -> vector<8x50xf32>
    %213 = arith.addf %207, %212 : vector<8x50xf32>
    %214 = vector.extract_strided_slice %193 {offsets = [24, 0], sizes = [8, 80], strides = [1, 1]} : vector<32x80xf32> to vector<8x80xf32>
    %215 = arith.truncf %214 : vector<8x80xf32> to vector<8x80xbf16>
    %c3_159 = arith.constant 3 : index
    %c0_160 = arith.constant 0 : index
    %c0_161 = arith.constant 0 : index
    %216 = vector.load %arg10[%c3_159, %c0_160, %c0_161] : memref<4x80x50xbf16, #tpu.memory_space<vmem>>, vector<1x80x50xbf16>
    %217 = vector.shape_cast %216 : vector<1x80x50xbf16> to vector<80x50xbf16>
    %cst_162 = arith.constant dense<0.000000e+00> : vector<8x50xf32>
    %218 = tpu.matmul %215, %217, %cst_162 {dimension_numbers = #tpu.dot_dimension_numbers<[1], [0], [0], [1], [0, 0, 1, 1], [], []>} : vector<8x80xbf16>, vector<80x50xbf16>, vector<8x50xf32> -> vector<8x50xf32>
    %219 = arith.addf %213, %218 : vector<8x50xf32>
    %cst_163 = arith.constant 0.000000e+00 : f32
    %220 = vector.broadcast %cst_163 : f32 to vector<8x50xf32>
    %221 = arith.maximumf %219, %220 : vector<8x50xf32>
    %222 = arith.truncf %221 : vector<8x50xf32> to vector<8x50xbf16>
    %cst_164 = arith.constant dense<0.000000e+00> : vector<8x10xf32>
    %223 = tpu.matmul %222, %3, %cst_164 {dimension_numbers = #tpu.dot_dimension_numbers<[1], [0], [0], [1], [0, 0, 1, 1], [], []>} : vector<8x50xbf16>, vector<50x10xbf16>, vector<8x10xf32> -> vector<8x10xf32>
    %c0_165 = arith.constant 0 : index
    %c0_166 = arith.constant 0 : index
    %224 = vector.load %arg13[%c0_165, %c0_166] : memref<1x10xf32, #tpu.memory_space<vmem>>, vector<1x10xf32>
    %225 = vector.broadcast %224 : vector<1x10xf32> to vector<8x10xf32>
    %226 = arith.addf %223, %225 : vector<8x10xf32>
    %cst_167 = arith.constant dense<0xFF800000> : vector<8xf32>
    %227 = vector.multi_reduction <maximumf>, %226, %cst_167 [1] : vector<8x10xf32> to vector<8xf32>
    %228 = vector.shape_cast %227 : vector<8xf32> to vector<8x1xf32>
    %229 = vector.broadcast %228 : vector<8x1xf32> to vector<8x10xf32>
    %230 = arith.subf %226, %229 : vector<8x10xf32>
    %231 = math.exp %230 : vector<8x10xf32>
    %cst_168 = arith.constant dense<0.000000e+00> : vector<8xf32>
    %232 = vector.multi_reduction <add>, %231, %cst_168 [1] : vector<8x10xf32> to vector<8xf32>
    %233 = vector.shape_cast %232 : vector<8xf32> to vector<8x1xf32>
    %234 = math.log %233 : vector<8x1xf32>
    %235 = vector.broadcast %234 : vector<8x1xf32> to vector<8x10xf32>
    %236 = arith.subf %230, %235 : vector<8x10xf32>
    %c8 = arith.constant 8 : index
    %c0_169 = arith.constant 0 : index
    %237 = vector.load %arg14[%c8, %c0_169] : memref<32x10xf32, #tpu.memory_space<vmem>>, vector<8x10xf32>
    tpu.vector_store %arg14[%c8, %c0_169], %236 {strides = array<i32>} : memref<32x10xf32, #tpu.memory_space<vmem>>, vector<8x10xf32>,
    %c192 = arith.constant 192 : index
    %c0_170 = arith.constant 0 : index
    %238 = vector.load %arg1[%c192, %c0_170] : memref<384x140xbf16, #tpu.memory_space<vmem>>, vector<96x140xbf16>
    %c192_171 = arith.constant 192 : index
    %c0_172 = arith.constant 0 : index
    %239 = vector.load %arg2[%c192_171, %c0_172] : memref<384x140xbf16, #tpu.memory_space<vmem>>, vector<96x140xbf16>
    %cst_173 = arith.constant dense<0.000000e+00> : vector<96x120xf32>
    %240 = tpu.matmul %238, %0, %cst_173 {dimension_numbers = #tpu.dot_dimension_numbers<[1], [0], [0], [1], [0, 0, 1, 1], [], []>} : vector<96x140xbf16>, vector<140x120xbf16>, vector<96x120xf32> -> vector<96x120xf32>
    %cst_174 = arith.constant dense<0.000000e+00> : vector<96x120xf32>
    %241 = tpu.matmul %238, %1, %cst_174 {dimension_numbers = #tpu.dot_dimension_numbers<[1], [0], [0], [1], [0, 0, 1, 1], [], []>} : vector<96x140xbf16>, vector<140x120xbf16>, vector<96x120xf32> -> vector<96x120xf32>
    %242 = arith.maximumf %240, %241 : vector<96x120xf32>
    %cst_175 = arith.constant dense<0.000000e+00> : vector<96x120xf32>
    %243 = tpu.matmul %239, %0, %cst_175 {dimension_numbers = #tpu.dot_dimension_numbers<[1], [0], [0], [1], [0, 0, 1, 1], [], []>} : vector<96x140xbf16>, vector<140x120xbf16>, vector<96x120xf32> -> vector<96x120xf32>
    %244 = arith.maximumf %242, %243 : vector<96x120xf32>
    %cst_176 = arith.constant dense<0.000000e+00> : vector<96x120xf32>
    %245 = tpu.matmul %239, %1, %cst_176 {dimension_numbers = #tpu.dot_dimension_numbers<[1], [0], [0], [1], [0, 0, 1, 1], [], []>} : vector<96x140xbf16>, vector<140x120xbf16>, vector<96x120xf32> -> vector<96x120xf32>
    %246 = arith.maximumf %244, %245 : vector<96x120xf32>
    %c0_177 = arith.constant 0 : index
    %c0_178 = arith.constant 0 : index
    %247 = vector.load %arg5[%c0_177, %c0_178] : memref<1x120xf32, #tpu.memory_space<vmem>>, vector<1x120xf32>
    %248 = vector.broadcast %247 : vector<1x120xf32> to vector<96x120xf32>
    %249 = arith.addf %246, %248 : vector<96x120xf32>
    %cst_179 = arith.constant 0.000000e+00 : f32
    %250 = vector.broadcast %cst_179 : f32 to vector<96x120xf32>
    %251 = arith.maximumf %249, %250 : vector<96x120xf32>
    %252 = arith.truncf %251 : vector<96x120xf32> to vector<96x120xbf16>
    %c0_180 = arith.constant 0 : index
    %c0_181 = arith.constant 0 : index
    %c0_182 = arith.constant 0 : index
    %253 = vector.load %arg6[%c0_180, %c0_181, %c0_182] : memref<5x120x80xbf16, #tpu.memory_space<vmem>>, vector<1x120x80xbf16>
    %254 = vector.shape_cast %253 : vector<1x120x80xbf16> to vector<120x80xbf16>
    %cst_183 = arith.constant dense<0.000000e+00> : vector<96x80xf32>
    %255 = tpu.matmul %252, %254, %cst_183 {dimension_numbers = #tpu.dot_dimension_numbers<[1], [0], [0], [1], [0, 0, 1, 1], [], []>} : vector<96x120xbf16>, vector<120x80xbf16>, vector<96x80xf32> -> vector<96x80xf32>
    %c0_184 = arith.constant 0 : index
    %c0_185 = arith.constant 0 : index
    %c0_186 = arith.constant 0 : index
    %256 = vector.load %arg7[%c0_184, %c0_185, %c0_186] : memref<5x120x80xbf16, #tpu.memory_space<vmem>>, vector<1x120x80xbf16>
    %257 = vector.shape_cast %256 : vector<1x120x80xbf16> to vector<120x80xbf16>
    %cst_187 = arith.constant dense<0.000000e+00> : vector<96x80xf32>
    %258 = tpu.matmul %252, %257, %cst_187 {dimension_numbers = #tpu.dot_dimension_numbers<[1], [0], [0], [1], [0, 0, 1, 1], [], []>} : vector<96x120xbf16>, vector<120x80xbf16>, vector<96x80xf32> -> vector<96x80xf32>
    %c95_i32_188 = arith.constant 95 : i32
    %259 = tpu.dynamic_rotate %251 by %c95_i32_188 dim 0 : vector<96x120xf32>, i32 -> vector<96x120xf32>
    %260 = arith.truncf %259 : vector<96x120xf32> to vector<96x120xbf16>
    %c1_189 = arith.constant 1 : index
    %c0_190 = arith.constant 0 : index
    %c0_191 = arith.constant 0 : index
    %261 = vector.load %arg6[%c1_189, %c0_190, %c0_191] : memref<5x120x80xbf16, #tpu.memory_space<vmem>>, vector<1x120x80xbf16>
    %262 = vector.shape_cast %261 : vector<1x120x80xbf16> to vector<120x80xbf16>
    %cst_192 = arith.constant dense<0.000000e+00> : vector<96x80xf32>
    %263 = tpu.matmul %260, %262, %cst_192 {dimension_numbers = #tpu.dot_dimension_numbers<[1], [0], [0], [1], [0, 0, 1, 1], [], []>} : vector<96x120xbf16>, vector<120x80xbf16>, vector<96x80xf32> -> vector<96x80xf32>
    %c1_193 = arith.constant 1 : index
    %c0_194 = arith.constant 0 : index
    %c0_195 = arith.constant 0 : index
    %264 = vector.load %arg7[%c1_193, %c0_194, %c0_195] : memref<5x120x80xbf16, #tpu.memory_space<vmem>>, vector<1x120x80xbf16>
    %265 = vector.shape_cast %264 : vector<1x120x80xbf16> to vector<120x80xbf16>
    %cst_196 = arith.constant dense<0.000000e+00> : vector<96x80xf32>
    %266 = tpu.matmul %260, %265, %cst_196 {dimension_numbers = #tpu.dot_dimension_numbers<[1], [0], [0], [1], [0, 0, 1, 1], [], []>} : vector<96x120xbf16>, vector<120x80xbf16>, vector<96x80xf32> -> vector<96x80xf32>
    %267 = arith.addf %255, %263 : vector<96x80xf32>
    %268 = arith.addf %258, %266 : vector<96x80xf32>
    %c94_i32_197 = arith.constant 94 : i32
    %269 = tpu.dynamic_rotate %251 by %c94_i32_197 dim 0 : vector<96x120xf32>, i32 -> vector<96x120xf32>
    %270 = arith.truncf %269 : vector<96x120xf32> to vector<96x120xbf16>
    %c2_198 = arith.constant 2 : index
    %c0_199 = arith.constant 0 : index
    %c0_200 = arith.constant 0 : index
    %271 = vector.load %arg6[%c2_198, %c0_199, %c0_200] : memref<5x120x80xbf16, #tpu.memory_space<vmem>>, vector<1x120x80xbf16>
    %272 = vector.shape_cast %271 : vector<1x120x80xbf16> to vector<120x80xbf16>
    %cst_201 = arith.constant dense<0.000000e+00> : vector<96x80xf32>
    %273 = tpu.matmul %270, %272, %cst_201 {dimension_numbers = #tpu.dot_dimension_numbers<[1], [0], [0], [1], [0, 0, 1, 1], [], []>} : vector<96x120xbf16>, vector<120x80xbf16>, vector<96x80xf32> -> vector<96x80xf32>
    %c2_202 = arith.constant 2 : index
    %c0_203 = arith.constant 0 : index
    %c0_204 = arith.constant 0 : index
    %274 = vector.load %arg7[%c2_202, %c0_203, %c0_204] : memref<5x120x80xbf16, #tpu.memory_space<vmem>>, vector<1x120x80xbf16>
    %275 = vector.shape_cast %274 : vector<1x120x80xbf16> to vector<120x80xbf16>
    %cst_205 = arith.constant dense<0.000000e+00> : vector<96x80xf32>
    %276 = tpu.matmul %270, %275, %cst_205 {dimension_numbers = #tpu.dot_dimension_numbers<[1], [0], [0], [1], [0, 0, 1, 1], [], []>} : vector<96x120xbf16>, vector<120x80xbf16>, vector<96x80xf32> -> vector<96x80xf32>
    %277 = arith.addf %267, %273 : vector<96x80xf32>
    %278 = arith.addf %268, %276 : vector<96x80xf32>
    %c93_i32_206 = arith.constant 93 : i32
    %279 = tpu.dynamic_rotate %251 by %c93_i32_206 dim 0 : vector<96x120xf32>, i32 -> vector<96x120xf32>
    %280 = arith.truncf %279 : vector<96x120xf32> to vector<96x120xbf16>
    %c3_207 = arith.constant 3 : index
    %c0_208 = arith.constant 0 : index
    %c0_209 = arith.constant 0 : index
    %281 = vector.load %arg6[%c3_207, %c0_208, %c0_209] : memref<5x120x80xbf16, #tpu.memory_space<vmem>>, vector<1x120x80xbf16>
    %282 = vector.shape_cast %281 : vector<1x120x80xbf16> to vector<120x80xbf16>
    %cst_210 = arith.constant dense<0.000000e+00> : vector<96x80xf32>
    %283 = tpu.matmul %280, %282, %cst_210 {dimension_numbers = #tpu.dot_dimension_numbers<[1], [0], [0], [1], [0, 0, 1, 1], [], []>} : vector<96x120xbf16>, vector<120x80xbf16>, vector<96x80xf32> -> vector<96x80xf32>
    %c3_211 = arith.constant 3 : index
    %c0_212 = arith.constant 0 : index
    %c0_213 = arith.constant 0 : index
    %284 = vector.load %arg7[%c3_211, %c0_212, %c0_213] : memref<5x120x80xbf16, #tpu.memory_space<vmem>>, vector<1x120x80xbf16>
    %285 = vector.shape_cast %284 : vector<1x120x80xbf16> to vector<120x80xbf16>
    %cst_214 = arith.constant dense<0.000000e+00> : vector<96x80xf32>
    %286 = tpu.matmul %280, %285, %cst_214 {dimension_numbers = #tpu.dot_dimension_numbers<[1], [0], [0], [1], [0, 0, 1, 1], [], []>} : vector<96x120xbf16>, vector<120x80xbf16>, vector<96x80xf32> -> vector<96x80xf32>
    %287 = arith.addf %277, %283 : vector<96x80xf32>
    %288 = arith.addf %278, %286 : vector<96x80xf32>
    %c92_i32_215 = arith.constant 92 : i32
    %289 = tpu.dynamic_rotate %251 by %c92_i32_215 dim 0 : vector<96x120xf32>, i32 -> vector<96x120xf32>
    %290 = arith.truncf %289 : vector<96x120xf32> to vector<96x120xbf16>
    %c4_216 = arith.constant 4 : index
    %c0_217 = arith.constant 0 : index
    %c0_218 = arith.constant 0 : index
    %291 = vector.load %arg6[%c4_216, %c0_217, %c0_218] : memref<5x120x80xbf16, #tpu.memory_space<vmem>>, vector<1x120x80xbf16>
    %292 = vector.shape_cast %291 : vector<1x120x80xbf16> to vector<120x80xbf16>
    %cst_219 = arith.constant dense<0.000000e+00> : vector<96x80xf32>
    %293 = tpu.matmul %290, %292, %cst_219 {dimension_numbers = #tpu.dot_dimension_numbers<[1], [0], [0], [1], [0, 0, 1, 1], [], []>} : vector<96x120xbf16>, vector<120x80xbf16>, vector<96x80xf32> -> vector<96x80xf32>
    %c4_220 = arith.constant 4 : index
    %c0_221 = arith.constant 0 : index
    %c0_222 = arith.constant 0 : index
    %294 = vector.load %arg7[%c4_220, %c0_221, %c0_222] : memref<5x120x80xbf16, #tpu.memory_space<vmem>>, vector<1x120x80xbf16>
    %295 = vector.shape_cast %294 : vector<1x120x80xbf16> to vector<120x80xbf16>
    %cst_223 = arith.constant dense<0.000000e+00> : vector<96x80xf32>
    %296 = tpu.matmul %290, %295, %cst_223 {dimension_numbers = #tpu.dot_dimension_numbers<[1], [0], [0], [1], [0, 0, 1, 1], [], []>} : vector<96x120xbf16>, vector<120x80xbf16>, vector<96x80xf32> -> vector<96x80xf32>
    %297 = arith.addf %287, %293 : vector<96x80xf32>
    %298 = arith.addf %288, %296 : vector<96x80xf32>
    %c95_i32_224 = arith.constant 95 : i32
    %299 = tpu.dynamic_rotate %297 by %c95_i32_224 dim 0 : vector<96x80xf32>, i32 -> vector<96x80xf32>
    %300 = arith.maximumf %297, %299 : vector<96x80xf32>
    %c95_i32_225 = arith.constant 95 : i32
    %301 = tpu.dynamic_rotate %298 by %c95_i32_225 dim 0 : vector<96x80xf32>, i32 -> vector<96x80xf32>
    %302 = arith.maximumf %298, %301 : vector<96x80xf32>
    %303 = arith.maximumf %300, %302 : vector<96x80xf32>
    %c0_226 = arith.constant 0 : index
    %c0_227 = arith.constant 0 : index
    %304 = vector.load %arg8[%c0_226, %c0_227] : memref<1x80xf32, #tpu.memory_space<vmem>>, vector<1x80xf32>
    %305 = vector.broadcast %304 : vector<1x80xf32> to vector<96x80xf32>
    %306 = arith.addf %303, %305 : vector<96x80xf32>
    %cst_228 = arith.constant 0.000000e+00 : f32
    %307 = vector.broadcast %cst_228 : f32 to vector<96x80xf32>
    %308 = arith.maximumf %306, %307 : vector<96x80xf32>
    %309 = arith.truncf %308 : vector<96x80xf32> to vector<96x80xbf16>
    %cst_229 = arith.constant dense<0.000000e+00> : vector<32x80xf32>
    %310 = tpu.matmul %2, %309, %cst_229 {dimension_numbers = #tpu.dot_dimension_numbers<[1], [0], [0], [1], [0, 0, 1, 1], [], []>} : vector<32x96xbf16>, vector<96x80xbf16>, vector<32x80xf32> -> vector<32x80xf32>
    %c0_230 = arith.constant 0 : index
    %c0_231 = arith.constant 0 : index
    %311 = vector.load %arg11[%c0_230, %c0_231] : memref<1x50xf32, #tpu.memory_space<vmem>>, vector<1x50xf32>
    %312 = vector.extract_strided_slice %310 {offsets = [0, 0], sizes = [8, 80], strides = [1, 1]} : vector<32x80xf32> to vector<8x80xf32>
    %313 = arith.truncf %312 : vector<8x80xf32> to vector<8x80xbf16>
    %c0_232 = arith.constant 0 : index
    %c0_233 = arith.constant 0 : index
    %c0_234 = arith.constant 0 : index
    %314 = vector.load %arg10[%c0_232, %c0_233, %c0_234] : memref<4x80x50xbf16, #tpu.memory_space<vmem>>, vector<1x80x50xbf16>
    %315 = vector.shape_cast %314 : vector<1x80x50xbf16> to vector<80x50xbf16>
    %cst_235 = arith.constant dense<0.000000e+00> : vector<8x50xf32>
    %316 = tpu.matmul %313, %315, %cst_235 {dimension_numbers = #tpu.dot_dimension_numbers<[1], [0], [0], [1], [0, 0, 1, 1], [], []>} : vector<8x80xbf16>, vector<80x50xbf16>, vector<8x50xf32> -> vector<8x50xf32>
    %317 = vector.broadcast %311 : vector<1x50xf32> to vector<8x50xf32>
    %318 = arith.addf %317, %316 : vector<8x50xf32>
    %319 = vector.extract_strided_slice %310 {offsets = [8, 0], sizes = [8, 80], strides = [1, 1]} : vector<32x80xf32> to vector<8x80xf32>
    %320 = arith.truncf %319 : vector<8x80xf32> to vector<8x80xbf16>
    %c1_236 = arith.constant 1 : index
    %c0_237 = arith.constant 0 : index
    %c0_238 = arith.constant 0 : index
    %321 = vector.load %arg10[%c1_236, %c0_237, %c0_238] : memref<4x80x50xbf16, #tpu.memory_space<vmem>>, vector<1x80x50xbf16>
    %322 = vector.shape_cast %321 : vector<1x80x50xbf16> to vector<80x50xbf16>
    %cst_239 = arith.constant dense<0.000000e+00> : vector<8x50xf32>
    %323 = tpu.matmul %320, %322, %cst_239 {dimension_numbers = #tpu.dot_dimension_numbers<[1], [0], [0], [1], [0, 0, 1, 1], [], []>} : vector<8x80xbf16>, vector<80x50xbf16>, vector<8x50xf32> -> vector<8x50xf32>
    %324 = arith.addf %318, %323 : vector<8x50xf32>
    %325 = vector.extract_strided_slice %310 {offsets = [16, 0], sizes = [8, 80], strides = [1, 1]} : vector<32x80xf32> to vector<8x80xf32>
    %326 = arith.truncf %325 : vector<8x80xf32> to vector<8x80xbf16>
    %c2_240 = arith.constant 2 : index
    %c0_241 = arith.constant 0 : index
    %c0_242 = arith.constant 0 : index
    %327 = vector.load %arg10[%c2_240, %c0_241, %c0_242] : memref<4x80x50xbf16, #tpu.memory_space<vmem>>, vector<1x80x50xbf16>
    %328 = vector.shape_cast %327 : vector<1x80x50xbf16> to vector<80x50xbf16>
    %cst_243 = arith.constant dense<0.000000e+00> : vector<8x50xf32>
    %329 = tpu.matmul %326, %328, %cst_243 {dimension_numbers = #tpu.dot_dimension_numbers<[1], [0], [0], [1], [0, 0, 1, 1], [], []>} : vector<8x80xbf16>, vector<80x50xbf16>, vector<8x50xf32> -> vector<8x50xf32>
    %330 = arith.addf %324, %329 : vector<8x50xf32>
    %331 = vector.extract_strided_slice %310 {offsets = [24, 0], sizes = [8, 80], strides = [1, 1]} : vector<32x80xf32> to vector<8x80xf32>
    %332 = arith.truncf %331 : vector<8x80xf32> to vector<8x80xbf16>
    %c3_244 = arith.constant 3 : index
    %c0_245 = arith.constant 0 : index
    %c0_246 = arith.constant 0 : index
    %333 = vector.load %arg10[%c3_244, %c0_245, %c0_246] : memref<4x80x50xbf16, #tpu.memory_space<vmem>>, vector<1x80x50xbf16>
    %334 = vector.shape_cast %333 : vector<1x80x50xbf16> to vector<80x50xbf16>
    %cst_247 = arith.constant dense<0.000000e+00> : vector<8x50xf32>
    %335 = tpu.matmul %332, %334, %cst_247 {dimension_numbers = #tpu.dot_dimension_numbers<[1], [0], [0], [1], [0, 0, 1, 1], [], []>} : vector<8x80xbf16>, vector<80x50xbf16>, vector<8x50xf32> -> vector<8x50xf32>
    %336 = arith.addf %330, %335 : vector<8x50xf32>
    %cst_248 = arith.constant 0.000000e+00 : f32
    %337 = vector.broadcast %cst_248 : f32 to vector<8x50xf32>
    %338 = arith.maximumf %336, %337 : vector<8x50xf32>
    %339 = arith.truncf %338 : vector<8x50xf32> to vector<8x50xbf16>
    %cst_249 = arith.constant dense<0.000000e+00> : vector<8x10xf32>
    %340 = tpu.matmul %339, %3, %cst_249 {dimension_numbers = #tpu.dot_dimension_numbers<[1], [0], [0], [1], [0, 0, 1, 1], [], []>} : vector<8x50xbf16>, vector<50x10xbf16>, vector<8x10xf32> -> vector<8x10xf32>
    %c0_250 = arith.constant 0 : index
    %c0_251 = arith.constant 0 : index
    %341 = vector.load %arg13[%c0_250, %c0_251] : memref<1x10xf32, #tpu.memory_space<vmem>>, vector<1x10xf32>
    %342 = vector.broadcast %341 : vector<1x10xf32> to vector<8x10xf32>
    %343 = arith.addf %340, %342 : vector<8x10xf32>
    %cst_252 = arith.constant dense<0xFF800000> : vector<8xf32>
    %344 = vector.multi_reduction <maximumf>, %343, %cst_252 [1] : vector<8x10xf32> to vector<8xf32>
    %345 = vector.shape_cast %344 : vector<8xf32> to vector<8x1xf32>
    %346 = vector.broadcast %345 : vector<8x1xf32> to vector<8x10xf32>
    %347 = arith.subf %343, %346 : vector<8x10xf32>
    %348 = math.exp %347 : vector<8x10xf32>
    %cst_253 = arith.constant dense<0.000000e+00> : vector<8xf32>
    %349 = vector.multi_reduction <add>, %348, %cst_253 [1] : vector<8x10xf32> to vector<8xf32>
    %350 = vector.shape_cast %349 : vector<8xf32> to vector<8x1xf32>
    %351 = math.log %350 : vector<8x1xf32>
    %352 = vector.broadcast %351 : vector<8x1xf32> to vector<8x10xf32>
    %353 = arith.subf %347, %352 : vector<8x10xf32>
    %c16 = arith.constant 16 : index
    %c0_254 = arith.constant 0 : index
    %354 = vector.load %arg14[%c16, %c0_254] : memref<32x10xf32, #tpu.memory_space<vmem>>, vector<8x10xf32>
    tpu.vector_store %arg14[%c16, %c0_254], %353 {strides = array<i32>} : memref<32x10xf32, #tpu.memory_space<vmem>>, vector<8x10xf32>,
    %c288 = arith.constant 288 : index
    %c0_255 = arith.constant 0 : index
    %355 = vector.load %arg1[%c288, %c0_255] : memref<384x140xbf16, #tpu.memory_space<vmem>>, vector<96x140xbf16>
    %c288_256 = arith.constant 288 : index
    %c0_257 = arith.constant 0 : index
    %356 = vector.load %arg2[%c288_256, %c0_257] : memref<384x140xbf16, #tpu.memory_space<vmem>>, vector<96x140xbf16>
    %cst_258 = arith.constant dense<0.000000e+00> : vector<96x120xf32>
    %357 = tpu.matmul %355, %0, %cst_258 {dimension_numbers = #tpu.dot_dimension_numbers<[1], [0], [0], [1], [0, 0, 1, 1], [], []>} : vector<96x140xbf16>, vector<140x120xbf16>, vector<96x120xf32> -> vector<96x120xf32>
    %cst_259 = arith.constant dense<0.000000e+00> : vector<96x120xf32>
    %358 = tpu.matmul %355, %1, %cst_259 {dimension_numbers = #tpu.dot_dimension_numbers<[1], [0], [0], [1], [0, 0, 1, 1], [], []>} : vector<96x140xbf16>, vector<140x120xbf16>, vector<96x120xf32> -> vector<96x120xf32>
    %359 = arith.maximumf %357, %358 : vector<96x120xf32>
    %cst_260 = arith.constant dense<0.000000e+00> : vector<96x120xf32>
    %360 = tpu.matmul %356, %0, %cst_260 {dimension_numbers = #tpu.dot_dimension_numbers<[1], [0], [0], [1], [0, 0, 1, 1], [], []>} : vector<96x140xbf16>, vector<140x120xbf16>, vector<96x120xf32> -> vector<96x120xf32>
    %361 = arith.maximumf %359, %360 : vector<96x120xf32>
    %cst_261 = arith.constant dense<0.000000e+00> : vector<96x120xf32>
    %362 = tpu.matmul %356, %1, %cst_261 {dimension_numbers = #tpu.dot_dimension_numbers<[1], [0], [0], [1], [0, 0, 1, 1], [], []>} : vector<96x140xbf16>, vector<140x120xbf16>, vector<96x120xf32> -> vector<96x120xf32>
    %363 = arith.maximumf %361, %362 : vector<96x120xf32>
    %c0_262 = arith.constant 0 : index
    %c0_263 = arith.constant 0 : index
    %364 = vector.load %arg5[%c0_262, %c0_263] : memref<1x120xf32, #tpu.memory_space<vmem>>, vector<1x120xf32>
    %365 = vector.broadcast %364 : vector<1x120xf32> to vector<96x120xf32>
    %366 = arith.addf %363, %365 : vector<96x120xf32>
    %cst_264 = arith.constant 0.000000e+00 : f32
    %367 = vector.broadcast %cst_264 : f32 to vector<96x120xf32>
    %368 = arith.maximumf %366, %367 : vector<96x120xf32>
    %369 = arith.truncf %368 : vector<96x120xf32> to vector<96x120xbf16>
    %c0_265 = arith.constant 0 : index
    %c0_266 = arith.constant 0 : index
    %c0_267 = arith.constant 0 : index
    %370 = vector.load %arg6[%c0_265, %c0_266, %c0_267] : memref<5x120x80xbf16, #tpu.memory_space<vmem>>, vector<1x120x80xbf16>
    %371 = vector.shape_cast %370 : vector<1x120x80xbf16> to vector<120x80xbf16>
    %cst_268 = arith.constant dense<0.000000e+00> : vector<96x80xf32>
    %372 = tpu.matmul %369, %371, %cst_268 {dimension_numbers = #tpu.dot_dimension_numbers<[1], [0], [0], [1], [0, 0, 1, 1], [], []>} : vector<96x120xbf16>, vector<120x80xbf16>, vector<96x80xf32> -> vector<96x80xf32>
    %c0_269 = arith.constant 0 : index
    %c0_270 = arith.constant 0 : index
    %c0_271 = arith.constant 0 : index
    %373 = vector.load %arg7[%c0_269, %c0_270, %c0_271] : memref<5x120x80xbf16, #tpu.memory_space<vmem>>, vector<1x120x80xbf16>
    %374 = vector.shape_cast %373 : vector<1x120x80xbf16> to vector<120x80xbf16>
    %cst_272 = arith.constant dense<0.000000e+00> : vector<96x80xf32>
    %375 = tpu.matmul %369, %374, %cst_272 {dimension_numbers = #tpu.dot_dimension_numbers<[1], [0], [0], [1], [0, 0, 1, 1], [], []>} : vector<96x120xbf16>, vector<120x80xbf16>, vector<96x80xf32> -> vector<96x80xf32>
    %c95_i32_273 = arith.constant 95 : i32
    %376 = tpu.dynamic_rotate %368 by %c95_i32_273 dim 0 : vector<96x120xf32>, i32 -> vector<96x120xf32>
    %377 = arith.truncf %376 : vector<96x120xf32> to vector<96x120xbf16>
    %c1_274 = arith.constant 1 : index
    %c0_275 = arith.constant 0 : index
    %c0_276 = arith.constant 0 : index
    %378 = vector.load %arg6[%c1_274, %c0_275, %c0_276] : memref<5x120x80xbf16, #tpu.memory_space<vmem>>, vector<1x120x80xbf16>
    %379 = vector.shape_cast %378 : vector<1x120x80xbf16> to vector<120x80xbf16>
    %cst_277 = arith.constant dense<0.000000e+00> : vector<96x80xf32>
    %380 = tpu.matmul %377, %379, %cst_277 {dimension_numbers = #tpu.dot_dimension_numbers<[1], [0], [0], [1], [0, 0, 1, 1], [], []>} : vector<96x120xbf16>, vector<120x80xbf16>, vector<96x80xf32> -> vector<96x80xf32>
    %c1_278 = arith.constant 1 : index
    %c0_279 = arith.constant 0 : index
    %c0_280 = arith.constant 0 : index
    %381 = vector.load %arg7[%c1_278, %c0_279, %c0_280] : memref<5x120x80xbf16, #tpu.memory_space<vmem>>, vector<1x120x80xbf16>
    %382 = vector.shape_cast %381 : vector<1x120x80xbf16> to vector<120x80xbf16>
    %cst_281 = arith.constant dense<0.000000e+00> : vector<96x80xf32>
    %383 = tpu.matmul %377, %382, %cst_281 {dimension_numbers = #tpu.dot_dimension_numbers<[1], [0], [0], [1], [0, 0, 1, 1], [], []>} : vector<96x120xbf16>, vector<120x80xbf16>, vector<96x80xf32> -> vector<96x80xf32>
    %384 = arith.addf %372, %380 : vector<96x80xf32>
    %385 = arith.addf %375, %383 : vector<96x80xf32>
    %c94_i32_282 = arith.constant 94 : i32
    %386 = tpu.dynamic_rotate %368 by %c94_i32_282 dim 0 : vector<96x120xf32>, i32 -> vector<96x120xf32>
    %387 = arith.truncf %386 : vector<96x120xf32> to vector<96x120xbf16>
    %c2_283 = arith.constant 2 : index
    %c0_284 = arith.constant 0 : index
    %c0_285 = arith.constant 0 : index
    %388 = vector.load %arg6[%c2_283, %c0_284, %c0_285] : memref<5x120x80xbf16, #tpu.memory_space<vmem>>, vector<1x120x80xbf16>
    %389 = vector.shape_cast %388 : vector<1x120x80xbf16> to vector<120x80xbf16>
    %cst_286 = arith.constant dense<0.000000e+00> : vector<96x80xf32>
    %390 = tpu.matmul %387, %389, %cst_286 {dimension_numbers = #tpu.dot_dimension_numbers<[1], [0], [0], [1], [0, 0, 1, 1], [], []>} : vector<96x120xbf16>, vector<120x80xbf16>, vector<96x80xf32> -> vector<96x80xf32>
    %c2_287 = arith.constant 2 : index
    %c0_288 = arith.constant 0 : index
    %c0_289 = arith.constant 0 : index
    %391 = vector.load %arg7[%c2_287, %c0_288, %c0_289] : memref<5x120x80xbf16, #tpu.memory_space<vmem>>, vector<1x120x80xbf16>
    %392 = vector.shape_cast %391 : vector<1x120x80xbf16> to vector<120x80xbf16>
    %cst_290 = arith.constant dense<0.000000e+00> : vector<96x80xf32>
    %393 = tpu.matmul %387, %392, %cst_290 {dimension_numbers = #tpu.dot_dimension_numbers<[1], [0], [0], [1], [0, 0, 1, 1], [], []>} : vector<96x120xbf16>, vector<120x80xbf16>, vector<96x80xf32> -> vector<96x80xf32>
    %394 = arith.addf %384, %390 : vector<96x80xf32>
    %395 = arith.addf %385, %393 : vector<96x80xf32>
    %c93_i32_291 = arith.constant 93 : i32
    %396 = tpu.dynamic_rotate %368 by %c93_i32_291 dim 0 : vector<96x120xf32>, i32 -> vector<96x120xf32>
    %397 = arith.truncf %396 : vector<96x120xf32> to vector<96x120xbf16>
    %c3_292 = arith.constant 3 : index
    %c0_293 = arith.constant 0 : index
    %c0_294 = arith.constant 0 : index
    %398 = vector.load %arg6[%c3_292, %c0_293, %c0_294] : memref<5x120x80xbf16, #tpu.memory_space<vmem>>, vector<1x120x80xbf16>
    %399 = vector.shape_cast %398 : vector<1x120x80xbf16> to vector<120x80xbf16>
    %cst_295 = arith.constant dense<0.000000e+00> : vector<96x80xf32>
    %400 = tpu.matmul %397, %399, %cst_295 {dimension_numbers = #tpu.dot_dimension_numbers<[1], [0], [0], [1], [0, 0, 1, 1], [], []>} : vector<96x120xbf16>, vector<120x80xbf16>, vector<96x80xf32> -> vector<96x80xf32>
    %c3_296 = arith.constant 3 : index
    %c0_297 = arith.constant 0 : index
    %c0_298 = arith.constant 0 : index
    %401 = vector.load %arg7[%c3_296, %c0_297, %c0_298] : memref<5x120x80xbf16, #tpu.memory_space<vmem>>, vector<1x120x80xbf16>
    %402 = vector.shape_cast %401 : vector<1x120x80xbf16> to vector<120x80xbf16>
    %cst_299 = arith.constant dense<0.000000e+00> : vector<96x80xf32>
    %403 = tpu.matmul %397, %402, %cst_299 {dimension_numbers = #tpu.dot_dimension_numbers<[1], [0], [0], [1], [0, 0, 1, 1], [], []>} : vector<96x120xbf16>, vector<120x80xbf16>, vector<96x80xf32> -> vector<96x80xf32>
    %404 = arith.addf %394, %400 : vector<96x80xf32>
    %405 = arith.addf %395, %403 : vector<96x80xf32>
    %c92_i32_300 = arith.constant 92 : i32
    %406 = tpu.dynamic_rotate %368 by %c92_i32_300 dim 0 : vector<96x120xf32>, i32 -> vector<96x120xf32>
    %407 = arith.truncf %406 : vector<96x120xf32> to vector<96x120xbf16>
    %c4_301 = arith.constant 4 : index
    %c0_302 = arith.constant 0 : index
    %c0_303 = arith.constant 0 : index
    %408 = vector.load %arg6[%c4_301, %c0_302, %c0_303] : memref<5x120x80xbf16, #tpu.memory_space<vmem>>, vector<1x120x80xbf16>
    %409 = vector.shape_cast %408 : vector<1x120x80xbf16> to vector<120x80xbf16>
    %cst_304 = arith.constant dense<0.000000e+00> : vector<96x80xf32>
    %410 = tpu.matmul %407, %409, %cst_304 {dimension_numbers = #tpu.dot_dimension_numbers<[1], [0], [0], [1], [0, 0, 1, 1], [], []>} : vector<96x120xbf16>, vector<120x80xbf16>, vector<96x80xf32> -> vector<96x80xf32>
    %c4_305 = arith.constant 4 : index
    %c0_306 = arith.constant 0 : index
    %c0_307 = arith.constant 0 : index
    %411 = vector.load %arg7[%c4_305, %c0_306, %c0_307] : memref<5x120x80xbf16, #tpu.memory_space<vmem>>, vector<1x120x80xbf16>
    %412 = vector.shape_cast %411 : vector<1x120x80xbf16> to vector<120x80xbf16>
    %cst_308 = arith.constant dense<0.000000e+00> : vector<96x80xf32>
    %413 = tpu.matmul %407, %412, %cst_308 {dimension_numbers = #tpu.dot_dimension_numbers<[1], [0], [0], [1], [0, 0, 1, 1], [], []>} : vector<96x120xbf16>, vector<120x80xbf16>, vector<96x80xf32> -> vector<96x80xf32>
    %414 = arith.addf %404, %410 : vector<96x80xf32>
    %415 = arith.addf %405, %413 : vector<96x80xf32>
    %c95_i32_309 = arith.constant 95 : i32
    %416 = tpu.dynamic_rotate %414 by %c95_i32_309 dim 0 : vector<96x80xf32>, i32 -> vector<96x80xf32>
    %417 = arith.maximumf %414, %416 : vector<96x80xf32>
    %c95_i32_310 = arith.constant 95 : i32
    %418 = tpu.dynamic_rotate %415 by %c95_i32_310 dim 0 : vector<96x80xf32>, i32 -> vector<96x80xf32>
    %419 = arith.maximumf %415, %418 : vector<96x80xf32>
    %420 = arith.maximumf %417, %419 : vector<96x80xf32>
    %c0_311 = arith.constant 0 : index
    %c0_312 = arith.constant 0 : index
    %421 = vector.load %arg8[%c0_311, %c0_312] : memref<1x80xf32, #tpu.memory_space<vmem>>, vector<1x80xf32>
    %422 = vector.broadcast %421 : vector<1x80xf32> to vector<96x80xf32>
    %423 = arith.addf %420, %422 : vector<96x80xf32>
    %cst_313 = arith.constant 0.000000e+00 : f32
    %424 = vector.broadcast %cst_313 : f32 to vector<96x80xf32>
    %425 = arith.maximumf %423, %424 : vector<96x80xf32>
    %426 = arith.truncf %425 : vector<96x80xf32> to vector<96x80xbf16>
    %cst_314 = arith.constant dense<0.000000e+00> : vector<32x80xf32>
    %427 = tpu.matmul %2, %426, %cst_314 {dimension_numbers = #tpu.dot_dimension_numbers<[1], [0], [0], [1], [0, 0, 1, 1], [], []>} : vector<32x96xbf16>, vector<96x80xbf16>, vector<32x80xf32> -> vector<32x80xf32>
    %c0_315 = arith.constant 0 : index
    %c0_316 = arith.constant 0 : index
    %428 = vector.load %arg11[%c0_315, %c0_316] : memref<1x50xf32, #tpu.memory_space<vmem>>, vector<1x50xf32>
    %429 = vector.extract_strided_slice %427 {offsets = [0, 0], sizes = [8, 80], strides = [1, 1]} : vector<32x80xf32> to vector<8x80xf32>
    %430 = arith.truncf %429 : vector<8x80xf32> to vector<8x80xbf16>
    %c0_317 = arith.constant 0 : index
    %c0_318 = arith.constant 0 : index
    %c0_319 = arith.constant 0 : index
    %431 = vector.load %arg10[%c0_317, %c0_318, %c0_319] : memref<4x80x50xbf16, #tpu.memory_space<vmem>>, vector<1x80x50xbf16>
    %432 = vector.shape_cast %431 : vector<1x80x50xbf16> to vector<80x50xbf16>
    %cst_320 = arith.constant dense<0.000000e+00> : vector<8x50xf32>
    %433 = tpu.matmul %430, %432, %cst_320 {dimension_numbers = #tpu.dot_dimension_numbers<[1], [0], [0], [1], [0, 0, 1, 1], [], []>} : vector<8x80xbf16>, vector<80x50xbf16>, vector<8x50xf32> -> vector<8x50xf32>
    %434 = vector.broadcast %428 : vector<1x50xf32> to vector<8x50xf32>
    %435 = arith.addf %434, %433 : vector<8x50xf32>
    %436 = vector.extract_strided_slice %427 {offsets = [8, 0], sizes = [8, 80], strides = [1, 1]} : vector<32x80xf32> to vector<8x80xf32>
    %437 = arith.truncf %436 : vector<8x80xf32> to vector<8x80xbf16>
    %c1_321 = arith.constant 1 : index
    %c0_322 = arith.constant 0 : index
    %c0_323 = arith.constant 0 : index
    %438 = vector.load %arg10[%c1_321, %c0_322, %c0_323] : memref<4x80x50xbf16, #tpu.memory_space<vmem>>, vector<1x80x50xbf16>
    %439 = vector.shape_cast %438 : vector<1x80x50xbf16> to vector<80x50xbf16>
    %cst_324 = arith.constant dense<0.000000e+00> : vector<8x50xf32>
    %440 = tpu.matmul %437, %439, %cst_324 {dimension_numbers = #tpu.dot_dimension_numbers<[1], [0], [0], [1], [0, 0, 1, 1], [], []>} : vector<8x80xbf16>, vector<80x50xbf16>, vector<8x50xf32> -> vector<8x50xf32>
    %441 = arith.addf %435, %440 : vector<8x50xf32>
    %442 = vector.extract_strided_slice %427 {offsets = [16, 0], sizes = [8, 80], strides = [1, 1]} : vector<32x80xf32> to vector<8x80xf32>
    %443 = arith.truncf %442 : vector<8x80xf32> to vector<8x80xbf16>
    %c2_325 = arith.constant 2 : index
    %c0_326 = arith.constant 0 : index
    %c0_327 = arith.constant 0 : index
    %444 = vector.load %arg10[%c2_325, %c0_326, %c0_327] : memref<4x80x50xbf16, #tpu.memory_space<vmem>>, vector<1x80x50xbf16>
    %445 = vector.shape_cast %444 : vector<1x80x50xbf16> to vector<80x50xbf16>
    %cst_328 = arith.constant dense<0.000000e+00> : vector<8x50xf32>
    %446 = tpu.matmul %443, %445, %cst_328 {dimension_numbers = #tpu.dot_dimension_numbers<[1], [0], [0], [1], [0, 0, 1, 1], [], []>} : vector<8x80xbf16>, vector<80x50xbf16>, vector<8x50xf32> -> vector<8x50xf32>
    %447 = arith.addf %441, %446 : vector<8x50xf32>
    %448 = vector.extract_strided_slice %427 {offsets = [24, 0], sizes = [8, 80], strides = [1, 1]} : vector<32x80xf32> to vector<8x80xf32>
    %449 = arith.truncf %448 : vector<8x80xf32> to vector<8x80xbf16>
    %c3_329 = arith.constant 3 : index
    %c0_330 = arith.constant 0 : index
    %c0_331 = arith.constant 0 : index
    %450 = vector.load %arg10[%c3_329, %c0_330, %c0_331] : memref<4x80x50xbf16, #tpu.memory_space<vmem>>, vector<1x80x50xbf16>
    %451 = vector.shape_cast %450 : vector<1x80x50xbf16> to vector<80x50xbf16>
    %cst_332 = arith.constant dense<0.000000e+00> : vector<8x50xf32>
    %452 = tpu.matmul %449, %451, %cst_332 {dimension_numbers = #tpu.dot_dimension_numbers<[1], [0], [0], [1], [0, 0, 1, 1], [], []>} : vector<8x80xbf16>, vector<80x50xbf16>, vector<8x50xf32> -> vector<8x50xf32>
    %453 = arith.addf %447, %452 : vector<8x50xf32>
    %cst_333 = arith.constant 0.000000e+00 : f32
    %454 = vector.broadcast %cst_333 : f32 to vector<8x50xf32>
    %455 = arith.maximumf %453, %454 : vector<8x50xf32>
    %456 = arith.truncf %455 : vector<8x50xf32> to vector<8x50xbf16>
    %cst_334 = arith.constant dense<0.000000e+00> : vector<8x10xf32>
    %457 = tpu.matmul %456, %3, %cst_334 {dimension_numbers = #tpu.dot_dimension_numbers<[1], [0], [0], [1], [0, 0, 1, 1], [], []>} : vector<8x50xbf16>, vector<50x10xbf16>, vector<8x10xf32> -> vector<8x10xf32>
    %c0_335 = arith.constant 0 : index
    %c0_336 = arith.constant 0 : index
    %458 = vector.load %arg13[%c0_335, %c0_336] : memref<1x10xf32, #tpu.memory_space<vmem>>, vector<1x10xf32>
    %459 = vector.broadcast %458 : vector<1x10xf32> to vector<8x10xf32>
    %460 = arith.addf %457, %459 : vector<8x10xf32>
    %cst_337 = arith.constant dense<0xFF800000> : vector<8xf32>
    %461 = vector.multi_reduction <maximumf>, %460, %cst_337 [1] : vector<8x10xf32> to vector<8xf32>
    %462 = vector.shape_cast %461 : vector<8xf32> to vector<8x1xf32>
    %463 = vector.broadcast %462 : vector<8x1xf32> to vector<8x10xf32>
    %464 = arith.subf %460, %463 : vector<8x10xf32>
    %465 = math.exp %464 : vector<8x10xf32>
    %cst_338 = arith.constant dense<0.000000e+00> : vector<8xf32>
    %466 = vector.multi_reduction <add>, %465, %cst_338 [1] : vector<8x10xf32> to vector<8xf32>
    %467 = vector.shape_cast %466 : vector<8xf32> to vector<8x1xf32>
    %468 = math.log %467 : vector<8x1xf32>
    %469 = vector.broadcast %468 : vector<8x1xf32> to vector<8x10xf32>
    %470 = arith.subf %464, %469 : vector<8x10xf32>
    %c24 = arith.constant 24 : index
    %c0_339 = arith.constant 0 : index
    %471 = vector.load %arg14[%c24, %c0_339] : memref<32x10xf32, #tpu.memory_space<vmem>>, vector<8x10xf32>
    tpu.vector_store %arg14[%c24, %c0_339], %470 {strides = array<i32>} : memref<32x10xf32, #tpu.memory_space<vmem>>, vector<8x10xf32>,
    return
  }
  func.func @transform_0(%arg0: i32) -> (i32, i32) {
    %c0_i32 = arith.constant 0 : i32
    %c0_i32_0 = arith.constant 0 : i32
    return %arg0, %c0_i32 : i32, i32
  }
  func.func @transform_1(%arg0: i32) -> (i32, i32) {
    %c0_i32 = arith.constant 0 : i32
    %c0_i32_0 = arith.constant 0 : i32
    return %arg0, %c0_i32 : i32, i32
  }
  func.func @transform_2(%arg0: i32) -> (i32, i32) {
    %c0_i32 = arith.constant 0 : i32
    %c0_i32_0 = arith.constant 0 : i32
    %c0_i32_1 = arith.constant 0 : i32
    return %c0_i32, %c0_i32_0 : i32, i32
  }
  func.func @transform_3(%arg0: i32) -> (i32, i32) {
    %c0_i32 = arith.constant 0 : i32
    %c0_i32_0 = arith.constant 0 : i32
    %c0_i32_1 = arith.constant 0 : i32
    return %c0_i32, %c0_i32_0 : i32, i32
  }
  func.func @transform_4(%arg0: i32) -> (i32, i32) {
    %c0_i32 = arith.constant 0 : i32
    %c0_i32_0 = arith.constant 0 : i32
    %c0_i32_1 = arith.constant 0 : i32
    return %c0_i32, %c0_i32_0 : i32, i32
  }
  func.func @transform_5(%arg0: i32) -> (i32, i32, i32) {
    %c0_i32 = arith.constant 0 : i32
    %c0_i32_0 = arith.constant 0 : i32
    %c0_i32_1 = arith.constant 0 : i32
    %c0_i32_2 = arith.constant 0 : i32
    return %c0_i32, %c0_i32_0, %c0_i32_1 : i32, i32, i32
  }
  func.func @transform_6(%arg0: i32) -> (i32, i32, i32) {
    %c0_i32 = arith.constant 0 : i32
    %c0_i32_0 = arith.constant 0 : i32
    %c0_i32_1 = arith.constant 0 : i32
    %c0_i32_2 = arith.constant 0 : i32
    return %c0_i32, %c0_i32_0, %c0_i32_1 : i32, i32, i32
  }
  func.func @transform_7(%arg0: i32) -> (i32, i32) {
    %c0_i32 = arith.constant 0 : i32
    %c0_i32_0 = arith.constant 0 : i32
    %c0_i32_1 = arith.constant 0 : i32
    return %c0_i32, %c0_i32_0 : i32, i32
  }
  func.func @transform_8(%arg0: i32) -> (i32, i32) {
    %c0_i32 = arith.constant 0 : i32
    %c0_i32_0 = arith.constant 0 : i32
    %c0_i32_1 = arith.constant 0 : i32
    return %c0_i32, %c0_i32_0 : i32, i32
  }
  func.func @transform_9(%arg0: i32) -> (i32, i32, i32) {
    %c0_i32 = arith.constant 0 : i32
    %c0_i32_0 = arith.constant 0 : i32
    %c0_i32_1 = arith.constant 0 : i32
    %c0_i32_2 = arith.constant 0 : i32
    return %c0_i32, %c0_i32_0, %c0_i32_1 : i32, i32, i32
  }
  func.func @transform_10(%arg0: i32) -> (i32, i32) {
    %c0_i32 = arith.constant 0 : i32
    %c0_i32_0 = arith.constant 0 : i32
    %c0_i32_1 = arith.constant 0 : i32
    return %c0_i32, %c0_i32_0 : i32, i32
  }
  func.func @transform_11(%arg0: i32) -> (i32, i32) {
    %c0_i32 = arith.constant 0 : i32
    %c0_i32_0 = arith.constant 0 : i32
    %c0_i32_1 = arith.constant 0 : i32
    return %c0_i32, %c0_i32_0 : i32, i32
  }
  func.func @transform_12(%arg0: i32) -> (i32, i32) {
    %c0_i32 = arith.constant 0 : i32
    %c0_i32_0 = arith.constant 0 : i32
    %c0_i32_1 = arith.constant 0 : i32
    return %c0_i32, %c0_i32_0 : i32, i32
  }
  func.func @transform_13(%arg0: i32) -> (i32, i32) {
    %c0_i32 = arith.constant 0 : i32
    %c0_i32_0 = arith.constant 0 : i32
    return %arg0, %c0_i32 : i32, i32
  }
}

</mosaic_0001>

<bundles_post_ra>
// kernel: net_forward.1
= control target key start
LH: loop header
LB: loop body
LE: loop exit
PB: predicated region body
PF: predicated region fallthrough
CT: control target
= control target key end

     0   :  { %s16700_s25 = smov 0   ;;  %s21902_s0 = inlined_call_operand.vmem [shape: bf16[768,140], index: 0, kind: input, shape index: {}]   ;;  %s21903_s1 = inlined_call_operand.vmem [shape: bf16[768,140], index: 1, kind: input, shape index: {}]   ;;  %s21904_s2 = inlined_call_operand.vmem [shape: bf16[140,120], index: 2, kind: input, shape index: {}]   ;;  %s21905_s3 = inlined_call_operand.vmem [shape: bf16[140,120], index: 3, kind: input, shape index: {}]   ;;  %s21906_s4 = inlined_call_operand.vmem [shape: f32[1,120], index: 4, kind: input, shape index: {}]   ;;  %s21907_s5 = inlined_call_operand.vmem [shape: bf16[5,120,80], index: 5, kind: input, shape index: {}]   ;;  %s21908_s6 = inlined_call_operand.vmem [shape: bf16[5,120,80], index: 6, kind: input, shape index: {}]   ;;  %s21909_s7 = inlined_call_operand.vmem [shape: f32[1,80], index: 7, kind: input, shape index: {}]   ;;  %s21910_s8 = inlined_call_operand.vmem [shape: bf16[32,96], index: 8, kind: input, shape index: {}]   ;;  %s21911_s9 = inlined_call_operand.vmem [shape: bf16[4,80,50], index: 9, kind: input, shape index: {}]   ;;  %s21912_s10 = inlined_call_operand.vmem [shape: f32[1,50], index: 10, kind: input, shape index: {}]   ;;  %s21913_s11 = inlined_call_operand.vmem [shape: bf16[50,10], index: 11, kind: input, shape index: {}]   ;;  %s21914_s12 = inlined_call_operand.vmem [shape: f32[1,10], index: 12, kind: input, shape index: {}]   ;;  %s21915_s13 = inlined_call_operand.vmem [shape: f32[64,10], index: 13, kind: output, shape index: {}]  }
   0x1 LB: > { %s12242_s26 = sadd.s32 4294967295, %s16625_s25   ;;  %p12246_p0 = scmp.ge.s32.totalorder %s16625_s25, 1  ;;  %s16625_s25 = sphi %s16700_s25, %s23_s25  }
   0x2   : > { %p401_p1 = scmp.lt.s32.totalorder %s16625_s25, 3 }
   0x4   : > { %p402_p2 = pnand %p12246_p0, %p401_p1 }
   0x6   : > { %405 = sbr.rel (%p402_p2) target bundleno = 4982 (0x1376), region = 72 }
   0xb   : > { %v16711_v0 = vld [vmem:[%s21904_s2 + $0x38] sm:$0xff]   ;;  %v21916_v1 = vmov 0   ;;  %v16724_v3 = vld [vmem:[%s21904_s2 + $0x30] sm:$0xff]   ;;  %s452_s16 = smul.u32 48, %s12242_s26  ;;  %v16740_v5 = vld [vmem:[%s21904_s2 + $0x28] sm:$0xff]   ;;  %vm651_vm0 = vcmask 97280  }
   0xc   : > { %674 = vmatprep.subr.bf16.mxu0 %v21916_v1  ;;  %811 = vmatprep.subr.bf16.mxu1 %v21916_v1  ;;  %v16718_v2 = vld [vmem:[%s21905_s3 + $0x38] sm:$0xff]   ;;  %v16733_v4 = vld [vmem:[%s21905_s3 + $0x30] sm:$0xff]   ;;  %v16747_v6 = vld [vmem:[%s21905_s3 + $0x28] sm:$0xff]   ;;  %vm670_vm1 = vcmask 1045504   ;;  %vm1342_vm2 = vcmask 1043456   ;;  %vm1323_vm6 = vcmask 982016  }
   0xd   : > { %675 = vmatpush1.bf16.msra.mxu0 %v16711_v0  ;;  %812 = vmatpush1.bf16.msra.mxu1 %v16718_v2  ;;  %p453_p3 = scmp.lt.s32.totalorder %s452_s16, 95  ;;  %v16756_v7 = vld [vmem:[%s21904_s2 + $0x20] sm:$0xff]   ;;  %v16771_v9 = vld [vmem:[%s21904_s2 + $0x18] sm:$0xff]   ;;  %v16789_v11 = vld [vmem:[%s21904_s2 + $0x10] sm:$0xff]   ;;  %vm3068_vm8 = vcmask 785408   ;;  %vm16629_vm9 = vmmov 0  }
   0xe   : > { %676 = vmatprep.subr.bf16.mxu0 %v21916_v1  ;;  %813 = vmatprep.subr.bf16.mxu1 %v21916_v1  ;;  %v16763_v8 = vld [vmem:[%s21905_s3 + $0x20] sm:$0xff]   ;;  %v16778_v10 = vld [vmem:[%s21905_s3 + $0x18] sm:$0xff]   ;;  %v16795_v12 = vld [vmem:[%s21905_s3 + $0x10] sm:$0xff]   ;;  %vm3166_vm10 = vcmask 654336   ;;  %vm3509_vm11 = vcmask 1040384   ;;  %vm3505_vm12 = vcmask 408576  }
   0xf   : > { %s22064_s16 = smov (!%p453_p3, %s452_s16), 95  ;;  %v16807_v14 = vld [vmem:[%s21904_s2 + $0x8] sm:$0xff]   ;;  %v16820_v16 = vld [vmem:[%s21904_s2] sm:$0xff]   ;;  %v16026_v45 = vld [vmem:[%s21907_s5 + $0x74] ss:$0 sps:$4 sm:$0xff]   ;;  %vm3553_vm13 = vcmask 80896  }
  0x10   : > { %s13755_s29 = sshll.u32 %s22064_s16, 3  ;;  %v16814_v15 = vld [vmem:[%s21905_s3 + $0x8] sm:$0xff]   ;;  %v16831_v17 = vld [vmem:[%s21905_s3] sm:$0xff]   ;;  %v16027_v46 = vld [vmem:[%s21908_s6 + $0x74] ss:$0 sps:$4 sm:$0xff]   ;;  %v1344_v47 = vsel %vm1342_vm2, %v16026_v45, 0 }
  0x11   : > { %677 = vmatpush1.bf16.msra.mxu0 %v16724_v3  ;;  %814 = vmatpush1.bf16.msra.mxu1 %v16733_v4  ;;  %s16784_s19 = scalar_lea.vmem %s21902_s0, %s13755_s29  ;;  %s16825_s16 = scalar_lea.vmem %s21903_s1, %s13755_s29  ;;  %v15988_v18 = vld [vmem:[%s21904_s2 + $0x40] sm:$0x3f]   ;;  %v1489_v48 = vsel %vm1342_vm2, %v16027_v46, 0  ;;  %v16028_v49 = vld [vmem:[%s21907_s5 + $0x6c] sm:$0xff]   ;;  %v16034_v55 = vld [vmem:[%s21907_s5 + $0x54] sm:$0xff]  }
  0x12   : > { %678 = vmatprep.subr.bf16.mxu0 %v21916_v1  ;;  %815 = vmatprep.subr.bf16.mxu1 %v21916_v1  ;;  %v15992_v13 = vld [vmem:[%s16784_s19 + $0x4] ss:$8 sps:$4 sm:$0xff]   ;;  %v16845_v20 = vsel %vm670_vm1, %v15988_v18, 0  ;;  %v15990_v22 = vld [vmem:[%s16784_s19] ss:$8 sps:$4 sm:$0xff]   ;;  %v16035_v56 = vld [vmem:[%s21908_s6 + $0x54] sm:$0xff]  }
  0x13   : > { %12274 = vmatprep.mubr.msk.bf16.mxu0 %vm651_vm0, %v15992_v13  ;;  %12289 = vmatprep.mubr.msk.bf16.mxu1 %vm651_vm0, %v15992_v13  ;;  %v15989_v19 = vld [vmem:[%s21905_s3 + $0x40] sm:$0x3f]   ;;  %21943 = vst [vmem:[#allocation2_spill] sm:$0xff] %v16845_v20  ;;  %v15993_v23 = vld [vmem:[%s16784_s19 + $0x14] ss:$8 sps:$4 sm:$0xff]   ;;  %v16029_v50 = vld [vmem:[%s21908_s6 + $0x6c] sm:$0xff]  }
  0x14   : > { %v16848_v21 = vsel %vm670_vm1, %v15989_v19, 0  ;;  %v15995_v24 = vld [vmem:[%s16784_s19 + $0x10] ss:$8 sps:$4 sm:$0xff]   ;;  %v15996_v25 = vld [vmem:[%s16784_s19 + $0x24] ss:$8 sps:$4 sm:$0xff]   ;;  %v16032_v53 = vld [vmem:[%s21907_s5 + $0x5c] sm:$0xff]  }
  0x15   : > { %679 = vmatpush1.bf16.msra.mxu0 %v16740_v5  ;;  %816 = vmatpush1.bf16.msra.mxu1 %v16747_v6  ;;  %21944 = vst [vmem:[#allocation3_spill] sm:$0xff] %v16848_v21  ;;  %v15998_v26 = vld [vmem:[%s16784_s19 + $0x20] ss:$8 sps:$4 sm:$0xff]   ;;  %v15999_v27 = vld [vmem:[%s16784_s19 + $0x34] ss:$8 sps:$4 sm:$0xff]   ;;  %v16036_v57 = vld [vmem:[%s21907_s5 + $0x4c] sm:$0xff]  }
  0x16   : > { %680 = vmatprep.subr.bf16.mxu0 %v21916_v1  ;;  %817 = vmatprep.subr.bf16.mxu1 %v21916_v1  ;;  %v16001_v28 = vld [vmem:[%s16784_s19 + $0x30] ss:$8 sps:$4 sm:$0xff]   ;;  %v16002_v29 = vld [vmem:[%s16784_s19 + $0x44] ss:$8 sps:$4 sm:$0xff]   ;;  %v16004_v30 = vld [vmem:[%s16784_s19 + $0x40] ss:$8 sps:$4 sm:$0xff]  }
  0x17   : > { %v16005_v31 = vld [vmem:[%s16784_s19 + $0x54] ss:$8 sps:$4 sm:$0xff]   ;;  %v16007_v32 = vld [vmem:[%s16784_s19 + $0x50] ss:$8 sps:$4 sm:$0xff]   ;;  %v16010_v33 = vld [vmem:[%s16825_s16 + $0x4] ss:$8 sps:$4 sm:$0xff]  }
  0x18   : > { %v16008_v34 = vld [vmem:[%s16825_s16] ss:$8 sps:$4 sm:$0xff]   ;;  %v16011_v35 = vld [vmem:[%s16825_s16 + $0x14] ss:$8 sps:$4 sm:$0xff]   ;;  %v16013_v36 = vld [vmem:[%s16825_s16 + $0x10] ss:$8 sps:$4 sm:$0xff]  }
  0x19   : > { %681 = vmatpush1.bf16.msra.mxu0 %v16756_v7  ;;  %818 = vmatpush1.bf16.msra.mxu1 %v16763_v8  ;;  %v16014_v37 = vld [vmem:[%s16825_s16 + $0x24] ss:$8 sps:$4 sm:$0xff]   ;;  %v16016_v38 = vld [vmem:[%s16825_s16 + $0x20] ss:$8 sps:$4 sm:$0xff]   ;;  %v16017_v39 = vld [vmem:[%s16825_s16 + $0x34] ss:$8 sps:$4 sm:$0xff]  }
  0x1a   : > { %682 = vmatprep.subr.bf16.mxu0 %v21916_v1  ;;  %819 = vmatprep.subr.bf16.mxu1 %v21916_v1  ;;  %v16019_v40 = vld [vmem:[%s16825_s16 + $0x30] ss:$8 sps:$4 sm:$0xff]   ;;  %v16020_v41 = vld [vmem:[%s16825_s16 + $0x44] ss:$8 sps:$4 sm:$0xff]   ;;  %v16022_v42 = vld [vmem:[%s16825_s16 + $0x40] ss:$8 sps:$4 sm:$0xff]  }
  0x1b   : > { %v16023_v43 = vld [vmem:[%s16825_s16 + $0x54] ss:$8 sps:$4 sm:$0xff]   ;;  %v16025_v44 = vld [vmem:[%s16825_s16 + $0x50] ss:$8 sps:$4 sm:$0xff]   ;;  %v16030_v51 = vld [vmem:[%s21907_s5 + $0x64] sm:$0xff]   ;;  %s12251_s27 = sshll.u32 %s12242_s26, 2 }
  0x1c   : > { %v16031_v52 = vld [vmem:[%s21908_s6 + $0x64] sm:$0xff]   ;;  %v16033_v54 = vld [vmem:[%s21908_s6 + $0x5c] sm:$0xff]   ;;  %v16037_v58 = vld [vmem:[%s21908_s6 + $0x4c] sm:$0xff]   ;;  %p467_p4 = scmp.lt.s32.totalorder %s12251_s27, 7 }
  0x1d   : > { %683 = vmatpush1.bf16.msra.mxu0 %v16771_v9  ;;  %820 = vmatpush1.bf16.msra.mxu1 %v16778_v10  ;;  %v16038_v59 = vld [vmem:[%s21907_s5 + $0x44] sm:$0xff]   ;;  %v16040_v61 = vld [vmem:[%s21907_s5 + $0x3c] sm:$0xff]   ;;  %v16988_v63 = vld [vmem:[%s21907_s5 + $0x38] ss:$0 sps:$4 sm:$0xff]  }
  0x1e   : > { %684 = vmatprep.subr.bf16.mxu0 %v21916_v1  ;;  %821 = vmatprep.subr.bf16.mxu1 %v21916_v1  ;;  %v16039_v60 = vld [vmem:[%s21908_s6 + $0x44] sm:$0xff]   ;;  %v16041_v62 = vld [vmem:[%s21908_s6 + $0x3c] sm:$0xff]   ;;  %s22066_s27 = smov (!%p467_p4, %s12251_s27), 7 }
  0x1f   : > { %s12252_s24 = sshll.u32 %s22066_s27, 3 }
  0x20   : > { %s20001_s17 = scalar_lea.vmem %s21915_s13, %s12252_s24 }
  0x21   : > { %685 = vmatpush1.bf16.msra.mxu0 %v16789_v11  ;;  %822 = vmatpush1.bf16.msra.mxu1 %v16795_v12 }
  0x22   : > { %686 = vmatprep.subr.bf16.mxu0 %v21916_v1  ;;  %823 = vmatprep.subr.bf16.mxu1 %v21916_v1 }
  0x25   : > { %687 = vmatpush1.bf16.msra.mxu0 %v16807_v14  ;;  %824 = vmatpush1.bf16.msra.mxu1 %v16814_v15 }
  0x26   : > { %688 = vmatprep.subr.bf16.mxu0 %v21916_v1  ;;  %825 = vmatprep.subr.bf16.mxu1 %v21916_v1 }
  0x29   : > { %689 = vmatpush1.bf16.msra.mxu0 %v16820_v16  ;;  %826 = vmatpush1.bf16.msra.mxu1 %v16831_v17 }
  0x2a   : > { %704 = vmatprep.subr.bf16.mxu0 %v21916_v1  ;;  %841 = vmatprep.subr.bf16.mxu1 %v21916_v1 }
  0x2d   : > { %705 = vmatpush2.bf16.msra.mxu0 %v16845_v20  ;;  %842 = vmatpush2.bf16.msra.mxu1 %v16848_v21 }
  0x2e   : > { %976 = vmatprep.subr.bf16.mxu0 %v21916_v1  ;;  %1069 = vmatprep.subr.bf16.mxu1 %v21916_v1 }
  0x30   : > { %707 = vmatmul.mubr.bf16.vlgmr.msra.gmra.mxu0 %v15990_v22  ;;  %844 = vmatmul.mubr.bf16.vlgmr.msra.gmra.mxu1 %v15990_v22 }
  0x31   : > { %977 = vmatpush1.bf16.msra.mxu0 %v16711_v0  ;;  %1070 = vmatpush1.bf16.msra.mxu1 %v16718_v2  ;;  %v16993_v0 = vld [vmem:[%s21908_s6 + $0x38] ss:$0 sps:$4 sm:$0xff]  }
  0x32   : > { %978 = vmatprep.subr.bf16.mxu0 %v21916_v1  ;;  %12275 = vmatprep.mubr.msk.bf16.mxu0 %vm651_vm0, %v15993_v23 }
  0x33   : > { %12290 = vmatprep.mubr.msk.bf16.mxu1 %vm651_vm0, %v15993_v23  ;;  %1071 = vmatprep.subr.bf16.mxu1 %v21916_v1 }
  0x35   : > { %979 = vmatpush1.bf16.msra.mxu0 %v16724_v3  ;;  %1072 = vmatpush1.bf16.msra.mxu1 %v16733_v4 }
  0x36   : > { %980 = vmatprep.subr.bf16.mxu0 %v21916_v1  ;;  %1073 = vmatprep.subr.bf16.mxu1 %v21916_v1 }
  0x38   : > { %715 = vmatmul.mubr.bf16.gmra.mxu0 %v15995_v24  ;;  %852 = vmatmul.mubr.bf16.gmra.mxu1 %v15995_v24 }
  0x39   : > { %981 = vmatpush1.bf16.msra.mxu0 %v16740_v5  ;;  %1074 = vmatpush1.bf16.msra.mxu1 %v16747_v6 }
  0x3a   : > { %12276 = vmatprep.mubr.msk.bf16.mxu0 %vm651_vm0, %v15996_v25  ;;  %12291 = vmatprep.mubr.msk.bf16.mxu1 %vm651_vm0, %v15996_v25 }
  0x3b   : > { %982 = vmatprep.subr.bf16.mxu0 %v21916_v1  ;;  %1075 = vmatprep.subr.bf16.mxu1 %v21916_v1 }
  0x3d   : > { %983 = vmatpush1.bf16.msra.mxu0 %v16756_v7  ;;  %1076 = vmatpush1.bf16.msra.mxu1 %v16763_v8 }
  0x3e   : > { %984 = vmatprep.subr.bf16.mxu0 %v21916_v1  ;;  %1077 = vmatprep.subr.bf16.mxu1 %v21916_v1 }
  0x40   : > { %723 = vmatmul.mubr.bf16.gmra.mxu0 %v15998_v26  ;;  %860 = vmatmul.mubr.bf16.gmra.mxu1 %v15998_v26 }
  0x41   : > { %12277 = vmatprep.mubr.msk.bf16.mxu0 %vm651_vm0, %v15999_v27  ;;  %12292 = vmatprep.mubr.msk.bf16.mxu1 %vm651_vm0, %v15999_v27 }
  0x42   : > { %985 = vmatpush1.bf16.msra.mxu0 %v16771_v9  ;;  %1078 = vmatpush1.bf16.msra.mxu1 %v16778_v10 }
  0x43   : > { %986 = vmatprep.subr.bf16.mxu0 %v21916_v1  ;;  %1079 = vmatprep.subr.bf16.mxu1 %v21916_v1 }
  0x46   : > { %987 = vmatpush1.bf16.msra.mxu0 %v16789_v11  ;;  %1080 = vmatpush1.bf16.msra.mxu1 %v16795_v12 }
  0x47   : > { %988 = vmatprep.subr.bf16.mxu0 %v21916_v1  ;;  %1081 = vmatprep.subr.bf16.mxu1 %v21916_v1 }
  0x48   : > { %731 = vmatmul.mubr.bf16.gmra.mxu0 %v16001_v28  ;;  %868 = vmatmul.mubr.bf16.gmra.mxu1 %v16001_v28 }
  0x49   : > { %12278 = vmatprep.mubr.msk.bf16.mxu0 %vm651_vm0, %v16002_v29  ;;  %12293 = vmatprep.mubr.msk.bf16.mxu1 %vm651_vm0, %v16002_v29 }
  0x4a   : > { %989 = vmatpush1.bf16.msra.mxu0 %v16807_v14  ;;  %1082 = vmatpush1.bf16.msra.mxu1 %v16814_v15 }
  0x4b   : > { %990 = vmatprep.subr.bf16.mxu0 %v21916_v1  ;;  %1083 = vmatprep.subr.bf16.mxu1 %v21916_v1 }
  0x4e   : > { %991 = vmatpush1.bf16.msra.mxu0 %v16820_v16  ;;  %1084 = vmatpush1.bf16.msra.mxu1 %v16831_v17 }
  0x4f   : > { %1006 = vmatprep.subr.bf16.mxu0 %v21916_v1  ;;  %1099 = vmatprep.subr.bf16.mxu1 %v21916_v1 }
  0x50   : > { %739 = vmatmul.mubr.bf16.gmra.mxu0 %v16004_v30  ;;  %876 = vmatmul.mubr.bf16.gmra.mxu1 %v16004_v30 }
  0x51   : > { %12279 = vmatprep.mubr.msk.bf16.mxu0 %vm651_vm0, %v16005_v31  ;;  %12294 = vmatprep.mubr.msk.bf16.mxu1 %vm651_vm0, %v16005_v31 }
  0x52   : > { %1007 = vmatpush2.bf16.msra.mxu0 %v16845_v20  ;;  %1100 = vmatpush2.bf16.msra.mxu1 %v16848_v21 }
  0x53   : > { %15921 = vmatprep.subr.msk.bf16.mxu0 %vm1342_vm2, %v16026_v45  ;;  %15922 = vmatprep.subr.msk.bf16.mxu1 %vm1342_vm2, %v16027_v46 }
  0x58   : > { %747 = vmatmul.mubr.bf16.gmra.mxu0 %v16007_v32  ;;  %884 = vmatmul.mubr.bf16.gmra.mxu1 %v16007_v32 }
  0x59   : > { %12307 = vmatprep.mubr.msk.bf16.mxu0 %vm651_vm0, %v16010_v33  ;;  %12313 = vmatprep.mubr.msk.bf16.mxu1 %vm651_vm0, %v16010_v33 }
  0x60   : > { %1009 = vmatmul.mubr.bf16.vlgmr.msra.gmra.mxu0 %v16008_v34  ;;  %1102 = vmatmul.mubr.bf16.vlgmr.msra.gmra.mxu1 %v16008_v34 }
  0x61   : > { %12308 = vmatprep.mubr.msk.bf16.mxu0 %vm651_vm0, %v16011_v35  ;;  %12314 = vmatprep.mubr.msk.bf16.mxu1 %vm651_vm0, %v16011_v35 }
  0x62   : > { %14466 = vmatpush3.bf16.msra.mxu0 %v1344_v47  ;;  %14494 = vmatpush3.bf16.msra.mxu1 %v1489_v48 }
  0x63   : > { %14467 = vmatprep.subr.bf16.mxu0 %v16028_v49  ;;  %14495 = vmatprep.subr.bf16.mxu1 %v16029_v50 }
  0x66   : > { %14468 = vmatpush3.bf16.msra.mxu0 %v16028_v49  ;;  %14496 = vmatpush3.bf16.msra.mxu1 %v16029_v50 }
  0x67   : > { %14469 = vmatprep.subr.bf16.mxu0 %v16030_v51  ;;  %14497 = vmatprep.subr.bf16.mxu1 %v16031_v52 }
  0x68   : > { %1017 = vmatmul.mubr.bf16.gmra.mxu0 %v16013_v36  ;;  %1110 = vmatmul.mubr.bf16.gmra.mxu1 %v16013_v36 }
  0x69   : > { %12309 = vmatprep.mubr.msk.bf16.mxu0 %vm651_vm0, %v16014_v37  ;;  %12315 = vmatprep.mubr.msk.bf16.mxu1 %vm651_vm0, %v16014_v37 }
  0x6a   : > { %14470 = vmatpush3.bf16.msra.mxu0 %v16030_v51  ;;  %14498 = vmatpush3.bf16.msra.mxu1 %v16031_v52 }
  0x6b   : > { %14471 = vmatprep.subr.bf16.mxu0 %v16032_v53  ;;  %14499 = vmatprep.subr.bf16.mxu1 %v16033_v54 }
  0x6e   : > { %14472 = vmatpush3.bf16.msra.mxu0 %v16032_v53  ;;  %14500 = vmatpush3.bf16.msra.mxu1 %v16033_v54 }
  0x6f   : > { %14473 = vmatprep.subr.bf16.mxu0 %v16034_v55  ;;  %14501 = vmatprep.subr.bf16.mxu1 %v16035_v56 }
  0x70   : > { %1025 = vmatmul.mubr.bf16.gmra.mxu0 %v16016_v38  ;;  %1118 = vmatmul.mubr.bf16.gmra.mxu1 %v16016_v38 }
  0x71   : > { %12310 = vmatprep.mubr.msk.bf16.mxu0 %vm651_vm0, %v16017_v39  ;;  %12316 = vmatprep.mubr.msk.bf16.mxu1 %vm651_vm0, %v16017_v39 }
  0x72   : > { %14474 = vmatpush3.bf16.msra.mxu0 %v16034_v55  ;;  %14502 = vmatpush3.bf16.msra.mxu1 %v16035_v56  ;;  %v17038_v56 = vld [vmem:[%s21906_s4] ss:$0 sm:$0xff] }
  0x73   : > { %14475 = vmatprep.subr.bf16.mxu0 %v16036_v57  ;;  %14503 = vmatprep.subr.bf16.mxu1 %v16037_v58 }
  0x76   : > { %14476 = vmatpush3.bf16.msra.mxu0 %v16036_v57  ;;  %14504 = vmatpush3.bf16.msra.mxu1 %v16037_v58 }
  0x77   : > { %14477 = vmatprep.subr.bf16.mxu0 %v16038_v59  ;;  %14505 = vmatprep.subr.bf16.mxu1 %v16039_v60 }
  0x78   : > { %1033 = vmatmul.mubr.bf16.gmra.mxu0 %v16019_v40  ;;  %1126 = vmatmul.mubr.bf16.gmra.mxu1 %v16019_v40 }
  0x79   : > { %12311 = vmatprep.mubr.msk.bf16.mxu0 %vm651_vm0, %v16020_v41  ;;  %12317 = vmatprep.mubr.msk.bf16.mxu1 %vm651_vm0, %v16020_v41 }
  0x7a   : > { %14478 = vmatpush3.bf16.msra.mxu0 %v16038_v59  ;;  %14506 = vmatpush3.bf16.msra.mxu1 %v16039_v60 }
  0x7b   : > { %14479 = vmatprep.subr.bf16.mxu0 %v16040_v61  ;;  %14507 = vmatprep.subr.bf16.mxu1 %v16041_v62 }
  0x7e   : > { %14480 = vmatpush3.bf16.msra.mxu0 %v16040_v61  ;;  %14508 = vmatpush3.bf16.msra.mxu1 %v16041_v62  ;;  %v1241_v61 = vlaneseq }
  0x7f   : > { %15923 = vmatprep.subr.msk.bf16.mxu0 %vm1342_vm2, %v16988_v63  ;;  %15924 = vmatprep.subr.msk.bf16.mxu1 %vm1342_vm2, %v16993_v0 }
  0x80   : > { %1041 = vmatmul.mubr.bf16.gmra.mxu0 %v16022_v42  ;;  %1134 = vmatmul.mubr.bf16.gmra.mxu1 %v16022_v42 }
  0x81   : > { %12312 = vmatprep.mubr.msk.bf16.mxu0 %vm651_vm0, %v16023_v43  ;;  %12318 = vmatprep.mubr.msk.bf16.mxu1 %vm651_vm0, %v16023_v43 }
  0x88   : > { %1049 = vmatmul.mubr.bf16.gmra.mxu0 %v16025_v44  ;;  %1142 = vmatmul.mubr.bf16.gmra.mxu1 %v16025_v44 }
  0xf0   : > { %v708_v2 = vpop.f32.mrf.mxu0  ;;  %v845_v3 = vpop.f32.mrf.mxu1 }
  0xf1   : > { %v892_v51 = vmax.f32 %v708_v2, %v845_v3 }
  0xf2   : > { %v710_v4 = vpop.f32.mrf.mxu0  ;;  %v847_v5 = vpop.f32.mrf.mxu1 }
  0xf4   : > { %v711_v6 = vpop.f32.mrf.mxu0  ;;  %v848_v7 = vpop.f32.mrf.mxu1 }
  0xf5   : > { %v893_v58 = vmax.f32 %v711_v6, %v848_v7 }
  0xf6   : > { %v713_v8 = vpop.f32.mrf.mxu0  ;;  %v850_v9 = vpop.f32.mrf.mxu1 }
  0xf8   : > { %v716_v10 = vpop.f32.mrf.mxu0  ;;  %v853_v11 = vpop.f32.mrf.mxu1 }
  0xf9   : > { %v894_v3 = vmax.f32 %v716_v10, %v853_v11 }
  0xfa   : > { %v718_v12 = vpop.f32.mrf.mxu0  ;;  %v855_v13 = vpop.f32.mrf.mxu1 }
  0xfb   : > { %v17041_v13 = vshrl.u32 %v1241_v61, 7 }
  0xfc   : > { %v16999_v14 = vpop.f32.mrf.mxu0  ;;  %v17001_v15 = vpop.f32.mrf.mxu1 }
  0xfd   : > { %21945 = vst [vmem:[#allocation4_spill] sm:$0xff] %v17041_v13  ;;  %vm1243_vm3 = vcmp.lt.s32.totalorder %v17041_v13, 7  ;;  %vm2223_vm4 = vcmp.lt.s32.totalorder %v17041_v13, 5  ;;  %vm2586_vm5 = vcmp.lt.s32.totalorder %v17041_v13, 4  ;;  %vm1860_vm7 = vcmp.lt.s32.totalorder %v17041_v13, 6 }
  0xfe   : > { %v721_v16 = vpop.f32.mrf.mxu0  ;;  %v858_v17 = vpop.f32.mrf.mxu1 }
 0x100   : > { %v17003_v18 = vpop.f32.mrf.mxu0  ;;  %v17005_v19 = vpop.f32.mrf.mxu1 }
 0x102   : > { %v726_v22 = vpop.f32.mrf.mxu0  ;;  %v863_v23 = vpop.f32.mrf.mxu1 }
 0x104   : > { %v17007_v24 = vpop.f32.mrf.mxu0  ;;  %v17009_v25 = vpop.f32.mrf.mxu1 }
 0x106   : > { %v729_v26 = vpop.f32.mrf.mxu0  ;;  %v866_v27 = vpop.f32.mrf.mxu1 }
 0x107   : > { %v895_v26 = vmax.f32 %v16999_v14, %v17001_v15 }
 0x108   : > { %v17011_v28 = vpop.f32.mrf.mxu0  ;;  %v17013_v29 = vpop.f32.mrf.mxu1 }
 0x10a   : > { %v734_v30 = vpop.f32.mrf.mxu0  ;;  %v871_v31 = vpop.f32.mrf.mxu1 }
 0x10c   : > { %v17015_v32 = vpop.f32.mrf.mxu0  ;;  %v17017_v33 = vpop.f32.mrf.mxu1 }
 0x10e   : > { %v737_v34 = vpop.f32.mrf.mxu0  ;;  %v874_v35 = vpop.f32.mrf.mxu1 }
 0x110   : > { %v17019_v36 = vpop.f32.mrf.mxu0  ;;  %v17021_v37 = vpop.f32.mrf.mxu1 }
 0x112   : > { %v742_v38 = vpop.f32.mrf.mxu0  ;;  %v879_v39 = vpop.f32.mrf.mxu1 }
 0x114   : > { %v17023_v40 = vpop.f32.mrf.mxu0  ;;  %v17025_v41 = vpop.f32.mrf.mxu1 }
 0x116   : > { %v745_v42 = vpop.f32.mrf.mxu0  ;;  %v882_v43 = vpop.f32.mrf.mxu1 }
 0x117   : > { %v896_v43 = vmax.f32 %v17003_v18, %v17005_v19 }
 0x118   : > { %v17027_v44 = vpop.f32.mrf.mxu0  ;;  %v17029_v45 = vpop.f32.mrf.mxu1 }
 0x11a   : > { %v750_v46 = vpop.f32.mrf.mxu0  ;;  %v887_v47 = vpop.f32.mrf.mxu1 }
 0x11c   : > { %v17031_v48 = vpop.f32.mrf.mxu0  ;;  %v17033_v49 = vpop.f32.mrf.mxu1 }
 0x11e   : > { %v753_v50 = vpop.f32.mrf.mxu0  ;;  %v890_v52 = vpop.f32.mrf.mxu1 }
 0x120   : > { %v1010_v53 = vpop.f32.mrf.mxu0  ;;  %v1103_v55 = vpop.f32.mrf.mxu1 }
 0x121   : > { %v1057_v54 = vmax.f32 %v892_v51, %v1010_v53 }
 0x122   : > { %v1012_v57 = vpop.f32.mrf.mxu0  ;;  %v1105_v60 = vpop.f32.mrf.mxu1 }
 0x123   : > { %v1150_v59 = vmax.f32 %v1057_v54, %v1103_v55 }
 0x124   : > { %v1013_v62 = vpop.f32.mrf.mxu0  ;;  %v1106_v5 = vpop.f32.mrf.mxu1 }
 0x125   : > { %v1058_v4 = vmax.f32 %v893_v58, %v1013_v62  ;;  %v1169_v8 = vadd.f32 %v17038_v56, %v1150_v59 }
 0x126   : > { %v1015_v2 = vpop.f32.mrf.mxu0  ;;  %v1108_v12 = vpop.f32.mrf.mxu1 }
 0x127   : > { %v1151_v9 = vmax.f32 %v1058_v4, %v1106_v5  ;;  %v17044_v6 = vmax.f32 %v1169_v8, 0.0 }
 0x128   : > { %v1018_v16 = vpop.f32.mrf.mxu0  ;;  %v1111_v23 = vpop.f32.mrf.mxu1 }
 0x129   : > { %v1170_v17 = vadd.f32 %v17038_v56, %v1151_v9  ;;  %v1059_v22 = vmax.f32 %v894_v3, %v1018_v16  ;;  %v2211_v39 = vrot.slane %v17044_v6, 3  ;;  %v2574_v15 = vrot.slane %v17044_v6, 4 }
 0x12a   : > { %v1020_v7 = vpop.f32.mrf.mxu0  ;;  %v1113_v31 = vpop.f32.mrf.mxu1  ;;  %v1229_v57 = vrot.slane %v17044_v6, 1  ;;  %v897_v3 = vmax.f32 %v17007_v24, %v17009_v25 }
 0x12b   : > { %v17048_v27 = vmax.f32 %v1170_v17, 0.0  ;;  %v1152_v30 = vmax.f32 %v1059_v22, %v1111_v23 }
 0x12c   : > { %v1021_v10 = vpop.f32.mrf.mxu0  ;;  %v1114_v35 = vpop.f32.mrf.mxu1 }
 0x12d   : > { %v1171_v11 = vadd.f32 %v17038_v56, %v1152_v30  ;;  %v1060_v34 = vmax.f32 %v895_v26, %v1021_v10  ;;  %v2212_v14 = vrot.slane %v17048_v27, 3  ;;  %v2575_v42 = vrot.slane %v17048_v27, 4 }
 0x12e   : > { %v1023_v38 = vpop.f32.mrf.mxu0  ;;  %v1116_v50 = vpop.f32.mrf.mxu1  ;;  %v1230_v51 = vrot.slane %v17048_v27, 1 }
 0x12f   : > { %v17060_v46 = vmax.f32 %v1171_v11, 0.0  ;;  %v1153_v47 = vmax.f32 %v1060_v34, %v1114_v35  ;;  %v2234_v53 = vsel %vm2223_vm4, %v2211_v39, %v2212_v14  ;;  %v2597_v54 = vsel %vm2586_vm5, %v2574_v15, %v2575_v42 }
 0x130   : > { %v1026_v52 = vpop.f32.mrf.mxu0  ;;  %v1119_v19 = vpop.f32.mrf.mxu1  ;;  %v1254_v2 = vsel %vm1243_vm3, %v1229_v57, %v1230_v51  ;;  %v898_v11 = vmax.f32 %v17011_v28, %v17013_v29 }
 0x131   : > { %v1172_v55 = vadd.f32 %v17038_v56, %v1153_v47  ;;  %v1061_v18 = vmax.f32 %v896_v43, %v1026_v52  ;;  %v1231_v58 = vrot.slane %v17060_v46, 1  ;;  %v2213_v60 = vrot.slane %v17060_v46, 3 }
 0x132   : > { %v1028_v59 = vpop.f32.mrf.mxu0  ;;  %v2576_v61 = vrot.slane %v17060_v46, 4  ;;  %v1121_v5 = vpop.f32.mrf.mxu1  ;;  %v1636_v47 = vsel %vm1342_vm2, %v16988_v63, 0  ;;  %v1765_v52 = vsel %vm1342_vm2, %v16993_v0, 0  ;;  %v16044_v0 = vld [vmem:[%s21907_s5 + $0x30] sm:$0xff]  }
 0x133   : > { %v17076_v62 = vmax.f32 %v1172_v55, 0.0  ;;  %v1154_v4 = vmax.f32 %v1061_v18, %v1119_v19  ;;  %v1253_v8 = vsel %vm1243_vm3, %v1230_v51, %v1231_v58  ;;  %v2233_v16 = vsel %vm2223_vm4, %v2212_v14, %v2213_v60 }
 0x134   : > { %v1029_v9 = vpop.f32.mrf.mxu0  ;;  %v1256_v12 = vpack.c.bf16 %v1253_v8, %v1254_v2  ;;  %v2596_v17 = vsel %vm2586_vm5, %v2575_v42, %v2576_v61  ;;  %v1122_v26 = vpop.f32.mrf.mxu1  ;;  %v17098_v10 = vpack.c.bf16 %v2233_v16, %v2234_v53  ;;  %v899_v51 = vmax.f32 %v17015_v32, %v17017_v33 }
 0x135   : > { %v1232_v22 = vrot.slane %v17076_v62, 1  ;;  %v1851_v23 = vrot.slane %v17076_v62, 2  ;;  %v2214_v7 = vrot.slane %v17076_v62, 3  ;;  %v2577_v30 = vrot.slane %v17076_v62, 4 }
 0x136   : > { %v1173_v24 = vadd.f32 %v17038_v56, %v1154_v4  ;;  %v1062_v25 = vmax.f32 %v897_v3, %v1029_v9  ;;  %v1031_v31 = vpop.f32.mrf.mxu0  ;;  %14481 = vmatprep.mubr.msk.bf16.mxu0 %vm1323_vm6, %v1256_v12  ;;  %14509 = vmatprep.mubr.msk.bf16.mxu1 %vm1323_vm6, %v1256_v12  ;;  %v1124_v34 = vpop.f32.mrf.mxu1  ;;  %v17104_v38 = vpack.c.bf16 %v2596_v17, %v2597_v54  ;;  %v1850_v53 = vrot.slane %v17060_v46, 2 }
 0x137   : > { %v2232_v35 = vsel %vm2223_vm4, %v2213_v60, %v2214_v7  ;;  %v2595_v50 = vsel %vm2586_vm5, %v2576_v61, %v2577_v30  ;;  %v1252_v32 = vsel %vm1243_vm3, %v1231_v58, %v1232_v22 }
 0x138   : > { %v17106_v14 = vmax.f32 %v1173_v24, 0.0  ;;  %v1155_v42 = vmax.f32 %v1062_v25, %v1122_v26  ;;  %v1034_v43 = vpop.f32.mrf.mxu0  ;;  %v1127_v29 = vpop.f32.mrf.mxu1  ;;  %v1869_v61 = vsel %vm1860_vm7, %v1850_v53, %v1851_v23 }
 0x139   : > { %v1063_v28 = vmax.f32 %v898_v11, %v1034_v43 }
 0x13a   : > { %v1233_v54 = vrot.slane %v17106_v14, 1  ;;  %v1852_v55 = vrot.slane %v17106_v14, 2  ;;  %v2215_v18 = vrot.slane %v17106_v14, 3  ;;  %v2578_v63 = vrot.slane %v17106_v14, 4  ;;  %v1036_v19 = vpop.f32.mrf.mxu0  ;;  %v1129_v60 = vpop.f32.mrf.mxu1 }
 0x13b   : > { %v1174_v59 = vadd.f32 %v17038_v56, %v1155_v42  ;;  %v1156_v33 = vmax.f32 %v1063_v28, %v1127_v29 }
 0x13c   : > { %v1037_v4 = vpop.f32.mrf.mxu0  ;;  %v1251_v5 = vsel %vm1243_vm3, %v1232_v22, %v1233_v54  ;;  %v1868_v58 = vsel %vm1860_vm7, %v1851_v23, %v1852_v55  ;;  %v2231_v8 = vsel %vm2223_vm4, %v2214_v7, %v2215_v18  ;;  %v2594_v2 = vsel %vm2586_vm5, %v2577_v30, %v2578_v63  ;;  %v1130_v16 = vpop.f32.mrf.mxu1  ;;  %v16045_v22 = vld [vmem:[%s21908_s6 + $0x30] sm:$0xff]  }
 0x13d   : > { %v17143_v3 = vmax.f32 %v1174_v59, 0.0  ;;  %v1175_v9 = vadd.f32 %v17038_v56, %v1156_v33  ;;  %v1064_v12 = vmax.f32 %v899_v51, %v1037_v4  ;;  %v1257_v17 = vpack.c.bf16 %v1251_v5, %v1252_v32 }
 0x13e   : > { %v1039_v23 = vpop.f32.mrf.mxu0  ;;  %v17149_v26 = vpack.c.bf16 %v1868_v58, %v1869_v61  ;;  %v17151_v7 = vpack.c.bf16 %v2231_v8, %v2232_v35  ;;  %v17153_v24 = vpack.c.bf16 %v2594_v2, %v2595_v50  ;;  %v900_v30 = vmax.f32 %v17019_v36, %v17021_v37  ;;  %v1132_v11 = vpop.f32.mrf.mxu1  ;;  %v16046_v35 = vld [vmem:[%s21907_s5 + $0x28] sm:$0xff]   ;;  %v16048_v61 = vld [vmem:[%s21907_s5 + $0x20] sm:$0xff]  }
 0x13f   : > { %v17157_v25 = vmax.f32 %v1175_v9, 0.0  ;;  %v1157_v31 = vmax.f32 %v1064_v12, %v1130_v16  ;;  %14482 = vmatmul.mubr.msk.bf16.vlgmr.msra.gmra.mxu0 %vm1323_vm6, %v1257_v17  ;;  %14510 = vmatmul.mubr.msk.bf16.vlgmr.msra.gmra.mxu1 %vm1323_vm6, %v1257_v17  ;;  %v1234_v34 = vrot.slane %v17143_v3, 1  ;;  %v2216_v43 = vrot.slane %v17143_v3, 3  ;;  %v16049_v9 = vld [vmem:[%s21908_s6 + $0x20] sm:$0xff]  }
 0x140   : > { %v1042_v42 = vpop.f32.mrf.mxu0  ;;  %14522 = vmatpush3.bf16.msra.mxu0 %v1636_v47  ;;  %14550 = vmatpush3.bf16.msra.mxu1 %v1765_v52  ;;  %v901_v36 = vmax.f32 %v17023_v40, %v17025_v41  ;;  %v1135_v51 = vpop.f32.mrf.mxu1  ;;  %v16047_v47 = vld [vmem:[%s21908_s6 + $0x28] sm:$0xff]   ;;  %v2579_v41 = vrot.slane %v17143_v3, 4  ;;  %v902_v12 = vmax.f32 %v17027_v44, %v17029_v45  ;;  %v16050_v44 = vld [vmem:[%s21907_s5 + $0x18] sm:$0xff]  }
 0x141   : > { %v1176_v37 = vadd.f32 %v17038_v56, %v1157_v31  ;;  %v1065_v50 = vmax.f32 %v900_v30, %v1042_v42  ;;  %14523 = vmatprep.subr.bf16.mxu0 %v16044_v0  ;;  %14551 = vmatprep.subr.bf16.mxu1 %v16045_v22  ;;  %v1235_v28 = vrot.slane %v17157_v25, 1  ;;  %v1250_v52 = vsel %vm1243_vm3, %v1233_v54, %v1234_v34 }
 0x142   : > { %v1044_v29 = vpop.f32.mrf.mxu0  ;;  %v2217_v19 = vrot.slane %v17157_v25, 3  ;;  %v2230_v40 = vsel %vm2223_vm4, %v2215_v18, %v2216_v43  ;;  %v1137_v33 = vpop.f32.mrf.mxu1  ;;  %v2580_v54 = vrot.slane %v17157_v25, 4  ;;  %v2593_v42 = vsel %vm2586_vm5, %v2578_v63, %v2579_v41 }
 0x143   : > { %v17179_v59 = vmax.f32 %v1176_v37, 0.0  ;;  %v1158_v32 = vmax.f32 %v1065_v50, %v1135_v51  ;;  %v1249_v60 = vsel %vm1243_vm3, %v1234_v34, %v1235_v28 }
 0x144   : > { %v1045_v4 = vpop.f32.mrf.mxu0  ;;  %v1258_v5 = vpack.c.bf16 %v1249_v60, %v1250_v52  ;;  %14524 = vmatpush3.bf16.msra.mxu0 %v16044_v0  ;;  %14552 = vmatpush3.bf16.msra.mxu1 %v16045_v22  ;;  %v2229_v18 = vsel %vm2223_vm4, %v2216_v43, %v2217_v19  ;;  %v1138_v2 = vpop.f32.mrf.mxu1  ;;  %v2592_v11 = vsel %vm2586_vm5, %v2579_v41, %v2580_v54  ;;  %v16052_v60 = vld [vmem:[%s21907_s5 + $0x10] sm:$0xff]  }
 0x145   : > { %v1177_v58 = vadd.f32 %v17038_v56, %v1158_v32  ;;  %v1066_v8 = vmax.f32 %v901_v36, %v1045_v4  ;;  %14525 = vmatprep.subr.bf16.mxu0 %v16046_v35  ;;  %14553 = vmatprep.subr.bf16.mxu1 %v16047_v47  ;;  %v17197_v0 = vpack.c.bf16 %v2229_v18, %v2230_v40  ;;  %v2218_v17 = vrot.slane %v17179_v59, 3 }
 0x146   : > { %v1047_v16 = vpop.f32.mrf.mxu0  ;;  %14485 = vmatprep.mubr.msk.bf16.mxu0 %vm1323_vm6, %v1258_v5  ;;  %14513 = vmatprep.mubr.msk.bf16.mxu1 %vm1323_vm6, %v1258_v5  ;;  %v1140_v30 = vpop.f32.mrf.mxu1  ;;  %v1236_v31 = vrot.slane %v17179_v59, 1  ;;  %v2581_v43 = vrot.slane %v17179_v59, 4  ;;  %v903_v36 = vmax.f32 %v17031_v48, %v17033_v49  ;;  %v17223_v52 = vpack.c.bf16 %v2592_v11, %v2593_v42  ;;  %v16058_v11 = vld [vmem:[%s21907_s5 + $0xb0] ss:$0 sps:$4 sm:$0xff]  }
 0x147   : > { %v17200_v22 = vmax.f32 %v1177_v58, 0.0  ;;  %v1159_v23 = vmax.f32 %v1066_v8, %v1138_v2  ;;  %v2228_v45 = vsel %vm2223_vm4, %v2217_v19, %v2218_v17 }
 0x148   : > { %v1050_v34 = vpop.f32.mrf.mxu0  ;;  %14526 = vmatpush3.bf16.msra.mxu0 %v16046_v35  ;;  %14554 = vmatpush3.bf16.msra.mxu1 %v16047_v47  ;;  %v1143_v50 = vpop.f32.mrf.mxu1  ;;  %v16051_v47 = vld [vmem:[%s21908_s6 + $0x18] sm:$0xff]   ;;  %v2591_v48 = vsel %vm2586_vm5, %v2580_v54, %v2581_v43  ;;  %v1248_v33 = vsel %vm1243_vm3, %v1235_v28, %v1236_v31  ;;  %v16053_v28 = vld [vmem:[%s21908_s6 + $0x10] sm:$0xff]  }
 0x149   : > { %v1178_v35 = vadd.f32 %v17038_v56, %v1159_v23  ;;  %v1067_v37 = vmax.f32 %v902_v12, %v1050_v34  ;;  %14527 = vmatprep.subr.bf16.mxu0 %v16048_v61  ;;  %14555 = vmatprep.subr.bf16.mxu1 %v16049_v9  ;;  %v1237_v51 = vrot.slane %v17200_v22, 1  ;;  %v2219_v63 = vrot.slane %v17200_v22, 3 }
 0x14a   : > { %v1052_v29 = vpop.f32.mrf.mxu0  ;;  %v2582_v19 = vrot.slane %v17200_v22, 4  ;;  %v1145_v41 = vpop.f32.mrf.mxu1 }
 0x14b   : > { %v17228_v49 = vmax.f32 %v1178_v35, 0.0  ;;  %v1160_v40 = vmax.f32 %v1067_v37, %v1143_v50  ;;  %v1247_v32 = vsel %vm1243_vm3, %v1236_v31, %v1237_v51  ;;  %v2227_v54 = vsel %vm2223_vm4, %v2218_v17, %v2219_v63  ;;  %v16054_v31 = vld [vmem:[%s21907_s5 + $0x8] sm:$0xff]  }
 0x14c   : > { %v1053_v4 = vpop.f32.mrf.mxu0  ;;  %v1259_v5 = vpack.c.bf16 %v1247_v32, %v1248_v33  ;;  %14528 = vmatpush3.bf16.msra.mxu0 %v16048_v61  ;;  %14556 = vmatpush3.bf16.msra.mxu1 %v16049_v9  ;;  %v1146_v8 = vpop.f32.mrf.mxu1  ;;  %v17245_v61 = vpack.c.bf16 %v2227_v54, %v2228_v45  ;;  %v2590_v12 = vsel %vm2586_vm5, %v2581_v43, %v2582_v19  ;;  %v16055_v45 = vld [vmem:[%s21908_s6 + $0x8] sm:$0xff]   ;;  %v1959_v33 = vsel %vm1342_vm2, %v16058_v11, 0 }
 0x14d   : > { %v1179_v18 = vadd.f32 %v17038_v56, %v1160_v40  ;;  %v1068_v58 = vmax.f32 %v903_v36, %v1053_v4  ;;  %14529 = vmatprep.subr.bf16.mxu0 %v16050_v44  ;;  %14557 = vmatprep.subr.bf16.mxu1 %v16051_v47  ;;  %v2220_v9 = vrot.slane %v17228_v49, 3  ;;  %v1238_v30 = vrot.slane %v17228_v49, 1 }
 0x14e   : > { %v1055_v2 = vpop.f32.mrf.mxu0  ;;  %14486 = vmatmul.mubr.msk.bf16.gmra.mxu0 %vm1323_vm6, %v1259_v5  ;;  %14514 = vmatmul.mubr.msk.bf16.gmra.mxu1 %vm1323_vm6, %v1259_v5  ;;  %v1148_v23 = vpop.f32.mrf.mxu1  ;;  %v17259_v34 = vpack.c.bf16 %v2590_v12, %v2591_v48  ;;  %v2583_v43 = vrot.slane %v17228_v49, 4  ;;  %v16056_v48 = vld [vmem:[%s21907_s5] sm:$0xff]  }
 0x14f   : > { %v17250_v16 = vmax.f32 %v1179_v18, 0.0  ;;  %v1161_v17 = vmax.f32 %v1068_v58, %v1146_v8  ;;  %v2226_v42 = vsel %vm2223_vm4, %v2219_v63, %v2220_v9  ;;  %v1246_v63 = vsel %vm1243_vm3, %v1237_v51, %v1238_v30  ;;  %v16057_v51 = vld [vmem:[%s21908_s6] sm:$0xff]  }
 0x150   : > { %14530 = vmatpush3.bf16.msra.mxu0 %v16050_v44  ;;  %14558 = vmatpush3.bf16.msra.mxu1 %v16051_v47  ;;  %v16059_v44 = vld [vmem:[%s21908_s6 + $0xb0] ss:$0 sps:$4 sm:$0xff]   ;;  %v2589_v47 = vsel %vm2586_vm5, %v2582_v19, %v2583_v43 }
 0x151   : > { %v1180_v36 = vadd.f32 %v17038_v56, %v1161_v17  ;;  %14531 = vmatprep.subr.bf16.mxu0 %v16052_v60  ;;  %14559 = vmatprep.subr.bf16.mxu1 %v16053_v28  ;;  %v1239_v35 = vrot.slane %v17250_v16, 1  ;;  %v2221_v37 = vrot.slane %v17250_v16, 3  ;;  %v2584_v50 = vrot.slane %v17250_v16, 4 }
 0x153   : > { %v17276_v29 = vmax.f32 %v1180_v36, 0.0  ;;  %v1245_v56 = vsel %vm1243_vm3, %v1238_v30, %v1239_v35  ;;  %v2225_v40 = vsel %vm2223_vm4, %v2220_v9, %v2221_v37  ;;  %v2588_v5 = vsel %vm2586_vm5, %v2583_v43, %v2584_v50  ;;  %v16060_v30 = vld [vmem:[%s21907_s5 + $0xa8] sm:$0xff]   ;;  %v16065_v43 = vld [vmem:[%s21908_s6 + $0x98] sm:$0xff]  }
 0x154   : > { %v1260_v41 = vpack.c.bf16 %v1245_v56, %v1246_v63  ;;  %14532 = vmatpush3.bf16.msra.mxu0 %v16052_v60  ;;  %14560 = vmatpush3.bf16.msra.mxu1 %v16053_v28  ;;  %v17287_v32 = vpack.c.bf16 %v2225_v40, %v2226_v42  ;;  %v2104_v60 = vsel %vm1342_vm2, %v16059_v44, 0  ;;  %v1193_v28 = vpack.c.bf16 %v17048_v27, %v17044_v6  ;;  %v16063_v42 = vld [vmem:[%s21908_s6 + $0xa0] sm:$0xff]  }
 0x155   : > { %14533 = vmatprep.subr.bf16.mxu0 %v16054_v31  ;;  %14561 = vmatprep.subr.bf16.mxu1 %v16055_v45  ;;  %v1240_v19 = vrot.slane %v17276_v29, 1  ;;  %v2222_v4 = vrot.slane %v17276_v29, 3  ;;  %v2585_v54 = vrot.slane %v17276_v29, 4  ;;  %v17315_v12 = vpack.c.bf16 %v2588_v5, %v2589_v47  ;;  %v16070_v40 = vld [vmem:[%s21907_s5 + $0x80] sm:$0xff]  }
 0x156   : > { %14489 = vmatprep.mubr.msk.bf16.mxu0 %vm1323_vm6, %v1260_v41  ;;  %14517 = vmatprep.mubr.msk.bf16.mxu1 %vm1323_vm6, %v1260_v41  ;;  %v1196_v36 = vpack.c.bf16 %v17179_v59, %v17157_v25  ;;  %v1848_v47 = vrot.slane %v17044_v6, 2  ;;  %v1198_v63 = vpack.c.bf16 %v17276_v29, %v17250_v16  ;;  %v16071_v41 = vld [vmem:[%s21908_s6 + $0x80] sm:$0xff]   ;;  %v1853_v5 = vrot.slane %v17143_v3, 2 }
 0x157   : > { %v1244_v18 = vsel %vm1243_vm3, %v1239_v35, %v1240_v19  ;;  %v1255_v58 = vsel %vm1243_vm3, %v1240_v19, %v1229_v57  ;;  %v2224_v2 = vsel %vm2223_vm4, %v2221_v37, %v2222_v4  ;;  %v2235_v9 = vsel %vm2223_vm4, %v2222_v4, %v2211_v39  ;;  %v16067_v37 = vld [vmem:[%s21908_s6 + $0x90] sm:$0xff]   ;;  %v16072_v19 = vld [vmem:[%s21907_s5 + $0x78] sm:$0xff]   ;;  %v16074_v4 = vld [vmem:[%s21907_s5 + $0xec] ss:$0 sps:$4 sm:$0xff]  }
 0x158   : > { %v1261_v8 = vpack.c.bf16 %v1255_v58, %v1244_v18  ;;  %14534 = vmatpush3.bf16.msra.mxu0 %v16054_v31  ;;  %14562 = vmatpush3.bf16.msra.mxu1 %v16055_v45  ;;  %v2587_v57 = vsel %vm2586_vm5, %v2584_v50, %v2585_v54  ;;  %v17321_v17 = vpack.c.bf16 %v2235_v9, %v2224_v2  ;;  %v16062_v45 = vld [vmem:[%s21907_s5 + $0xa0] sm:$0xff]   ;;  %v1849_v50 = vrot.slane %v17048_v27, 2  ;;  %v16068_v27 = vld [vmem:[%s21907_s5 + $0x88] sm:$0xff]  }
 0x159   : > { %14535 = vmatprep.subr.bf16.mxu0 %v16056_v48  ;;  %14563 = vmatprep.subr.bf16.mxu1 %v16057_v51  ;;  %v2598_v23 = vsel %vm2586_vm5, %v2585_v54, %v2574_v15  ;;  %v16061_v15 = vld [vmem:[%s21908_s6 + $0xa8] sm:$0xff]   ;;  %v1194_v31 = vpack.c.bf16 %v17076_v62, %v17060_v46  ;;  %v16064_v62 = vld [vmem:[%s21907_s5 + $0x98] sm:$0xff]   ;;  %v1197_v35 = vpack.c.bf16 %v17228_v49, %v17200_v22  ;;  %v2322_v58 = vsel %vm1342_vm2, %v16074_v4, 0 }
 0x15a   : > { %14490 = vmatmul.mubr.msk.bf16.gmra.mxu0 %vm1323_vm6, %v1261_v8  ;;  %14518 = vmatmul.mubr.msk.bf16.gmra.mxu1 %vm1323_vm6, %v1261_v8  ;;  %v17329_v39 = vpack.c.bf16 %v2598_v23, %v2587_v57  ;;  %v1870_v56 = vsel %vm1860_vm7, %v1849_v50, %v1850_v53  ;;  %v16069_v46 = vld [vmem:[%s21908_s6 + $0x88] sm:$0xff]   ;;  %v1856_v2 = vrot.slane %v17200_v22, 2  ;;  %v1857_v9 = vrot.slane %v17228_v49, 2 }
 0x15b   : > { %14537 = vmatprep.mubr.msk.bf16.mxu0 %vm1323_vm6, %v1193_v28  ;;  %14565 = vmatprep.mubr.msk.bf16.mxu1 %vm1323_vm6, %v1193_v28  ;;  %v16077_v28 = vld [vmem:[%s21908_s6 + $0xe4] sm:$0xff]  }
 0x15c   : > { %14536 = vmatpush3.bf16.msra.mxu0 %v16056_v48  ;;  %14564 = vmatpush3.bf16.msra.mxu1 %v16057_v51  ;;  %v1871_v48 = vsel %vm1860_vm7, %v1848_v47, %v1849_v50  ;;  %v16073_v51 = vld [vmem:[%s21908_s6 + $0x78] sm:$0xff]   ;;  %v1863_v23 = vsel %vm1860_vm7, %v1856_v2, %v1857_v9  ;;  %v16084_v6 = vld [vmem:[%s21907_s5 + $0xc4] sm:$0xff]  }
 0x15d   : > { %15925 = vmatprep.subr.msk.bf16.mxu0 %vm1342_vm2, %v16058_v11  ;;  %15926 = vmatprep.subr.msk.bf16.mxu1 %vm1342_vm2, %v16059_v44  ;;  %v1195_v11 = vpack.c.bf16 %v17143_v3, %v17106_v14  ;;  %v16066_v44 = vld [vmem:[%s21907_s5 + $0x90] sm:$0xff]   ;;  %v1873_v53 = vpack.c.bf16 %v1870_v56, %v1871_v48  ;;  %v16076_v3 = vld [vmem:[%s21907_s5 + $0xe4] sm:$0xff]   ;;  %v1858_v14 = vrot.slane %v17250_v16, 2  ;;  %v16079_v16 = vld [vmem:[%s21908_s6 + $0xdc] sm:$0xff]  }
 0x15e   : > { %v16090_v50 = vld [vmem:[%s21907_s5 + $0x128] ss:$0 sps:$4 sm:$0xff]   ;;  %v16092_v48 = vld [vmem:[%s21907_s5 + $0x120] sm:$0xff]  }
 0x15f   : > { %v2685_v56 = vsel %vm1342_vm2, %v16090_v50, 0 }
 0x162   : > { %14538 = vmatmul.mubr.msk.bf16.vlgmr.msra.gmra.mxu0 %vm1323_vm6, %v1194_v31  ;;  %14566 = vmatmul.mubr.msk.bf16.vlgmr.msra.gmra.mxu1 %vm1323_vm6, %v1194_v31  ;;  %v16081_v31 = vld [vmem:[%s21908_s6 + $0xd4] sm:$0xff]  }
 0x163   : > { %14578 = vmatpush3.bf16.msra.mxu0 %v1959_v33  ;;  %14606 = vmatpush3.bf16.msra.mxu1 %v2104_v60  ;;  %v1854_v33 = vrot.slane %v17157_v25, 2  ;;  %v16075_v60 = vld [vmem:[%s21908_s6 + $0xec] ss:$0 sps:$4 sm:$0xff]   ;;  %v1867_v25 = vsel %vm1860_vm7, %v1852_v55, %v1853_v5  ;;  %v1855_v55 = vrot.slane %v17179_v59, 2  ;;  %v1862_v59 = vsel %vm1860_vm7, %v1857_v9, %v1858_v14 }
 0x164   : > { %14541 = vmatprep.mubr.msk.bf16.mxu0 %vm1323_vm6, %v1195_v11  ;;  %14569 = vmatprep.mubr.msk.bf16.mxu1 %vm1323_vm6, %v1195_v11  ;;  %v2467_v8 = vsel %vm1342_vm2, %v16075_v60, 0  ;;  %v1859_v11 = vrot.slane %v17276_v29, 2 }
 0x165   : > { %14579 = vmatprep.subr.bf16.mxu0 %v16060_v30  ;;  %14607 = vmatprep.subr.bf16.mxu1 %v16061_v15  ;;  %v1866_v54 = vsel %vm1860_vm7, %v1853_v5, %v1854_v33  ;;  %v1864_v22 = vsel %vm1860_vm7, %v1855_v55, %v1856_v2  ;;  %v1865_v57 = vsel %vm1860_vm7, %v1854_v33, %v1855_v55 }
 0x166   : > { %v1875_v18 = vpack.c.bf16 %v1866_v54, %v1867_v25  ;;  %v1876_v49 = vpack.c.bf16 %v1864_v22, %v1865_v57  ;;  %v1872_v29 = vsel %vm1860_vm7, %v1859_v11, %v1848_v47  ;;  %v16091_v47 = vld [vmem:[%s21908_s6 + $0x128] ss:$0 sps:$4 sm:$0xff]  }
 0x167   : > { %14580 = vmatpush3.bf16.msra.mxu0 %v16060_v30  ;;  %14608 = vmatpush3.bf16.msra.mxu1 %v16061_v15  ;;  %v1877_v30 = vpack.c.bf16 %v1862_v59, %v1863_v23  ;;  %v16080_v15 = vld [vmem:[%s21907_s5 + $0xd4] sm:$0xff]  }
 0x168   : > { %14581 = vmatprep.subr.bf16.mxu0 %v16062_v45  ;;  %14609 = vmatprep.subr.bf16.mxu1 %v16063_v42 }
 0x16a   : > { %14542 = vmatmul.mubr.msk.bf16.gmra.mxu0 %vm1323_vm6, %v1196_v36  ;;  %14570 = vmatmul.mubr.msk.bf16.gmra.mxu1 %vm1323_vm6, %v1196_v36  ;;  %v16085_v36 = vld [vmem:[%s21908_s6 + $0xc4] sm:$0xff]  }
 0x16b   : > { %14582 = vmatpush3.bf16.msra.mxu0 %v16062_v45  ;;  %14610 = vmatpush3.bf16.msra.mxu1 %v16063_v42  ;;  %v1861_v45 = vsel %vm1860_vm7, %v1858_v14, %v1859_v11  ;;  %v16082_v42 = vld [vmem:[%s21907_s5 + $0xcc] sm:$0xff]  }
 0x16c   : > { %14545 = vmatprep.mubr.msk.bf16.mxu0 %vm1323_vm6, %v1197_v35  ;;  %14573 = vmatprep.mubr.msk.bf16.mxu1 %vm1323_vm6, %v1197_v35  ;;  %v16086_v35 = vld [vmem:[%s21907_s5 + $0xbc] sm:$0xff]  }
 0x16d   : > { %14583 = vmatprep.subr.bf16.mxu0 %v16064_v62  ;;  %14611 = vmatprep.subr.bf16.mxu1 %v16065_v43 }
 0x16f   : > { %14584 = vmatpush3.bf16.msra.mxu0 %v16064_v62  ;;  %14612 = vmatpush3.bf16.msra.mxu1 %v16065_v43  ;;  %v16083_v62 = vld [vmem:[%s21908_s6 + $0xcc] sm:$0xff]   ;;  %v1878_v43 = vpack.c.bf16 %v1872_v29, %v1861_v45 }
 0x170   : > { %14585 = vmatprep.subr.bf16.mxu0 %v16066_v44  ;;  %14613 = vmatprep.subr.bf16.mxu1 %v16067_v37 }
 0x172   : > { %14546 = vmatmul.mubr.msk.bf16.gmra.mxu0 %vm1323_vm6, %v1198_v63  ;;  %14574 = vmatmul.mubr.msk.bf16.gmra.mxu1 %vm1323_vm6, %v1198_v63  ;;  %v2830_v63 = vsel %vm1342_vm2, %v16091_v47, 0 }
 0x173   : > { %14586 = vmatpush3.bf16.msra.mxu0 %v16066_v44  ;;  %14614 = vmatpush3.bf16.msra.mxu1 %v16067_v37  ;;  %v16087_v44 = vld [vmem:[%s21908_s6 + $0xbc] sm:$0xff]   ;;  %v16089_v37 = vld [vmem:[%s21908_s6 + $0xb4] sm:$0xff]  }
 0x174   : > { %14593 = vmatprep.mubr.msk.bf16.mxu0 %vm1323_vm6, %v1873_v53  ;;  %14621 = vmatprep.mubr.msk.bf16.mxu1 %vm1323_vm6, %v1873_v53  ;;  %v16095_v53 = vld [vmem:[%s21908_s6 + $0x118] sm:$0xff]  }
 0x175   : > { %14587 = vmatprep.subr.bf16.mxu0 %v16068_v27  ;;  %14615 = vmatprep.subr.bf16.mxu1 %v16069_v46 }
 0x177   : > { %14588 = vmatpush3.bf16.msra.mxu0 %v16068_v27  ;;  %14616 = vmatpush3.bf16.msra.mxu1 %v16069_v46  ;;  %v16093_v27 = vld [vmem:[%s21908_s6 + $0x120] sm:$0xff]   ;;  %v16094_v46 = vld [vmem:[%s21907_s5 + $0x118] sm:$0xff]  }
 0x178   : > { %14589 = vmatprep.subr.bf16.mxu0 %v16070_v40  ;;  %14617 = vmatprep.subr.bf16.mxu1 %v16071_v41 }
 0x17b   : > { %14590 = vmatpush3.bf16.msra.mxu0 %v16070_v40  ;;  %14618 = vmatpush3.bf16.msra.mxu1 %v16071_v41  ;;  %v16098_v40 = vld [vmem:[%s21907_s5 + $0x108] sm:$0xff]  }
 0x17c   : > { %14591 = vmatprep.subr.bf16.mxu0 %v16072_v19  ;;  %14619 = vmatprep.subr.bf16.mxu1 %v16073_v51  ;;  %v16099_v41 = vld [vmem:[%s21908_s6 + $0x108] sm:$0xff]  }
 0x17f   : > { %14592 = vmatpush3.bf16.msra.mxu0 %v16072_v19  ;;  %14620 = vmatpush3.bf16.msra.mxu1 %v16073_v51  ;;  %v16102_v19 = vld [vmem:[%s21907_s5 + $0xf8] sm:$0xff]  }
 0x180   : > { %15927 = vmatprep.subr.msk.bf16.mxu0 %vm1342_vm2, %v16074_v4  ;;  %15928 = vmatprep.subr.msk.bf16.mxu1 %vm1342_vm2, %v16075_v60  ;;  %v16103_v51 = vld [vmem:[%s21908_s6 + $0xf8] sm:$0xff]  }
 0x182   : > { %14594 = vmatmul.mubr.msk.bf16.vlgmr.msra.gmra.mxu0 %vm1323_vm6, %v17149_v26  ;;  %14622 = vmatmul.mubr.msk.bf16.vlgmr.msra.gmra.mxu1 %vm1323_vm6, %v17149_v26  ;;  %v16078_v26 = vld [vmem:[%s21907_s5 + $0xdc] sm:$0xff]  }
 0x183   : > { %14597 = vmatprep.mubr.msk.bf16.mxu0 %vm1323_vm6, %v1875_v18  ;;  %14625 = vmatprep.mubr.msk.bf16.mxu1 %vm1323_vm6, %v1875_v18 }
 0x184   : > { %14634 = vmatpush3.bf16.msra.mxu0 %v2322_v58  ;;  %14662 = vmatpush3.bf16.msra.mxu1 %v2467_v8 }
 0x185   : > { %14635 = vmatprep.subr.bf16.mxu0 %v16076_v3  ;;  %14663 = vmatprep.subr.bf16.mxu1 %v16077_v28 }
 0x188   : > { %14636 = vmatpush3.bf16.msra.mxu0 %v16076_v3  ;;  %14664 = vmatpush3.bf16.msra.mxu1 %v16077_v28 }
 0x189   : > { %14637 = vmatprep.subr.bf16.mxu0 %v16078_v26  ;;  %14665 = vmatprep.subr.bf16.mxu1 %v16079_v16 }
 0x18a   : > { %14598 = vmatmul.mubr.msk.bf16.gmra.mxu0 %vm1323_vm6, %v1876_v49  ;;  %14626 = vmatmul.mubr.msk.bf16.gmra.mxu1 %vm1323_vm6, %v1876_v49 }
 0x18b   : > { %14601 = vmatprep.mubr.msk.bf16.mxu0 %vm1323_vm6, %v1877_v30  ;;  %14629 = vmatprep.mubr.msk.bf16.mxu1 %vm1323_vm6, %v1877_v30 }
 0x18c   : > { %14638 = vmatpush3.bf16.msra.mxu0 %v16078_v26  ;;  %14666 = vmatpush3.bf16.msra.mxu1 %v16079_v16 }
 0x18d   : > { %14639 = vmatprep.subr.bf16.mxu0 %v16080_v15  ;;  %14667 = vmatprep.subr.bf16.mxu1 %v16081_v31 }
 0x190   : > { %14640 = vmatpush3.bf16.msra.mxu0 %v16080_v15  ;;  %14668 = vmatpush3.bf16.msra.mxu1 %v16081_v31 }
 0x191   : > { %14641 = vmatprep.subr.bf16.mxu0 %v16082_v42  ;;  %14669 = vmatprep.subr.bf16.mxu1 %v16083_v62 }
 0x192   : > { %14602 = vmatmul.mubr.msk.bf16.gmra.mxu0 %vm1323_vm6, %v1878_v43  ;;  %14630 = vmatmul.mubr.msk.bf16.gmra.mxu1 %vm1323_vm6, %v1878_v43 }
 0x193   : > { %14649 = vmatprep.mubr.msk.bf16.mxu0 %vm1323_vm6, %v17098_v10  ;;  %14677 = vmatprep.mubr.msk.bf16.mxu1 %vm1323_vm6, %v17098_v10  ;;  %v16088_v10 = vld [vmem:[%s21907_s5 + $0xb4] sm:$0xff]  }
 0x194   : > { %14642 = vmatpush3.bf16.msra.mxu0 %v16082_v42  ;;  %14670 = vmatpush3.bf16.msra.mxu1 %v16083_v62 }
 0x195   : > { %14643 = vmatprep.subr.bf16.mxu0 %v16084_v6  ;;  %14671 = vmatprep.subr.bf16.mxu1 %v16085_v36 }
 0x198   : > { %14644 = vmatpush3.bf16.msra.mxu0 %v16084_v6  ;;  %14672 = vmatpush3.bf16.msra.mxu1 %v16085_v36 }
 0x199   : > { %14645 = vmatprep.subr.bf16.mxu0 %v16086_v35  ;;  %14673 = vmatprep.subr.bf16.mxu1 %v16087_v44 }
 0x19c   : > { %14646 = vmatpush3.bf16.msra.mxu0 %v16086_v35  ;;  %14674 = vmatpush3.bf16.msra.mxu1 %v16087_v44 }
 0x19d   : > { %14647 = vmatprep.subr.bf16.mxu0 %v16088_v10  ;;  %14675 = vmatprep.subr.bf16.mxu1 %v16089_v37 }
 0x1a0   : > { %14648 = vmatpush3.bf16.msra.mxu0 %v16088_v10  ;;  %14676 = vmatpush3.bf16.msra.mxu1 %v16089_v37 }
 0x1a1   : > { %15929 = vmatprep.subr.msk.bf16.mxu0 %vm1342_vm2, %v16090_v50  ;;  %15930 = vmatprep.subr.msk.bf16.mxu1 %vm1342_vm2, %v16091_v47 }
 0x1a3   : > { %14650 = vmatmul.mubr.msk.bf16.vlgmr.msra.gmra.mxu0 %vm1323_vm6, %v17151_v7  ;;  %14678 = vmatmul.mubr.msk.bf16.vlgmr.msra.gmra.mxu1 %vm1323_vm6, %v17151_v7  ;;  %v16096_v7 = vld [vmem:[%s21907_s5 + $0x110] sm:$0xff]  }
 0x1a4   : > { %14653 = vmatprep.mubr.msk.bf16.mxu0 %vm1323_vm6, %v17197_v0  ;;  %14681 = vmatprep.mubr.msk.bf16.mxu1 %vm1323_vm6, %v17197_v0  ;;  %v16097_v0 = vld [vmem:[%s21908_s6 + $0x110] sm:$0xff]  }
 0x1a5   : > { %14690 = vmatpush3.bf16.msra.mxu0 %v2685_v56  ;;  %14718 = vmatpush3.bf16.msra.mxu1 %v2830_v63 }
 0x1a6   : > { %14691 = vmatprep.subr.bf16.mxu0 %v16092_v48  ;;  %14719 = vmatprep.subr.bf16.mxu1 %v16093_v27 }
 0x1a9   : > { %14692 = vmatpush3.bf16.msra.mxu0 %v16092_v48  ;;  %14720 = vmatpush3.bf16.msra.mxu1 %v16093_v27 }
 0x1aa   : > { %14693 = vmatprep.subr.bf16.mxu0 %v16094_v46  ;;  %14721 = vmatprep.subr.bf16.mxu1 %v16095_v53 }
 0x1ab   : > { %14654 = vmatmul.mubr.msk.bf16.gmra.mxu0 %vm1323_vm6, %v17245_v61  ;;  %14682 = vmatmul.mubr.msk.bf16.gmra.mxu1 %vm1323_vm6, %v17245_v61  ;;  %v16100_v61 = vld [vmem:[%s21907_s5 + $0x100] sm:$0xff]  }
 0x1ac   : > { %14657 = vmatprep.mubr.msk.bf16.mxu0 %vm1323_vm6, %v17287_v32  ;;  %14685 = vmatprep.mubr.msk.bf16.mxu1 %vm1323_vm6, %v17287_v32  ;;  %v16101_v32 = vld [vmem:[%s21908_s6 + $0x100] sm:$0xff]  }
 0x1ad   : > { %14694 = vmatpush3.bf16.msra.mxu0 %v16094_v46  ;;  %14722 = vmatpush3.bf16.msra.mxu1 %v16095_v53 }
 0x1ae   : > { %14695 = vmatprep.subr.bf16.mxu0 %v16096_v7  ;;  %14723 = vmatprep.subr.bf16.mxu1 %v16097_v0 }
 0x1b1   : > { %14696 = vmatpush3.bf16.msra.mxu0 %v16096_v7  ;;  %14724 = vmatpush3.bf16.msra.mxu1 %v16097_v0 }
 0x1b2   : > { %14697 = vmatprep.subr.bf16.mxu0 %v16098_v40  ;;  %14725 = vmatprep.subr.bf16.mxu1 %v16099_v41 }
 0x1b3   : > { %14658 = vmatmul.mubr.msk.bf16.gmra.mxu0 %vm1323_vm6, %v17321_v17  ;;  %14686 = vmatmul.mubr.msk.bf16.gmra.mxu1 %vm1323_vm6, %v17321_v17  ;;  %v16105_v17 = vld [vmem:[%s21908_s6 + $0xf0] sm:$0xff]  }
 0x1b4   : > { %14705 = vmatprep.mubr.msk.bf16.mxu0 %vm1323_vm6, %v17104_v38  ;;  %14733 = vmatprep.mubr.msk.bf16.mxu1 %vm1323_vm6, %v17104_v38  ;;  %v16104_v38 = vld [vmem:[%s21907_s5 + $0xf0] sm:$0xff]  }
 0x1b5   : > { %14698 = vmatpush3.bf16.msra.mxu0 %v16098_v40  ;;  %14726 = vmatpush3.bf16.msra.mxu1 %v16099_v41 }
 0x1b6   : > { %14699 = vmatprep.subr.bf16.mxu0 %v16100_v61  ;;  %14727 = vmatprep.subr.bf16.mxu1 %v16101_v32 }
 0x1b9   : > { %14700 = vmatpush3.bf16.msra.mxu0 %v16100_v61  ;;  %14728 = vmatpush3.bf16.msra.mxu1 %v16101_v32 }
 0x1ba   : > { %14701 = vmatprep.subr.bf16.mxu0 %v16102_v19  ;;  %14729 = vmatprep.subr.bf16.mxu1 %v16103_v51 }
 0x1bd   : > { %14702 = vmatpush3.bf16.msra.mxu0 %v16102_v19  ;;  %14730 = vmatpush3.bf16.msra.mxu1 %v16103_v51 }
 0x1be   : > { %14703 = vmatprep.subr.bf16.mxu0 %v16104_v38  ;;  %14731 = vmatprep.subr.bf16.mxu1 %v16105_v17 }
 0x1c1   : > { %14704 = vmatpush3.bf16.msra.mxu0 %v16104_v38  ;;  %14732 = vmatpush3.bf16.msra.mxu1 %v16105_v17 }
 0x1c4   : > { %14706 = vmatmul.mubr.msk.bf16.vlgmr.msra.gmra.mxu0 %vm1323_vm6, %v17153_v24  ;;  %14734 = vmatmul.mubr.msk.bf16.vlgmr.msra.gmra.mxu1 %vm1323_vm6, %v17153_v24 }
 0x1c5   : > { %14709 = vmatprep.mubr.msk.bf16.mxu0 %vm1323_vm6, %v17223_v52  ;;  %14737 = vmatprep.mubr.msk.bf16.mxu1 %vm1323_vm6, %v17223_v52 }
 0x1cc   : > { %14710 = vmatmul.mubr.msk.bf16.gmra.mxu0 %vm1323_vm6, %v17259_v34  ;;  %14738 = vmatmul.mubr.msk.bf16.gmra.mxu1 %vm1323_vm6, %v17259_v34 }
 0x1cd   : > { %14713 = vmatprep.mubr.msk.bf16.mxu0 %vm1323_vm6, %v17315_v12  ;;  %14741 = vmatprep.mubr.msk.bf16.mxu1 %vm1323_vm6, %v17315_v12 }
 0x1d4   : > { %14714 = vmatmul.mubr.msk.bf16.gmra.mxu0 %vm1323_vm6, %v17329_v39  ;;  %14742 = vmatmul.mubr.msk.bf16.gmra.mxu1 %vm1323_vm6, %v17329_v39 }
 0x1ff   : > { %v14483_v24 = vpop.f32.mrf.mxu0  ;;  %v14511_v52 = vpop.f32.mrf.mxu1 }
 0x201   : > { %v1380_v33 = vpop.f32.mrf.mxu0  ;;  %v1525_v4 = vpop.f32.mrf.mxu1 }
 0x203   : > { %v14484_v60 = vpop.f32.mrf.mxu0  ;;  %v14512_v5 = vpop.f32.mrf.mxu1 }
 0x205   : > { %v17598_v54 = vpop.f32.mrf.mxu0  ;;  %v17600_v34 = vpop.f32.mrf.mxu1 }
 0x20e   : > { %v14487_v25 = vpop.f32.mrf.mxu0  ;;  %v14515_v18 = vpop.f32.mrf.mxu1 }
 0x210   : > { %v1396_v58 = vpop.f32.mrf.mxu0  ;;  %v1541_v12 = vpop.f32.mrf.mxu1 }
 0x212   : > { %v14488_v8 = vpop.f32.mrf.mxu0  ;;  %v14516_v3 = vpop.f32.mrf.mxu1 }
 0x214   : > { %v17602_v28 = vpop.f32.mrf.mxu0  ;;  %v17604_v2 = vpop.f32.mrf.mxu1 }
 0x21a   : > { %v14491_v39 = vpop.f32.mrf.mxu0  ;;  %v14519_v14 = vpop.f32.mrf.mxu1 }
 0x21c   : > { %v1412_v55 = vpop.f32.mrf.mxu0  ;;  %v1557_v9 = vpop.f32.mrf.mxu1 }
 0x21e   : > { %v14492_v22 = vpop.f32.mrf.mxu0  ;;  %v14520_v26 = vpop.f32.mrf.mxu1 }
 0x220   : > { %v17606_v16 = vpop.f32.mrf.mxu0  ;;  %v17608_v59 = vpop.f32.mrf.mxu1 }
 0x222   : > { %v14539_v57 = vpop.f32.mrf.mxu0  ;;  %v14567_v49 = vpop.f32.mrf.mxu1 }
 0x223   : > { %v1681_v23 = vadd.f32 %v14539_v57, %v14483_v24  ;;  %v1810_v30 = vadd.f32 %v14567_v49, %v14511_v52 }
 0x224   : > { %v1672_v15 = vpop.f32.mrf.mxu0  ;;  %v1801_v31 = vpop.f32.mrf.mxu1 }
 0x225   : > { %v17610_v11 = vadd.f32 %v1672_v15, %v1380_v33  ;;  %v17612_v45 = vadd.f32 %v1801_v31, %v1525_v4  ;;  %v16111_v15 = vld [vmem:[%s21911_s9 + $0x10] sm:$0xff]  }
 0x226   : > { %v14540_v29 = vpop.f32.mrf.mxu0  ;;  %v14568_v42 = vpop.f32.mrf.mxu1 }
 0x227   : > { %v1684_v62 = vadd.f32 %v14540_v29, %v14484_v60  ;;  %v1813_v43 = vadd.f32 %v14568_v42, %v14512_v5 }
 0x228   : > { %v17614_v6 = vpop.f32.mrf.mxu0  ;;  %v17616_v36 = vpop.f32.mrf.mxu1 }
 0x22a   : > { %v14543_v35 = vpop.f32.mrf.mxu0  ;;  %v14571_v44 = vpop.f32.mrf.mxu1 }
 0x22b   : > { %v17618_v10 = vadd.f32 %v14543_v35, %v14487_v25  ;;  %v17620_v37 = vadd.f32 %v14571_v44, %v14515_v18  ;;  %v16106_v25 = vld [vmem:[%s21910_s8] sm:$0xff]  }
 0x22c   : > { %v1688_v50 = vpop.f32.mrf.mxu0  ;;  %v1817_v47 = vpop.f32.mrf.mxu1  ;;  %14757 = vmatprep.mubr.msk.bf16.mxu0 %vm3068_vm8, %v16106_v25 }
 0x22d   : > { %v1689_v56 = vadd.f32 %v1688_v50, %v1396_v58  ;;  %v1818_v63 = vadd.f32 %v1817_v47, %v1541_v12 }
 0x22e   : > { %v14544_v48 = vpop.f32.mrf.mxu0  ;;  %v14572_v27 = vpop.f32.mrf.mxu1 }
 0x22f   : > { %v17622_v46 = vadd.f32 %v14544_v48, %v14488_v8  ;;  %v17624_v53 = vadd.f32 %v14572_v27, %v14516_v3  ;;  %v16108_v3 = vld [vmem:[%s21911_s9 + $0x20] sm:$0xff]  }
 0x230   : > { %v17626_v7 = vpop.f32.mrf.mxu0  ;;  %v17628_v0 = vpop.f32.mrf.mxu1 }
 0x232   : > { %v14547_v40 = vpop.f32.mrf.mxu0  ;;  %v14575_v41 = vpop.f32.mrf.mxu1 }
 0x233   : > { %v17630_v61 = vadd.f32 %v14547_v40, %v14491_v39  ;;  %v17632_v32 = vadd.f32 %v14575_v41, %v14519_v14 }
 0x234   : > { %v1704_v19 = vpop.f32.mrf.mxu0  ;;  %v1833_v51 = vpop.f32.mrf.mxu1 }
 0x235   : > { %21946 = vst [vmem:[#allocation5_spill] sm:$0xff] %v17630_v61  ;;  %21947 = vst [vmem:[#allocation6_spill] sm:$0xff] %v17632_v32  ;;  %v17634_v38 = vadd.f32 %v1704_v19, %v1412_v55  ;;  %v17636_v17 = vadd.f32 %v1833_v51, %v1557_v9  ;;  %v21918_v55 = vmov 0.0   ;;  %v16109_v9 = vld [vmem:[%s21911_s9 + $0x18] sm:$0xff]  }
 0x236   : > { %v14548_v24 = vpop.f32.mrf.mxu0  ;;  %v14576_v52 = vpop.f32.mrf.mxu1  ;;  %14761 = vmatprep.subr.bf16.mxu1 %v21918_v55 }
 0x237   : > { %21948 = vst [vmem:[#allocation7_spill] sm:$0xff] %v17634_v38  ;;  %21949 = vst [vmem:[#allocation8_spill] sm:$0xff] %v17636_v17  ;;  %v17638_v33 = vadd.f32 %v14548_v24, %v14492_v22  ;;  %v17640_v4 = vadd.f32 %v14576_v52, %v14520_v26  ;;  %14762 = vmatpush3.bf16.msra.mxu1 %v16108_v3 }
 0x238   : > { %v17642_v60 = vpop.f32.mrf.mxu0  ;;  %v17644_v5 = vpop.f32.mrf.mxu1  ;;  %14763 = vmatprep.subr.bf16.mxu1 %v21918_v55 }
 0x239   : > { %21950 = vst [vmem:[#allocation9_spill] sm:$0xff] %v17638_v33  ;;  %21951 = vst [vmem:[#allocation10_spill] sm:$0xff] %v17640_v4  ;;  %v1692_v4 = vadd.f32 %v17626_v7, %v17602_v28  ;;  %v1821_v33 = vadd.f32 %v17628_v0, %v17604_v2  ;;  %v1708_v17 = vadd.f32 %v17642_v60, %v17606_v16 }
 0x23a   : > { %v1837_v38 = vadd.f32 %v17644_v5, %v17608_v59 }
 0x23b   : > { %14764 = vmatpush3.bf16.msra.mxu1 %v16109_v9 }
 0x23c   : > { %14765 = vmatprep.subr.bf16.mxu1 %v21918_v55  ;;  %v21958_v60 = vld [vmem:[#allocation5_spill] sm:$0xff] }
 0x23f   : > { %14766 = vmatpush3.bf16.msra.mxu1 %v16111_v15 }
 0x240   : > { %14767 = vmatprep.subr.bf16.mxu1 %v21918_v55 }
 0x242   : > { %v14595_v18 = vpop.f32.mrf.mxu0  ;;  %v14623_v58 = vpop.f32.mrf.mxu1 }
 0x243   : > { %v17650_v12 = vadd.f32 %v14595_v18, %v1681_v23  ;;  %v17652_v8 = vadd.f32 %v14623_v58, %v1810_v30 }
 0x244   : > { %v17657_v39 = vpop.f32.mrf.mxu0  ;;  %v17659_v14 = vpop.f32.mrf.mxu1 }
 0x245   : > { %21952 = vst [vmem:[#allocation11_spill] sm:$0xff] %v17650_v12  ;;  %21953 = vst [vmem:[#allocation12_spill] sm:$0xff] %v17652_v8  ;;  %v1676_v8 = vadd.f32 %v17614_v6, %v17598_v54  ;;  %v1805_v12 = vadd.f32 %v17616_v36, %v17600_v34  ;;  %v2187_v54 = vadd.f32 %v17657_v39, %v17610_v11  ;;  %v21959_v11 = vld [vmem:[#allocation6_spill] sm:$0xff] }
 0x246   : > { %v14596_v22 = vpop.f32.mrf.mxu0  ;;  %v14624_v26 = vpop.f32.mrf.mxu1  ;;  %v2199_v34 = vadd.f32 %v17659_v14, %v17612_v45  ;;  %v21960_v14 = vld [vmem:[#allocation7_spill] sm:$0xff] }
 0x247   : > { %v17666_v57 = vadd.f32 %v14596_v22, %v1684_v62  ;;  %v17668_v49 = vadd.f32 %v14624_v26, %v1813_v43  ;;  %v16113_v62 = vld [vmem:[%s21911_s9 + $0x8] sm:$0xff]  }
 0x248   : > { %v1998_v23 = vpop.f32.mrf.mxu0  ;;  %v2143_v30 = vpop.f32.mrf.mxu1  ;;  %14768 = vmatpush3.bf16.msra.mxu1 %v16113_v62 }
 0x249   : > { %21954 = vst [vmem:[#allocation13_spill] sm:$0xff] %v17666_v57  ;;  %21955 = vst [vmem:[#allocation14_spill] sm:$0xff] %v17668_v49  ;;  %14769 = vmatprep.subr.bf16.mxu1 %v21918_v55  ;;  %v2188_v6 = vadd.f32 %v1998_v23, %v1676_v8  ;;  %v2200_v36 = vadd.f32 %v2143_v30, %v1805_v12  ;;  %v21961_v8 = vld [vmem:[#allocation8_spill] sm:$0xff]  ;;  %v21962_v12 = vld [vmem:[#allocation9_spill] sm:$0xff] }
 0x24a   : > { %v14599_v31 = vpop.f32.mrf.mxu0  ;;  %v14627_v29 = vpop.f32.mrf.mxu1 }
 0x24b   : > { %v2193_v28 = vadd.f32 %v14599_v31, %v17618_v10  ;;  %v2205_v2 = vadd.f32 %v14627_v29, %v17620_v37  ;;  %v21963_v10 = vld [vmem:[#allocation10_spill] sm:$0xff] }
 0x24c   : > { %v2011_v42 = vpop.f32.mrf.mxu0  ;;  %v2156_v35 = vpop.f32.mrf.mxu1 }
 0x24d   : > { %v17674_v44 = vadd.f32 %v2011_v42, %v1689_v56  ;;  %v17676_v50 = vadd.f32 %v2156_v35, %v1818_v63 }
 0x24e   : > { %v14600_v43 = vpop.f32.mrf.mxu0  ;;  %v14628_v47 = vpop.f32.mrf.mxu1 }
 0x24f   : > { %21956 = vst [vmem:[#allocation15_spill] sm:$0xff] %v17674_v44  ;;  %21957 = vst [vmem:[#allocation16_spill] sm:$0xff] %v17676_v50  ;;  %v2194_v7 = vadd.f32 %v14600_v43, %v17622_v46  ;;  %v2206_v16 = vadd.f32 %v14628_v47, %v17624_v53  ;;  %v21964_v47 = vld [vmem:[#allocation11_spill] sm:$0xff] }
 0x250   : > { %v2014_v48 = vpop.f32.mrf.mxu0  ;;  %v2159_v27 = vpop.f32.mrf.mxu1 }
 0x251   : > { %v2192_v0 = vadd.f32 %v2014_v48, %v1692_v4  ;;  %v2204_v59 = vadd.f32 %v2159_v27, %v1821_v33  ;;  %v21965_v4 = vld [vmem:[#allocation12_spill] sm:$0xff] }
 0x252   : > { %v14603_v40 = vpop.f32.mrf.mxu0  ;;  %v14631_v41 = vpop.f32.mrf.mxu1 }
 0x253   : > { %v2197_v5 = vadd.f32 %v14603_v40, %v21958_v60  ;;  %v2209_v39 = vadd.f32 %v14631_v41, %v21959_v11  ;;  %v21966_v40 = vld [vmem:[#allocation13_spill] sm:$0xff]  ;;  %v21967_v60 = vld [vmem:[#allocation14_spill] sm:$0xff] }
 0x254   : > { %v2027_v56 = vpop.f32.mrf.mxu0  ;;  %v2172_v19 = vpop.f32.mrf.mxu1 }
 0x255   : > { %v2195_v45 = vadd.f32 %v2027_v56, %v21960_v14  ;;  %v2207_v23 = vadd.f32 %v2172_v19, %v21961_v8 }
 0x256   : > { %v14604_v63 = vpop.f32.mrf.mxu0  ;;  %v14632_v51 = vpop.f32.mrf.mxu1 }
 0x257   : > { %v2198_v30 = vadd.f32 %v14604_v63, %v21962_v12  ;;  %v2210_v31 = vadd.f32 %v14632_v51, %v21963_v10  ;;  %v21968_v12 = vld [vmem:[#allocation15_spill] sm:$0xff] }
 0x258   : > { %v2030_v24 = vpop.f32.mrf.mxu0  ;;  %v2175_v52 = vpop.f32.mrf.mxu1 }
 0x259   : > { %v2196_v43 = vadd.f32 %v2030_v24, %v1708_v17  ;;  %v2208_v46 = vadd.f32 %v2175_v52, %v1837_v38  ;;  %v21969_v17 = vld [vmem:[#allocation16_spill] sm:$0xff] }
 0x263   : > { %v14651_v25 = vpop.f32.mrf.mxu0  ;;  %v14679_v18 = vpop.f32.mrf.mxu1 }
 0x264   : > { %v2552_v53 = vadd.f32 %v14651_v25, %v21964_v47  ;;  %v2564_v33 = vadd.f32 %v14679_v18, %v21965_v4 }
 0x265   : > { %v2358_v58 = vpop.f32.mrf.mxu0  ;;  %v2503_v3 = vpop.f32.mrf.mxu1 }
 0x266   : > { %v2550_v48 = vadd.f32 %v2358_v58, %v2187_v54  ;;  %v2562_v27 = vadd.f32 %v2503_v3, %v2199_v34 }
 0x267   : > { %v14652_v9 = vpop.f32.mrf.mxu0  ;;  %v14680_v22 = vpop.f32.mrf.mxu1 }
 0x268   : > { %v2553_v41 = vadd.f32 %v14652_v9, %v21966_v40  ;;  %v2565_v56 = vadd.f32 %v14680_v22, %v21967_v60 }
 0x269   : > { %v2361_v26 = vpop.f32.mrf.mxu0  ;;  %v2506_v15 = vpop.f32.mrf.mxu1 }
 0x26a   : > { %v2551_v14 = vadd.f32 %v2361_v26, %v2188_v6  ;;  %v2563_v63 = vadd.f32 %v2506_v15, %v2200_v36 }
 0x26b   : > { %v14655_v42 = vpop.f32.mrf.mxu0  ;;  %v14683_v35 = vpop.f32.mrf.mxu1 }
 0x26c   : > { %v2556_v8 = vadd.f32 %v14655_v42, %v2193_v28  ;;  %v2568_v51 = vadd.f32 %v14683_v35, %v2205_v2 }
 0x26d   : > { %v2374_v62 = vpop.f32.mrf.mxu0  ;;  %v2519_v1 = vpop.f32.mrf.mxu1 }
 0x26e   : > { %v2554_v10 = vadd.f32 %v2374_v62, %v21968_v12  ;;  %v2566_v38 = vadd.f32 %v2519_v1, %v21969_v17 }
 0x26f   : > { %v14656_v55 = vpop.f32.mrf.mxu0  ;;  %v14684_v20 = vpop.f32.mrf.mxu1 }
 0x270   : > { %v2557_v58 = vadd.f32 %v14656_v55, %v2194_v7  ;;  %v2569_v3 = vadd.f32 %v14684_v20, %v2206_v16 }
 0x271   : > { %v2377_v21 = vpop.f32.mrf.mxu0  ;;  %v2522_v13 = vpop.f32.mrf.mxu1 }
 0x272   : > { %v2555_v9 = vadd.f32 %v2377_v21, %v2192_v0  ;;  %v2567_v22 = vadd.f32 %v2522_v13, %v2204_v59 }
 0x273   : > { %v14659_v50 = vpop.f32.mrf.mxu0  ;;  %v14687_v44 = vpop.f32.mrf.mxu1 }
 0x274   : > { %v17719_v54 = vadd.f32 %v14659_v50, %v2197_v5  ;;  %v17721_v26 = vadd.f32 %v14687_v44, %v2209_v39 }
 0x275   : > { %v2390_v49 = vpop.f32.mrf.mxu0  ;;  %v2535_v57 = vpop.f32.mrf.mxu1 }
 0x276   : > { %v17727_v62 = vadd.f32 %v2390_v49, %v2195_v45  ;;  %v17729_v34 = vadd.f32 %v2535_v57, %v2207_v23 }
 0x277   : > { %v14660_v32 = vpop.f32.mrf.mxu0  ;;  %v14688_v61 = vpop.f32.mrf.mxu1 }
 0x278   : > { %v17735_v20 = vadd.f32 %v14660_v32, %v2198_v30  ;;  %v17737_v21 = vadd.f32 %v14688_v61, %v2210_v31 }
 0x279   : > { %v2393_v29 = vpop.f32.mrf.mxu0  ;;  %v2538_v37 = vpop.f32.mrf.mxu1 }
 0x27a   : > { %v17743_v7 = vadd.f32 %v2393_v29, %v2196_v43  ;;  %v17745_v16 = vadd.f32 %v2538_v37, %v2208_v46 }
 0x284   : > { %v14707_v11 = vpop.f32.mrf.mxu0  ;;  %v14735_v19 = vpop.f32.mrf.mxu1 }
 0x285   : > { %v17715_v24 = vadd.f32 %v14707_v11, %v2552_v53  ;;  %v17717_v52 = vadd.f32 %v14735_v19, %v2564_v33 }
 0x286   : > { %v2721_v25 = vpop.f32.mrf.mxu0  ;;  %v2866_v18 = vpop.f32.mrf.mxu1 }
 0x287   : > { %v17723_v15 = vadd.f32 %v2721_v25, %v2550_v48  ;;  %v17725_v42 = vadd.f32 %v2866_v18, %v2562_v27  ;;  %v2939_v13 = vrot.slane %v17715_v24, 1  ;;  %v2975_v44 = vrot.slane %v17717_v52, 1 }
 0x288   : > { %v14708_v35 = vpop.f32.mrf.mxu0  ;;  %v14736_v1 = vpop.f32.mrf.mxu1 }
 0x289   : > { %v17731_v6 = vadd.f32 %v14708_v35, %v2553_v41  ;;  %v17733_v55 = vadd.f32 %v14736_v1, %v2565_v56  ;;  %v2937_v32 = vrot.slane %v17723_v15, 1  ;;  %v2973_v61 = vrot.slane %v17725_v42, 1 }
 0x28a   : > { %v2724_v50 = vpop.f32.mrf.mxu0  ;;  %v2869_v36 = vpop.f32.mrf.mxu1 }
 0x28b   : > { %v2940_v28 = vrot.slane %v17731_v6, 1  ;;  %v2976_v49 = vrot.slane %v17733_v55, 1  ;;  %v2914_v57 = vadd.f32 %v2724_v50, %v2551_v14  ;;  %v2926_v2 = vadd.f32 %v2869_v36, %v2563_v63 }
 0x28c   : > { %v14711_v0 = vpop.f32.mrf.mxu0  ;;  %v14739_v59 = vpop.f32.mrf.mxu1 }
 0x28d   : > { %v2957_v39 = vsel %vm1243_vm3, %v2939_v13, %v2940_v28  ;;  %v2993_v45 = vsel %vm1243_vm3, %v2975_v44, %v2976_v49  ;;  %v2938_v23 = vrot.slane %v2914_v57, 1  ;;  %v2974_v30 = vrot.slane %v2926_v2, 1 }
 0x28e   : > { %v2963_v31 = vmax.f32 %v17715_v24, %v2957_v39  ;;  %v2999_v29 = vmax.f32 %v17717_v52, %v2993_v45  ;;  %v17755_v37 = vadd.f32 %v14711_v0, %v2556_v8  ;;  %v17757_v43 = vadd.f32 %v14739_v59, %v2568_v51  ;;  %v2737_v46 = vpop.f32.mrf.mxu0  ;;  %v2882_v47 = vpop.f32.mrf.mxu1  ;;  %v17778_v51 = vld [vmem:[%s21909_s7] ss:$0 sm:$0xff] }
 0x28f   : > { %v2958_v53 = vsel %vm1243_vm3, %v2938_v23, %v2939_v13  ;;  %v2959_v4 = vsel %vm1243_vm3, %v2937_v32, %v2938_v23  ;;  %v2994_v33 = vsel %vm1243_vm3, %v2974_v30, %v2975_v44  ;;  %v2995_v48 = vsel %vm1243_vm3, %v2973_v61, %v2974_v30 }
 0x290   : > { %v2961_v27 = vmax.f32 %v17723_v15, %v2959_v4  ;;  %v2962_v40 = vmax.f32 %v2914_v57, %v2958_v53  ;;  %v2997_v41 = vmax.f32 %v17725_v42, %v2995_v48  ;;  %v2998_v60 = vmax.f32 %v2926_v2, %v2994_v33  ;;  %v14712_v56 = vpop.f32.mrf.mxu0  ;;  %v14740_v11 = vpop.f32.mrf.mxu1 }
 0x291   : > { %v2943_v19 = vrot.slane %v17755_v37, 1  ;;  %v2979_v14 = vrot.slane %v17757_v43, 1  ;;  %v2917_v63 = vadd.f32 %v2737_v46, %v2554_v10  ;;  %v2929_v8 = vadd.f32 %v2882_v47, %v2566_v38 }
 0x292   : > { %v17780_v12 = vmax.f32 %v2962_v40, %v2998_v60  ;;  %v17782_v17 = vadd.f32 %v14712_v56, %v2557_v58  ;;  %v17784_v24 = vadd.f32 %v14740_v11, %v2569_v3  ;;  %v2740_v52 = vpop.f32.mrf.mxu0  ;;  %v2885_v25 = vpop.f32.mrf.mxu1  ;;  %v3011_v18 = vmax.f32 %v2963_v31, %v2999_v29 }
 0x293   : > { %v2941_v35 = vrot.slane %v2917_v63, 1  ;;  %v2977_v1 = vrot.slane %v2929_v8, 1  ;;  %v2918_v13 = vadd.f32 %v2740_v52, %v2555_v9  ;;  %v2930_v44 = vadd.f32 %v2885_v25, %v2567_v22 }
 0x294   : > { %v2944_v10 = vrot.slane %v17782_v17, 1  ;;  %v2980_v38 = vrot.slane %v17784_v24, 1  ;;  %v14715_v50 = vpop.f32.mrf.mxu0  ;;  %v14743_v36 = vpop.f32.mrf.mxu1  ;;  %v17789_v57 = vadd.f32 %v17778_v51, %v3011_v18  ;;  %v17791_v58 = vmax.f32 %v2961_v27, %v2997_v41 }
 0x295   : > { %v17795_v3 = vsel %vm1243_vm3, %v2940_v28, %v2941_v35  ;;  %v17799_v2 = vsel %vm1243_vm3, %v2976_v49, %v2977_v1  ;;  %v2942_v9 = vrot.slane %v2918_v13, 1  ;;  %v2978_v22 = vrot.slane %v2930_v44, 1 }
 0x296   : > { %v2964_v0 = vmax.f32 %v17731_v6, %v17795_v3  ;;  %v3000_v59 = vmax.f32 %v17733_v55, %v17799_v2  ;;  %v2953_v39 = vsel %vm1243_vm3, %v2943_v19, %v2944_v10  ;;  %v2989_v45 = vsel %vm1243_vm3, %v2979_v14, %v2980_v38  ;;  %v2753_v28 = vpop.f32.mrf.mxu0  ;;  %v2898_v23 = vpop.f32.mrf.mxu1 }
 0x297   : > { %v2967_v30 = vmax.f32 %v17755_v37, %v2953_v39  ;;  %v3003_v49 = vmax.f32 %v17757_v43, %v2989_v45  ;;  %v2954_v31 = vsel %vm1243_vm3, %v2942_v9, %v2943_v19  ;;  %v2955_v6 = vsel %vm1243_vm3, %v2941_v35, %v2942_v9 }
 0x298   : > { %v2965_v29 = vmax.f32 %v2917_v63, %v2955_v6  ;;  %v2966_v55 = vmax.f32 %v2918_v13, %v2954_v31  ;;  %v2990_v46 = vsel %vm1243_vm3, %v2978_v22, %v2979_v14  ;;  %v2991_v47 = vsel %vm1243_vm3, %v2977_v1, %v2978_v22  ;;  %v14716_v53 = vpop.f32.mrf.mxu0  ;;  %v14744_v4 = vpop.f32.mrf.mxu1 }
 0x299   : > { %v3001_v33 = vmax.f32 %v2929_v8, %v2991_v47  ;;  %v3002_v37 = vmax.f32 %v2930_v44, %v2990_v46  ;;  %v2923_v43 = vadd.f32 %v14715_v50, %v17719_v54  ;;  %v2935_v48 = vadd.f32 %v14743_v36, %v17721_v26 }
 0x29a   : > { %v2921_v27 = vadd.f32 %v2753_v28, %v17727_v62  ;;  %v2933_v40 = vadd.f32 %v2898_v23, %v17729_v34  ;;  %v2924_v41 = vadd.f32 %v14716_v53, %v17735_v20  ;;  %v2936_v60 = vadd.f32 %v14744_v4, %v17737_v21  ;;  %v2756_v56 = vpop.f32.mrf.mxu0  ;;  %v2901_v11 = vpop.f32.mrf.mxu1 }
 0x29b   : > { %v3014_v19 = vmax.f32 %v2966_v55, %v3002_v37  ;;  %v2947_v14 = vrot.slane %v2923_v43, 1  ;;  %v2983_v63 = vrot.slane %v2935_v48, 1  ;;  %v2922_v8 = vadd.f32 %v2756_v56, %v17743_v7 }
 0x29c   : > { %v2945_v52 = vrot.slane %v2921_v27, 1  ;;  %v2981_v25 = vrot.slane %v2933_v40, 1  ;;  %v2948_v54 = vrot.slane %v2924_v41, 1  ;;  %v2984_v18 = vrot.slane %v2936_v60, 1 }
 0x29d   : > { %v2946_v26 = vrot.slane %v2922_v8, 1  ;;  %v2934_v62 = vadd.f32 %v2901_v11, %v17745_v16  ;;  %v3015_v35 = vmax.f32 %v2967_v30, %v3003_v49  ;;  %v3013_v34 = vmax.f32 %v2965_v29, %v3001_v33 }
 0x29e   : > { %v2952_v20 = vsel %vm1243_vm3, %v2944_v10, %v2945_v52  ;;  %v2988_v21 = vsel %vm1243_vm3, %v2980_v38, %v2981_v25  ;;  %v2949_v1 = vsel %vm1243_vm3, %v2947_v14, %v2948_v54  ;;  %v2960_v7 = vsel %vm1243_vm3, %v2948_v54, %v2937_v32 }
 0x29f   : > { %v2968_v13 = vmax.f32 %v17782_v17, %v2952_v20  ;;  %v3004_v16 = vmax.f32 %v17784_v24, %v2988_v21  ;;  %v2971_v44 = vmax.f32 %v2923_v43, %v2949_v1  ;;  %v2972_v50 = vmax.f32 %v2924_v41, %v2960_v7  ;;  %v16117_v20 = vld [vmem:[%s21911_s9 + $0x28] sm:$0xff]   ;;  %v16118_v7 = vld [vmem:[%s21911_s9 + $0x70] sm:$0xff]  }
 0x2a0   : > { %v2985_v10 = vsel %vm1243_vm3, %v2983_v63, %v2984_v18  ;;  %v2996_v38 = vsel %vm1243_vm3, %v2984_v18, %v2973_v61  ;;  %v2950_v15 = vsel %vm1243_vm3, %v2946_v26, %v2947_v14  ;;  %v2951_v32 = vsel %vm1243_vm3, %v2945_v52, %v2946_v26  ;;  %v16112_v26 = vld [vmem:[%s21911_s9 + $0x40] sm:$0xff]  }
 0x2a1   : > { %v3007_v36 = vmax.f32 %v2935_v48, %v2985_v10  ;;  %v3008_v17 = vmax.f32 %v2936_v60, %v2996_v38  ;;  %v2969_v3 = vmax.f32 %v2921_v27, %v2951_v32  ;;  %v2970_v24 = vmax.f32 %v2922_v8, %v2950_v15  ;;  %v16120_v10 = vld [vmem:[%s21911_s9 + $0x98] sm:$0xff]   ;;  %v16121_v15 = vld [vmem:[%s21911_s9 + $0x60] sm:$0xff]   ;;  %v16122_v32 = vld [vmem:[%s21911_s9 + $0x90] sm:$0xff]  }
 0x2a2   : > { %v2982_v2 = vrot.slane %v2934_v62, 1  ;;  %v3016_v9 = vmax.f32 %v2968_v13, %v3004_v16  ;;  %v3034_v22 = vadd.f32 %v17778_v51, %v3015_v35  ;;  %v3032_v39 = vadd.f32 %v17778_v51, %v3013_v34  ;;  %v16115_v35 = vld [vmem:[%s21911_s9] sm:$0xff]   ;;  %v16116_v34 = vld [vmem:[%s21911_s9 + $0x30] sm:$0xff]  }
 0x2a3   : > { %v3020_v42 = vmax.f32 %v2972_v50, %v3008_v17  ;;  %v3019_v45 = vmax.f32 %v2971_v44, %v3007_v36  ;;  %v3033_v61 = vadd.f32 %v17778_v51, %v3014_v19  ;;  %v3012_v28 = vmax.f32 %v2964_v0, %v3000_v59  ;;  %14770 = vmatpush3.bf16.msra.mxu1 %v16115_v35  ;;  %v16119_v50 = vld [vmem:[%s21911_s9 + $0x68] sm:$0xff]   ;;  %v16123_v36 = vld [vmem:[%s21911_s9 + $0x58] sm:$0xff]  }
 0x2a4   : > { %v2986_v23 = vsel %vm1243_vm3, %v2982_v2, %v2983_v63  ;;  %v2987_v30 = vsel %vm1243_vm3, %v2981_v25, %v2982_v2  ;;  %v3035_v49 = vadd.f32 %v17778_v51, %v3016_v9  ;;  %v3046_v31 = vmax.f32 %v3034_v22, 0.0  ;;  %v16124_v17 = vld [vmem:[%s21911_s9 + $0x88] sm:$0xff]   ;;  %v16127_v2 = vld [vmem:[%s21911_s9 + $0x78] sm:$0xff]  }
 0x2a5   : > { %v3005_v6 = vmax.f32 %v2933_v40, %v2987_v30  ;;  %v3006_v29 = vmax.f32 %v2934_v62, %v2986_v23  ;;  %v3038_v55 = vadd.f32 %v17778_v51, %v3019_v45  ;;  %v3039_v46 = vadd.f32 %v17778_v51, %v3020_v42  ;;  %v16114_v62 = vld [vmem:[%s21911_s9 + $0x38] sm:$0xff]   ;;  %v16557_v45 = vld [vmem:[%s21905_s3 + $0x30] sm:$0xff]  }
 0x2a6   : > { %v3047_v47 = vmax.f32 %v3035_v49, 0.0  ;;  %v3044_v53 = vmax.f32 %v3032_v39, 0.0  ;;  %v3045_v4 = vmax.f32 %v3033_v61, 0.0  ;;  %v3031_v0 = vadd.f32 %v17778_v51, %v3012_v28  ;;  %v16556_v42 = vld [vmem:[%s21905_s3 + $0x38] sm:$0xff]   ;;  %v16558_v61 = vld [vmem:[%s21905_s3 + $0x28] sm:$0xff]   ;;  %v16559_v28 = vld [vmem:[%s21905_s3 + $0x20] sm:$0xff]  }
 0x2a7   : > { %v3018_v59 = vmax.f32 %v2970_v24, %v3006_v29  ;;  %v3050_v33 = vmax.f32 %v3038_v55, 0.0  ;;  %v3051_v37 = vmax.f32 %v3039_v46, 0.0  ;;  %v3017_v43 = vmax.f32 %v2969_v3, %v3005_v6  ;;  %v16125_v3 = vld [vmem:[%s21911_s9 + $0x50] sm:$0xff]   ;;  %v16126_v24 = vld [vmem:[%s21911_s9 + $0x80] sm:$0xff]   ;;  %v16560_v23 = vld [vmem:[%s21905_s3 + $0x18] sm:$0xff]  }
 0x2a8   : > { %v3055_v48 = vpack.c.bf16 %v3047_v47, %v3046_v31  ;;  %v3054_v27 = vpack.c.bf16 %v3045_v4, %v3044_v53  ;;  %v3042_v41 = vmax.f32 %v17789_v57, 0.0  ;;  %v3043_v60 = vmax.f32 %v3031_v0, 0.0  ;;  %v16561_v30 = vld [vmem:[%s21905_s3 + $0x10] sm:$0xff]   ;;  %v16562_v49 = vld [vmem:[%s21905_s3 + $0x8] sm:$0xff]   ;;  %v16563_v31 = vld [vmem:[%s21905_s3] sm:$0xff]  }
 0x2a9   : > { %v3057_v40 = vpack.c.bf16 %v3051_v37, %v3050_v33  ;;  %v3036_v56 = vadd.f32 %v17778_v51, %v3017_v43  ;;  %v3037_v11 = vadd.f32 %v17778_v51, %v3018_v59  ;;  %v3028_v19 = vadd.f32 %v17778_v51, %v17791_v58  ;;  %v21973_v6 = vld [vmem:[#allocation3_spill] sm:$0xff]  ;;  %v16128_v29 = vld [vmem:[%s21913_s11 + $0x18] ss:$0 sps:$4 sm:$0x11]   ;;  %v16129_v46 = vld [vmem:[%s21913_s11 + $0x10] sm:$0xff]  }
 0x2aa   : > { %v3053_v14 = vpack.c.bf16 %v3043_v60, %v3042_v41  ;;  %v3029_v63 = vadd.f32 %v17778_v51, %v17780_v12  ;;  %v16107_v51 = vld [vmem:[%s21910_s8 + $0x8] sm:$0xff]   ;;  %v21971_v58 = vmov 0.0   ;;  %v21972_v39 = vmov 0   ;;  %v16131_v53 = vld [vmem:[%s21913_s11] sm:$0xff]   ;;  %v18014_v59 = vld [vmem:[%s16784_s19 + $0x74] ss:$8 sps:$4 sm:$0xff]  }
 0x2ab   : > { %14745 = vmatprep.subr.bf16.mxu0 %v3057_v40  ;;  %v3048_v8 = vmax.f32 %v3036_v56, 0.0  ;;  %v3049_v52 = vmax.f32 %v3037_v11, 0.0  ;;  %v3040_v25 = vmax.f32 %v3028_v19, 0.0  ;;  %v16110_v12 = vld [vmem:[%s21911_s9 + $0x48] sm:$0xff]   ;;  %14789 = vmatprep.subr.bf16.mxu1 %v21971_v58  ;;  %v17987_v55 = vsel %vm3509_vm11, %v16128_v29, 0  ;;  %v21975_v29 = vld [vmem:[#allocation2_spill] sm:$0xff] }
 0x2ac   : > { %14746 = vmatpush3.bf16.msra.mxu0 %v3057_v40  ;;  %v3041_v54 = vmax.f32 %v3029_v63, 0.0  ;;  %14771 = vmatprep.mubr.msk.bf16.mxu1 %vm16629_vm9, %v21971_v58  ;;  %21974 = vst [vmem:[#allocation5_spill] sm:$0xff] %v17987_v55  ;;  %v16130_v47 = vld [vmem:[%s21913_s11 + $0x8] sm:$0xff]   ;;  %v18017_v33 = vld [vmem:[%s16784_s19 + $0x70] ss:$8 sps:$4 sm:$0xff]  }
 0x2ad   : > { %v3056_v57 = vpack.c.bf16 %v3049_v52, %v3048_v8  ;;  %v18004_v4 = vld [vmem:[%s16784_s19 + $0x60] ss:$8 sps:$4 sm:$0xff]   ;;  %v18007_v0 = vld [vmem:[%s16784_s19 + $0x64] ss:$8 sps:$4 sm:$0xff]   ;;  %v18058_v40 = vld [vmem:[%s16784_s19 + $0xb4] ss:$8 sps:$4 sm:$0xff]  }
 0x2ae   : > { %v3052_v18 = vpack.c.bf16 %v3041_v54, %v3040_v25  ;;  %v18025_v37 = vld [vmem:[%s16784_s19 + $0x84] ss:$8 sps:$4 sm:$0xff]   ;;  %v18028_v43 = vld [vmem:[%s16784_s19 + $0x80] ss:$8 sps:$4 sm:$0xff]   ;;  %v18061_v56 = vld [vmem:[%s16784_s19 + $0xb0] ss:$8 sps:$4 sm:$0xff]  }
 0x2af   : > { %14747 = vmatprep.subr.bf16.mxu0 %v3056_v57  ;;  %v18047_v41 = vld [vmem:[%s16784_s19 + $0xa4] ss:$8 sps:$4 sm:$0xff]   ;;  %v18050_v60 = vld [vmem:[%s16784_s19 + $0xa0] ss:$8 sps:$4 sm:$0xff]   ;;  %v18079_v63 = vld [vmem:[%s16825_s16 + $0x70] ss:$8 sps:$4 sm:$0xff]  }
 0x2b0   : > { %14748 = vmatpush3.bf16.msra.mxu0 %v3056_v57  ;;  %v18067_v11 = vld [vmem:[%s16825_s16 + $0x60] ss:$8 sps:$4 sm:$0xff]   ;;  %v18070_v19 = vld [vmem:[%s16825_s16 + $0x64] ss:$8 sps:$4 sm:$0xff]   ;;  %v18094_v57 = vld [vmem:[%s16825_s16 + $0x94] ss:$8 sps:$4 sm:$0xff]  }
 0x2b1   : > { %14749 = vmatprep.subr.bf16.mxu0 %v3055_v48  ;;  %v18085_v8 = vld [vmem:[%s16825_s16 + $0x84] ss:$8 sps:$4 sm:$0xff]   ;;  %v18088_v52 = vld [vmem:[%s16825_s16 + $0x80] ss:$8 sps:$4 sm:$0xff]  }
 0x2b4   : > { %14750 = vmatpush3.bf16.msra.mxu0 %v3055_v48  ;;  %v18036_v48 = vld [vmem:[%s16784_s19 + $0x94] ss:$8 sps:$4 sm:$0xff]  }
 0x2b5   : > { %14751 = vmatprep.subr.bf16.mxu0 %v3054_v27 }
 0x2b8   : > { %14752 = vmatpush3.bf16.msra.mxu0 %v3054_v27  ;;  %v18039_v27 = vld [vmem:[%s16784_s19 + $0x90] ss:$8 sps:$4 sm:$0xff]  }
 0x2b9   : > { %14753 = vmatprep.subr.bf16.mxu0 %v3053_v14 }
 0x2bc   : > { %14754 = vmatpush3.bf16.msra.mxu0 %v3053_v14  ;;  %v18076_v14 = vld [vmem:[%s16825_s16 + $0x74] ss:$8 sps:$4 sm:$0xff]  }
 0x2bd   : > { %14755 = vmatprep.subr.bf16.mxu0 %v3052_v18 }
 0x2c0   : > { %14756 = vmatpush3.bf16.msra.mxu0 %v3052_v18  ;;  %v18097_v18 = vld [vmem:[%s16825_s16 + $0x90] ss:$8 sps:$4 sm:$0xff]  }
 0x2c1   : > { %14775 = vmatprep.subr.bf16.mxu0 %v21971_v58 }
 0x2c3   : > { %14758 = vmatmul.mubr.msk.bf16.vlgmr.msra.gmra.mxu0 %vm3068_vm8, %v16107_v51 }
 0x2c4   : > { %14776 = vmatpush3.bf16.msra.mxu0 %v16110_v12  ;;  %14785 = vmatprep.mubr.msk.bf16.mxu0 %vm16629_vm9, %v21971_v58 }
 0x2c5   : > { %14777 = vmatprep.subr.bf16.mxu0 %v21971_v58 }
 0x2c8   : > { %14778 = vmatpush3.bf16.msra.mxu0 %v16112_v26 }
 0x2c9   : > { %14779 = vmatprep.subr.bf16.mxu0 %v21971_v58 }
 0x2cc   : > { %14780 = vmatpush3.bf16.msra.mxu0 %v16114_v62 }
 0x2cd   : > { %14781 = vmatprep.subr.bf16.mxu0 %v21971_v58 }
 0x2d0   : > { %14782 = vmatpush3.bf16.msra.mxu0 %v16116_v34 }
 0x2d1   : > { %14783 = vmatprep.subr.bf16.mxu0 %v21971_v58 }
 0x2d4   : > { %14784 = vmatpush3.bf16.msra.mxu0 %v16117_v20  ;;  %v18103_v20 = vld [vmem:[%s16825_s16 + $0xa4] ss:$8 sps:$4 sm:$0xff]  }
 0x2d5   : > { %14803 = vmatprep.subr.bf16.mxu0 %v21971_v58 }
 0x383   : > { %v14759_v21 = vpop.f32.mrf.mxu0 }
 0x384   : > { %v3303_v9 = vpack.c.bf16 %v14759_v21, %v14759_v21  ;;  %v18106_v21 = vld [vmem:[%s16825_s16 + $0xa0] ss:$8 sps:$4 sm:$0xff]  }
 0x385   : > { %v3109_v1 = vpop.f32.mrf.mxu0 }
 0x386   : > { %v3125_v13 = vpack.c.bf16 %v3109_v1, %v3109_v1  ;;  %v12591_v1 = vld [vmem:[%s21912_s10] ss:$0 sm:$0xff] }
 0x387   : > { %v14760_v16 = vpop.f32.mrf.mxu0 }
 0x388   : > { %14772 = vmatmul.mubr.msk.bf16.vlgmr.msra.gmra.mxu1 %vm3166_vm10, %v3125_v13  ;;  %v3389_v22 = vpack.c.bf16 %v14760_v16, %v14760_v16  ;;  %v18115_v13 = vld [vmem:[%s16825_s16 + $0xb4] ss:$8 sps:$4 sm:$0xff]   ;;  %v18118_v16 = vld [vmem:[%s16825_s16 + $0xb0] ss:$8 sps:$4 sm:$0xff]  }
 0x389   : > { %14790 = vmatpush3.bf16.msra.mxu1 %v16118_v7  ;;  %v3112_v44 = vpop.f32.mrf.mxu0  ;;  %14799 = vmatprep.mubr.msk.bf16.mxu1 %vm16629_vm9, %v21971_v58 }
 0x38a   : > { %v3217_v38 = vpack.c.bf16 %v3112_v44, %v3112_v44  ;;  %14791 = vmatprep.subr.bf16.mxu1 %v21971_v58 }
 0x38c   : > { %14786 = vmatmul.mubr.msk.bf16.vlgmr.msra.gmra.mxu0 %vm3166_vm10, %v3217_v38 }
 0x38d   : > { %14792 = vmatpush3.bf16.msra.mxu1 %v16119_v50  ;;  %14804 = vmatpush3.bf16.msra.mxu0 %v16120_v10 }
 0x38e   : > { %14793 = vmatprep.subr.bf16.mxu1 %v21971_v58  ;;  %14805 = vmatprep.subr.bf16.mxu0 %v21971_v58 }
 0x38f   : > { %14813 = vmatprep.mubr.msk.bf16.mxu0 %vm16629_vm9, %v21971_v58 }
 0x391   : > { %14794 = vmatpush3.bf16.msra.mxu1 %v16121_v15  ;;  %14806 = vmatpush3.bf16.msra.mxu0 %v16122_v32 }
 0x392   : > { %14795 = vmatprep.subr.bf16.mxu1 %v21971_v58  ;;  %14807 = vmatprep.subr.bf16.mxu0 %v21971_v58 }
 0x395   : > { %14796 = vmatpush3.bf16.msra.mxu1 %v16123_v36  ;;  %14808 = vmatpush3.bf16.msra.mxu0 %v16124_v17 }
 0x396   : > { %14797 = vmatprep.subr.bf16.mxu1 %v21971_v58  ;;  %14809 = vmatprep.subr.bf16.mxu0 %v21971_v58 }
 0x399   : > { %14798 = vmatpush3.bf16.msra.mxu1 %v16125_v3  ;;  %14810 = vmatpush3.bf16.msra.mxu0 %v16126_v24 }
 0x39a   : > { %14811 = vmatprep.subr.bf16.mxu0 %v21971_v58  ;;  %14817 = vmatprep.subr.bf16.mxu1 %v21971_v58 }
 0x39c   : > { %14800 = vmatmul.mubr.msk.bf16.vlgmr.msra.gmra.mxu1 %vm3166_vm10, %v3303_v9 }
 0x39d   : > { %14812 = vmatpush3.bf16.msra.mxu0 %v16127_v2  ;;  %14825 = vmatprep.mubr.msk.bf16.mxu1 %vm16629_vm9, %v21971_v58 }
 0x39e   : > { %3744 = vmatprep.subr.bf16.mxu0 %v21972_v39  ;;  %14818 = vmatpush3.bf16.msra.mxu1 %v17987_v55 }
 0x39f   : > { %14819 = vmatprep.subr.bf16.mxu1 %v21971_v58 }
 0x3a0   : > { %14814 = vmatmul.mubr.msk.bf16.vlgmr.msra.gmra.mxu0 %vm3166_vm10, %v3389_v22 }
 0x3a1   : > { %3745 = vmatpush1.bf16.msra.mxu0 %v16556_v42  ;;  %12664 = vmatprep.mubr.msk.bf16.mxu0 %vm651_vm0, %v18007_v0 }
 0x3a2   : > { %3746 = vmatprep.subr.bf16.mxu0 %v21972_v39  ;;  %14820 = vmatpush3.bf16.msra.mxu1 %v16129_v46 }
 0x3a3   : > { %14821 = vmatprep.subr.bf16.mxu1 %v21971_v58 }
 0x3a5   : > { %3747 = vmatpush1.bf16.msra.mxu0 %v16557_v45 }
 0x3a6   : > { %3748 = vmatprep.subr.bf16.mxu0 %v21972_v39  ;;  %14822 = vmatpush3.bf16.msra.mxu1 %v16130_v47 }
 0x3a7   : > { %14823 = vmatprep.subr.bf16.mxu1 %v21971_v58 }
 0x3a9   : > { %3749 = vmatpush1.bf16.msra.mxu0 %v16558_v61 }
 0x3aa   : > { %3750 = vmatprep.subr.bf16.mxu0 %v21972_v39  ;;  %14824 = vmatpush3.bf16.msra.mxu1 %v16131_v53 }
 0x3ab   : > { %3663 = vmatprep.subr.bf16.mxu1 %v21972_v39 }
 0x3ad   : > { %3751 = vmatpush1.bf16.msra.mxu0 %v16559_v28 }
 0x3ae   : > { %3752 = vmatprep.subr.bf16.mxu0 %v21972_v39 }
 0x3b1   : > { %3753 = vmatpush1.bf16.msra.mxu0 %v16560_v23 }
 0x3b2   : > { %3754 = vmatprep.subr.bf16.mxu0 %v21972_v39 }
 0x3b5   : > { %3755 = vmatpush1.bf16.msra.mxu0 %v16561_v30 }
 0x3b6   : > { %3756 = vmatprep.subr.bf16.mxu0 %v21972_v39 }
 0x3b9   : > { %3757 = vmatpush1.bf16.msra.mxu0 %v16562_v49 }
 0x3ba   : > { %3758 = vmatprep.subr.bf16.mxu0 %v21972_v39 }
 0x3bd   : > { %3759 = vmatpush1.bf16.msra.mxu0 %v16563_v31 }
 0x3be   : > { %3774 = vmatprep.subr.bf16.mxu0 %v21972_v39 }
 0x3c1   : > { %3775 = vmatpush2.bf16.msra.mxu0 %v21973_v6 }
 0x3c2   : > { %4002 = vmatprep.subr.bf16.mxu0 %v21972_v39 }
 0x3c4   : > { %3777 = vmatmul.mubr.bf16.vlgmr.msra.gmra.mxu0 %v18004_v4 }
 0x3c5   : > { %4003 = vmatpush1.bf16.msra.mxu0 %v16556_v42  ;;  %12665 = vmatprep.mubr.msk.bf16.mxu0 %vm651_vm0, %v18014_v59  ;;  %v16564_v42 = vld [vmem:[%s21904_s2 + $0x38] sm:$0xff]  }
 0x3c6   : > { %4004 = vmatprep.subr.bf16.mxu0 %v21972_v39 }
 0x3c9   : > { %4005 = vmatpush1.bf16.msra.mxu0 %v16557_v45  ;;  %v16565_v45 = vld [vmem:[%s21904_s2 + $0x30] sm:$0xff]  }
 0x3ca   : > { %4006 = vmatprep.subr.bf16.mxu0 %v21972_v39 }
 0x3cc   : > { %3785 = vmatmul.mubr.bf16.gmra.mxu0 %v18017_v33 }
 0x3cd   : > { %4007 = vmatpush1.bf16.msra.mxu0 %v16558_v61  ;;  %12666 = vmatprep.mubr.msk.bf16.mxu0 %vm651_vm0, %v18025_v37  ;;  %v16566_v61 = vld [vmem:[%s21904_s2 + $0x28] sm:$0xff]  }
 0x3ce   : > { %4008 = vmatprep.subr.bf16.mxu0 %v21972_v39 }
 0x3d1   : > { %4009 = vmatpush1.bf16.msra.mxu0 %v16559_v28  ;;  %v16567_v28 = vld [vmem:[%s21904_s2 + $0x20] sm:$0xff]  }
 0x3d2   : > { %4010 = vmatprep.subr.bf16.mxu0 %v21972_v39 }
 0x3d4   : > { %3793 = vmatmul.mubr.bf16.gmra.mxu0 %v18028_v43 }
 0x3d5   : > { %4011 = vmatpush1.bf16.msra.mxu0 %v16560_v23  ;;  %12667 = vmatprep.mubr.msk.bf16.mxu0 %vm651_vm0, %v18036_v48  ;;  %v16568_v23 = vld [vmem:[%s21904_s2 + $0x18] sm:$0xff]  }
 0x3d6   : > { %4012 = vmatprep.subr.bf16.mxu0 %v21972_v39 }
 0x3d9   : > { %4013 = vmatpush1.bf16.msra.mxu0 %v16561_v30  ;;  %v16569_v30 = vld [vmem:[%s21904_s2 + $0x10] sm:$0xff]  }
 0x3da   : > { %4014 = vmatprep.subr.bf16.mxu0 %v21972_v39 }
 0x3dc   : > { %3801 = vmatmul.mubr.bf16.gmra.mxu0 %v18039_v27 }
 0x3dd   : > { %4015 = vmatpush1.bf16.msra.mxu0 %v16562_v49  ;;  %12668 = vmatprep.mubr.msk.bf16.mxu0 %vm651_vm0, %v18047_v41  ;;  %v16570_v49 = vld [vmem:[%s21904_s2 + $0x8] sm:$0xff]  }
 0x3de   : > { %4016 = vmatprep.subr.bf16.mxu0 %v21972_v39 }
 0x3e1   : > { %4017 = vmatpush1.bf16.msra.mxu0 %v16563_v31  ;;  %v16571_v31 = vld [vmem:[%s21904_s2] sm:$0xff]  }
 0x3e2   : > { %4032 = vmatprep.subr.bf16.mxu0 %v21972_v39 }
 0x3e4   : > { %3809 = vmatmul.mubr.bf16.gmra.mxu0 %v18050_v60 }
 0x3e5   : > { %4033 = vmatpush2.bf16.msra.mxu0 %v21973_v6  ;;  %12669 = vmatprep.mubr.msk.bf16.mxu0 %vm651_vm0, %v18058_v40 }
 0x3ec   : > { %3817 = vmatmul.mubr.bf16.gmra.mxu0 %v18061_v56 }
 0x3ed   : > { %12688 = vmatprep.mubr.msk.bf16.mxu0 %vm651_vm0, %v18070_v19 }
 0x3f4   : > { %4035 = vmatmul.mubr.bf16.vlgmr.msra.gmra.mxu0 %v18067_v11 }
 0x3f5   : > { %12689 = vmatprep.mubr.msk.bf16.mxu0 %vm651_vm0, %v18076_v14 }
 0x3fc   : > { %4043 = vmatmul.mubr.bf16.gmra.mxu0 %v18079_v63 }
 0x3fd   : > { %12690 = vmatprep.mubr.msk.bf16.mxu0 %vm651_vm0, %v18085_v8 }
 0x404   : > { %4051 = vmatmul.mubr.bf16.gmra.mxu0 %v18088_v52 }
 0x405   : > { %12691 = vmatprep.mubr.msk.bf16.mxu0 %vm651_vm0, %v18094_v57 }
 0x40c   : > { %4059 = vmatmul.mubr.bf16.gmra.mxu0 %v18097_v18 }
 0x40d   : > { %12692 = vmatprep.mubr.msk.bf16.mxu0 %vm651_vm0, %v18103_v20 }
 0x414   : > { %4067 = vmatmul.mubr.bf16.gmra.mxu0 %v18106_v21 }
 0x415   : > { %12693 = vmatprep.mubr.msk.bf16.mxu0 %vm651_vm0, %v18115_v13 }
 0x41c   : > { %4075 = vmatmul.mubr.bf16.gmra.mxu0 %v18118_v16 }
 0x448   : > { %v3204_v25 = vpop.f32.mrf.mxu1 }
 0x449   : > { %v3216_v7 = vadd.f32 %v12591_v1, %v3204_v25 }
 0x44a   : > { %v14773_v54 = vpop.f32.mrf.mxu1 }
 0x44c   : > { %v3207_v51 = vpop.f32.mrf.mxu1  ;;  %v3296_v12 = vpop.f32.mrf.mxu0 }
 0x44d   : > { %v3302_v50 = vadd.f32 %v3296_v12, %v3216_v7 }
 0x44e   : > { %v14774_v26 = vpop.f32.mrf.mxu1  ;;  %v14787_v62 = vpop.f32.mrf.mxu0 }
 0x44f   : > { %v16170_v26 = vld [vmem:[%s21907_s5 + $0x6c] sm:$0xff]  }
 0x450   : > { %v3299_v35 = vpop.f32.mrf.mxu0  ;;  %v16171_v62 = vld [vmem:[%s21908_s6 + $0x6c] sm:$0xff]  }
 0x452   : > { %v14788_v34 = vpop.f32.mrf.mxu0 }
 0x45c   : > { %v3382_v44 = vpop.f32.mrf.mxu1 }
 0x45d   : > { %v3388_v38 = vadd.f32 %v3382_v44, %v3302_v50  ;;  %v16174_v44 = vld [vmem:[%s21907_s5 + $0x5c] sm:$0xff]  }
 0x45e   : > { %v14801_v10 = vpop.f32.mrf.mxu1  ;;  %v16175_v50 = vld [vmem:[%s21908_s6 + $0x5c] sm:$0xff]  }
 0x460   : > { %v3385_v15 = vpop.f32.mrf.mxu1  ;;  %v3468_v32 = vpop.f32.mrf.mxu0 }
 0x461   : > { %v3474_v36 = vadd.f32 %v3468_v32, %v3388_v38  ;;  %v16176_v15 = vld [vmem:[%s21907_s5 + $0x54] sm:$0xff]  }
 0x462   : > { %v14802_v17 = vpop.f32.mrf.mxu1  ;;  %v14815_v3 = vpop.f32.mrf.mxu0  ;;  %v16177_v32 = vld [vmem:[%s21908_s6 + $0x54] sm:$0xff]  }
 0x463   : > { %v3475_v24 = vmax.f32 %v3474_v36, 0.0 }
 0x464   : > { %v3471_v2 = vpop.f32.mrf.mxu0 }
 0x465   : > { %v3476_v9 = vpack.c.bf16 %v3475_v24, %v3475_v24  ;;  %v16178_v2 = vld [vmem:[%s21907_s5 + $0x4c] sm:$0xff]  }
 0x466   : > { %v14816_v22 = vpop.f32.mrf.mxu0 }
 0x467   : > { %14826 = vmatmul.mubr.msk.bf16.vlgmr.msra.gmra.mxu1 %vm3505_vm12, %v3476_v9  ;;  %v16179_v9 = vld [vmem:[%s21908_s6 + $0x4c] sm:$0xff]  }
 0x468   : > { %3664 = vmatpush1.bf16.msra.mxu1 %v16564_v42  ;;  %12658 = vmatprep.mubr.msk.bf16.mxu1 %vm651_vm0, %v18007_v0 }
 0x469   : > { %3665 = vmatprep.subr.bf16.mxu1 %v21972_v39 }
 0x46c   : > { %3666 = vmatpush1.bf16.msra.mxu1 %v16565_v45 }
 0x46d   : > { %3667 = vmatprep.subr.bf16.mxu1 %v21972_v39 }
 0x470   : > { %3668 = vmatpush1.bf16.msra.mxu1 %v16566_v61 }
 0x471   : > { %3669 = vmatprep.subr.bf16.mxu1 %v21972_v39 }
 0x474   : > { %3670 = vmatpush1.bf16.msra.mxu1 %v16567_v28 }
 0x475   : > { %3671 = vmatprep.subr.bf16.mxu1 %v21972_v39 }
 0x478   : > { %3672 = vmatpush1.bf16.msra.mxu1 %v16568_v23 }
 0x479   : > { %3673 = vmatprep.subr.bf16.mxu1 %v21972_v39 }
 0x47c   : > { %3674 = vmatpush1.bf16.msra.mxu1 %v16569_v30 }
 0x47d   : > { %3675 = vmatprep.subr.bf16.mxu1 %v21972_v39 }
 0x480   : > { %3676 = vmatpush1.bf16.msra.mxu1 %v16570_v49 }
 0x481   : > { %3677 = vmatprep.subr.bf16.mxu1 %v21972_v39 }
 0x484   : > { %3678 = vmatpush1.bf16.msra.mxu1 %v16571_v31  ;;  %v18193_v46 = vpop.f32.mrf.mxu0 }
 0x485   : > { %3693 = vmatprep.subr.bf16.mxu1 %v21972_v39 }
 0x486   : > { %v3780_v47 = vpop.f32.mrf.mxu0 }
 0x488   : > { %3694 = vmatpush2.bf16.msra.mxu1 %v21975_v29  ;;  %v18198_v53 = vpop.f32.mrf.mxu0 }
 0x489   : > { %3909 = vmatprep.subr.bf16.mxu1 %v21972_v39 }
 0x48b   : > { %3696 = vmatmul.mubr.bf16.vlgmr.msra.gmra.mxu1 %v18004_v4  ;;  %v3783_v4 = vpop.f32.mrf.mxu0 }
 0x48c   : > { %3910 = vmatpush1.bf16.msra.mxu1 %v16564_v42  ;;  %12659 = vmatprep.mubr.msk.bf16.mxu1 %vm651_vm0, %v18014_v59  ;;  %v16180_v42 = vld [vmem:[%s21907_s5 + $0x44] sm:$0xff]   ;;  %v18300_v4 = vld [vmem:[%s21907_s5 + $0x38] ss:$0 sps:$4 sm:$0xff]  }
 0x48d   : > { %3911 = vmatprep.subr.bf16.mxu1 %v21972_v39  ;;  %v18200_v0 = vpop.f32.mrf.mxu0 }
 0x48f   : > { %v3788_v59 = vpop.f32.mrf.mxu0 }
 0x490   : > { %3912 = vmatpush1.bf16.msra.mxu1 %v16565_v45  ;;  %v16181_v45 = vld [vmem:[%s21908_s6 + $0x44] sm:$0xff]   ;;  %v18305_v59 = vld [vmem:[%s21908_s6 + $0x38] ss:$0 sps:$4 sm:$0xff]  }
 0x491   : > { %3913 = vmatprep.subr.bf16.mxu1 %v21972_v39 }
 0x493   : > { %3704 = vmatmul.mubr.bf16.gmra.mxu1 %v18017_v33  ;;  %v18205_v33 = vpop.f32.mrf.mxu0 }
 0x494   : > { %3914 = vmatpush1.bf16.msra.mxu1 %v16566_v61  ;;  %12660 = vmatprep.mubr.msk.bf16.mxu1 %vm651_vm0, %v18025_v37 }
 0x495   : > { %3915 = vmatprep.subr.bf16.mxu1 %v21972_v39  ;;  %v3791_v37 = vpop.f32.mrf.mxu0 }
 0x498   : > { %3916 = vmatpush1.bf16.msra.mxu1 %v16567_v28  ;;  %v16182_v28 = vld [vmem:[%s21907_s5 + $0x3c] sm:$0xff]  }
 0x499   : > { %3917 = vmatprep.subr.bf16.mxu1 %v21972_v39 }
 0x49b   : > { %3712 = vmatmul.mubr.bf16.gmra.mxu1 %v18028_v43  ;;  %v18207_v43 = vpop.f32.mrf.mxu0 }
 0x49c   : > { %12661 = vmatprep.mubr.msk.bf16.mxu1 %vm651_vm0, %v18036_v48  ;;  %3918 = vmatpush1.bf16.msra.mxu1 %v16568_v23  ;;  %v16183_v23 = vld [vmem:[%s21908_s6 + $0x3c] sm:$0xff]  }
 0x49d   : > { %3919 = vmatprep.subr.bf16.mxu1 %v21972_v39  ;;  %v3796_v48 = vpop.f32.mrf.mxu0 }
 0x49e   : > { %v12640_v48 = vld [vmem:[%s21914_s12] ss:$0 sm:$0xff] }
 0x4a0   : > { %3920 = vmatpush1.bf16.msra.mxu1 %v16569_v30 }
 0x4a1   : > { %3921 = vmatprep.subr.bf16.mxu1 %v21972_v39 }
 0x4a3   : > { %3720 = vmatmul.mubr.bf16.gmra.mxu1 %v18039_v27  ;;  %v18212_v27 = vpop.f32.mrf.mxu0 }
 0x4a4   : > { %12662 = vmatprep.mubr.msk.bf16.mxu1 %vm651_vm0, %v18047_v41  ;;  %3922 = vmatpush1.bf16.msra.mxu1 %v16570_v49 }
 0x4a5   : > { %3923 = vmatprep.subr.bf16.mxu1 %v21972_v39  ;;  %v3799_v41 = vpop.f32.mrf.mxu0 }
 0x4a8   : > { %3924 = vmatpush1.bf16.msra.mxu1 %v16571_v31 }
 0x4a9   : > { %3939 = vmatprep.subr.bf16.mxu1 %v21972_v39 }
 0x4ab   : > { %3728 = vmatmul.mubr.bf16.gmra.mxu1 %v18050_v60  ;;  %v18214_v60 = vpop.f32.mrf.mxu0 }
 0x4ac   : > { %12663 = vmatprep.mubr.msk.bf16.mxu1 %vm651_vm0, %v18058_v40  ;;  %3940 = vmatpush2.bf16.msra.mxu1 %v21975_v29 }
 0x4ad   : > { %v3804_v40 = vpop.f32.mrf.mxu0 }
 0x4b3   : > { %3736 = vmatmul.mubr.bf16.gmra.mxu1 %v18061_v56  ;;  %v18217_v56 = vpop.f32.mrf.mxu0 }
 0x4b4   : > { %12682 = vmatprep.mubr.msk.bf16.mxu1 %vm651_vm0, %v18070_v19 }
 0x4bb   : > { %3942 = vmatmul.mubr.bf16.vlgmr.msra.gmra.mxu1 %v18067_v11  ;;  %v3807_v11 = vpop.f32.mrf.mxu0 }
 0x4bc   : > { %12683 = vmatprep.mubr.msk.bf16.mxu1 %vm651_vm0, %v18076_v14 }
 0x4bd   : > { %v18219_v19 = vpop.f32.mrf.mxu0 }
 0x4bf   : > { %v3812_v14 = vpop.f32.mrf.mxu0 }
 0x4c3   : > { %3950 = vmatmul.mubr.bf16.gmra.mxu1 %v18079_v63  ;;  %v18221_v63 = vpop.f32.mrf.mxu0 }
 0x4c4   : > { %12684 = vmatprep.mubr.msk.bf16.mxu1 %vm651_vm0, %v18085_v8  ;;  %v16168_v8 = vld [vmem:[%s21907_s5 + $0x74] ss:$0 sps:$4 sm:$0xff]  }
 0x4c5   : > { %v3815_v25 = vpop.f32.mrf.mxu0  ;;  %15931 = vmatprep.subr.msk.bf16.mxu1 %vm1342_vm2, %v16168_v8  ;;  %v4271_v54 = vsel %vm1342_vm2, %v16168_v8, 0 }
 0x4c6   : > { %14830 = vmatpush3.bf16.msra.mxu1 %v4271_v54 }
 0x4c7   : > { %14831 = vmatprep.subr.bf16.mxu1 %v16170_v26 }
 0x4ca   : > { %14832 = vmatpush3.bf16.msra.mxu1 %v16170_v26 }
 0x4cb   : > { %3958 = vmatmul.mubr.bf16.gmra.mxu1 %v18088_v52  ;;  %v16169_v52 = vld [vmem:[%s21908_s6 + $0x74] ss:$0 sps:$4 sm:$0xff]  }
 0x4cc   : > { %12685 = vmatprep.mubr.msk.bf16.mxu1 %vm651_vm0, %v18094_v57  ;;  %15932 = vmatprep.subr.msk.bf16.mxu0 %vm1342_vm2, %v16169_v52  ;;  %v4415_v57 = vsel %vm1342_vm2, %v16169_v52, 0 }
 0x4cd   : > { %14858 = vmatpush3.bf16.msra.mxu0 %v4415_v57 }
 0x4ce   : > { %14859 = vmatprep.subr.bf16.mxu0 %v16171_v62 }
 0x4d1   : > { %14860 = vmatpush3.bf16.msra.mxu0 %v16171_v62 }
 0x4d3   : > { %3966 = vmatmul.mubr.bf16.gmra.mxu1 %v18097_v18  ;;  %v18233_v18 = vpop.f32.mrf.mxu0 }
 0x4d4   : > { %12686 = vmatprep.mubr.msk.bf16.mxu1 %vm651_vm0, %v18103_v20  ;;  %v16172_v20 = vld [vmem:[%s21907_s5 + $0x64] sm:$0xff]  }
 0x4d5   : > { %v3820_v51 = vpop.f32.mrf.mxu0  ;;  %14833 = vmatprep.subr.bf16.mxu1 %v16172_v20 }
 0x4d6   : > { %14834 = vmatpush3.bf16.msra.mxu1 %v16172_v20 }
 0x4d7   : > { %v18235_v12 = vpop.f32.mrf.mxu0  ;;  %14835 = vmatprep.subr.bf16.mxu1 %v16174_v44 }
 0x4d9   : > { %v3823_v35 = vpop.f32.mrf.mxu0 }
 0x4da   : > { %14836 = vmatpush3.bf16.msra.mxu1 %v16174_v44 }
 0x4db   : > { %3974 = vmatmul.mubr.bf16.gmra.mxu1 %v18106_v21  ;;  %v18243_v34 = vpop.f32.mrf.mxu0  ;;  %v16173_v21 = vld [vmem:[%s21908_s6 + $0x64] sm:$0xff]   ;;  %14837 = vmatprep.subr.bf16.mxu1 %v16176_v15 }
 0x4dc   : > { %12687 = vmatprep.mubr.msk.bf16.mxu1 %vm651_vm0, %v18115_v13  ;;  %14861 = vmatprep.subr.bf16.mxu0 %v16173_v21 }
 0x4dd   : > { %v4038_v1 = vpop.f32.mrf.mxu0  ;;  %14862 = vmatpush3.bf16.msra.mxu0 %v16173_v21 }
 0x4de   : > { %14863 = vmatprep.subr.bf16.mxu0 %v16175_v50  ;;  %14838 = vmatpush3.bf16.msra.mxu1 %v16176_v15 }
 0x4df   : > { %v18251_v7 = vpop.f32.mrf.mxu0  ;;  %14839 = vmatprep.subr.bf16.mxu1 %v16178_v2 }
 0x4e1   : > { %v4041_v13 = vpop.f32.mrf.mxu0  ;;  %14864 = vmatpush3.bf16.msra.mxu0 %v16175_v50 }
 0x4e2   : > { %14865 = vmatprep.subr.bf16.mxu0 %v16177_v32  ;;  %14840 = vmatpush3.bf16.msra.mxu1 %v16178_v2 }
 0x4e3   : > { %3982 = vmatmul.mubr.bf16.gmra.mxu1 %v18118_v16  ;;  %v18253_v16 = vpop.f32.mrf.mxu0  ;;  %14841 = vmatprep.subr.bf16.mxu1 %v16180_v42 }
 0x4e5   : > { %v4046_v10 = vpop.f32.mrf.mxu0  ;;  %14866 = vmatpush3.bf16.msra.mxu0 %v16177_v32 }
 0x4e6   : > { %14867 = vmatprep.subr.bf16.mxu0 %v16179_v9  ;;  %14842 = vmatpush3.bf16.msra.mxu1 %v16180_v42 }
 0x4e7   : > { %v18261_v38 = vpop.f32.mrf.mxu0  ;;  %14843 = vmatprep.subr.bf16.mxu1 %v16182_v28 }
 0x4e9   : > { %v4049_v36 = vpop.f32.mrf.mxu0  ;;  %14868 = vmatpush3.bf16.msra.mxu0 %v16179_v9 }
 0x4ea   : > { %14869 = vmatprep.subr.bf16.mxu0 %v16181_v45  ;;  %14844 = vmatpush3.bf16.msra.mxu1 %v16182_v28 }
 0x4eb   : > { %v18269_v17 = vpop.f32.mrf.mxu0  ;;  %15933 = vmatprep.subr.msk.bf16.mxu1 %vm1342_vm2, %v18300_v4 }
 0x4ed   : > { %v4054_v3 = vpop.f32.mrf.mxu0  ;;  %14870 = vmatpush3.bf16.msra.mxu0 %v16181_v45 }
 0x4ee   : > { %14871 = vmatprep.subr.bf16.mxu0 %v16183_v23 }
 0x4ef   : > { %v18271_v24 = vpop.f32.mrf.mxu0 }
 0x4f1   : > { %v4057_v22 = vpop.f32.mrf.mxu0  ;;  %14872 = vmatpush3.bf16.msra.mxu0 %v16183_v23 }
 0x4f2   : > { %15934 = vmatprep.subr.msk.bf16.mxu0 %vm1342_vm2, %v18305_v59 }
 0x4f3   : > { %v18285_v61 = vpop.f32.mrf.mxu0 }
 0x4f5   : > { %v4062_v30 = vpop.f32.mrf.mxu0 }
 0x4f7   : > { %v18293_v49 = vpop.f32.mrf.mxu0 }
 0x4f9   : > { %v4065_v31 = vpop.f32.mrf.mxu0 }
 0x4fb   : > { %v18295_v47 = vpop.f32.mrf.mxu0 }
 0x4fd   : > { %v4070_v37 = vpop.f32.mrf.mxu0 }
 0x4ff   : > { %v18314_v41 = vpop.f32.mrf.mxu0 }
 0x501   : > { %v4073_v11 = vpop.f32.mrf.mxu0 }
 0x503   : > { %v18318_v52 = vpop.f32.mrf.mxu0 }
 0x505   : > { %v4078_v57 = vpop.f32.mrf.mxu0 }
 0x507   : > { %v18322_v26 = vpop.f32.mrf.mxu0 }
 0x509   : > { %v4081_v62 = vpop.f32.mrf.mxu0 }
 0x50a   : > { %v18344_v62 = vld [vmem:[%s21906_s4] ss:$0 sm:$0xff] }
 0x527   : > { %v3547_v40 = vpop.f32.mrf.mxu1 }
 0x528   : > { %v18316_v14 = vadd.f32 %v12640_v48, %v3547_v40 }
 0x529   : > { %v14827_v8 = vpop.f32.mrf.mxu1 }
 0x52a   : > { %21976 = vst [vmem:[#allocation6_spill] sm:$0xff] %v18316_v14  ;;  %v3554_v25 = vsel %vm3553_vm13, %v18316_v14, -inf }
 0x52b   : > { %3555 = vmax.xlane.f32.xlu0 %v3554_v25  ;;  %v3550_v54 = vpop.f32.mrf.mxu1 }
 0x52d   : > { %v14828_v51 = vpop.f32.mrf.mxu1 }
 0x54b   : > { %v3697_v35 = vpop.f32.mrf.mxu1 }
 0x54c   : > { %v3825_v11 = vmax.f32 %v3697_v35, %v18193_v46 }
 0x54d   : > { %v3699_v20 = vpop.f32.mrf.mxu1 }
 0x54f   : > { %v3700_v21 = vpop.f32.mrf.mxu1 }
 0x550   : > { %v3826_v57 = vmax.f32 %v3700_v21, %v18198_v53 }
 0x551   : > { %v3702_v1 = vpop.f32.mrf.mxu1 }
 0x553   : > { %v3705_v13 = vpop.f32.mrf.mxu1 }
 0x555   : > { %v3707_v44 = vpop.f32.mrf.mxu1 }
 0x557   : > { %v3708_v50 = vpop.f32.mrf.mxu1 }
 0x559   : > { %v3710_v10 = vpop.f32.mrf.mxu1 }
 0x55b   : > { %v3713_v15 = vpop.f32.mrf.mxu1 }
 0x55d   : > { %v3715_v32 = vpop.f32.mrf.mxu1 }
 0x55e   : > { %v3827_v32 = vmax.f32 %v3705_v13, %v18200_v0 }
 0x55f   : > { %v18324_v36 = vpop.f32.mrf.mxu1 }
 0x561   : > { %v3718_v3 = vpop.f32.mrf.mxu1 }
 0x563   : > { %v18326_v2 = vpop.f32.mrf.mxu1 }
 0x565   : > { %v3723_v9 = vpop.f32.mrf.mxu1 }
 0x566   : > { %v3828_v9 = vmax.f32 %v3708_v50, %v18205_v33 }
 0x567   : > { %v18328_v22 = vpop.f32.mrf.mxu1 }
 0x569   : > { %v3726_v42 = vpop.f32.mrf.mxu1 }
 0x56b   : > { %v18330_v45 = vpop.f32.mrf.mxu1 }
 0x56d   : > { %v3731_v28 = vpop.f32.mrf.mxu1 }
 0x56f   : > { %v18332_v23 = vpop.f32.mrf.mxu1 }
 0x571   : > { %v3734_v30 = vpop.f32.mrf.mxu1 }
 0x573   : > { %v18334_v31 = vpop.f32.mrf.mxu1 }
 0x575   : > { %v3739_v37 = vpop.f32.mrf.mxu1 }
 0x577   : > { %v18336_v48 = vpop.f32.mrf.mxu1 }
 0x579   : > { %v3742_v40 = vpop.f32.mrf.mxu1 }
 0x57b   : > { %v3943_v8 = vpop.f32.mrf.mxu1 }
 0x57c   : > { %v3990_v25 = vmax.f32 %v3825_v11, %v3943_v8 }
 0x57d   : > { %v3945_v54 = vpop.f32.mrf.mxu1 }
 0x57e   : > { %v4083_v51 = vmax.f32 %v3990_v25, %v18243_v34  ;;  %v3829_v25 = vmax.f32 %v3713_v15, %v18207_v43 }
 0x57f   : > { %v3946_v20 = vpop.f32.mrf.mxu1 }
 0x580   : > { %v3991_v1 = vmax.f32 %v3826_v57, %v3946_v20  ;;  %v4102_v44 = vadd.f32 %v18344_v62, %v4083_v51 }
 0x581   : > { %v3948_v10 = vpop.f32.mrf.mxu1 }
 0x582   : > { %v4084_v46 = vmax.f32 %v3991_v1, %v18251_v7  ;;  %v18350_v21 = vmax.f32 %v4102_v44, 0.0 }
 0x583   : > { %v3951_v35 = vpop.f32.mrf.mxu1 }
 0x584   : > { %v4103_v3 = vadd.f32 %v18344_v62, %v4084_v46  ;;  %v3992_v53 = vmax.f32 %v3827_v32, %v3951_v35  ;;  %v5134_v7 = vrot.slane %v18350_v21, 3  ;;  %v5494_v11 = vrot.slane %v18350_v21, 4 }
 0x585   : > { %v3953_v34 = vpop.f32.mrf.mxu1  ;;  %v4162_v15 = vrot.slane %v18350_v21, 1 }
 0x586   : > { %v18353_v42 = vmax.f32 %v4103_v3, 0.0  ;;  %v4085_v28 = vmax.f32 %v3992_v53, %v18253_v16  ;;  %v3830_v53 = vmax.f32 %v18324_v36, %v18212_v27 }
 0x587   : > { %v3954_v30 = vpop.f32.mrf.mxu1 }
 0x588   : > { %v4104_v37 = vadd.f32 %v18344_v62, %v4085_v28  ;;  %v3993_v40 = vmax.f32 %v3828_v9, %v3954_v30  ;;  %v5135_v13 = vrot.slane %v18353_v42, 3  ;;  %v5495_v8 = vrot.slane %v18353_v42, 4 }
 0x589   : > { %v3956_v0 = vpop.f32.mrf.mxu1  ;;  %v4163_v16 = vrot.slane %v18353_v42, 1 }
 0x58a   : > { %v18362_v33 = vmax.f32 %v4104_v37, 0.0  ;;  %v4086_v50 = vmax.f32 %v3993_v40, %v18261_v38  ;;  %v5156_v57 = vsel %vm2223_vm4, %v5134_v7, %v5135_v13  ;;  %v5516_v51 = vsel %vm2586_vm5, %v5494_v11, %v5495_v8 }
 0x58b   : > { %v3959_v54 = vpop.f32.mrf.mxu1  ;;  %v4184_v3 = vsel %vm1243_vm3, %v4162_v15, %v4163_v16 }
 0x58c   : > { %v4105_v20 = vadd.f32 %v18344_v62, %v4086_v50  ;;  %v3994_v43 = vmax.f32 %v3829_v25, %v3959_v54  ;;  %v4164_v38 = vrot.slane %v18362_v33, 1  ;;  %v5136_v44 = vrot.slane %v18362_v33, 3 }
 0x58d   : > { %v3961_v1 = vpop.f32.mrf.mxu1  ;;  %v5496_v10 = vrot.slane %v18362_v33, 4 }
 0x58e   : > { %v18379_v32 = vmax.f32 %v4105_v20, 0.0  ;;  %v4087_v46 = vmax.f32 %v3994_v43, %v18269_v17  ;;  %v4183_v35 = vsel %vm1243_vm3, %v4163_v16, %v4164_v38  ;;  %v5155_v28 = vsel %vm2223_vm4, %v5135_v13, %v5136_v44 }
 0x58f   : > { %v3962_v34 = vpop.f32.mrf.mxu1  ;;  %v4186_v9 = vpack.c.bf16 %v4183_v35, %v4184_v3  ;;  %v5515_v30 = vsel %vm2586_vm5, %v5495_v8, %v5496_v10  ;;  %v3831_v17 = vmax.f32 %v18326_v2, %v18214_v60  ;;  %v18401_v27 = vpack.c.bf16 %v5155_v28, %v5156_v57 }
 0x590   : > { %v5137_v37 = vrot.slane %v18379_v32, 3  ;;  %v5497_v40 = vrot.slane %v18379_v32, 4  ;;  %v4106_v0 = vadd.f32 %v18344_v62, %v4087_v46  ;;  %v3995_v25 = vmax.f32 %v3830_v53, %v3962_v34 }
 0x591   : > { %v3964_v50 = vpop.f32.mrf.mxu1  ;;  %14845 = vmatprep.mubr.msk.bf16.mxu1 %vm1323_vm6, %v4186_v9  ;;  %14873 = vmatprep.mubr.msk.bf16.mxu0 %vm1323_vm6, %v4186_v9  ;;  %v4165_v36 = vrot.slane %v18379_v32, 1  ;;  %v4777_v13 = vrot.slane %v18379_v32, 2  ;;  %v18407_v2 = vpack.c.bf16 %v5515_v30, %v5516_v51  ;;  %v4562_v20 = vsel %vm1342_vm2, %v18300_v4, 0 }
 0x592   : > { %v5154_v60 = vsel %vm2223_vm4, %v5136_v44, %v5137_v37  ;;  %v18409_v8 = vmax.f32 %v4106_v0, 0.0  ;;  %v4088_v16 = vmax.f32 %v3995_v25, %v18271_v24  ;;  %v5514_v57 = vsel %vm2586_vm5, %v5496_v10, %v5497_v40  ;;  %v16186_v25 = vld [vmem:[%s21907_s5 + $0x30] sm:$0xff]  }
 0x593   : > { %v3967_v54 = vpop.f32.mrf.mxu1  ;;  %v3832_v43 = vmax.f32 %v18328_v22, %v18217_v56  ;;  %v4691_v44 = vsel %vm1342_vm2, %v18305_v59, 0  ;;  %v4776_v51 = vrot.slane %v18362_v33, 2  ;;  %v4182_v56 = vsel %vm1243_vm3, %v4164_v38, %v4165_v36  ;;  %v16187_v50 = vld [vmem:[%s21908_s6 + $0x30] sm:$0xff]  }
 0x594   : > { %v3996_v1 = vmax.f32 %v3831_v17, %v3967_v54  ;;  %v4166_v46 = vrot.slane %v18409_v8, 1  ;;  %v4778_v24 = vrot.slane %v18409_v8, 2  ;;  %v5138_v35 = vrot.slane %v18409_v8, 3 }
 0x595   : > { %v5498_v4 = vrot.slane %v18409_v8, 4  ;;  %v3969_v3 = vpop.f32.mrf.mxu1  ;;  %v4107_v10 = vadd.f32 %v18344_v62, %v4088_v16  ;;  %v4794_v59 = vsel %vm1860_vm7, %v4776_v51, %v4777_v13  ;;  %v3833_v16 = vmax.f32 %v18330_v45, %v18219_v19  ;;  %v16189_v45 = vld [vmem:[%s21908_s6 + $0x28] sm:$0xff]  }
 0x596   : > { %v4089_v22 = vmax.f32 %v3996_v1, %v18285_v61  ;;  %v4181_v53 = vsel %vm1243_vm3, %v4165_v36, %v4166_v46  ;;  %v4793_v9 = vsel %vm1860_vm7, %v4777_v13, %v4778_v24  ;;  %v5153_v28 = vsel %vm2223_vm4, %v5137_v37, %v5138_v35 }
 0x597   : > { %v3970_v34 = vpop.f32.mrf.mxu1  ;;  %v5513_v61 = vsel %vm2586_vm5, %v5497_v40, %v5498_v4  ;;  %v18445_v38 = vmax.f32 %v4107_v10, 0.0  ;;  %v4187_v30 = vpack.c.bf16 %v4181_v53, %v4182_v56  ;;  %v18454_v36 = vpack.c.bf16 %v4793_v9, %v4794_v59 }
 0x598   : > { %v4108_v17 = vadd.f32 %v18344_v62, %v4089_v22  ;;  %v3997_v0 = vmax.f32 %v3832_v43, %v3970_v34  ;;  %v18456_v13 = vpack.c.bf16 %v5153_v28, %v5154_v60  ;;  %v18458_v40 = vpack.c.bf16 %v5513_v61, %v5514_v57 }
 0x599   : > { %v3972_v37 = vpop.f32.mrf.mxu1  ;;  %14846 = vmatmul.mubr.msk.bf16.vlgmr.msra.gmra.mxu1 %vm1323_vm6, %v4187_v30  ;;  %14874 = vmatmul.mubr.msk.bf16.vlgmr.msra.gmra.mxu0 %vm1323_vm6, %v4187_v30  ;;  %v4167_v1 = vrot.slane %v18445_v38, 1  ;;  %v5139_v60 = vrot.slane %v18445_v38, 3 }
 0x59a   : > { %v18462_v54 = vmax.f32 %v4108_v17, 0.0  ;;  %v4090_v43 = vmax.f32 %v3997_v0, %v18293_v49  ;;  %14886 = vmatpush3.bf16.msra.mxu1 %v4562_v20  ;;  %14914 = vmatpush3.bf16.msra.mxu0 %v4691_v44  ;;  %v16188_v49 = vld [vmem:[%s21907_s5 + $0x28] sm:$0xff]   ;;  %v3834_v20 = vmax.f32 %v18332_v23, %v18221_v63  ;;  %v16191_v17 = vld [vmem:[%s21908_s6 + $0x20] sm:$0xff]   ;;  %v3835_v0 = vmax.f32 %v18334_v31, %v18233_v18 }
 0x59b   : > { %v3975_v3 = vpop.f32.mrf.mxu1  ;;  %14887 = vmatprep.subr.bf16.mxu1 %v16186_v25  ;;  %14915 = vmatprep.subr.bf16.mxu0 %v16187_v50  ;;  %v4180_v56 = vsel %vm1243_vm3, %v4166_v46, %v4167_v1  ;;  %v5152_v59 = vsel %vm2223_vm4, %v5138_v35, %v5139_v60  ;;  %v5499_v46 = vrot.slane %v18445_v38, 4 }
 0x59c   : > { %v4109_v57 = vadd.f32 %v18344_v62, %v4090_v43  ;;  %v3998_v10 = vmax.f32 %v3833_v16, %v3975_v3  ;;  %v4168_v19 = vrot.slane %v18462_v54, 1  ;;  %v5140_v22 = vrot.slane %v18462_v54, 3 }
 0x59d   : > { %v3977_v44 = vpop.f32.mrf.mxu1  ;;  %v5500_v28 = vrot.slane %v18462_v54, 4  ;;  %v5512_v31 = vsel %vm2586_vm5, %v5498_v4, %v5499_v46  ;;  %v16193_v4 = vld [vmem:[%s21908_s6 + $0x18] sm:$0xff]  }
 0x59e   : > { %v18484_v53 = vmax.f32 %v4109_v57, 0.0  ;;  %v4091_v34 = vmax.f32 %v3998_v10, %v18295_v47  ;;  %v4179_v9 = vsel %vm1243_vm3, %v4167_v1, %v4168_v19  ;;  %14888 = vmatpush3.bf16.msra.mxu1 %v16186_v25  ;;  %14916 = vmatpush3.bf16.msra.mxu0 %v16187_v50  ;;  %v5151_v23 = vsel %vm2223_vm4, %v5139_v60, %v5140_v22  ;;  %v16190_v47 = vld [vmem:[%s21907_s5 + $0x20] sm:$0xff]  }
 0x59f   : > { %v3978_v61 = vpop.f32.mrf.mxu1  ;;  %v4188_v63 = vpack.c.bf16 %v4179_v9, %v4180_v56  ;;  %14889 = vmatprep.subr.bf16.mxu1 %v16188_v49  ;;  %14917 = vmatprep.subr.bf16.mxu0 %v16189_v45  ;;  %v18504_v50 = vpack.c.bf16 %v5151_v23, %v5152_v59  ;;  %v5511_v3 = vsel %vm2586_vm5, %v5499_v46, %v5500_v28 }
 0x5a0   : > { %v4110_v35 = vadd.f32 %v18344_v62, %v4091_v34  ;;  %v3999_v30 = vmax.f32 %v3834_v20, %v3978_v61  ;;  %v5141_v37 = vrot.slane %v18484_v53, 3  ;;  %v4169_v1 = vrot.slane %v18484_v53, 1 }
 0x5a1   : > { %v3980_v25 = vpop.f32.mrf.mxu1  ;;  %14849 = vmatprep.mubr.msk.bf16.mxu1 %vm1323_vm6, %v4188_v63  ;;  %14877 = vmatprep.mubr.msk.bf16.mxu0 %vm1323_vm6, %v4188_v63  ;;  %v5501_v57 = vrot.slane %v18484_v53, 4 }
 0x5a2   : > { %v18507_v16 = vmax.f32 %v4110_v35, 0.0  ;;  %v4092_v43 = vmax.f32 %v3999_v30, %v18314_v41  ;;  %14890 = vmatpush3.bf16.msra.mxu1 %v16188_v49  ;;  %14918 = vmatpush3.bf16.msra.mxu0 %v16189_v45  ;;  %v5150_v18 = vsel %vm2223_vm4, %v5140_v22, %v5141_v37  ;;  %v3836_v41 = vmax.f32 %v18336_v48, %v18235_v12  ;;  %v16192_v45 = vld [vmem:[%s21907_s5 + $0x18] sm:$0xff]  }
 0x5a3   : > { %v3983_v60 = vpop.f32.mrf.mxu1  ;;  %14891 = vmatprep.subr.bf16.mxu1 %v16190_v47  ;;  %14919 = vmatprep.subr.bf16.mxu0 %v16191_v17  ;;  %v18531_v22 = vpack.c.bf16 %v5511_v3, %v5512_v31  ;;  %v5510_v48 = vsel %vm2586_vm5, %v5500_v28, %v5501_v57  ;;  %v4178_v61 = vsel %vm1243_vm3, %v4168_v19, %v4169_v1  ;;  %v16195_v19 = vld [vmem:[%s21908_s6 + $0x10] sm:$0xff]  }
 0x5a4   : > { %v4111_v10 = vadd.f32 %v18344_v62, %v4092_v43  ;;  %v4000_v20 = vmax.f32 %v3835_v0, %v3983_v60  ;;  %v4170_v49 = vrot.slane %v18507_v16, 1  ;;  %v5142_v56 = vrot.slane %v18507_v16, 3 }
 0x5a5   : > { %v3985_v44 = vpop.f32.mrf.mxu1  ;;  %v5502_v12 = vrot.slane %v18507_v16, 4 }
 0x5a6   : > { %v18536_v59 = vmax.f32 %v4111_v10, 0.0  ;;  %v4093_v34 = vmax.f32 %v4000_v20, %v18318_v52  ;;  %v4177_v9 = vsel %vm1243_vm3, %v4169_v1, %v4170_v49  ;;  %14892 = vmatpush3.bf16.msra.mxu1 %v16190_v47  ;;  %14920 = vmatpush3.bf16.msra.mxu0 %v16191_v17  ;;  %v5149_v46 = vsel %vm2223_vm4, %v5141_v37, %v5142_v56  ;;  %v16194_v52 = vld [vmem:[%s21907_s5 + $0x10] sm:$0xff]  }
 0x5a7   : > { %v3986_v63 = vpop.f32.mrf.mxu1  ;;  %v4189_v23 = vpack.c.bf16 %v4177_v9, %v4178_v61  ;;  %14893 = vmatprep.subr.bf16.mxu1 %v16192_v45  ;;  %14921 = vmatprep.subr.bf16.mxu0 %v16193_v4  ;;  %v18554_v47 = vpack.c.bf16 %v5149_v46, %v5150_v18  ;;  %v5509_v0 = vsel %vm2586_vm5, %v5501_v57, %v5502_v12  ;;  %v16197_v57 = vld [vmem:[%s21908_s6 + $0x8] sm:$0xff]  }
 0x5a8   : > { %v4112_v35 = vadd.f32 %v18344_v62, %v4093_v34  ;;  %v4001_v28 = vmax.f32 %v3836_v41, %v3986_v63  ;;  %v5143_v17 = vrot.slane %v18536_v59, 3  ;;  %v4171_v43 = vrot.slane %v18536_v59, 1  ;;  %v16198_v34 = vld [vmem:[%s21907_s5] sm:$0xff]  }
 0x5a9   : > { %v3988_v30 = vpop.f32.mrf.mxu1  ;;  %14850 = vmatmul.mubr.msk.bf16.gmra.mxu1 %vm1323_vm6, %v4189_v23  ;;  %14878 = vmatmul.mubr.msk.bf16.gmra.mxu0 %vm1323_vm6, %v4189_v23  ;;  %v18563_v1 = vpack.c.bf16 %v5509_v0, %v5510_v48  ;;  %v5503_v60 = vrot.slane %v18536_v59, 4 }
 0x5aa   : > { %v18559_v25 = vmax.f32 %v4112_v35, 0.0  ;;  %v4094_v37 = vmax.f32 %v4001_v28, %v18322_v26  ;;  %14894 = vmatpush3.bf16.msra.mxu1 %v16192_v45  ;;  %14922 = vmatpush3.bf16.msra.mxu0 %v16193_v4  ;;  %v5148_v3 = vsel %vm2223_vm4, %v5142_v56, %v5143_v17  ;;  %v16196_v26 = vld [vmem:[%s21907_s5 + $0x8] sm:$0xff]   ;;  %v4176_v4 = vsel %vm1243_vm3, %v4170_v49, %v4171_v43  ;;  %v16199_v49 = vld [vmem:[%s21908_s6] sm:$0xff]   ;;  %v16201_v30 = vld [vmem:[%s21908_s6 + $0xb0] ss:$0 sps:$4 sm:$0xff]  }
 0x5ab   : > { %14895 = vmatprep.subr.bf16.mxu1 %v16194_v52  ;;  %14923 = vmatprep.subr.bf16.mxu0 %v16195_v19  ;;  %v5508_v20 = vsel %vm2586_vm5, %v5502_v12, %v5503_v60  ;;  %v4126_v28 = vpack.c.bf16 %v18353_v42, %v18350_v21 }
 0x5ac   : > { %v4113_v18 = vadd.f32 %v18344_v62, %v4094_v37  ;;  %v4172_v31 = vrot.slane %v18559_v25, 1  ;;  %v5144_v41 = vrot.slane %v18559_v25, 3  ;;  %v5504_v10 = vrot.slane %v18559_v25, 4 }
 0x5ae   : > { %v18580_v62 = vmax.f32 %v4113_v18, 0.0  ;;  %v4175_v45 = vsel %vm1243_vm3, %v4171_v43, %v4172_v31  ;;  %v5147_v44 = vsel %vm2223_vm4, %v5143_v17, %v5144_v41  ;;  %14896 = vmatpush3.bf16.msra.mxu1 %v16194_v52  ;;  %14924 = vmatpush3.bf16.msra.mxu0 %v16195_v19  ;;  %v5507_v61 = vsel %vm2586_vm5, %v5503_v60, %v5504_v10  ;;  %v16200_v19 = vld [vmem:[%s21907_s5 + $0xb0] ss:$0 sps:$4 sm:$0xff]  }
 0x5af   : > { %v4190_v56 = vpack.c.bf16 %v4175_v45, %v4176_v4  ;;  %v18588_v48 = vpack.c.bf16 %v5147_v44, %v5148_v3  ;;  %14897 = vmatprep.subr.bf16.mxu1 %v16196_v26  ;;  %14925 = vmatprep.subr.bf16.mxu0 %v16197_v57  ;;  %v18623_v17 = vpack.c.bf16 %v5507_v61, %v5508_v20  ;;  %v4883_v60 = vsel %vm1342_vm2, %v16200_v19, 0  ;;  %v16207_v20 = vld [vmem:[%s21908_s6 + $0x98] sm:$0xff]   ;;  %v16208_v4 = vld [vmem:[%s21907_s5 + $0x90] sm:$0xff]   ;;  %v16212_v61 = vld [vmem:[%s21907_s5 + $0x80] sm:$0xff]  }
 0x5b0   : > { %v4173_v12 = vrot.slane %v18580_v62, 1  ;;  %v5145_v9 = vrot.slane %v18580_v62, 3  ;;  %v5505_v63 = vrot.slane %v18580_v62, 4  ;;  %v4127_v3 = vpack.c.bf16 %v18379_v32, %v18362_v33  ;;  %v16204_v32 = vld [vmem:[%s21907_s5 + $0xa0] sm:$0xff]   ;;  %v16209_v44 = vld [vmem:[%s21908_s6 + $0x90] sm:$0xff]   ;;  %v16211_v33 = vld [vmem:[%s21908_s6 + $0x88] sm:$0xff]  }
 0x5b1   : > { %14853 = vmatprep.mubr.msk.bf16.mxu1 %vm1323_vm6, %v4190_v56  ;;  %14881 = vmatprep.mubr.msk.bf16.mxu0 %vm1323_vm6, %v4190_v56  ;;  %v5027_v18 = vsel %vm1342_vm2, %v16201_v30, 0  ;;  %v4130_v45 = vpack.c.bf16 %v18536_v59, %v18507_v16  ;;  %v4775_v56 = vrot.slane %v18353_v42, 2  ;;  %v16210_v42 = vld [vmem:[%s21907_s5 + $0x88] sm:$0xff]  }
 0x5b2   : > { %v4174_v23 = vsel %vm1243_vm3, %v4172_v31, %v4173_v12  ;;  %v4185_v46 = vsel %vm1243_vm3, %v4173_v12, %v4162_v15  ;;  %14898 = vmatpush3.bf16.msra.mxu1 %v16196_v26  ;;  %14926 = vmatpush3.bf16.msra.mxu0 %v16197_v57  ;;  %v5146_v52 = vsel %vm2223_vm4, %v5144_v41, %v5145_v9  ;;  %v16203_v31 = vld [vmem:[%s21908_s6 + $0xa8] sm:$0xff]   ;;  %v16205_v57 = vld [vmem:[%s21908_s6 + $0xa0] sm:$0xff]   ;;  %v4774_v12 = vrot.slane %v18350_v21, 2 }
 0x5b3   : > { %v4191_v35 = vpack.c.bf16 %v4185_v46, %v4174_v23  ;;  %14899 = vmatprep.subr.bf16.mxu1 %v16198_v34  ;;  %14927 = vmatprep.subr.bf16.mxu0 %v16199_v49  ;;  %v5157_v15 = vsel %vm2223_vm4, %v5145_v9, %v5134_v7  ;;  %v5506_v0 = vsel %vm2586_vm5, %v5504_v10, %v5505_v63  ;;  %v16206_v10 = vld [vmem:[%s21907_s5 + $0x98] sm:$0xff]   ;;  %v16226_v21 = vld [vmem:[%s21907_s5 + $0xc4] sm:$0xff]  }
 0x5b4   : > { %v18629_v37 = vpack.c.bf16 %v5157_v15, %v5146_v52  ;;  %v5517_v43 = vsel %vm2586_vm5, %v5505_v63, %v5494_v11  ;;  %v16202_v11 = vld [vmem:[%s21907_s5 + $0xa8] sm:$0xff]   ;;  %v4128_v26 = vpack.c.bf16 %v18445_v38, %v18409_v8  ;;  %v4129_v41 = vpack.c.bf16 %v18484_v53, %v18462_v54  ;;  %v16213_v63 = vld [vmem:[%s21908_s6 + $0x80] sm:$0xff]   ;;  %v16214_v23 = vld [vmem:[%s21907_s5 + $0x78] sm:$0xff]  }
 0x5b5   : > { %14854 = vmatmul.mubr.msk.bf16.gmra.mxu1 %vm1323_vm6, %v4191_v35  ;;  %14882 = vmatmul.mubr.msk.bf16.gmra.mxu0 %vm1323_vm6, %v4191_v35  ;;  %v18637_v7 = vpack.c.bf16 %v5517_v43, %v5506_v0  ;;  %v4796_v9 = vsel %vm1860_vm7, %v4774_v12, %v4775_v56  ;;  %v16215_v46 = vld [vmem:[%s21908_s6 + $0x78] sm:$0xff]   ;;  %v4780_v35 = vrot.slane %v18462_v54, 2  ;;  %v16217_v52 = vld [vmem:[%s21908_s6 + $0xec] ss:$0 sps:$4 sm:$0xff]   ;;  %v4784_v8 = vrot.slane %v18559_v25, 2 }
 0x5b6   : > { %14901 = vmatprep.mubr.msk.bf16.mxu1 %vm1323_vm6, %v4126_v28  ;;  %14929 = vmatprep.mubr.msk.bf16.mxu0 %vm1323_vm6, %v4126_v28  ;;  %v16216_v28 = vld [vmem:[%s21907_s5 + $0xec] ss:$0 sps:$4 sm:$0xff]   ;;  %v5387_v43 = vsel %vm1342_vm2, %v16217_v52, 0 }
 0x5b7   : > { %14900 = vmatpush3.bf16.msra.mxu1 %v16198_v34  ;;  %14928 = vmatpush3.bf16.msra.mxu0 %v16199_v49  ;;  %v4795_v34 = vsel %vm1860_vm7, %v4775_v56, %v4776_v51  ;;  %v4131_v49 = vpack.c.bf16 %v18580_v62, %v18559_v25  ;;  %v5243_v0 = vsel %vm1342_vm2, %v16216_v28, 0  ;;  %v16221_v25 = vld [vmem:[%s21908_s6 + $0xdc] sm:$0xff]  }
 0x5b8   : > { %15935 = vmatprep.subr.msk.bf16.mxu1 %vm1342_vm2, %v16200_v19  ;;  %15936 = vmatprep.subr.msk.bf16.mxu0 %vm1342_vm2, %v16201_v30  ;;  %v4798_v51 = vpack.c.bf16 %v4795_v34, %v4796_v9  ;;  %v4779_v19 = vrot.slane %v18445_v38, 2  ;;  %v16218_v38 = vld [vmem:[%s21907_s5 + $0xe4] sm:$0xff]   ;;  %v16228_v56 = vld [vmem:[%s21907_s5 + $0xbc] sm:$0xff]   ;;  %v16231_v34 = vld [vmem:[%s21908_s6 + $0xb4] sm:$0xff]  }
 0x5b9   : > { %v16233_v9 = vld [vmem:[%s21908_s6 + $0x128] ss:$0 sps:$4 sm:$0xff]  }
 0x5ba   : > { %v4791_v30 = vsel %vm1860_vm7, %v4779_v19, %v4780_v35  ;;  %v4792_v54 = vsel %vm1860_vm7, %v4778_v24, %v4779_v19  ;;  %v4781_v24 = vrot.slane %v18484_v53, 2 }
 0x5bb   : > { %v4800_v15 = vpack.c.bf16 %v4791_v30, %v4792_v54 }
 0x5bd   : > { %14902 = vmatmul.mubr.msk.bf16.vlgmr.msra.gmra.mxu1 %vm1323_vm6, %v4127_v3  ;;  %14930 = vmatmul.mubr.msk.bf16.vlgmr.msra.gmra.mxu0 %vm1323_vm6, %v4127_v3  ;;  %v16219_v3 = vld [vmem:[%s21908_s6 + $0xe4] sm:$0xff]  }
 0x5be   : > { %14942 = vmatpush3.bf16.msra.mxu1 %v4883_v60  ;;  %14970 = vmatpush3.bf16.msra.mxu0 %v5027_v18  ;;  %v4782_v60 = vrot.slane %v18507_v16, 2  ;;  %v4783_v18 = vrot.slane %v18536_v59, 2 }
 0x5bf   : > { %14905 = vmatprep.mubr.msk.bf16.mxu1 %vm1323_vm6, %v4128_v26  ;;  %14933 = vmatprep.mubr.msk.bf16.mxu0 %vm1323_vm6, %v4128_v26 }
 0x5c0   : > { %14943 = vmatprep.subr.bf16.mxu1 %v16202_v11  ;;  %14971 = vmatprep.subr.bf16.mxu0 %v16203_v31  ;;  %v4789_v16 = vsel %vm1860_vm7, %v4781_v24, %v4782_v60  ;;  %v4787_v53 = vsel %vm1860_vm7, %v4783_v18, %v4784_v8 }
 0x5c2   : > { %14944 = vmatpush3.bf16.msra.mxu1 %v16202_v11  ;;  %14972 = vmatpush3.bf16.msra.mxu0 %v16203_v31  ;;  %v4790_v11 = vsel %vm1860_vm7, %v4780_v35, %v4781_v24  ;;  %v4788_v31 = vsel %vm1860_vm7, %v4782_v60, %v4783_v18  ;;  %v16241_v35 = vld [vmem:[%s21908_s6 + $0x108] sm:$0xff]  }
 0x5c3   : > { %14945 = vmatprep.subr.bf16.mxu1 %v16204_v32  ;;  %14973 = vmatprep.subr.bf16.mxu0 %v16205_v57  ;;  %v4801_v59 = vpack.c.bf16 %v4789_v16, %v4790_v11  ;;  %v4802_v26 = vpack.c.bf16 %v4787_v53, %v4788_v31 }
 0x5c5   : > { %14906 = vmatmul.mubr.msk.bf16.gmra.mxu1 %vm1323_vm6, %v4129_v41  ;;  %14934 = vmatmul.mubr.msk.bf16.gmra.mxu0 %vm1323_vm6, %v4129_v41  ;;  %v4785_v41 = vrot.slane %v18580_v62, 2 }
 0x5c6   : > { %14946 = vmatpush3.bf16.msra.mxu1 %v16204_v32  ;;  %14974 = vmatpush3.bf16.msra.mxu0 %v16205_v57  ;;  %v16222_v32 = vld [vmem:[%s21907_s5 + $0xd4] sm:$0xff]  }
 0x5c7   : > { %14909 = vmatprep.mubr.msk.bf16.mxu1 %vm1323_vm6, %v4130_v45  ;;  %14937 = vmatprep.mubr.msk.bf16.mxu0 %vm1323_vm6, %v4130_v45  ;;  %v16223_v57 = vld [vmem:[%s21908_s6 + $0xd4] sm:$0xff]   ;;  %v4797_v62 = vsel %vm1860_vm7, %v4785_v41, %v4774_v12  ;;  %v16225_v45 = vld [vmem:[%s21908_s6 + $0xcc] sm:$0xff]   ;;  %v16229_v12 = vld [vmem:[%s21908_s6 + $0xbc] sm:$0xff]  }
 0x5c8   : > { %14947 = vmatprep.subr.bf16.mxu1 %v16206_v10  ;;  %14975 = vmatprep.subr.bf16.mxu0 %v16207_v20 }
 0x5ca   : > { %14948 = vmatpush3.bf16.msra.mxu1 %v16206_v10  ;;  %14976 = vmatpush3.bf16.msra.mxu0 %v16207_v20  ;;  %v4786_v10 = vsel %vm1860_vm7, %v4784_v8, %v4785_v41  ;;  %v16224_v20 = vld [vmem:[%s21907_s5 + $0xcc] sm:$0xff]  }
 0x5cb   : > { %14949 = vmatprep.subr.bf16.mxu1 %v16208_v4  ;;  %14977 = vmatprep.subr.bf16.mxu0 %v16209_v44 }
 0x5cd   : > { %14910 = vmatmul.mubr.msk.bf16.gmra.mxu1 %vm1323_vm6, %v4131_v49  ;;  %14938 = vmatmul.mubr.msk.bf16.gmra.mxu0 %vm1323_vm6, %v4131_v49  ;;  %v16232_v49 = vld [vmem:[%s21907_s5 + $0x128] ss:$0 sps:$4 sm:$0xff]  }
 0x5ce   : > { %14950 = vmatpush3.bf16.msra.mxu1 %v16208_v4  ;;  %14978 = vmatpush3.bf16.msra.mxu0 %v16209_v44  ;;  %v4803_v4 = vpack.c.bf16 %v4797_v62, %v4786_v10  ;;  %v16227_v44 = vld [vmem:[%s21908_s6 + $0xc4] sm:$0xff]  }
 0x5cf   : > { %14957 = vmatprep.mubr.msk.bf16.mxu1 %vm1323_vm6, %v4798_v51  ;;  %14985 = vmatprep.mubr.msk.bf16.mxu0 %vm1323_vm6, %v4798_v51  ;;  %v16234_v51 = vld [vmem:[%s21907_s5 + $0x120] sm:$0xff]  }
 0x5d0   : > { %14951 = vmatprep.subr.bf16.mxu1 %v16210_v42  ;;  %14979 = vmatprep.subr.bf16.mxu0 %v16211_v33 }
 0x5d2   : > { %14952 = vmatpush3.bf16.msra.mxu1 %v16210_v42  ;;  %14980 = vmatpush3.bf16.msra.mxu0 %v16211_v33  ;;  %v5603_v42 = vsel %vm1342_vm2, %v16232_v49, 0  ;;  %v5747_v33 = vsel %vm1342_vm2, %v16233_v9, 0 }
 0x5d3   : > { %14953 = vmatprep.subr.bf16.mxu1 %v16212_v61  ;;  %14981 = vmatprep.subr.bf16.mxu0 %v16213_v63 }
 0x5d6   : > { %14954 = vmatpush3.bf16.msra.mxu1 %v16212_v61  ;;  %14982 = vmatpush3.bf16.msra.mxu0 %v16213_v63  ;;  %v16235_v61 = vld [vmem:[%s21908_s6 + $0x120] sm:$0xff]   ;;  %v16236_v63 = vld [vmem:[%s21907_s5 + $0x118] sm:$0xff]  }
 0x5d7   : > { %14955 = vmatprep.subr.bf16.mxu1 %v16214_v23  ;;  %14983 = vmatprep.subr.bf16.mxu0 %v16215_v46 }
 0x5da   : > { %14956 = vmatpush3.bf16.msra.mxu1 %v16214_v23  ;;  %14984 = vmatpush3.bf16.msra.mxu0 %v16215_v46  ;;  %v16237_v23 = vld [vmem:[%s21908_s6 + $0x118] sm:$0xff]   ;;  %v16240_v46 = vld [vmem:[%s21907_s5 + $0x108] sm:$0xff]  }
 0x5db   : > { %15937 = vmatprep.subr.msk.bf16.mxu1 %vm1342_vm2, %v16216_v28  ;;  %15938 = vmatprep.subr.msk.bf16.mxu0 %vm1342_vm2, %v16217_v52  ;;  %v16244_v28 = vld [vmem:[%s21907_s5 + $0xf8] sm:$0xff]  }
 0x5dc   : > { %v16245_v52 = vld [vmem:[%s21908_s6 + $0xf8] sm:$0xff]  }
 0x5dd   : > { %14958 = vmatmul.mubr.msk.bf16.vlgmr.msra.gmra.mxu1 %vm1323_vm6, %v18454_v36  ;;  %14986 = vmatmul.mubr.msk.bf16.vlgmr.msra.gmra.mxu0 %vm1323_vm6, %v18454_v36  ;;  %v16220_v36 = vld [vmem:[%s21907_s5 + $0xdc] sm:$0xff]  }
 0x5de   : > { %14961 = vmatprep.mubr.msk.bf16.mxu1 %vm1323_vm6, %v4800_v15  ;;  %14989 = vmatprep.mubr.msk.bf16.mxu0 %vm1323_vm6, %v4800_v15 }
 0x5df   : > { %14998 = vmatpush3.bf16.msra.mxu1 %v5243_v0  ;;  %15026 = vmatpush3.bf16.msra.mxu0 %v5387_v43 }
 0x5e0   : > { %14999 = vmatprep.subr.bf16.mxu1 %v16218_v38  ;;  %15027 = vmatprep.subr.bf16.mxu0 %v16219_v3 }
 0x5e3   : > { %15000 = vmatpush3.bf16.msra.mxu1 %v16218_v38  ;;  %15028 = vmatpush3.bf16.msra.mxu0 %v16219_v3 }
 0x5e4   : > { %15001 = vmatprep.subr.bf16.mxu1 %v16220_v36  ;;  %15029 = vmatprep.subr.bf16.mxu0 %v16221_v25 }
 0x5e5   : > { %14962 = vmatmul.mubr.msk.bf16.gmra.mxu1 %vm1323_vm6, %v4801_v59  ;;  %14990 = vmatmul.mubr.msk.bf16.gmra.mxu0 %vm1323_vm6, %v4801_v59 }
 0x5e6   : > { %14965 = vmatprep.mubr.msk.bf16.mxu1 %vm1323_vm6, %v4802_v26  ;;  %14993 = vmatprep.mubr.msk.bf16.mxu0 %vm1323_vm6, %v4802_v26 }
 0x5e7   : > { %15002 = vmatpush3.bf16.msra.mxu1 %v16220_v36  ;;  %15030 = vmatpush3.bf16.msra.mxu0 %v16221_v25 }
 0x5e8   : > { %15003 = vmatprep.subr.bf16.mxu1 %v16222_v32  ;;  %15031 = vmatprep.subr.bf16.mxu0 %v16223_v57 }
 0x5eb   : > { %15004 = vmatpush3.bf16.msra.mxu1 %v16222_v32  ;;  %15032 = vmatpush3.bf16.msra.mxu0 %v16223_v57 }
 0x5ec   : > { %15005 = vmatprep.subr.bf16.mxu1 %v16224_v20  ;;  %15033 = vmatprep.subr.bf16.mxu0 %v16225_v45 }
 0x5ed   : > { %14966 = vmatmul.mubr.msk.bf16.gmra.mxu1 %vm1323_vm6, %v4803_v4  ;;  %14994 = vmatmul.mubr.msk.bf16.gmra.mxu0 %vm1323_vm6, %v4803_v4 }
 0x5ee   : > { %15013 = vmatprep.mubr.msk.bf16.mxu1 %vm1323_vm6, %v18401_v27  ;;  %15041 = vmatprep.mubr.msk.bf16.mxu0 %vm1323_vm6, %v18401_v27  ;;  %v16230_v27 = vld [vmem:[%s21907_s5 + $0xb4] sm:$0xff]  }
 0x5ef   : > { %15006 = vmatpush3.bf16.msra.mxu1 %v16224_v20  ;;  %15034 = vmatpush3.bf16.msra.mxu0 %v16225_v45 }
 0x5f0   : > { %15007 = vmatprep.subr.bf16.mxu1 %v16226_v21  ;;  %15035 = vmatprep.subr.bf16.mxu0 %v16227_v44 }
 0x5f3   : > { %15008 = vmatpush3.bf16.msra.mxu1 %v16226_v21  ;;  %15036 = vmatpush3.bf16.msra.mxu0 %v16227_v44 }
 0x5f4   : > { %15009 = vmatprep.subr.bf16.mxu1 %v16228_v56  ;;  %15037 = vmatprep.subr.bf16.mxu0 %v16229_v12 }
 0x5f7   : > { %15010 = vmatpush3.bf16.msra.mxu1 %v16228_v56  ;;  %15038 = vmatpush3.bf16.msra.mxu0 %v16229_v12 }
 0x5f8   : > { %15011 = vmatprep.subr.bf16.mxu1 %v16230_v27  ;;  %15039 = vmatprep.subr.bf16.mxu0 %v16231_v34 }
 0x5fb   : > { %15012 = vmatpush3.bf16.msra.mxu1 %v16230_v27  ;;  %15040 = vmatpush3.bf16.msra.mxu0 %v16231_v34 }
 0x5fc   : > { %15939 = vmatprep.subr.msk.bf16.mxu1 %vm1342_vm2, %v16232_v49  ;;  %15940 = vmatprep.subr.msk.bf16.mxu0 %vm1342_vm2, %v16233_v9 }
 0x5fe   : > { %15014 = vmatmul.mubr.msk.bf16.vlgmr.msra.gmra.mxu1 %vm1323_vm6, %v18456_v13  ;;  %15042 = vmatmul.mubr.msk.bf16.vlgmr.msra.gmra.mxu0 %vm1323_vm6, %v18456_v13  ;;  %v16238_v13 = vld [vmem:[%s21907_s5 + $0x110] sm:$0xff]  }
 0x5ff   : > { %15017 = vmatprep.mubr.msk.bf16.mxu1 %vm1323_vm6, %v18504_v50  ;;  %15045 = vmatprep.mubr.msk.bf16.mxu0 %vm1323_vm6, %v18504_v50  ;;  %v16239_v50 = vld [vmem:[%s21908_s6 + $0x110] sm:$0xff]  }
 0x600   : > { %15054 = vmatpush3.bf16.msra.mxu1 %v5603_v42  ;;  %15082 = vmatpush3.bf16.msra.mxu0 %v5747_v33 }
 0x601   : > { %15055 = vmatprep.subr.bf16.mxu1 %v16234_v51  ;;  %15083 = vmatprep.subr.bf16.mxu0 %v16235_v61 }
 0x604   : > { %15056 = vmatpush3.bf16.msra.mxu1 %v16234_v51  ;;  %15084 = vmatpush3.bf16.msra.mxu0 %v16235_v61 }
 0x605   : > { %15057 = vmatprep.subr.bf16.mxu1 %v16236_v63  ;;  %15085 = vmatprep.subr.bf16.mxu0 %v16237_v23 }
 0x606   : > { %15018 = vmatmul.mubr.msk.bf16.gmra.mxu1 %vm1323_vm6, %v18554_v47  ;;  %15046 = vmatmul.mubr.msk.bf16.gmra.mxu0 %vm1323_vm6, %v18554_v47  ;;  %v16242_v47 = vld [vmem:[%s21907_s5 + $0x100] sm:$0xff]  }
 0x607   : > { %15021 = vmatprep.mubr.msk.bf16.mxu1 %vm1323_vm6, %v18588_v48  ;;  %15049 = vmatprep.mubr.msk.bf16.mxu0 %vm1323_vm6, %v18588_v48  ;;  %v16243_v48 = vld [vmem:[%s21908_s6 + $0x100] sm:$0xff]  }
 0x608   : > { %15058 = vmatpush3.bf16.msra.mxu1 %v16236_v63  ;;  %15086 = vmatpush3.bf16.msra.mxu0 %v16237_v23 }
 0x609   : > { %15059 = vmatprep.subr.bf16.mxu1 %v16238_v13  ;;  %15087 = vmatprep.subr.bf16.mxu0 %v16239_v50 }
 0x60c   : > { %15060 = vmatpush3.bf16.msra.mxu1 %v16238_v13  ;;  %15088 = vmatpush3.bf16.msra.mxu0 %v16239_v50 }
 0x60d   : > { %15061 = vmatprep.subr.bf16.mxu1 %v16240_v46  ;;  %15089 = vmatprep.subr.bf16.mxu0 %v16241_v35 }
 0x60e   : > { %15022 = vmatmul.mubr.msk.bf16.gmra.mxu1 %vm1323_vm6, %v18629_v37  ;;  %15050 = vmatmul.mubr.msk.bf16.gmra.mxu0 %vm1323_vm6, %v18629_v37  ;;  %v16247_v37 = vld [vmem:[%s21908_s6 + $0xf0] sm:$0xff]  }
 0x60f   : > { %15069 = vmatprep.mubr.msk.bf16.mxu1 %vm1323_vm6, %v18407_v2  ;;  %15097 = vmatprep.mubr.msk.bf16.mxu0 %vm1323_vm6, %v18407_v2  ;;  %v16246_v2 = vld [vmem:[%s21907_s5 + $0xf0] sm:$0xff]  }
 0x610   : > { %15062 = vmatpush3.bf16.msra.mxu1 %v16240_v46  ;;  %15090 = vmatpush3.bf16.msra.mxu0 %v16241_v35 }
 0x611   : > { %15063 = vmatprep.subr.bf16.mxu1 %v16242_v47  ;;  %15091 = vmatprep.subr.bf16.mxu0 %v16243_v48 }
 0x614   : > { %15064 = vmatpush3.bf16.msra.mxu1 %v16242_v47  ;;  %15092 = vmatpush3.bf16.msra.mxu0 %v16243_v48 }
 0x615   : > { %15065 = vmatprep.subr.bf16.mxu1 %v16244_v28  ;;  %15093 = vmatprep.subr.bf16.mxu0 %v16245_v52 }
 0x618   : > { %15066 = vmatpush3.bf16.msra.mxu1 %v16244_v28  ;;  %15094 = vmatpush3.bf16.msra.mxu0 %v16245_v52 }
 0x619   : > { %15067 = vmatprep.subr.bf16.mxu1 %v16246_v2  ;;  %15095 = vmatprep.subr.bf16.mxu0 %v16247_v37 }
 0x61c   : > { %15068 = vmatpush3.bf16.msra.mxu1 %v16246_v2  ;;  %15096 = vmatpush3.bf16.msra.mxu0 %v16247_v37 }
 0x61d   : > { %15125 = vmatprep.subr.bf16.mxu0 %v21971_v58 }
 0x61f   : > { %15070 = vmatmul.mubr.msk.bf16.vlgmr.msra.gmra.mxu1 %vm1323_vm6, %v18458_v40  ;;  %15098 = vmatmul.mubr.msk.bf16.vlgmr.msra.gmra.mxu0 %vm1323_vm6, %v18458_v40  ;;  %v16572_v40 = vld [vmem:[%s21910_s8] sm:$0xff]  }
 0x620   : > { %15073 = vmatprep.mubr.msk.bf16.mxu1 %vm1323_vm6, %v18531_v22  ;;  %15101 = vmatprep.mubr.msk.bf16.mxu0 %vm1323_vm6, %v18531_v22 }
 0x627   : > { %15074 = vmatmul.mubr.msk.bf16.gmra.mxu1 %vm1323_vm6, %v18563_v1  ;;  %15102 = vmatmul.mubr.msk.bf16.gmra.mxu0 %vm1323_vm6, %v18563_v1 }
 0x628   : > { %15077 = vmatprep.mubr.msk.bf16.mxu1 %vm1323_vm6, %v18623_v17  ;;  %15105 = vmatprep.mubr.msk.bf16.mxu0 %vm1323_vm6, %v18623_v17 }
 0x62f   : > { %15078 = vmatmul.mubr.msk.bf16.gmra.mxu1 %vm1323_vm6, %v18637_v7  ;;  %15106 = vmatmul.mubr.msk.bf16.gmra.mxu0 %vm1323_vm6, %v18637_v7 }
 0x630   : > { %15121 = vmatprep.mubr.msk.bf16.mxu1 %vm3068_vm8, %v16572_v40  ;;  %15135 = vmatprep.mubr.msk.bf16.mxu0 %vm16629_vm9, %v21971_v58 }
 0x659   : > { %v14847_v22 = vpop.f32.mrf.mxu1  ;;  %v14875_v1 = vpop.f32.mrf.mxu0 }
 0x65b   : > { %v4307_v19 = vpop.f32.mrf.mxu1  ;;  %v4451_v30 = vpop.f32.mrf.mxu0 }
 0x65d   : > { %v14848_v17 = vpop.f32.mrf.mxu1  ;;  %v14876_v54 = vpop.f32.mrf.mxu0 }
 0x65f   : > { %v18915_v15 = vpop.f32.mrf.mxu1  ;;  %v18917_v0 = vpop.f32.mrf.mxu0 }
 0x669   : > { %v14851_v7 = vpop.f32.mrf.mxu1  ;;  %v14879_v43 = vpop.f32.mrf.mxu0 }
 0x66b   : > { %v4323_v38 = vpop.f32.mrf.mxu1  ;;  %v4467_v3 = vpop.f32.mrf.mxu0 }
 0x66d   : > { %v14852_v60 = vpop.f32.mrf.mxu1  ;;  %v14880_v8 = vpop.f32.mrf.mxu0 }
 0x66f   : > { %v18919_v24 = vpop.f32.mrf.mxu1  ;;  %v18921_v18 = vpop.f32.mrf.mxu0 }
 0x675   : > { %v14855_v16 = vpop.f32.mrf.mxu1  ;;  %v14883_v36 = vpop.f32.mrf.mxu0 }
 0x677   : > { %v4339_v25 = vpop.f32.mrf.mxu1  ;;  %v4483_v53 = vpop.f32.mrf.mxu0 }
 0x679   : > { %v14856_v11 = vpop.f32.mrf.mxu1  ;;  %v14884_v59 = vpop.f32.mrf.mxu0 }
 0x67b   : > { %v18923_v31 = vpop.f32.mrf.mxu1  ;;  %v18925_v26 = vpop.f32.mrf.mxu0 }
 0x67d   : > { %v14903_v32 = vpop.f32.mrf.mxu1  ;;  %v14931_v57 = vpop.f32.mrf.mxu0 }
 0x67e   : > { %v4607_v41 = vadd.f32 %v14903_v32, %v14847_v22  ;;  %v4736_v10 = vadd.f32 %v14931_v57, %v14875_v1 }
 0x67f   : > { %v4598_v62 = vpop.f32.mrf.mxu1  ;;  %v4727_v20 = vpop.f32.mrf.mxu0 }
 0x680   : > { %v18927_v45 = vadd.f32 %v4598_v62, %v4307_v19  ;;  %v18929_v4 = vadd.f32 %v4727_v20, %v4451_v30  ;;  %v16251_v20 = vld [vmem:[%s21911_s9 + $0x10] sm:$0xff]  }
 0x681   : > { %v14904_v21 = vpop.f32.mrf.mxu1  ;;  %v14932_v44 = vpop.f32.mrf.mxu0 }
 0x682   : > { %v4610_v56 = vadd.f32 %v14904_v21, %v14848_v17  ;;  %v4739_v12 = vadd.f32 %v14932_v44, %v14876_v54 }
 0x683   : > { %v18931_v27 = vpop.f32.mrf.mxu1  ;;  %v18933_v34 = vpop.f32.mrf.mxu0 }
 0x685   : > { %v14907_v49 = vpop.f32.mrf.mxu1  ;;  %v14935_v9 = vpop.f32.mrf.mxu0 }
 0x686   : > { %v18935_v42 = vadd.f32 %v14907_v49, %v14851_v7  ;;  %v18937_v33 = vadd.f32 %v14935_v9, %v14879_v43 }
 0x687   : > { %v4614_v51 = vpop.f32.mrf.mxu1  ;;  %v4743_v61 = vpop.f32.mrf.mxu0 }
 0x688   : > { %v4615_v63 = vadd.f32 %v4614_v51, %v4323_v38  ;;  %v4744_v23 = vadd.f32 %v4743_v61, %v4467_v3 }
 0x689   : > { %v14908_v13 = vpop.f32.mrf.mxu1  ;;  %v14936_v50 = vpop.f32.mrf.mxu0 }
 0x68a   : > { %v18939_v46 = vadd.f32 %v14908_v13, %v14852_v60  ;;  %v18941_v35 = vadd.f32 %v14936_v50, %v14880_v8 }
 0x68b   : > { %v18943_v47 = vpop.f32.mrf.mxu1  ;;  %v18945_v48 = vpop.f32.mrf.mxu0 }
 0x68d   : > { %v14911_v28 = vpop.f32.mrf.mxu1  ;;  %v14939_v52 = vpop.f32.mrf.mxu0 }
 0x68e   : > { %v18947_v2 = vadd.f32 %v14911_v28, %v14855_v16  ;;  %v18949_v37 = vadd.f32 %v14939_v52, %v14883_v36  ;;  %v16248_v36 = vld [vmem:[%s21911_s9 + $0x20] sm:$0xff]  }
 0x68f   : > { %v4630_v40 = vpop.f32.mrf.mxu1  ;;  %v4759_v22 = vpop.f32.mrf.mxu0  ;;  %15126 = vmatpush3.bf16.msra.mxu0 %v16248_v36 }
 0x690   : > { %21977 = vst [vmem:[#allocation7_spill] sm:$0xff] %v18947_v2  ;;  %21978 = vst [vmem:[#allocation8_spill] sm:$0xff] %v18949_v37  ;;  %v18951_v1 = vadd.f32 %v4630_v40, %v4339_v25  ;;  %v18953_v19 = vadd.f32 %v4759_v22, %v4483_v53  ;;  %15127 = vmatprep.subr.bf16.mxu0 %v21971_v58 }
 0x691   : > { %v14912_v30 = vpop.f32.mrf.mxu1  ;;  %v14940_v17 = vpop.f32.mrf.mxu0 }
 0x692   : > { %21979 = vst [vmem:[#allocation9_spill] sm:$0xff] %v18951_v1  ;;  %21980 = vst [vmem:[#allocation10_spill] sm:$0xff] %v18953_v19  ;;  %v18955_v54 = vadd.f32 %v14912_v30, %v14856_v11  ;;  %v18957_v7 = vadd.f32 %v14940_v17, %v14884_v59  ;;  %v16249_v11 = vld [vmem:[%s21911_s9 + $0x18] sm:$0xff]  }
 0x693   : > { %v18959_v43 = vpop.f32.mrf.mxu1  ;;  %v18961_v38 = vpop.f32.mrf.mxu0  ;;  %15128 = vmatpush3.bf16.msra.mxu0 %v16249_v11 }
 0x694   : > { %21981 = vst [vmem:[#allocation11_spill] sm:$0xff] %v18955_v54  ;;  %21982 = vst [vmem:[#allocation12_spill] sm:$0xff] %v18957_v7  ;;  %15129 = vmatprep.subr.bf16.mxu0 %v21971_v58  ;;  %v4618_v7 = vadd.f32 %v18943_v47, %v18919_v24  ;;  %v4747_v54 = vadd.f32 %v18945_v48, %v18921_v18  ;;  %v4634_v19 = vadd.f32 %v18959_v43, %v18923_v31 }
 0x695   : > { %v4763_v1 = vadd.f32 %v18961_v38, %v18925_v26 }
 0x697   : > { %15130 = vmatpush3.bf16.msra.mxu0 %v16251_v20  ;;  %v21989_v43 = vld [vmem:[#allocation7_spill] sm:$0xff] }
 0x698   : > { %15131 = vmatprep.subr.bf16.mxu0 %v21971_v58 }
 0x69d   : > { %v14959_v3 = vpop.f32.mrf.mxu1  ;;  %v14987_v60 = vpop.f32.mrf.mxu0 }
 0x69e   : > { %v18963_v8 = vadd.f32 %v14959_v3, %v4607_v41  ;;  %v18965_v16 = vadd.f32 %v14987_v60, %v4736_v10 }
 0x69f   : > { %v18970_v25 = vpop.f32.mrf.mxu1  ;;  %v18972_v53 = vpop.f32.mrf.mxu0 }
 0x6a0   : > { %21983 = vst [vmem:[#allocation13_spill] sm:$0xff] %v18963_v8  ;;  %21984 = vst [vmem:[#allocation14_spill] sm:$0xff] %v18965_v16  ;;  %v4602_v16 = vadd.f32 %v18931_v27, %v18915_v15  ;;  %v4731_v8 = vadd.f32 %v18933_v34, %v18917_v0  ;;  %v5110_v15 = vadd.f32 %v18970_v25, %v18927_v45  ;;  %v21990_v25 = vld [vmem:[#allocation8_spill] sm:$0xff] }
 0x6a1   : > { %v14960_v59 = vpop.f32.mrf.mxu1  ;;  %v14988_v32 = vpop.f32.mrf.mxu0  ;;  %v5122_v0 = vadd.f32 %v18972_v53, %v18929_v4  ;;  %v21991_v4 = vld [vmem:[#allocation9_spill] sm:$0xff] }
 0x6a2   : > { %v18978_v57 = vadd.f32 %v14960_v59, %v4610_v56  ;;  %v18980_v41 = vadd.f32 %v14988_v32, %v4739_v12  ;;  %v16253_v56 = vld [vmem:[%s21911_s9 + $0x8] sm:$0xff]  }
 0x6a3   : > { %v4922_v10 = vpop.f32.mrf.mxu1  ;;  %v5066_v62 = vpop.f32.mrf.mxu0  ;;  %15132 = vmatpush3.bf16.msra.mxu0 %v16253_v56 }
 0x6a4   : > { %21985 = vst [vmem:[#allocation15_spill] sm:$0xff] %v18978_v57  ;;  %21986 = vst [vmem:[#allocation16_spill] sm:$0xff] %v18980_v41  ;;  %15133 = vmatprep.subr.bf16.mxu0 %v21971_v58  ;;  %v5111_v27 = vadd.f32 %v4922_v10, %v4602_v16  ;;  %v5123_v34 = vadd.f32 %v5066_v62, %v4731_v8  ;;  %v21992_v10 = vld [vmem:[#allocation10_spill] sm:$0xff]  ;;  %v21993_v8 = vld [vmem:[#allocation11_spill] sm:$0xff] }
 0x6a5   : > { %v14963_v21 = vpop.f32.mrf.mxu1  ;;  %v14991_v44 = vpop.f32.mrf.mxu0 }
 0x6a6   : > { %v5116_v24 = vadd.f32 %v14963_v21, %v18935_v42  ;;  %v5128_v18 = vadd.f32 %v14991_v44, %v18937_v33  ;;  %v21994_v21 = vld [vmem:[#allocation12_spill] sm:$0xff] }
 0x6a7   : > { %v4935_v49 = vpop.f32.mrf.mxu1  ;;  %v5079_v9 = vpop.f32.mrf.mxu0 }
 0x6a8   : > { %v18986_v51 = vadd.f32 %v4935_v49, %v4615_v63  ;;  %v18988_v61 = vadd.f32 %v5079_v9, %v4744_v23 }
 0x6a9   : > { %v14964_v12 = vpop.f32.mrf.mxu1  ;;  %v14992_v13 = vpop.f32.mrf.mxu0 }
 0x6aa   : > { %21987 = vst [vmem:[#allocation17_spill] sm:$0xff] %v18986_v51  ;;  %21988 = vst [vmem:[#allocation18_spill] sm:$0xff] %v18988_v61  ;;  %v5117_v47 = vadd.f32 %v14964_v12, %v18939_v46  ;;  %v5129_v31 = vadd.f32 %v14992_v13, %v18941_v35  ;;  %v21995_v13 = vld [vmem:[#allocation13_spill] sm:$0xff] }
 0x6ab   : > { %v4938_v50 = vpop.f32.mrf.mxu1  ;;  %v5082_v28 = vpop.f32.mrf.mxu0 }
 0x6ac   : > { %v5115_v48 = vadd.f32 %v4938_v50, %v4618_v7  ;;  %v5127_v26 = vadd.f32 %v5082_v28, %v4747_v54  ;;  %v21996_v7 = vld [vmem:[#allocation14_spill] sm:$0xff] }
 0x6ad   : > { %v14967_v52 = vpop.f32.mrf.mxu1  ;;  %v14995_v40 = vpop.f32.mrf.mxu0 }
 0x6ae   : > { %v5120_v38 = vadd.f32 %v14967_v52, %v21989_v43  ;;  %v5132_v45 = vadd.f32 %v14995_v40, %v21990_v25  ;;  %v21997_v52 = vld [vmem:[#allocation15_spill] sm:$0xff]  ;;  %v21998_v43 = vld [vmem:[#allocation16_spill] sm:$0xff] }
 0x6af   : > { %v4951_v63 = vpop.f32.mrf.mxu1  ;;  %v5095_v22 = vpop.f32.mrf.mxu0 }
 0x6b0   : > { %v5118_v53 = vadd.f32 %v4951_v63, %v21991_v4  ;;  %v5130_v16 = vadd.f32 %v5095_v22, %v21992_v10 }
 0x6b1   : > { %v14968_v23 = vpop.f32.mrf.mxu1  ;;  %v14996_v30 = vpop.f32.mrf.mxu0 }
 0x6b2   : > { %v5121_v62 = vadd.f32 %v14968_v23, %v21993_v8  ;;  %v5133_v42 = vadd.f32 %v14996_v30, %v21994_v21  ;;  %v21999_v8 = vld [vmem:[#allocation17_spill] sm:$0xff] }
 0x6b3   : > { %v4954_v17 = vpop.f32.mrf.mxu1  ;;  %v5098_v3 = vpop.f32.mrf.mxu0 }
 0x6b4   : > { %v5119_v12 = vadd.f32 %v4954_v17, %v4634_v19  ;;  %v5131_v46 = vadd.f32 %v5098_v3, %v4763_v1  ;;  %v22000_v19 = vld [vmem:[#allocation18_spill] sm:$0xff] }
 0x6be   : > { %v15015_v60 = vpop.f32.mrf.mxu1  ;;  %v15043_v36 = vpop.f32.mrf.mxu0 }
 0x6bf   : > { %v5472_v35 = vadd.f32 %v15015_v60, %v21995_v13  ;;  %v5484_v54 = vadd.f32 %v15043_v36, %v21996_v7 }
 0x6c0   : > { %v5279_v11 = vpop.f32.mrf.mxu1  ;;  %v5423_v59 = vpop.f32.mrf.mxu0 }
 0x6c1   : > { %v5470_v50 = vadd.f32 %v5279_v11, %v5110_v15  ;;  %v5482_v28 = vadd.f32 %v5423_v59, %v5122_v0 }
 0x6c2   : > { %v15016_v32 = vpop.f32.mrf.mxu1  ;;  %v15044_v20 = vpop.f32.mrf.mxu0 }
 0x6c3   : > { %v5473_v40 = vadd.f32 %v15016_v32, %v21997_v52  ;;  %v5485_v63 = vadd.f32 %v15044_v20, %v21998_v43 }
 0x6c4   : > { %v5282_v49 = vpop.f32.mrf.mxu1  ;;  %v5426_v9 = vpop.f32.mrf.mxu0 }
 0x6c5   : > { %v5471_v4 = vadd.f32 %v5282_v49, %v5111_v27  ;;  %v5483_v23 = vadd.f32 %v5426_v9, %v5123_v34 }
 0x6c6   : > { %v15019_v14 = vpop.f32.mrf.mxu1  ;;  %v15047_v56 = vpop.f32.mrf.mxu0 }
 0x6c7   : > { %v5476_v10 = vadd.f32 %v15019_v14, %v5116_v24  ;;  %v5488_v30 = vadd.f32 %v15047_v56, %v5128_v18 }
 0x6c8   : > { %v5295_v29 = vpop.f32.mrf.mxu1  ;;  %v5439_v6 = vpop.f32.mrf.mxu0 }
 0x6c9   : > { %v5474_v21 = vadd.f32 %v5295_v29, %v21999_v8  ;;  %v5486_v1 = vadd.f32 %v5439_v6, %v22000_v19 }
 0x6ca   : > { %v15020_v39 = vpop.f32.mrf.mxu1  ;;  %v15048_v55 = vpop.f32.mrf.mxu0 }
 0x6cb   : > { %v5477_v11 = vadd.f32 %v15020_v39, %v5117_v47  ;;  %v5489_v59 = vadd.f32 %v15048_v55, %v5129_v31 }
 0x6cc   : > { %v5298_v58 = vpop.f32.mrf.mxu1  ;;  %v5442_v5 = vpop.f32.mrf.mxu0 }
 0x6cd   : > { %v5475_v32 = vadd.f32 %v5298_v58, %v5115_v48  ;;  %v5487_v20 = vadd.f32 %v5442_v5, %v5127_v26 }
 0x6ce   : > { %v15023_v61 = vpop.f32.mrf.mxu1  ;;  %v15051_v51 = vpop.f32.mrf.mxu0 }
 0x6cf   : > { %v19031_v15 = vadd.f32 %v15023_v61, %v5120_v38  ;;  %v19033_v49 = vadd.f32 %v15051_v51, %v5132_v45 }
 0x6d0   : > { %v5311_v41 = vpop.f32.mrf.mxu1  ;;  %v5455_v57 = vpop.f32.mrf.mxu0 }
 0x6d1   : > { %v19039_v56 = vadd.f32 %v5311_v41, %v5118_v53  ;;  %v19041_v0 = vadd.f32 %v5455_v57, %v5130_v16 }
 0x6d2   : > { %v15024_v37 = vpop.f32.mrf.mxu1  ;;  %v15052_v2 = vpop.f32.mrf.mxu0 }
 0x6d3   : > { %v19047_v58 = vadd.f32 %v15024_v37, %v5121_v62  ;;  %v19049_v5 = vadd.f32 %v15052_v2, %v5133_v42 }
 0x6d4   : > { %v5314_v33 = vpop.f32.mrf.mxu1  ;;  %v5458_v44 = vpop.f32.mrf.mxu0 }
 0x6d5   : > { %v19055_v47 = vadd.f32 %v5314_v33, %v5119_v12  ;;  %v19057_v31 = vadd.f32 %v5458_v44, %v5131_v46 }
 0x6df   : > { %v15071_v25 = vpop.f32.mrf.mxu1  ;;  %v15099_v22 = vpop.f32.mrf.mxu0 }
 0x6e0   : > { %v19027_v17 = vadd.f32 %v15071_v25, %v5472_v35  ;;  %v19029_v3 = vadd.f32 %v15099_v22, %v5484_v54 }
 0x6e1   : > { %v5639_v60 = vpop.f32.mrf.mxu1  ;;  %v5783_v36 = vpop.f32.mrf.mxu0 }
 0x6e2   : > { %v19035_v14 = vadd.f32 %v5639_v60, %v5470_v50  ;;  %v19037_v9 = vadd.f32 %v5783_v36, %v5482_v28  ;;  %v5856_v55 = vrot.slane %v19027_v17, 1  ;;  %v5892_v51 = vrot.slane %v19029_v3, 1 }
 0x6e3   : > { %v15072_v29 = vpop.f32.mrf.mxu1  ;;  %v15100_v6 = vpop.f32.mrf.mxu0 }
 0x6e4   : > { %v19043_v27 = vadd.f32 %v15072_v29, %v5473_v40  ;;  %v19045_v39 = vadd.f32 %v15100_v6, %v5485_v63  ;;  %v5854_v37 = vrot.slane %v19035_v14, 1  ;;  %v5890_v2 = vrot.slane %v19037_v9, 1 }
 0x6e5   : > { %v5642_v61 = vpop.f32.mrf.mxu1  ;;  %v5786_v34 = vpop.f32.mrf.mxu0 }
 0x6e6   : > { %v5857_v24 = vrot.slane %v19043_v27, 1  ;;  %v5893_v41 = vrot.slane %v19045_v39, 1  ;;  %v5831_v57 = vadd.f32 %v5642_v61, %v5471_v4  ;;  %v5843_v18 = vadd.f32 %v5786_v34, %v5483_v23 }
 0x6e7   : > { %v15075_v48 = vpop.f32.mrf.mxu1  ;;  %v15103_v26 = vpop.f32.mrf.mxu0 }
 0x6e8   : > { %v5874_v45 = vsel %vm1243_vm3, %v5856_v55, %v5857_v24  ;;  %v5910_v53 = vsel %vm1243_vm3, %v5892_v51, %v5893_v41  ;;  %v5855_v16 = vrot.slane %v5831_v57, 1  ;;  %v5891_v62 = vrot.slane %v5843_v18, 1 }
 0x6e9   : > { %v5880_v42 = vmax.f32 %v19027_v17, %v5874_v45  ;;  %v5916_v33 = vmax.f32 %v19029_v3, %v5910_v53  ;;  %v19067_v44 = vadd.f32 %v15075_v48, %v5476_v10  ;;  %v19069_v12 = vadd.f32 %v15103_v26, %v5488_v30  ;;  %v5655_v46 = vpop.f32.mrf.mxu1  ;;  %v5799_v13 = vpop.f32.mrf.mxu0  ;;  %v19090_v30 = vld [vmem:[%s21909_s7] ss:$0 sm:$0xff] }
 0x6ea   : > { %v5875_v35 = vsel %vm1243_vm3, %v5855_v16, %v5856_v55  ;;  %v5876_v7 = vsel %vm1243_vm3, %v5854_v37, %v5855_v16  ;;  %v5911_v54 = vsel %vm1243_vm3, %v5891_v62, %v5892_v51  ;;  %v5912_v50 = vsel %vm1243_vm3, %v5890_v2, %v5891_v62 }
 0x6eb   : > { %v5878_v28 = vmax.f32 %v19035_v14, %v5876_v7  ;;  %v5879_v52 = vmax.f32 %v5831_v57, %v5875_v35  ;;  %v5914_v40 = vmax.f32 %v19037_v9, %v5912_v50  ;;  %v5915_v43 = vmax.f32 %v5843_v18, %v5911_v54  ;;  %v15076_v63 = vpop.f32.mrf.mxu1  ;;  %v15104_v25 = vpop.f32.mrf.mxu0 }
 0x6ec   : > { %v5860_v22 = vrot.slane %v19067_v44, 1  ;;  %v5896_v4 = vrot.slane %v19069_v12, 1  ;;  %v5834_v23 = vadd.f32 %v5655_v46, %v5474_v21  ;;  %v5846_v10 = vadd.f32 %v5799_v13, %v5486_v1 }
 0x6ed   : > { %v19092_v8 = vmax.f32 %v5879_v52, %v5915_v43  ;;  %v19094_v19 = vadd.f32 %v15076_v63, %v5477_v11  ;;  %v19096_v17 = vadd.f32 %v15104_v25, %v5489_v59  ;;  %v5658_v3 = vpop.f32.mrf.mxu1  ;;  %v5802_v60 = vpop.f32.mrf.mxu0  ;;  %v5928_v36 = vmax.f32 %v5880_v42, %v5916_v33 }
 0x6ee   : > { %v5858_v29 = vrot.slane %v5834_v23, 1  ;;  %v5894_v6 = vrot.slane %v5846_v10, 1  ;;  %v5835_v55 = vadd.f32 %v5658_v3, %v5475_v32  ;;  %v5847_v51 = vadd.f32 %v5802_v60, %v5487_v20 }
 0x6ef   : > { %v5861_v21 = vrot.slane %v19094_v19, 1  ;;  %v5897_v1 = vrot.slane %v19096_v17, 1  ;;  %v15079_v61 = vpop.f32.mrf.mxu1  ;;  %v15107_v34 = vpop.f32.mrf.mxu0  ;;  %v19101_v57 = vadd.f32 %v19090_v30, %v5928_v36  ;;  %v19103_v11 = vmax.f32 %v5878_v28, %v5914_v40 }
 0x6f0   : > { %v19107_v59 = vsel %vm1243_vm3, %v5857_v24, %v5858_v29  ;;  %v19111_v18 = vsel %vm1243_vm3, %v5893_v41, %v5894_v6  ;;  %v5859_v32 = vrot.slane %v5835_v55, 1  ;;  %v5895_v20 = vrot.slane %v5847_v51, 1 }
 0x6f1   : > { %v5881_v48 = vmax.f32 %v19043_v27, %v19107_v59  ;;  %v5917_v26 = vmax.f32 %v19045_v39, %v19111_v18  ;;  %v5870_v45 = vsel %vm1243_vm3, %v5860_v22, %v5861_v21  ;;  %v5906_v53 = vsel %vm1243_vm3, %v5896_v4, %v5897_v1  ;;  %v5671_v24 = vpop.f32.mrf.mxu1  ;;  %v5815_v16 = vpop.f32.mrf.mxu0 }
 0x6f2   : > { %v5884_v62 = vmax.f32 %v19067_v44, %v5870_v45  ;;  %v5920_v41 = vmax.f32 %v19069_v12, %v5906_v53  ;;  %v5871_v42 = vsel %vm1243_vm3, %v5859_v32, %v5860_v22  ;;  %v5872_v27 = vsel %vm1243_vm3, %v5858_v29, %v5859_v32 }
 0x6f3   : > { %v5882_v33 = vmax.f32 %v5834_v23, %v5872_v27  ;;  %v5883_v39 = vmax.f32 %v5835_v55, %v5871_v42  ;;  %v5907_v46 = vsel %vm1243_vm3, %v5895_v20, %v5896_v4  ;;  %v5908_v13 = vsel %vm1243_vm3, %v5894_v6, %v5895_v20  ;;  %v15080_v35 = vpop.f32.mrf.mxu1  ;;  %v15108_v7 = vpop.f32.mrf.mxu0 }
 0x6f4   : > { %v5918_v54 = vmax.f32 %v5846_v10, %v5908_v13  ;;  %v5919_v44 = vmax.f32 %v5847_v51, %v5907_v46  ;;  %v5840_v12 = vadd.f32 %v15079_v61, %v19031_v15  ;;  %v5852_v50 = vadd.f32 %v15107_v34, %v19033_v49 }
 0x6f5   : > { %v5838_v28 = vadd.f32 %v5671_v24, %v19039_v56  ;;  %v5850_v52 = vadd.f32 %v5815_v16, %v19041_v0  ;;  %v5841_v40 = vadd.f32 %v15080_v35, %v19047_v58  ;;  %v5853_v43 = vadd.f32 %v15108_v7, %v19049_v5  ;;  %v5674_v63 = vpop.f32.mrf.mxu1  ;;  %v5818_v25 = vpop.f32.mrf.mxu0 }
 0x6f6   : > { %v5931_v22 = vmax.f32 %v5883_v39, %v5919_v44  ;;  %v5864_v4 = vrot.slane %v5840_v12, 1  ;;  %v5900_v23 = vrot.slane %v5852_v50, 1  ;;  %v5839_v10 = vadd.f32 %v5674_v63, %v19055_v47 }
 0x6f7   : > { %v5862_v3 = vrot.slane %v5838_v28, 1  ;;  %v5898_v60 = vrot.slane %v5850_v52, 1  ;;  %v5865_v15 = vrot.slane %v5841_v40, 1  ;;  %v5901_v36 = vrot.slane %v5853_v43, 1 }
 0x6f8   : > { %v5863_v49 = vrot.slane %v5839_v10, 1  ;;  %v5851_v56 = vadd.f32 %v5818_v25, %v19057_v31  ;;  %v5932_v29 = vmax.f32 %v5884_v62, %v5920_v41  ;;  %v5930_v0 = vmax.f32 %v5882_v33, %v5918_v54 }
 0x6f9   : > { %v5869_v58 = vsel %vm1243_vm3, %v5861_v21, %v5862_v3  ;;  %v5905_v5 = vsel %vm1243_vm3, %v5897_v1, %v5898_v60  ;;  %v5866_v6 = vsel %vm1243_vm3, %v5864_v4, %v5865_v15  ;;  %v5877_v47 = vsel %vm1243_vm3, %v5865_v15, %v5854_v37 }
 0x6fa   : > { %v5885_v55 = vmax.f32 %v19094_v19, %v5869_v58  ;;  %v5921_v31 = vmax.f32 %v19096_v17, %v5905_v5  ;;  %v5888_v51 = vmax.f32 %v5840_v12, %v5866_v6  ;;  %v5889_v61 = vmax.f32 %v5841_v40, %v5877_v47  ;;  %v16257_v58 = vld [vmem:[%s21911_s9 + $0x28] sm:$0xff]   ;;  %v16258_v47 = vld [vmem:[%s21911_s9 + $0x70] sm:$0xff]  }
 0x6fb   : > { %v5902_v21 = vsel %vm1243_vm3, %v5900_v23, %v5901_v36  ;;  %v5913_v1 = vsel %vm1243_vm3, %v5901_v36, %v5890_v2  ;;  %v5867_v14 = vsel %vm1243_vm3, %v5863_v49, %v5864_v4  ;;  %v5868_v37 = vsel %vm1243_vm3, %v5862_v3, %v5863_v49  ;;  %v16252_v49 = vld [vmem:[%s21911_s9 + $0x40] sm:$0xff]  }
 0x6fc   : > { %v5924_v34 = vmax.f32 %v5852_v50, %v5902_v21  ;;  %v5925_v19 = vmax.f32 %v5853_v43, %v5913_v1  ;;  %v5886_v59 = vmax.f32 %v5838_v28, %v5868_v37  ;;  %v5887_v17 = vmax.f32 %v5839_v10, %v5867_v14  ;;  %v16260_v21 = vld [vmem:[%s21911_s9 + $0x98] sm:$0xff]   ;;  %v16261_v14 = vld [vmem:[%s21911_s9 + $0x60] sm:$0xff]   ;;  %v16262_v37 = vld [vmem:[%s21911_s9 + $0x90] sm:$0xff]  }
 0x6fd   : > { %v5899_v18 = vrot.slane %v5851_v56, 1  ;;  %v5933_v32 = vmax.f32 %v5885_v55, %v5921_v31  ;;  %v5951_v20 = vadd.f32 %v19090_v30, %v5932_v29  ;;  %v5949_v45 = vadd.f32 %v19090_v30, %v5930_v0  ;;  %v16255_v29 = vld [vmem:[%s21911_s9] sm:$0xff]   ;;  %v16256_v0 = vld [vmem:[%s21911_s9 + $0x30] sm:$0xff]  }
 0x6fe   : > { %v5937_v9 = vmax.f32 %v5889_v61, %v5925_v19  ;;  %v5936_v53 = vmax.f32 %v5888_v51, %v5924_v34  ;;  %v5950_v2 = vadd.f32 %v19090_v30, %v5931_v22  ;;  %v5929_v24 = vmax.f32 %v5881_v48, %v5917_v26  ;;  %15134 = vmatpush3.bf16.msra.mxu0 %v16255_v29  ;;  %v16259_v61 = vld [vmem:[%s21911_s9 + $0x68] sm:$0xff]   ;;  %v16263_v34 = vld [vmem:[%s21911_s9 + $0x58] sm:$0xff]  }
 0x6ff   : > { %v5903_v16 = vsel %vm1243_vm3, %v5899_v18, %v5900_v23  ;;  %v5904_v62 = vsel %vm1243_vm3, %v5898_v60, %v5899_v18  ;;  %v5952_v41 = vadd.f32 %v19090_v30, %v5933_v32  ;;  %v5963_v42 = vmax.f32 %v5951_v20, 0.0  ;;  %v16264_v19 = vld [vmem:[%s21911_s9 + $0x88] sm:$0xff]   ;;  %v16267_v18 = vld [vmem:[%s21911_s9 + $0x78] sm:$0xff]  }
 0x700   : > { %v5922_v27 = vmax.f32 %v5850_v52, %v5904_v62  ;;  %v5923_v33 = vmax.f32 %v5851_v56, %v5903_v16  ;;  %v5955_v39 = vadd.f32 %v19090_v30, %v5936_v53  ;;  %v5956_v46 = vadd.f32 %v19090_v30, %v5937_v9  ;;  %v16254_v56 = vld [vmem:[%s21911_s9 + $0x38] sm:$0xff]   ;;  %v16574_v53 = vld [vmem:[%s21913_s11 + $0x10] sm:$0xff]   ;;  %v16578_v62 = vld [vmem:[%s21913_s11] sm:$0xff]  }
 0x701   : > { %v5964_v13 = vmax.f32 %v5952_v41, 0.0  ;;  %v5961_v35 = vmax.f32 %v5949_v45, 0.0  ;;  %v5962_v7 = vmax.f32 %v5950_v2, 0.0  ;;  %v5948_v48 = vadd.f32 %v19090_v30, %v5929_v24  ;;  %v22003_v20 = vld [vmem:[#allocation5_spill] sm:$0xff]  ;;  %v16576_v24 = vld [vmem:[%s21913_s11 + $0x8] sm:$0xff]   ;;  %v16577_v16 = vld [vmem:[%s21905_s3 + $0x30] sm:$0xff]  }
 0x702   : > { %v5935_v26 = vmax.f32 %v5887_v17, %v5923_v33  ;;  %v5967_v54 = vmax.f32 %v5955_v39, 0.0  ;;  %v5968_v44 = vmax.f32 %v5956_v46, 0.0  ;;  %v5934_v12 = vmax.f32 %v5886_v59, %v5922_v27  ;;  %v16265_v59 = vld [vmem:[%s21911_s9 + $0x50] sm:$0xff]   ;;  %v16266_v17 = vld [vmem:[%s21911_s9 + $0x80] sm:$0xff]   ;;  %v16575_v2 = vld [vmem:[%s21905_s3 + $0x38] sm:$0xff]  }
 0x703   : > { %v5972_v50 = vpack.c.bf16 %v5964_v13, %v5963_v42  ;;  %v5971_v28 = vpack.c.bf16 %v5962_v7, %v5961_v35  ;;  %v5959_v40 = vmax.f32 %v19101_v57, 0.0  ;;  %v5960_v43 = vmax.f32 %v5948_v48, 0.0  ;;  %v16579_v41 = vld [vmem:[%s21905_s3 + $0x28] sm:$0xff]   ;;  %v16580_v42 = vld [vmem:[%s21905_s3 + $0x20] sm:$0xff]   ;;  %v16581_v27 = vld [vmem:[%s21905_s3 + $0x18] sm:$0xff]  }
 0x704   : > { %v5974_v52 = vpack.c.bf16 %v5968_v44, %v5967_v54  ;;  %v5953_v63 = vadd.f32 %v19090_v30, %v5934_v12  ;;  %v5954_v25 = vadd.f32 %v19090_v30, %v5935_v26  ;;  %v5945_v22 = vadd.f32 %v19090_v30, %v19103_v11  ;;  %v16573_v11 = vld [vmem:[%s21910_s8 + $0x8] sm:$0xff]   ;;  %v16582_v33 = vld [vmem:[%s21905_s3 + $0x10] sm:$0xff]   ;;  %v16584_v46 = vld [vmem:[%s21905_s3] sm:$0xff]  }
 0x705   : > { %v5970_v4 = vpack.c.bf16 %v5960_v43, %v5959_v40  ;;  %v5946_v23 = vadd.f32 %v19090_v30, %v19092_v8  ;;  %v16250_v30 = vld [vmem:[%s21911_s9 + $0x48] sm:$0xff]   ;;  %v22002_v8 = vmov 0.0   ;;  %v22004_v9 = vmov 0   ;;  %v19319_v48 = vld [vmem:[%s16784_s19 + $0xd4] ss:$8 sps:$4 sm:$0xff]  }
 0x706   : > { %15109 = vmatprep.subr.bf16.mxu1 %v5974_v52  ;;  %v5965_v10 = vmax.f32 %v5953_v63, 0.0  ;;  %v5966_v3 = vmax.f32 %v5954_v25, 0.0  ;;  %v5957_v60 = vmax.f32 %v5945_v22, 0.0  ;;  %15153 = vmatprep.subr.bf16.mxu0 %v22002_v8  ;;  %v16583_v39 = vld [vmem:[%s21905_s3 + $0x8] sm:$0xff]   ;;  %v19322_v26 = vld [vmem:[%s16784_s19 + $0xd0] ss:$8 sps:$4 sm:$0xff]  }
 0x707   : > { %15110 = vmatpush3.bf16.msra.mxu1 %v5974_v52  ;;  %v5958_v15 = vmax.f32 %v5946_v23, 0.0  ;;  %v22005_v13 = vld [vmem:[#allocation3_spill] sm:$0xff]  ;;  %v19341_v12 = vld [vmem:[%s16784_s19 + $0xf4] ss:$8 sps:$4 sm:$0xff]   ;;  %v19366_v52 = vld [vmem:[%s16784_s19 + $0x110] ss:$8 sps:$4 sm:$0xff]  }
 0x708   : > { %v5973_v57 = vpack.c.bf16 %v5966_v3, %v5965_v10  ;;  %v19309_v35 = vld [vmem:[%s16784_s19 + $0xc0] ss:$8 sps:$4 sm:$0xff]   ;;  %v19312_v7 = vld [vmem:[%s16784_s19 + $0xc4] ss:$8 sps:$4 sm:$0xff]   ;;  %v19363_v43 = vld [vmem:[%s16784_s19 + $0x114] ss:$8 sps:$4 sm:$0xff]  }
 0x709   : > { %v5969_v36 = vpack.c.bf16 %v5958_v15, %v5957_v60  ;;  %v19330_v54 = vld [vmem:[%s16784_s19 + $0xe4] ss:$8 sps:$4 sm:$0xff]   ;;  %v19333_v44 = vld [vmem:[%s16784_s19 + $0xe0] ss:$8 sps:$4 sm:$0xff]   ;;  %v19381_v22 = vld [vmem:[%s16825_s16 + $0xd4] ss:$8 sps:$4 sm:$0xff]  }
 0x70a   : > { %15111 = vmatprep.subr.bf16.mxu1 %v5973_v57  ;;  %v19355_v40 = vld [vmem:[%s16784_s19 + $0x100] ss:$8 sps:$4 sm:$0xff]   ;;  %v19375_v25 = vld [vmem:[%s16825_s16 + $0xc4] ss:$8 sps:$4 sm:$0xff]   ;;  %v19399_v15 = vld [vmem:[%s16825_s16 + $0xf4] ss:$8 sps:$4 sm:$0xff]  }
 0x70b   : > { %15112 = vmatpush3.bf16.msra.mxu1 %v5973_v57  ;;  %v19372_v63 = vld [vmem:[%s16825_s16 + $0xc0] ss:$8 sps:$4 sm:$0xff]   ;;  %v19390_v23 = vld [vmem:[%s16825_s16 + $0xe4] ss:$8 sps:$4 sm:$0xff]   ;;  %v19402_v57 = vld [vmem:[%s16825_s16 + $0xf0] ss:$8 sps:$4 sm:$0xff]  }
 0x70c   : > { %15113 = vmatprep.subr.bf16.mxu1 %v5972_v50  ;;  %v19393_v10 = vld [vmem:[%s16825_s16 + $0xe0] ss:$8 sps:$4 sm:$0xff]  }
 0x70f   : > { %15114 = vmatpush3.bf16.msra.mxu1 %v5972_v50  ;;  %v19344_v50 = vld [vmem:[%s16784_s19 + $0xf0] ss:$8 sps:$4 sm:$0xff]  }
 0x710   : > { %15115 = vmatprep.subr.bf16.mxu1 %v5971_v28 }
 0x713   : > { %15116 = vmatpush3.bf16.msra.mxu1 %v5971_v28  ;;  %v19352_v28 = vld [vmem:[%s16784_s19 + $0x104] ss:$8 sps:$4 sm:$0xff]  }
 0x714   : > { %15117 = vmatprep.subr.bf16.mxu1 %v5970_v4 }
 0x717   : > { %15118 = vmatpush3.bf16.msra.mxu1 %v5970_v4  ;;  %v19384_v4 = vld [vmem:[%s16825_s16 + $0xd0] ss:$8 sps:$4 sm:$0xff]  }
 0x718   : > { %15119 = vmatprep.subr.bf16.mxu1 %v5969_v36 }
 0x71b   : > { %15120 = vmatpush3.bf16.msra.mxu1 %v5969_v36 }
 0x71c   : > { %15139 = vmatprep.subr.bf16.mxu1 %v22002_v8 }
 0x71e   : > { %15122 = vmatmul.mubr.msk.bf16.vlgmr.msra.gmra.mxu1 %vm3068_vm8, %v16573_v11 }
 0x71f   : > { %15140 = vmatpush3.bf16.msra.mxu1 %v16250_v30  ;;  %15149 = vmatprep.mubr.msk.bf16.mxu1 %vm16629_vm9, %v22002_v8 }
 0x720   : > { %15141 = vmatprep.subr.bf16.mxu1 %v22002_v8 }
 0x723   : > { %15142 = vmatpush3.bf16.msra.mxu1 %v16252_v49 }
 0x724   : > { %15143 = vmatprep.subr.bf16.mxu1 %v22002_v8 }
 0x727   : > { %15144 = vmatpush3.bf16.msra.mxu1 %v16254_v56 }
 0x728   : > { %15145 = vmatprep.subr.bf16.mxu1 %v22002_v8 }
 0x72b   : > { %15146 = vmatpush3.bf16.msra.mxu1 %v16256_v0  ;;  %v19408_v0 = vld [vmem:[%s16825_s16 + $0x104] ss:$8 sps:$4 sm:$0xff]  }
 0x72c   : > { %15147 = vmatprep.subr.bf16.mxu1 %v22002_v8 }
 0x72f   : > { %15148 = vmatpush3.bf16.msra.mxu1 %v16257_v58  ;;  %v19411_v58 = vld [vmem:[%s16825_s16 + $0x100] ss:$8 sps:$4 sm:$0xff]  }
 0x730   : > { %15167 = vmatprep.subr.bf16.mxu1 %v22002_v8 }
 0x7de   : > { %v15123_v5 = vpop.f32.mrf.mxu1 }
 0x7df   : > { %v6201_v32 = vpack.c.bf16 %v15123_v5, %v15123_v5  ;;  %v12964_v5 = vld [vmem:[%s21912_s10] ss:$0 sm:$0xff] }
 0x7e0   : > { %v6009_v6 = vpop.f32.mrf.mxu1 }
 0x7e1   : > { %v6025_v55 = vpack.c.bf16 %v6009_v6, %v6009_v6 }
 0x7e2   : > { %v15124_v31 = vpop.f32.mrf.mxu1 }
 0x7e3   : > { %15136 = vmatmul.mubr.msk.bf16.vlgmr.msra.gmra.mxu0 %vm3166_vm10, %v6025_v55  ;;  %v6286_v45 = vpack.c.bf16 %v15124_v31, %v15124_v31  ;;  %v19423_v55 = vld [vmem:[%s16825_s16 + $0x110] ss:$8 sps:$4 sm:$0xff]  }
 0x7e4   : > { %15154 = vmatpush3.bf16.msra.mxu0 %v16258_v47  ;;  %v6012_v51 = vpop.f32.mrf.mxu1  ;;  %15163 = vmatprep.mubr.msk.bf16.mxu0 %vm16629_vm9, %v22002_v8  ;;  %v19420_v47 = vld [vmem:[%s16825_s16 + $0x114] ss:$8 sps:$4 sm:$0xff]  }
 0x7e5   : > { %v6116_v1 = vpack.c.bf16 %v6012_v51, %v6012_v51  ;;  %15155 = vmatprep.subr.bf16.mxu0 %v22002_v8 }
 0x7e7   : > { %15150 = vmatmul.mubr.msk.bf16.vlgmr.msra.gmra.mxu1 %vm3166_vm10, %v6116_v1 }
 0x7e8   : > { %15156 = vmatpush3.bf16.msra.mxu0 %v16259_v61  ;;  %15168 = vmatpush3.bf16.msra.mxu1 %v16260_v21 }
 0x7e9   : > { %15157 = vmatprep.subr.bf16.mxu0 %v22002_v8  ;;  %15169 = vmatprep.subr.bf16.mxu1 %v22002_v8 }
 0x7ea   : > { %15177 = vmatprep.mubr.msk.bf16.mxu1 %vm16629_vm9, %v22002_v8 }
 0x7ec   : > { %15158 = vmatpush3.bf16.msra.mxu0 %v16261_v14  ;;  %15170 = vmatpush3.bf16.msra.mxu1 %v16262_v37 }
 0x7ed   : > { %15159 = vmatprep.subr.bf16.mxu0 %v22002_v8  ;;  %15171 = vmatprep.subr.bf16.mxu1 %v22002_v8 }
 0x7f0   : > { %15160 = vmatpush3.bf16.msra.mxu0 %v16263_v34  ;;  %15172 = vmatpush3.bf16.msra.mxu1 %v16264_v19 }
 0x7f1   : > { %15161 = vmatprep.subr.bf16.mxu0 %v22002_v8  ;;  %15173 = vmatprep.subr.bf16.mxu1 %v22002_v8 }
 0x7f4   : > { %15162 = vmatpush3.bf16.msra.mxu0 %v16265_v59  ;;  %15174 = vmatpush3.bf16.msra.mxu1 %v16266_v17 }
 0x7f5   : > { %15175 = vmatprep.subr.bf16.mxu1 %v22002_v8  ;;  %15181 = vmatprep.subr.bf16.mxu0 %v22002_v8 }
 0x7f7   : > { %15164 = vmatmul.mubr.msk.bf16.vlgmr.msra.gmra.mxu0 %vm3166_vm10, %v6201_v32 }
 0x7f8   : > { %15176 = vmatpush3.bf16.msra.mxu1 %v16267_v18  ;;  %15182 = vmatpush3.bf16.msra.mxu0 %v22003_v20 }
 0x7f9   : > { %15183 = vmatprep.subr.bf16.mxu0 %v22002_v8  ;;  %6613 = vmatprep.subr.bf16.mxu1 %v22004_v9 }
 0x7fa   : > { %15189 = vmatprep.mubr.msk.bf16.mxu0 %vm16629_vm9, %v22002_v8 }
 0x7fb   : > { %15178 = vmatmul.mubr.msk.bf16.vlgmr.msra.gmra.mxu1 %vm3166_vm10, %v6286_v45  ;;  %v16585_v45 = vld [vmem:[%s21904_s2 + $0x38] sm:$0xff]  }
 0x7fc   : > { %15184 = vmatpush3.bf16.msra.mxu0 %v16574_v53  ;;  %6614 = vmatpush1.bf16.msra.mxu1 %v16575_v2  ;;  %v16586_v53 = vld [vmem:[%s21904_s2 + $0x30] sm:$0xff]  }
 0x7fd   : > { %15185 = vmatprep.subr.bf16.mxu0 %v22002_v8  ;;  %6615 = vmatprep.subr.bf16.mxu1 %v22004_v9 }
 0x7fe   : > { %13033 = vmatprep.mubr.msk.bf16.mxu1 %vm651_vm0, %v19312_v7 }
 0x800   : > { %15186 = vmatpush3.bf16.msra.mxu0 %v16576_v24  ;;  %6616 = vmatpush1.bf16.msra.mxu1 %v16577_v16  ;;  %v16588_v24 = vld [vmem:[%s21904_s2 + $0x20] sm:$0xff]  }
 0x801   : > { %15187 = vmatprep.subr.bf16.mxu0 %v22002_v8  ;;  %6617 = vmatprep.subr.bf16.mxu1 %v22004_v9 }
 0x804   : > { %15188 = vmatpush3.bf16.msra.mxu0 %v16578_v62  ;;  %6618 = vmatpush1.bf16.msra.mxu1 %v16579_v41  ;;  %v16590_v62 = vld [vmem:[%s21904_s2 + $0x10] sm:$0xff]  }
 0x805   : > { %6532 = vmatprep.subr.bf16.mxu0 %v22004_v9  ;;  %6619 = vmatprep.subr.bf16.mxu1 %v22004_v9 }
 0x808   : > { %6620 = vmatpush1.bf16.msra.mxu1 %v16580_v42 }
 0x809   : > { %6621 = vmatprep.subr.bf16.mxu1 %v22004_v9 }
 0x80c   : > { %6622 = vmatpush1.bf16.msra.mxu1 %v16581_v27 }
 0x80d   : > { %6623 = vmatprep.subr.bf16.mxu1 %v22004_v9 }
 0x810   : > { %6624 = vmatpush1.bf16.msra.mxu1 %v16582_v33 }
 0x811   : > { %6625 = vmatprep.subr.bf16.mxu1 %v22004_v9 }
 0x814   : > { %6626 = vmatpush1.bf16.msra.mxu1 %v16583_v39 }
 0x815   : > { %6627 = vmatprep.subr.bf16.mxu1 %v22004_v9 }
 0x818   : > { %6628 = vmatpush1.bf16.msra.mxu1 %v16584_v46 }
 0x819   : > { %6643 = vmatprep.subr.bf16.mxu1 %v22004_v9 }
 0x81c   : > { %6644 = vmatpush2.bf16.msra.mxu1 %v22005_v13 }
 0x81d   : > { %6871 = vmatprep.subr.bf16.mxu1 %v22004_v9 }
 0x81f   : > { %6646 = vmatmul.mubr.bf16.vlgmr.msra.gmra.mxu1 %v19309_v35 }
 0x820   : > { %6872 = vmatpush1.bf16.msra.mxu1 %v16575_v2  ;;  %13034 = vmatprep.mubr.msk.bf16.mxu1 %vm651_vm0, %v19319_v48  ;;  %v16587_v2 = vld [vmem:[%s21904_s2 + $0x28] sm:$0xff]  }
 0x821   : > { %6873 = vmatprep.subr.bf16.mxu1 %v22004_v9 }
 0x824   : > { %6874 = vmatpush1.bf16.msra.mxu1 %v16577_v16  ;;  %v16589_v16 = vld [vmem:[%s21904_s2 + $0x18] sm:$0xff]  }
 0x825   : > { %6875 = vmatprep.subr.bf16.mxu1 %v22004_v9 }
 0x827   : > { %6654 = vmatmul.mubr.bf16.gmra.mxu1 %v19322_v26 }
 0x828   : > { %6876 = vmatpush1.bf16.msra.mxu1 %v16579_v41  ;;  %13035 = vmatprep.mubr.msk.bf16.mxu1 %vm651_vm0, %v19330_v54  ;;  %v16591_v41 = vld [vmem:[%s21904_s2 + $0x8] sm:$0xff]  }
 0x829   : > { %6877 = vmatprep.subr.bf16.mxu1 %v22004_v9 }
 0x82c   : > { %6878 = vmatpush1.bf16.msra.mxu1 %v16580_v42  ;;  %v16592_v42 = vld [vmem:[%s21904_s2] sm:$0xff]  }
 0x82d   : > { %6879 = vmatprep.subr.bf16.mxu1 %v22004_v9 }
 0x82f   : > { %6662 = vmatmul.mubr.bf16.gmra.mxu1 %v19333_v44 }
 0x830   : > { %6880 = vmatpush1.bf16.msra.mxu1 %v16581_v27  ;;  %13036 = vmatprep.mubr.msk.bf16.mxu1 %vm651_vm0, %v19341_v12  ;;  %v22006_v27 = vld [vmem:[#allocation2_spill] sm:$0xff] }
 0x831   : > { %6881 = vmatprep.subr.bf16.mxu1 %v22004_v9 }
 0x834   : > { %6882 = vmatpush1.bf16.msra.mxu1 %v16582_v33 }
 0x835   : > { %6883 = vmatprep.subr.bf16.mxu1 %v22004_v9 }
 0x837   : > { %6670 = vmatmul.mubr.bf16.gmra.mxu1 %v19344_v50 }
 0x838   : > { %6884 = vmatpush1.bf16.msra.mxu1 %v16583_v39  ;;  %13037 = vmatprep.mubr.msk.bf16.mxu1 %vm651_vm0, %v19352_v28 }
 0x839   : > { %6885 = vmatprep.subr.bf16.mxu1 %v22004_v9 }
 0x83c   : > { %6886 = vmatpush1.bf16.msra.mxu1 %v16584_v46 }
 0x83d   : > { %6901 = vmatprep.subr.bf16.mxu1 %v22004_v9 }
 0x83f   : > { %6678 = vmatmul.mubr.bf16.gmra.mxu1 %v19355_v40 }
 0x840   : > { %6902 = vmatpush2.bf16.msra.mxu1 %v22005_v13  ;;  %13038 = vmatprep.mubr.msk.bf16.mxu1 %vm651_vm0, %v19363_v43 }
 0x847   : > { %6686 = vmatmul.mubr.bf16.gmra.mxu1 %v19366_v52 }
 0x848   : > { %13057 = vmatprep.mubr.msk.bf16.mxu1 %vm651_vm0, %v19375_v25 }
 0x84f   : > { %6904 = vmatmul.mubr.bf16.vlgmr.msra.gmra.mxu1 %v19372_v63 }
 0x850   : > { %13058 = vmatprep.mubr.msk.bf16.mxu1 %vm651_vm0, %v19381_v22 }
 0x857   : > { %6912 = vmatmul.mubr.bf16.gmra.mxu1 %v19384_v4 }
 0x858   : > { %13059 = vmatprep.mubr.msk.bf16.mxu1 %vm651_vm0, %v19390_v23 }
 0x85f   : > { %6920 = vmatmul.mubr.bf16.gmra.mxu1 %v19393_v10 }
 0x860   : > { %13060 = vmatprep.mubr.msk.bf16.mxu1 %vm651_vm0, %v19399_v15 }
 0x867   : > { %6928 = vmatmul.mubr.bf16.gmra.mxu1 %v19402_v57 }
 0x868   : > { %13061 = vmatprep.mubr.msk.bf16.mxu1 %vm651_vm0, %v19408_v0 }
 0x86f   : > { %6936 = vmatmul.mubr.bf16.gmra.mxu1 %v19411_v58 }
 0x870   : > { %13062 = vmatprep.mubr.msk.bf16.mxu1 %vm651_vm0, %v19420_v47 }
 0x877   : > { %6944 = vmatmul.mubr.bf16.gmra.mxu1 %v19423_v55 }
 0x8a3   : > { %v6103_v3 = vpop.f32.mrf.mxu0 }
 0x8a4   : > { %v6115_v6 = vadd.f32 %v12964_v5, %v6103_v3 }
 0x8a5   : > { %v15137_v60 = vpop.f32.mrf.mxu0 }
 0x8a7   : > { %v6106_v36 = vpop.f32.mrf.mxu0  ;;  %v6194_v30 = vpop.f32.mrf.mxu1 }
 0x8a8   : > { %v6200_v51 = vadd.f32 %v6194_v30, %v6115_v6 }
 0x8a9   : > { %v15138_v11 = vpop.f32.mrf.mxu0  ;;  %v15151_v49 = vpop.f32.mrf.mxu1 }
 0x8aa   : > { %v16306_v11 = vld [vmem:[%s21907_s5 + $0x6c] sm:$0xff]  }
 0x8ab   : > { %v6197_v56 = vpop.f32.mrf.mxu1  ;;  %v16307_v49 = vld [vmem:[%s21908_s6 + $0x6c] sm:$0xff]  }
 0x8ad   : > { %v15152_v29 = vpop.f32.mrf.mxu1 }
 0x8b7   : > { %v6279_v31 = vpop.f32.mrf.mxu0 }
 0x8b8   : > { %v6285_v21 = vadd.f32 %v6279_v31, %v6200_v51  ;;  %v16310_v31 = vld [vmem:[%s21907_s5 + $0x5c] sm:$0xff]  }
 0x8b9   : > { %v15165_v61 = vpop.f32.mrf.mxu0  ;;  %v16311_v51 = vld [vmem:[%s21908_s6 + $0x5c] sm:$0xff]  }
 0x8bb   : > { %v6282_v1 = vpop.f32.mrf.mxu0  ;;  %v6364_v14 = vpop.f32.mrf.mxu1 }
 0x8bc   : > { %v6370_v37 = vadd.f32 %v6364_v14, %v6285_v21  ;;  %v16312_v1 = vld [vmem:[%s21907_s5 + $0x54] sm:$0xff]  }
 0x8bd   : > { %v15166_v34 = vpop.f32.mrf.mxu0  ;;  %v15179_v19 = vpop.f32.mrf.mxu1  ;;  %v16313_v14 = vld [vmem:[%s21908_s6 + $0x54] sm:$0xff]  }
 0x8be   : > { %v6371_v59 = vmax.f32 %v6370_v37, 0.0  ;;  %v3556_v19 = vpop.xlane.xlu0 %3555 }
 0x8bf   : > { %v6367_v17 = vpop.f32.mrf.mxu1 }
 0x8c0   : > { %v6372_v18 = vpack.c.bf16 %v6371_v59, %v6371_v59 }
 0x8c1   : > { %v15180_v32 = vpop.f32.mrf.mxu1 }
 0x8c2   : > { %15190 = vmatmul.mubr.msk.bf16.vlgmr.msra.gmra.mxu0 %vm3505_vm12, %v6372_v18  ;;  %v16314_v18 = vld [vmem:[%s21907_s5 + $0x4c] sm:$0xff]  }
 0x8c3   : > { %6533 = vmatpush1.bf16.msra.mxu0 %v16585_v45  ;;  %13027 = vmatprep.mubr.msk.bf16.mxu0 %vm651_vm0, %v19312_v7  ;;  %v16315_v32 = vld [vmem:[%s21908_s6 + $0x4c] sm:$0xff]  }
 0x8c4   : > { %6534 = vmatprep.subr.bf16.mxu0 %v22004_v9 }
 0x8c7   : > { %6535 = vmatpush1.bf16.msra.mxu0 %v16586_v53 }
 0x8c8   : > { %6536 = vmatprep.subr.bf16.mxu0 %v22004_v9 }
 0x8cb   : > { %6537 = vmatpush1.bf16.msra.mxu0 %v16587_v2 }
 0x8cc   : > { %6538 = vmatprep.subr.bf16.mxu0 %v22004_v9 }
 0x8cf   : > { %6539 = vmatpush1.bf16.msra.mxu0 %v16588_v24 }
 0x8d0   : > { %6540 = vmatprep.subr.bf16.mxu0 %v22004_v9 }
 0x8d3   : > { %6541 = vmatpush1.bf16.msra.mxu0 %v16589_v16 }
 0x8d4   : > { %6542 = vmatprep.subr.bf16.mxu0 %v22004_v9 }
 0x8d7   : > { %6543 = vmatpush1.bf16.msra.mxu0 %v16590_v62 }
 0x8d8   : > { %6544 = vmatprep.subr.bf16.mxu0 %v22004_v9 }
 0x8db   : > { %6545 = vmatpush1.bf16.msra.mxu0 %v16591_v41 }
 0x8dc   : > { %6546 = vmatprep.subr.bf16.mxu0 %v22004_v9 }
 0x8df   : > { %6547 = vmatpush1.bf16.msra.mxu0 %v16592_v42  ;;  %v19498_v33 = vpop.f32.mrf.mxu1 }
 0x8e0   : > { %6562 = vmatprep.subr.bf16.mxu0 %v22004_v9 }
 0x8e1   : > { %v6649_v39 = vpop.f32.mrf.mxu1 }
 0x8e2   : > { %v16319_v39 = vld [vmem:[%s21908_s6 + $0x3c] sm:$0xff]  }
 0x8e3   : > { %6563 = vmatpush2.bf16.msra.mxu0 %v22006_v27  ;;  %v19503_v46 = vpop.f32.mrf.mxu1 }
 0x8e4   : > { %6778 = vmatprep.subr.bf16.mxu0 %v22004_v9 }
 0x8e6   : > { %6565 = vmatmul.mubr.bf16.vlgmr.msra.gmra.mxu0 %v19309_v35  ;;  %v6652_v35 = vpop.f32.mrf.mxu1 }
 0x8e7   : > { %6779 = vmatpush1.bf16.msra.mxu0 %v16585_v45  ;;  %13028 = vmatprep.mubr.msk.bf16.mxu0 %vm651_vm0, %v19319_v48  ;;  %v22007_v45 = vld [vmem:[#allocation6_spill] sm:$0xff] }
 0x8e8   : > { %6780 = vmatprep.subr.bf16.mxu0 %v22004_v9  ;;  %v19505_v7 = vpop.f32.mrf.mxu1 }
 0x8ea   : > { %v6657_v48 = vpop.f32.mrf.mxu1 }
 0x8eb   : > { %6781 = vmatpush1.bf16.msra.mxu0 %v16586_v53  ;;  %v19585_v53 = vsub.f32 %v22007_v45, %v3556_v19 }
 0x8ec   : > { %6782 = vmatprep.subr.bf16.mxu0 %v22004_v9 }
 0x8ee   : > { %6573 = vmatmul.mubr.bf16.gmra.mxu0 %v19322_v26  ;;  %v19510_v26 = vpop.f32.mrf.mxu1 }
 0x8ef   : > { %6783 = vmatpush1.bf16.msra.mxu0 %v16587_v2  ;;  %13029 = vmatprep.mubr.msk.bf16.mxu0 %vm651_vm0, %v19330_v54 }
 0x8f0   : > { %6784 = vmatprep.subr.bf16.mxu0 %v22004_v9  ;;  %v6660_v54 = vpop.f32.mrf.mxu1 }
 0x8f3   : > { %6785 = vmatpush1.bf16.msra.mxu0 %v16588_v24  ;;  %v16316_v24 = vld [vmem:[%s21907_s5 + $0x44] sm:$0xff]  }
 0x8f4   : > { %6786 = vmatprep.subr.bf16.mxu0 %v22004_v9 }
 0x8f6   : > { %6581 = vmatmul.mubr.bf16.gmra.mxu0 %v19333_v44  ;;  %v19512_v44 = vpop.f32.mrf.mxu1 }
 0x8f7   : > { %13030 = vmatprep.mubr.msk.bf16.mxu0 %vm651_vm0, %v19341_v12  ;;  %6787 = vmatpush1.bf16.msra.mxu0 %v16589_v16  ;;  %v16317_v16 = vld [vmem:[%s21908_s6 + $0x44] sm:$0xff]  }
 0x8f8   : > { %6788 = vmatprep.subr.bf16.mxu0 %v22004_v9  ;;  %v6665_v12 = vpop.f32.mrf.mxu1 }
 0x8fb   : > { %6789 = vmatpush1.bf16.msra.mxu0 %v16590_v62 }
 0x8fc   : > { %6790 = vmatprep.subr.bf16.mxu0 %v22004_v9 }
 0x8fe   : > { %6589 = vmatmul.mubr.bf16.gmra.mxu0 %v19344_v50  ;;  %v19517_v50 = vpop.f32.mrf.mxu1 }
 0x8ff   : > { %13031 = vmatprep.mubr.msk.bf16.mxu0 %vm651_vm0, %v19352_v28  ;;  %6791 = vmatpush1.bf16.msra.mxu0 %v16591_v41  ;;  %v3558_v41 = vmul.f32 1.442695, %v19585_v53 }
 0x900   : > { %6792 = vmatprep.subr.bf16.mxu0 %v22004_v9  ;;  %v6668_v28 = vpop.f32.mrf.mxu1 }
 0x901   : > { %16540 = vpow2.f32 %v3558_v41  ;;  %v19609_v28 = vld [vmem:[%s21907_s5 + $0x38] ss:$0 sps:$4 sm:$0xff]  }
 0x903   : > { %6793 = vmatpush1.bf16.msra.mxu0 %v16592_v42  ;;  %v16318_v42 = vld [vmem:[%s21907_s5 + $0x3c] sm:$0xff]  }
 0x904   : > { %6808 = vmatprep.subr.bf16.mxu0 %v22004_v9 }
 0x906   : > { %6597 = vmatmul.mubr.bf16.gmra.mxu0 %v19355_v40  ;;  %v19519_v40 = vpop.f32.mrf.mxu1 }
 0x907   : > { %13032 = vmatprep.mubr.msk.bf16.mxu0 %vm651_vm0, %v19363_v43  ;;  %6809 = vmatpush2.bf16.msra.mxu0 %v22006_v27 }
 0x908   : > { %v6673_v43 = vpop.f32.mrf.mxu1 }
 0x909   : > { %v19614_v43 = vld [vmem:[%s21908_s6 + $0x38] ss:$0 sps:$4 sm:$0xff]  }
 0x90e   : > { %6605 = vmatmul.mubr.bf16.gmra.mxu0 %v19366_v52  ;;  %v19522_v52 = vpop.f32.mrf.mxu1 }
 0x90f   : > { %13051 = vmatprep.mubr.msk.bf16.mxu0 %vm651_vm0, %v19375_v25 }
 0x916   : > { %6811 = vmatmul.mubr.bf16.vlgmr.msra.gmra.mxu0 %v19372_v63  ;;  %v6676_v63 = vpop.f32.mrf.mxu1 }
 0x917   : > { %13052 = vmatprep.mubr.msk.bf16.mxu0 %vm651_vm0, %v19381_v22 }
 0x918   : > { %v19524_v25 = vpop.f32.mrf.mxu1 }
 0x91a   : > { %v6681_v22 = vpop.f32.mrf.mxu1 }
 0x91b   : > { %v13013_v22 = vld [vmem:[%s21914_s12] ss:$0 sm:$0xff] }
 0x91e   : > { %6819 = vmatmul.mubr.bf16.gmra.mxu0 %v19384_v4  ;;  %v19526_v4 = vpop.f32.mrf.mxu1 }
 0x91f   : > { %13053 = vmatprep.mubr.msk.bf16.mxu0 %vm651_vm0, %v19390_v23  ;;  %v16304_v23 = vld [vmem:[%s21907_s5 + $0x74] ss:$0 sps:$4 sm:$0xff]  }
 0x920   : > { %v6684_v3 = vpop.f32.mrf.mxu1  ;;  %15941 = vmatprep.subr.msk.bf16.mxu0 %vm1342_vm2, %v16304_v23  ;;  %v7140_v60 = vsel %vm1342_vm2, %v16304_v23, 0 }
 0x921   : > { %15194 = vmatpush3.bf16.msra.mxu0 %v7140_v60 }
 0x922   : > { %15195 = vmatprep.subr.bf16.mxu0 %v16306_v11 }
 0x925   : > { %15196 = vmatpush3.bf16.msra.mxu0 %v16306_v11 }
 0x926   : > { %6827 = vmatmul.mubr.bf16.gmra.mxu0 %v19393_v10  ;;  %v16305_v10 = vld [vmem:[%s21908_s6 + $0x74] ss:$0 sps:$4 sm:$0xff]  }
 0x927   : > { %13054 = vmatprep.mubr.msk.bf16.mxu0 %vm651_vm0, %v19399_v15  ;;  %15942 = vmatprep.subr.msk.bf16.mxu1 %vm1342_vm2, %v16305_v10  ;;  %v7284_v15 = vsel %vm1342_vm2, %v16305_v10, 0 }
 0x928   : > { %15222 = vmatpush3.bf16.msra.mxu1 %v7284_v15 }
 0x929   : > { %15223 = vmatprep.subr.bf16.mxu1 %v16307_v49 }
 0x92c   : > { %15224 = vmatpush3.bf16.msra.mxu1 %v16307_v49  ;;  %v16541_v49 = vpop.eup %16540 }
 0x92e   : > { %6835 = vmatmul.mubr.bf16.gmra.mxu0 %v19402_v57  ;;  %v19538_v57 = vpop.f32.mrf.mxu1 }
 0x92f   : > { %13055 = vmatprep.mubr.msk.bf16.mxu0 %vm651_vm0, %v19408_v0  ;;  %v16308_v0 = vld [vmem:[%s21907_s5 + $0x64] sm:$0xff]  }
 0x930   : > { %v6689_v36 = vpop.f32.mrf.mxu1  ;;  %15197 = vmatprep.subr.bf16.mxu0 %v16308_v0 }
 0x931   : > { %15198 = vmatpush3.bf16.msra.mxu0 %v16308_v0 }
 0x932   : > { %v19540_v30 = vpop.f32.mrf.mxu1  ;;  %15199 = vmatprep.subr.bf16.mxu0 %v16310_v31 }
 0x934   : > { %v6692_v56 = vpop.f32.mrf.mxu1 }
 0x935   : > { %15200 = vmatpush3.bf16.msra.mxu0 %v16310_v31 }
 0x936   : > { %6843 = vmatmul.mubr.bf16.gmra.mxu0 %v19411_v58  ;;  %v19548_v29 = vpop.f32.mrf.mxu1  ;;  %v16309_v58 = vld [vmem:[%s21908_s6 + $0x64] sm:$0xff]   ;;  %15201 = vmatprep.subr.bf16.mxu0 %v16312_v1 }
 0x937   : > { %13056 = vmatprep.mubr.msk.bf16.mxu0 %vm651_vm0, %v19420_v47  ;;  %15225 = vmatprep.subr.bf16.mxu1 %v16309_v58 }
 0x938   : > { %v6907_v5 = vpop.f32.mrf.mxu1  ;;  %15226 = vmatpush3.bf16.msra.mxu1 %v16309_v58 }
 0x939   : > { %15227 = vmatprep.subr.bf16.mxu1 %v16311_v51  ;;  %15202 = vmatpush3.bf16.msra.mxu0 %v16312_v1 }
 0x93a   : > { %v19556_v6 = vpop.f32.mrf.mxu1  ;;  %15203 = vmatprep.subr.bf16.mxu0 %v16314_v18 }
 0x93c   : > { %v6910_v47 = vpop.f32.mrf.mxu1  ;;  %15228 = vmatpush3.bf16.msra.mxu1 %v16311_v51 }
 0x93d   : > { %15229 = vmatprep.subr.bf16.mxu1 %v16313_v14  ;;  %15204 = vmatpush3.bf16.msra.mxu0 %v16314_v18  ;;  %v3560_v47 = vsel %vm3553_vm13, %v16541_v49, 0.0 }
 0x93e   : > { %6851 = vmatmul.mubr.bf16.gmra.mxu0 %v19423_v55  ;;  %v19558_v55 = vpop.f32.mrf.mxu1  ;;  %15205 = vmatprep.subr.bf16.mxu0 %v16316_v24 }
 0x940   : > { %v6915_v61 = vpop.f32.mrf.mxu1  ;;  %15230 = vmatpush3.bf16.msra.mxu1 %v16313_v14 }
 0x941   : > { %15231 = vmatprep.subr.bf16.mxu1 %v16315_v32  ;;  %15206 = vmatpush3.bf16.msra.mxu0 %v16316_v24 }
 0x942   : > { %v19566_v21 = vpop.f32.mrf.mxu1  ;;  %15207 = vmatprep.subr.bf16.mxu0 %v16318_v42 }
 0x944   : > { %v6918_v37 = vpop.f32.mrf.mxu1  ;;  %15232 = vmatpush3.bf16.msra.mxu1 %v16315_v32 }
 0x945   : > { %15233 = vmatprep.subr.bf16.mxu1 %v16317_v16  ;;  %15208 = vmatpush3.bf16.msra.mxu0 %v16318_v42 }
 0x946   : > { %v19574_v34 = vpop.f32.mrf.mxu1  ;;  %15943 = vmatprep.subr.msk.bf16.mxu0 %vm1342_vm2, %v19609_v28 }
 0x948   : > { %v6923_v59 = vpop.f32.mrf.mxu1  ;;  %15234 = vmatpush3.bf16.msra.mxu1 %v16317_v16 }
 0x949   : > { %15235 = vmatprep.subr.bf16.mxu1 %v16319_v39 }
 0x94a   : > { %v19576_v17 = vpop.f32.mrf.mxu1 }
 0x94c   : > { %v6926_v2 = vpop.f32.mrf.mxu1  ;;  %15236 = vmatpush3.bf16.msra.mxu1 %v16319_v39 }
 0x94d   : > { %15944 = vmatprep.subr.msk.bf16.mxu1 %vm1342_vm2, %v19614_v43 }
 0x94e   : > { %v19593_v62 = vpop.f32.mrf.mxu1 }
 0x950   : > { %v6931_v35 = vpop.f32.mrf.mxu1 }
 0x952   : > { %v19602_v48 = vpop.f32.mrf.mxu1 }
 0x954   : > { %v6934_v54 = vpop.f32.mrf.mxu1 }
 0x956   : > { %v19604_v12 = vpop.f32.mrf.mxu1 }
 0x958   : > { %v6939_v63 = vpop.f32.mrf.mxu1 }
 0x95a   : > { %v19623_v23 = vpop.f32.mrf.mxu1 }
 0x95c   : > { %v6942_v3 = vpop.f32.mrf.mxu1 }
 0x95e   : > { %v19627_v36 = vpop.f32.mrf.mxu1 }
 0x960   : > { %v6947_v0 = vpop.f32.mrf.mxu1 }
 0x962   : > { %v19631_v5 = vpop.f32.mrf.mxu1 }
 0x964   : > { %v6950_v31 = vpop.f32.mrf.mxu1 }
 0x982   : > { %v6417_v10 = vpop.f32.mrf.mxu0 }
 0x983   : > { %v19625_v60 = vadd.f32 %v13013_v22, %v6417_v10 }
 0x984   : > { %v15191_v15 = vpop.f32.mrf.mxu0 }
 0x985   : > { %22008 = vst [vmem:[#allocation7_spill] sm:$0xff] %v19625_v60  ;;  %v6423_v11 = vsel %vm3553_vm13, %v19625_v60, -inf }
 0x986   : > { %6424 = vmax.xlane.f32.xlu0 %v6423_v11  ;;  %v6420_v56 = vpop.f32.mrf.mxu0 }
 0x988   : > { %v15192_v58 = vpop.f32.mrf.mxu0 }
 0x98a   : > { %3561 = vadd.xlane.f32.xlu0 %v3560_v47 }
 0x9a6   : > { %v6566_v51 = vpop.f32.mrf.mxu0 }
 0x9a7   : > { %v6694_v49 = vmax.f32 %v6566_v51, %v19498_v33 }
 0x9a8   : > { %v6568_v61 = vpop.f32.mrf.mxu0 }
 0x9a9   : > { %v19654_v61 = vld [vmem:[%s21906_s4] ss:$0 sm:$0xff] }
 0x9aa   : > { %v6569_v1 = vpop.f32.mrf.mxu0 }
 0x9ab   : > { %v6695_v47 = vmax.f32 %v6569_v1, %v19503_v46 }
 0x9ac   : > { %v6571_v14 = vpop.f32.mrf.mxu0 }
 0x9ae   : > { %v6574_v37 = vpop.f32.mrf.mxu0 }
 0x9b0   : > { %v6576_v19 = vpop.f32.mrf.mxu0 }
 0x9b2   : > { %v6577_v59 = vpop.f32.mrf.mxu0 }
 0x9b4   : > { %v6579_v18 = vpop.f32.mrf.mxu0 }
 0x9b6   : > { %v6582_v32 = vpop.f32.mrf.mxu0 }
 0x9b8   : > { %v6584_v45 = vpop.f32.mrf.mxu0 }
 0x9ba   : > { %v19634_v2 = vpop.f32.mrf.mxu0 }
 0x9bc   : > { %v6587_v24 = vpop.f32.mrf.mxu0 }
 0x9bd   : > { %v6696_v24 = vmax.f32 %v6574_v37, %v19505_v7 }
 0x9be   : > { %v19636_v16 = vpop.f32.mrf.mxu0 }
 0x9c0   : > { %v6592_v41 = vpop.f32.mrf.mxu0 }
 0x9c2   : > { %v19638_v42 = vpop.f32.mrf.mxu0 }
 0x9c4   : > { %v6595_v39 = vpop.f32.mrf.mxu0 }
 0x9c5   : > { %v6697_v39 = vmax.f32 %v6577_v59, %v19510_v26 }
 0x9c6   : > { %v19640_v35 = vpop.f32.mrf.mxu0 }
 0x9c8   : > { %v6600_v54 = vpop.f32.mrf.mxu0 }
 0x9ca   : > { %v19642_v63 = vpop.f32.mrf.mxu0 }
 0x9cc   : > { %v6603_v22 = vpop.f32.mrf.mxu0 }
 0x9ce   : > { %v19644_v10 = vpop.f32.mrf.mxu0 }
 0x9d0   : > { %v6608_v3 = vpop.f32.mrf.mxu0 }
 0x9d2   : > { %v19646_v15 = vpop.f32.mrf.mxu0 }
 0x9d4   : > { %v6611_v11 = vpop.f32.mrf.mxu0 }
 0x9d6   : > { %v6812_v56 = vpop.f32.mrf.mxu0 }
 0x9d7   : > { %v6859_v0 = vmax.f32 %v6694_v49, %v6812_v56 }
 0x9d8   : > { %v6814_v58 = vpop.f32.mrf.mxu0 }
 0x9d9   : > { %v6952_v31 = vmax.f32 %v6859_v0, %v19548_v29  ;;  %v6698_v58 = vmax.f32 %v6582_v32, %v19512_v44 }
 0x9da   : > { %v6815_v14 = vpop.f32.mrf.mxu0 }
 0x9db   : > { %v6860_v19 = vmax.f32 %v6695_v47, %v6815_v14  ;;  %v6971_v18 = vadd.f32 %v19654_v61, %v6952_v31 }
 0x9dc   : > { %v6817_v45 = vpop.f32.mrf.mxu0 }
 0x9dd   : > { %v6953_v33 = vmax.f32 %v6860_v19, %v19556_v6  ;;  %v19660_v1 = vmax.f32 %v6971_v18, 0.0 }
 0x9de   : > { %v6820_v51 = vpop.f32.mrf.mxu0 }
 0x9df   : > { %v6972_v41 = vadd.f32 %v19654_v61, %v6953_v33  ;;  %v6861_v46 = vmax.f32 %v6696_v24, %v6820_v51  ;;  %v8003_v6 = vrot.slane %v19660_v1, 3  ;;  %v8363_v56 = vrot.slane %v19660_v1, 4 }
 0x9e0   : > { %v6822_v29 = vpop.f32.mrf.mxu0  ;;  %v7031_v32 = vrot.slane %v19660_v1, 1 }
 0x9e1   : > { %v19663_v54 = vmax.f32 %v6972_v41, 0.0  ;;  %v6954_v22 = vmax.f32 %v6861_v46, %v19558_v55  ;;  %v6699_v29 = vmax.f32 %v19634_v2, %v19517_v50 }
 0x9e2   : > { %v6823_v3 = vpop.f32.mrf.mxu0 }
 0x9e3   : > { %v6973_v11 = vadd.f32 %v19654_v61, %v6954_v22  ;;  %v6862_v49 = vmax.f32 %v6697_v39, %v6823_v3  ;;  %v8004_v37 = vrot.slane %v19663_v54, 3  ;;  %v8364_v0 = vrot.slane %v19663_v54, 4 }
 0x9e4   : > { %v6825_v7 = vpop.f32.mrf.mxu0  ;;  %v7032_v55 = vrot.slane %v19663_v54, 1 }
 0x9e5   : > { %v19672_v26 = vmax.f32 %v6973_v11, 0.0  ;;  %v6955_v59 = vmax.f32 %v6862_v49, %v19566_v21  ;;  %v8025_v31 = vsel %vm2223_vm4, %v8003_v6, %v8004_v37  ;;  %v8385_v14 = vsel %vm2586_vm5, %v8363_v56, %v8364_v0 }
 0x9e6   : > { %v6828_v47 = vpop.f32.mrf.mxu0  ;;  %v7053_v46 = vsel %vm1243_vm3, %v7031_v32, %v7032_v55 }
 0x9e7   : > { %v6974_v19 = vadd.f32 %v19654_v61, %v6955_v59  ;;  %v6863_v44 = vmax.f32 %v6698_v58, %v6828_v47  ;;  %v7033_v21 = vrot.slane %v19672_v26, 1  ;;  %v8005_v45 = vrot.slane %v19672_v26, 3 }
 0x9e8   : > { %v6830_v18 = vpop.f32.mrf.mxu0  ;;  %v8365_v24 = vrot.slane %v19672_v26, 4 }
 0x9e9   : > { %v19689_v33 = vmax.f32 %v6974_v19, 0.0  ;;  %v6956_v51 = vmax.f32 %v6863_v44, %v19574_v34  ;;  %v7052_v41 = vsel %vm1243_vm3, %v7032_v55, %v7033_v21  ;;  %v8024_v3 = vsel %vm2223_vm4, %v8004_v37, %v8005_v45 }
 0x9ea   : > { %v6831_v39 = vpop.f32.mrf.mxu0  ;;  %v7055_v22 = vpack.c.bf16 %v7052_v41, %v7053_v46  ;;  %v8384_v11 = vsel %vm2586_vm5, %v8364_v0, %v8365_v24  ;;  %v6700_v34 = vmax.f32 %v19636_v16, %v19519_v40  ;;  %v19711_v50 = vpack.c.bf16 %v8024_v3, %v8025_v31 }
 0x9eb   : > { %v8006_v49 = vrot.slane %v19689_v33, 3  ;;  %v8366_v7 = vrot.slane %v19689_v33, 4  ;;  %v6975_v58 = vadd.f32 %v19654_v61, %v6956_v51  ;;  %v6864_v59 = vmax.f32 %v6699_v29, %v6831_v39 }
 0x9ec   : > { %v6833_v55 = vpop.f32.mrf.mxu0  ;;  %15209 = vmatprep.mubr.msk.bf16.mxu0 %vm1323_vm6, %v7055_v22  ;;  %15237 = vmatprep.mubr.msk.bf16.mxu1 %vm1323_vm6, %v7055_v22  ;;  %v7034_v2 = vrot.slane %v19689_v33, 1  ;;  %v7646_v37 = vrot.slane %v19689_v33, 2  ;;  %v19717_v16 = vpack.c.bf16 %v8384_v11, %v8385_v14  ;;  %v7431_v44 = vsel %vm1342_vm2, %v19609_v28, 0 }
 0x9ed   : > { %v8023_v40 = vsel %vm2223_vm4, %v8005_v45, %v8006_v49  ;;  %v19719_v0 = vmax.f32 %v6975_v58, 0.0  ;;  %v6957_v47 = vmax.f32 %v6864_v59, %v19576_v17  ;;  %v8383_v31 = vsel %vm2586_vm5, %v8365_v24, %v8366_v7  ;;  %v16322_v55 = vld [vmem:[%s21907_s5 + $0x30] sm:$0xff]  }
 0x9ee   : > { %v6836_v19 = vpop.f32.mrf.mxu0  ;;  %v6701_v18 = vmax.f32 %v19638_v42, %v19522_v52  ;;  %v7560_v45 = vsel %vm1342_vm2, %v19614_v43, 0  ;;  %v7645_v14 = vrot.slane %v19672_v26, 2  ;;  %v7051_v52 = vsel %vm1243_vm3, %v7033_v21, %v7034_v2 }
 0x9ef   : > { %v6865_v51 = vmax.f32 %v6700_v34, %v6836_v19  ;;  %v7035_v41 = vrot.slane %v19719_v0, 1  ;;  %v7647_v17 = vrot.slane %v19719_v0, 2  ;;  %v8007_v46 = vrot.slane %v19719_v0, 3 }
 0x9f0   : > { %v8367_v28 = vrot.slane %v19719_v0, 4  ;;  %v6838_v29 = vpop.f32.mrf.mxu0  ;;  %v6976_v24 = vadd.f32 %v19654_v61, %v6957_v47  ;;  %v7663_v43 = vsel %vm1860_vm7, %v7645_v14, %v7646_v37  ;;  %v6702_v19 = vmax.f32 %v19640_v35, %v19524_v25  ;;  %v16325_v35 = vld [vmem:[%s21908_s6 + $0x28] sm:$0xff]  }
 0x9f1   : > { %v6958_v42 = vmax.f32 %v6865_v51, %v19593_v62  ;;  %v7050_v39 = vsel %vm1243_vm3, %v7034_v2, %v7035_v41  ;;  %v7662_v3 = vsel %vm1860_vm7, %v7646_v37, %v7647_v17  ;;  %v8022_v11 = vsel %vm2223_vm4, %v8006_v49, %v8007_v46  ;;  %v16323_v2 = vld [vmem:[%s21908_s6 + $0x30] sm:$0xff]  }
 0x9f2   : > { %v6839_v22 = vpop.f32.mrf.mxu0  ;;  %v8382_v62 = vsel %vm2586_vm5, %v8366_v7, %v8367_v28  ;;  %v19755_v21 = vmax.f32 %v6976_v24, 0.0  ;;  %v7056_v34 = vpack.c.bf16 %v7050_v39, %v7051_v52  ;;  %v19764_v37 = vpack.c.bf16 %v7662_v3, %v7663_v43 }
 0x9f3   : > { %v6977_v58 = vadd.f32 %v19654_v61, %v6958_v42  ;;  %v6866_v59 = vmax.f32 %v6701_v18, %v6839_v22  ;;  %v19766_v47 = vpack.c.bf16 %v8022_v11, %v8023_v40  ;;  %v19768_v7 = vpack.c.bf16 %v8382_v62, %v8383_v31 }
 0x9f4   : > { %v6841_v49 = vpop.f32.mrf.mxu0  ;;  %15210 = vmatmul.mubr.msk.bf16.vlgmr.msra.gmra.mxu0 %vm1323_vm6, %v7056_v34  ;;  %15238 = vmatmul.mubr.msk.bf16.vlgmr.msra.gmra.mxu1 %vm1323_vm6, %v7056_v34  ;;  %v7036_v29 = vrot.slane %v19755_v21, 1  ;;  %v8008_v40 = vrot.slane %v19755_v21, 3 }
 0x9f5   : > { %v19772_v51 = vmax.f32 %v6977_v58, 0.0  ;;  %v6959_v18 = vmax.f32 %v6866_v59, %v19602_v48  ;;  %15250 = vmatpush3.bf16.msra.mxu0 %v7431_v44  ;;  %15278 = vmatpush3.bf16.msra.mxu1 %v7560_v45  ;;  %v16324_v48 = vld [vmem:[%s21907_s5 + $0x28] sm:$0xff]   ;;  %v6703_v44 = vmax.f32 %v19642_v63, %v19526_v4  ;;  %v16327_v59 = vld [vmem:[%s21908_s6 + $0x20] sm:$0xff]  }
 0x9f6   : > { %v6844_v24 = vpop.f32.mrf.mxu0  ;;  %15251 = vmatprep.subr.bf16.mxu0 %v16322_v55  ;;  %15279 = vmatprep.subr.bf16.mxu1 %v16323_v2  ;;  %v7049_v42 = vsel %vm1243_vm3, %v7035_v41, %v7036_v29  ;;  %v8021_v39 = vsel %vm2223_vm4, %v8007_v46, %v8008_v40  ;;  %v8368_v41 = vrot.slane %v19755_v21, 4 }
 0x9f7   : > { %v6978_v31 = vadd.f32 %v19654_v61, %v6959_v18  ;;  %v6867_v52 = vmax.f32 %v6702_v19, %v6844_v24  ;;  %v7037_v25 = vrot.slane %v19772_v51, 1  ;;  %v8009_v43 = vrot.slane %v19772_v51, 3 }
 0x9f8   : > { %v6846_v45 = vpop.f32.mrf.mxu0  ;;  %v8369_v62 = vrot.slane %v19772_v51, 4 }
 0x9f9   : > { %v19794_v22 = vmax.f32 %v6978_v31, 0.0  ;;  %v6960_v3 = vmax.f32 %v6867_v52, %v19604_v12  ;;  %v7048_v11 = vsel %vm1243_vm3, %v7036_v29, %v7037_v25  ;;  %15252 = vmatpush3.bf16.msra.mxu0 %v16322_v55  ;;  %15280 = vmatpush3.bf16.msra.mxu1 %v16323_v2  ;;  %v8020_v63 = vsel %vm2223_vm4, %v8008_v40, %v8009_v43  ;;  %v16326_v12 = vld [vmem:[%s21907_s5 + $0x20] sm:$0xff]  }
 0x9fa   : > { %v6847_v34 = vpop.f32.mrf.mxu0  ;;  %v7057_v4 = vpack.c.bf16 %v7048_v11, %v7049_v42  ;;  %15253 = vmatprep.subr.bf16.mxu0 %v16324_v48  ;;  %15281 = vmatprep.subr.bf16.mxu1 %v16325_v35  ;;  %v6704_v55 = vmax.f32 %v19644_v10, %v19538_v57  ;;  %v19814_v49 = vpack.c.bf16 %v8020_v63, %v8021_v39 }
 0x9fb   : > { %v6979_v46 = vadd.f32 %v19654_v61, %v6960_v3  ;;  %v6868_v58 = vmax.f32 %v6703_v44, %v6847_v34  ;;  %v8010_v19 = vrot.slane %v19794_v22, 3  ;;  %v7038_v24 = vrot.slane %v19794_v22, 1 }
 0x9fc   : > { %v6849_v2 = vpop.f32.mrf.mxu0  ;;  %15213 = vmatprep.mubr.msk.bf16.mxu0 %vm1323_vm6, %v7057_v4  ;;  %15241 = vmatprep.mubr.msk.bf16.mxu1 %vm1323_vm6, %v7057_v4  ;;  %v8380_v40 = vsel %vm2586_vm5, %v8368_v41, %v8369_v62  ;;  %v8381_v10 = vsel %vm2586_vm5, %v8367_v28, %v8368_v41  ;;  %v8370_v52 = vrot.slane %v19794_v22, 4  ;;  %v16329_v28 = vld [vmem:[%s21908_s6 + $0x18] sm:$0xff]  }
 0x9fd   : > { %v19817_v18 = vmax.f32 %v6979_v46, 0.0  ;;  %v6961_v29 = vmax.f32 %v6868_v58, %v19623_v23  ;;  %15254 = vmatpush3.bf16.msra.mxu0 %v16324_v48  ;;  %15282 = vmatpush3.bf16.msra.mxu1 %v16325_v35  ;;  %v8019_v57 = vsel %vm2223_vm4, %v8009_v43, %v8010_v19  ;;  %v6705_v23 = vmax.f32 %v19646_v15, %v19540_v30  ;;  %v16328_v35 = vld [vmem:[%s21907_s5 + $0x18] sm:$0xff]  }
 0x9fe   : > { %v6852_v31 = vpop.f32.mrf.mxu0  ;;  %15255 = vmatprep.subr.bf16.mxu0 %v16326_v12  ;;  %15283 = vmatprep.subr.bf16.mxu1 %v16327_v59  ;;  %v19841_v39 = vpack.c.bf16 %v8380_v40, %v8381_v10  ;;  %v8379_v15 = vsel %vm2586_vm5, %v8369_v62, %v8370_v52  ;;  %v7047_v4 = vsel %vm1243_vm3, %v7037_v25, %v7038_v24  ;;  %v16331_v25 = vld [vmem:[%s21908_s6 + $0x10] sm:$0xff]  }
 0x9ff   : > { %v6980_v44 = vadd.f32 %v19654_v61, %v6961_v29  ;;  %v6869_v45 = vmax.f32 %v6704_v55, %v6852_v31  ;;  %v7039_v48 = vrot.slane %v19817_v18, 1  ;;  %v8011_v43 = vrot.slane %v19817_v18, 3 }
 0xa00   : > { %v6854_v42 = vpop.f32.mrf.mxu0  ;;  %v8371_v30 = vrot.slane %v19817_v18, 4 }
 0xa01   : > { %v19846_v3 = vmax.f32 %v6980_v44, 0.0  ;;  %v6962_v11 = vmax.f32 %v6869_v45, %v19627_v36  ;;  %v7046_v34 = vsel %vm1243_vm3, %v7038_v24, %v7039_v48  ;;  %15256 = vmatpush3.bf16.msra.mxu0 %v16326_v12  ;;  %15284 = vmatpush3.bf16.msra.mxu1 %v16327_v59  ;;  %v8018_v46 = vsel %vm2223_vm4, %v8010_v19, %v8011_v43  ;;  %v16330_v36 = vld [vmem:[%s21907_s5 + $0x10] sm:$0xff]  }
 0xa02   : > { %v6855_v63 = vpop.f32.mrf.mxu0  ;;  %v7058_v41 = vpack.c.bf16 %v7046_v34, %v7047_v4  ;;  %15257 = vmatprep.subr.bf16.mxu0 %v16328_v35  ;;  %15285 = vmatprep.subr.bf16.mxu1 %v16329_v28  ;;  %v19864_v12 = vpack.c.bf16 %v8018_v46, %v8019_v57  ;;  %v8378_v2 = vsel %vm2586_vm5, %v8370_v52, %v8371_v30  ;;  %v16334_v34 = vld [vmem:[%s21907_s5] sm:$0xff]  }
 0xa03   : > { %v6981_v58 = vadd.f32 %v19654_v61, %v6962_v11  ;;  %v6870_v62 = vmax.f32 %v6705_v23, %v6855_v63  ;;  %v8012_v59 = vrot.slane %v19846_v3, 3  ;;  %v7040_v24 = vrot.slane %v19846_v3, 1  ;;  %v16333_v23 = vld [vmem:[%s21908_s6 + $0x8] sm:$0xff]  }
 0xa04   : > { %v6857_v55 = vpop.f32.mrf.mxu0  ;;  %15214 = vmatmul.mubr.msk.bf16.gmra.mxu0 %vm1323_vm6, %v7058_v41  ;;  %15242 = vmatmul.mubr.msk.bf16.gmra.mxu1 %vm1323_vm6, %v7058_v41  ;;  %v19873_v40 = vpack.c.bf16 %v8378_v2, %v8379_v15  ;;  %v8372_v57 = vrot.slane %v19846_v3, 4 }
 0xa05   : > { %v19869_v19 = vmax.f32 %v6981_v58, 0.0  ;;  %v6963_v29 = vmax.f32 %v6870_v62, %v19631_v5  ;;  %15258 = vmatpush3.bf16.msra.mxu0 %v16328_v35  ;;  %15286 = vmatpush3.bf16.msra.mxu1 %v16329_v28  ;;  %v8017_v31 = vsel %vm2223_vm4, %v8011_v43, %v8012_v59  ;;  %v16332_v5 = vld [vmem:[%s21907_s5 + $0x8] sm:$0xff]   ;;  %v7045_v42 = vsel %vm1243_vm3, %v7039_v48, %v7040_v24  ;;  %v16335_v48 = vld [vmem:[%s21908_s6] sm:$0xff]  }
 0xa06   : > { %15259 = vmatprep.subr.bf16.mxu0 %v16330_v36  ;;  %15287 = vmatprep.subr.bf16.mxu1 %v16331_v25  ;;  %v8377_v35 = vsel %vm2586_vm5, %v8371_v30, %v8372_v57 }
 0xa07   : > { %v6982_v10 = vadd.f32 %v19654_v61, %v6963_v29  ;;  %v7041_v52 = vrot.slane %v19869_v19, 1  ;;  %v8013_v44 = vrot.slane %v19869_v19, 3  ;;  %v8373_v45 = vrot.slane %v19869_v19, 4 }
 0xa09   : > { %v19890_v61 = vmax.f32 %v6982_v10, 0.0  ;;  %v7044_v28 = vsel %vm1243_vm3, %v7040_v24, %v7041_v52  ;;  %v8016_v43 = vsel %vm2223_vm4, %v8012_v59, %v8013_v44  ;;  %15260 = vmatpush3.bf16.msra.mxu0 %v16330_v36  ;;  %15288 = vmatpush3.bf16.msra.mxu1 %v16331_v25  ;;  %v8376_v63 = vsel %vm2586_vm5, %v8372_v57, %v8373_v45  ;;  %v16336_v59 = vld [vmem:[%s21907_s5 + $0xb0] ss:$0 sps:$4 sm:$0xff]  }
 0xa0a   : > { %v7059_v15 = vpack.c.bf16 %v7044_v28, %v7045_v42  ;;  %v19898_v11 = vpack.c.bf16 %v8016_v43, %v8017_v31  ;;  %15261 = vmatprep.subr.bf16.mxu0 %v16332_v5  ;;  %15289 = vmatprep.subr.bf16.mxu1 %v16333_v23  ;;  %v6995_v36 = vpack.c.bf16 %v19663_v54, %v19660_v1  ;;  %v16342_v42 = vld [vmem:[%s21907_s5 + $0x98] sm:$0xff]  }
 0xa0b   : > { %v7042_v30 = vrot.slane %v19890_v61, 1  ;;  %v8014_v4 = vrot.slane %v19890_v61, 3  ;;  %v8374_v41 = vrot.slane %v19890_v61, 4  ;;  %v19935_v29 = vpack.c.bf16 %v8376_v63, %v8377_v35  ;;  %v16341_v35 = vld [vmem:[%s21908_s6 + $0xa0] sm:$0xff]   ;;  %v16343_v43 = vld [vmem:[%s21908_s6 + $0x98] sm:$0xff]  }
 0xa0c   : > { %15217 = vmatprep.mubr.msk.bf16.mxu0 %vm1323_vm6, %v7059_v15  ;;  %15245 = vmatprep.mubr.msk.bf16.mxu1 %vm1323_vm6, %v7059_v15  ;;  %v6998_v28 = vpack.c.bf16 %v19794_v22, %v19772_v51  ;;  %v6999_v15 = vpack.c.bf16 %v19846_v3, %v19817_v18  ;;  %v7644_v63 = vrot.slane %v19663_v54, 2  ;;  %v7000_v54 = vpack.c.bf16 %v19890_v61, %v19869_v19 }
 0xa0d   : > { %v7043_v46 = vsel %vm1243_vm3, %v7041_v52, %v7042_v30  ;;  %v7054_v58 = vsel %vm1243_vm3, %v7042_v30, %v7031_v32  ;;  %15262 = vmatpush3.bf16.msra.mxu0 %v16332_v5  ;;  %15290 = vmatpush3.bf16.msra.mxu1 %v16333_v23  ;;  %v8015_v25 = vsel %vm2223_vm4, %v8013_v44, %v8014_v4  ;;  %v16337_v32 = vld [vmem:[%s21908_s6 + $0xb0] ss:$0 sps:$4 sm:$0xff]   ;;  %v16338_v23 = vld [vmem:[%s21907_s5 + $0xa8] sm:$0xff]  }
 0xa0e   : > { %v7060_v62 = vpack.c.bf16 %v7054_v58, %v7043_v46  ;;  %15263 = vmatprep.subr.bf16.mxu0 %v16334_v34  ;;  %15291 = vmatprep.subr.bf16.mxu1 %v16335_v48  ;;  %v8026_v2 = vsel %vm2223_vm4, %v8014_v4, %v8003_v6  ;;  %v8375_v24 = vsel %vm2586_vm5, %v8373_v45, %v8374_v41  ;;  %v7896_v5 = vsel %vm1342_vm2, %v16337_v32, 0  ;;  %v16339_v44 = vld [vmem:[%s21908_s6 + $0xa8] sm:$0xff]   ;;  %v16340_v45 = vld [vmem:[%s21907_s5 + $0xa0] sm:$0xff]  }
 0xa0f   : > { %v19923_v55 = vpop.xlane.xlu0 %6424  ;;  %v19941_v31 = vpack.c.bf16 %v8026_v2, %v8015_v25  ;;  %v8386_v57 = vsel %vm2586_vm5, %v8374_v41, %v8363_v56  ;;  %v6996_v52 = vpack.c.bf16 %v19689_v33, %v19672_v26  ;;  %v7752_v56 = vsel %vm1342_vm2, %v16336_v59, 0  ;;  %v16347_v26 = vld [vmem:[%s21908_s6 + $0x88] sm:$0xff]   ;;  %v16349_v25 = vld [vmem:[%s21908_s6 + $0x80] sm:$0xff]  }
 0xa10   : > { %22009 = vst [vmem:[#allocation8_spill] sm:$0xff] %v19923_v55  ;;  %15218 = vmatmul.mubr.msk.bf16.gmra.mxu0 %vm1323_vm6, %v7060_v62  ;;  %15246 = vmatmul.mubr.msk.bf16.gmra.mxu1 %vm1323_vm6, %v7060_v62  ;;  %v19949_v6 = vpack.c.bf16 %v8386_v57, %v8375_v24  ;;  %v6997_v33 = vpack.c.bf16 %v19755_v21, %v19719_v0  ;;  %v7643_v46 = vrot.slane %v19660_v1, 2  ;;  %v16346_v62 = vld [vmem:[%s21907_s5 + $0x88] sm:$0xff]   ;;  %v7649_v2 = vrot.slane %v19772_v51, 2 }
 0xa11   : > { %15265 = vmatprep.mubr.msk.bf16.mxu0 %vm1323_vm6, %v6995_v36  ;;  %15293 = vmatprep.mubr.msk.bf16.mxu1 %vm1323_vm6, %v6995_v36  ;;  %v7664_v58 = vsel %vm1860_vm7, %v7644_v63, %v7645_v14  ;;  %v16348_v36 = vld [vmem:[%s21907_s5 + $0x80] sm:$0xff]   ;;  %v16352_v24 = vld [vmem:[%s21907_s5 + $0xec] ss:$0 sps:$4 sm:$0xff]   ;;  %v7653_v0 = vrot.slane %v19869_v19, 2 }
 0xa12   : > { %15264 = vmatpush3.bf16.msra.mxu0 %v16334_v34  ;;  %15292 = vmatpush3.bf16.msra.mxu1 %v16335_v48  ;;  %v16344_v34 = vld [vmem:[%s21907_s5 + $0x90] sm:$0xff]   ;;  %v16353_v57 = vld [vmem:[%s21908_s6 + $0xec] ss:$0 sps:$4 sm:$0xff]   ;;  %v16357_v19 = vld [vmem:[%s21908_s6 + $0xdc] sm:$0xff]  }
 0xa13   : > { %v3562_v10 = vpop.xlane.xlu0 %3561  ;;  %15945 = vmatprep.subr.msk.bf16.mxu0 %vm1342_vm2, %v16336_v59  ;;  %15946 = vmatprep.subr.msk.bf16.mxu1 %vm1342_vm2, %v16337_v32  ;;  %v16345_v48 = vld [vmem:[%s21908_s6 + $0x90] sm:$0xff]   ;;  %v16350_v59 = vld [vmem:[%s21907_s5 + $0x78] sm:$0xff]   ;;  %v16362_v1 = vld [vmem:[%s21907_s5 + $0xc4] sm:$0xff]  }
 0xa14   : > { %16542 = vlog2.f32 %v3562_v10  ;;  %v16351_v32 = vld [vmem:[%s21908_s6 + $0x78] sm:$0xff]   ;;  %v7648_v10 = vrot.slane %v19755_v21, 2  ;;  %v16354_v21 = vld [vmem:[%s21907_s5 + $0xe4] sm:$0xff]  }
 0xa16   : > { %v7661_v51 = vsel %vm1860_vm7, %v7647_v17, %v7648_v10  ;;  %v7650_v17 = vrot.slane %v19794_v22, 2 }
 0xa18   : > { %15266 = vmatmul.mubr.msk.bf16.vlgmr.msra.gmra.mxu0 %vm1323_vm6, %v6996_v52  ;;  %15294 = vmatmul.mubr.msk.bf16.vlgmr.msra.gmra.mxu1 %vm1323_vm6, %v6996_v52  ;;  %v7660_v52 = vsel %vm1860_vm7, %v7648_v10, %v7649_v2  ;;  %v16381_v10 = vld [vmem:[%s21908_s6 + $0xf8] sm:$0xff]  }
 0xa19   : > { %15306 = vmatpush3.bf16.msra.mxu0 %v7752_v56  ;;  %15334 = vmatpush3.bf16.msra.mxu1 %v7896_v5  ;;  %v7669_v56 = vpack.c.bf16 %v7660_v52, %v7661_v51  ;;  %v8112_v5 = vsel %vm1342_vm2, %v16352_v24, 0 }
 0xa1a   : > { %15269 = vmatprep.mubr.msk.bf16.mxu0 %vm1323_vm6, %v6997_v33  ;;  %15297 = vmatprep.mubr.msk.bf16.mxu1 %vm1323_vm6, %v6997_v33  ;;  %v7651_v33 = vrot.slane %v19817_v18, 2 }
 0xa1b   : > { %15307 = vmatprep.subr.bf16.mxu0 %v16338_v23  ;;  %15335 = vmatprep.subr.bf16.mxu1 %v16339_v44 }
 0xa1c   : > { %v7658_v18 = vsel %vm1860_vm7, %v7650_v17, %v7651_v33 }
 0xa1d   : > { %15308 = vmatpush3.bf16.msra.mxu0 %v16338_v23  ;;  %15336 = vmatpush3.bf16.msra.mxu1 %v16339_v44  ;;  %v8256_v23 = vsel %vm1342_vm2, %v16353_v57, 0  ;;  %v16355_v44 = vld [vmem:[%s21908_s6 + $0xe4] sm:$0xff]  }
 0xa1e   : > { %15309 = vmatprep.subr.bf16.mxu0 %v16340_v45  ;;  %15337 = vmatprep.subr.bf16.mxu1 %v16341_v35 }
 0xa20   : > { %15270 = vmatmul.mubr.msk.bf16.gmra.mxu0 %vm1323_vm6, %v6998_v28  ;;  %15298 = vmatmul.mubr.msk.bf16.gmra.mxu1 %vm1323_vm6, %v6998_v28 }
 0xa21   : > { %15310 = vmatpush3.bf16.msra.mxu0 %v16340_v45  ;;  %15338 = vmatpush3.bf16.msra.mxu1 %v16341_v35  ;;  %v16543_v30 = vpop.eup %16542  ;;  %v7652_v45 = vrot.slane %v19846_v3, 2  ;;  %v7659_v35 = vsel %vm1860_vm7, %v7649_v2, %v7650_v17  ;;  %v16376_v2 = vld [vmem:[%s21907_s5 + $0x108] sm:$0xff]  }
 0xa22   : > { %15273 = vmatprep.mubr.msk.bf16.mxu0 %vm1323_vm6, %v6999_v15  ;;  %15301 = vmatprep.mubr.msk.bf16.mxu1 %vm1323_vm6, %v6999_v15  ;;  %v3564_v4 = vmul.f32 0.6931472, %v16543_v30  ;;  %v7670_v3 = vpack.c.bf16 %v7658_v18, %v7659_v35  ;;  %v16359_v15 = vld [vmem:[%s21908_s6 + $0xd4] sm:$0xff]   ;;  %v7654_v30 = vrot.slane %v19890_v61, 2 }
 0xa23   : > { %15311 = vmatprep.subr.bf16.mxu0 %v16342_v42  ;;  %15339 = vmatprep.subr.bf16.mxu1 %v16343_v43  ;;  %v7656_v22 = vsel %vm1860_vm7, %v7652_v45, %v7653_v0  ;;  %v7657_v28 = vsel %vm1860_vm7, %v7651_v33, %v7652_v45 }
 0xa24   : > { %v3565_v41 = vsub.f32 %v19585_v53, %v3564_v4  ;;  %v7665_v53 = vsel %vm1860_vm7, %v7643_v46, %v7644_v63  ;;  %v7666_v61 = vsel %vm1860_vm7, %v7654_v30, %v7643_v46  ;;  %v16361_v4 = vld [vmem:[%s21908_s6 + $0xcc] sm:$0xff]   ;;  %v16364_v46 = vld [vmem:[%s21907_s5 + $0xbc] sm:$0xff]  }
 0xa25   : > { %15312 = vmatpush3.bf16.msra.mxu0 %v16342_v42  ;;  %15340 = vmatpush3.bf16.msra.mxu1 %v16343_v43  ;;  %v7667_v14 = vpack.c.bf16 %v7664_v58, %v7665_v53  ;;  %v7671_v42 = vpack.c.bf16 %v7656_v22, %v7657_v28  ;;  %v16358_v43 = vld [vmem:[%s21907_s5 + $0xd4] sm:$0xff]   ;;  %v16365_v58 = vld [vmem:[%s21908_s6 + $0xbc] sm:$0xff]   ;;  %v16368_v53 = vld [vmem:[%s21907_s5 + $0x128] ss:$0 sps:$4 sm:$0xff]  }
 0xa26   : > { %15313 = vmatprep.subr.bf16.mxu0 %v16344_v34  ;;  %15341 = vmatprep.subr.bf16.mxu1 %v16345_v48  ;;  %3566 = vst.msk [vmem:[%s20001_s17] sm:$0xff] %vm3553_vm13, %v3565_v41  ;;  %v16363_v41 = vld [vmem:[%s21908_s6 + $0xc4] sm:$0xff]  }
 0xa28   : > { %15274 = vmatmul.mubr.msk.bf16.gmra.mxu0 %vm1323_vm6, %v7000_v54  ;;  %15302 = vmatmul.mubr.msk.bf16.gmra.mxu1 %vm1323_vm6, %v7000_v54  ;;  %v16367_v54 = vld [vmem:[%s21908_s6 + $0xb4] sm:$0xff]  }
 0xa29   : > { %15314 = vmatpush3.bf16.msra.mxu0 %v16344_v34  ;;  %15342 = vmatpush3.bf16.msra.mxu1 %v16345_v48  ;;  %v7655_v34 = vsel %vm1860_vm7, %v7653_v0, %v7654_v30  ;;  %v16360_v48 = vld [vmem:[%s21907_s5 + $0xcc] sm:$0xff]  }
 0xa2a   : > { %15321 = vmatprep.mubr.msk.bf16.mxu0 %vm1323_vm6, %v7667_v14  ;;  %15349 = vmatprep.mubr.msk.bf16.mxu1 %vm1323_vm6, %v7667_v14  ;;  %v7672_v63 = vpack.c.bf16 %v7666_v61, %v7655_v34 }
 0xa2b   : > { %15315 = vmatprep.subr.bf16.mxu0 %v16346_v62  ;;  %15343 = vmatprep.subr.bf16.mxu1 %v16347_v26 }
 0xa2d   : > { %15316 = vmatpush3.bf16.msra.mxu0 %v16346_v62  ;;  %15344 = vmatpush3.bf16.msra.mxu1 %v16347_v26  ;;  %v16369_v62 = vld [vmem:[%s21908_s6 + $0x128] ss:$0 sps:$4 sm:$0xff]   ;;  %v8472_v26 = vsel %vm1342_vm2, %v16368_v53, 0 }
 0xa2e   : > { %15317 = vmatprep.subr.bf16.mxu0 %v16348_v36  ;;  %15345 = vmatprep.subr.bf16.mxu1 %v16349_v25  ;;  %v8616_v14 = vsel %vm1342_vm2, %v16369_v62, 0 }
 0xa31   : > { %15318 = vmatpush3.bf16.msra.mxu0 %v16348_v36  ;;  %15346 = vmatpush3.bf16.msra.mxu1 %v16349_v25  ;;  %v16370_v36 = vld [vmem:[%s21907_s5 + $0x120] sm:$0xff]  }
 0xa32   : > { %15319 = vmatprep.subr.bf16.mxu0 %v16350_v59  ;;  %15347 = vmatprep.subr.bf16.mxu1 %v16351_v32  ;;  %v16371_v25 = vld [vmem:[%s21908_s6 + $0x120] sm:$0xff]  }
 0xa35   : > { %15320 = vmatpush3.bf16.msra.mxu0 %v16350_v59  ;;  %15348 = vmatpush3.bf16.msra.mxu1 %v16351_v32  ;;  %v16372_v59 = vld [vmem:[%s21907_s5 + $0x118] sm:$0xff]  }
 0xa36   : > { %15947 = vmatprep.subr.msk.bf16.mxu0 %vm1342_vm2, %v16352_v24  ;;  %15948 = vmatprep.subr.msk.bf16.mxu1 %vm1342_vm2, %v16353_v57  ;;  %v16373_v32 = vld [vmem:[%s21908_s6 + $0x118] sm:$0xff]   ;;  %v16377_v24 = vld [vmem:[%s21908_s6 + $0x108] sm:$0xff]  }
 0xa37   : > { %v16380_v57 = vld [vmem:[%s21907_s5 + $0xf8] sm:$0xff]  }
 0xa38   : > { %15322 = vmatmul.mubr.msk.bf16.vlgmr.msra.gmra.mxu0 %vm1323_vm6, %v19764_v37  ;;  %15350 = vmatmul.mubr.msk.bf16.vlgmr.msra.gmra.mxu1 %vm1323_vm6, %v19764_v37  ;;  %v16356_v37 = vld [vmem:[%s21907_s5 + $0xdc] sm:$0xff]  }
 0xa39   : > { %15325 = vmatprep.mubr.msk.bf16.mxu0 %vm1323_vm6, %v7669_v56  ;;  %15353 = vmatprep.mubr.msk.bf16.mxu1 %vm1323_vm6, %v7669_v56 }
 0xa3a   : > { %15362 = vmatpush3.bf16.msra.mxu0 %v8112_v5  ;;  %15390 = vmatpush3.bf16.msra.mxu1 %v8256_v23 }
 0xa3b   : > { %15363 = vmatprep.subr.bf16.mxu0 %v16354_v21  ;;  %15391 = vmatprep.subr.bf16.mxu1 %v16355_v44 }
 0xa3e   : > { %15364 = vmatpush3.bf16.msra.mxu0 %v16354_v21  ;;  %15392 = vmatpush3.bf16.msra.mxu1 %v16355_v44 }
 0xa3f   : > { %15365 = vmatprep.subr.bf16.mxu0 %v16356_v37  ;;  %15393 = vmatprep.subr.bf16.mxu1 %v16357_v19 }
 0xa40   : > { %15326 = vmatmul.mubr.msk.bf16.gmra.mxu0 %vm1323_vm6, %v7670_v3  ;;  %15354 = vmatmul.mubr.msk.bf16.gmra.mxu1 %vm1323_vm6, %v7670_v3 }
 0xa41   : > { %15329 = vmatprep.mubr.msk.bf16.mxu0 %vm1323_vm6, %v7671_v42  ;;  %15357 = vmatprep.mubr.msk.bf16.mxu1 %vm1323_vm6, %v7671_v42 }
 0xa42   : > { %15366 = vmatpush3.bf16.msra.mxu0 %v16356_v37  ;;  %15394 = vmatpush3.bf16.msra.mxu1 %v16357_v19 }
 0xa43   : > { %15367 = vmatprep.subr.bf16.mxu0 %v16358_v43  ;;  %15395 = vmatprep.subr.bf16.mxu1 %v16359_v15 }
 0xa46   : > { %15368 = vmatpush3.bf16.msra.mxu0 %v16358_v43  ;;  %15396 = vmatpush3.bf16.msra.mxu1 %v16359_v15 }
 0xa47   : > { %15369 = vmatprep.subr.bf16.mxu0 %v16360_v48  ;;  %15397 = vmatprep.subr.bf16.mxu1 %v16361_v4 }
 0xa48   : > { %15330 = vmatmul.mubr.msk.bf16.gmra.mxu0 %vm1323_vm6, %v7672_v63  ;;  %15358 = vmatmul.mubr.msk.bf16.gmra.mxu1 %vm1323_vm6, %v7672_v63 }
 0xa49   : > { %15377 = vmatprep.mubr.msk.bf16.mxu0 %vm1323_vm6, %v19711_v50  ;;  %15405 = vmatprep.mubr.msk.bf16.mxu1 %vm1323_vm6, %v19711_v50  ;;  %v16366_v50 = vld [vmem:[%s21907_s5 + $0xb4] sm:$0xff]  }
 0xa4a   : > { %15370 = vmatpush3.bf16.msra.mxu0 %v16360_v48  ;;  %15398 = vmatpush3.bf16.msra.mxu1 %v16361_v4 }
 0xa4b   : > { %15371 = vmatprep.subr.bf16.mxu0 %v16362_v1  ;;  %15399 = vmatprep.subr.bf16.mxu1 %v16363_v41 }
 0xa4e   : > { %15372 = vmatpush3.bf16.msra.mxu0 %v16362_v1  ;;  %15400 = vmatpush3.bf16.msra.mxu1 %v16363_v41 }
 0xa4f   : > { %15373 = vmatprep.subr.bf16.mxu0 %v16364_v46  ;;  %15401 = vmatprep.subr.bf16.mxu1 %v16365_v58 }
 0xa52   : > { %15374 = vmatpush3.bf16.msra.mxu0 %v16364_v46  ;;  %15402 = vmatpush3.bf16.msra.mxu1 %v16365_v58 }
 0xa53   : > { %15375 = vmatprep.subr.bf16.mxu0 %v16366_v50  ;;  %15403 = vmatprep.subr.bf16.mxu1 %v16367_v54 }
 0xa56   : > { %15376 = vmatpush3.bf16.msra.mxu0 %v16366_v50  ;;  %15404 = vmatpush3.bf16.msra.mxu1 %v16367_v54 }
 0xa57   : > { %15949 = vmatprep.subr.msk.bf16.mxu0 %vm1342_vm2, %v16368_v53  ;;  %15950 = vmatprep.subr.msk.bf16.mxu1 %vm1342_vm2, %v16369_v62 }
 0xa59   : > { %15378 = vmatmul.mubr.msk.bf16.vlgmr.msra.gmra.mxu0 %vm1323_vm6, %v19766_v47  ;;  %15406 = vmatmul.mubr.msk.bf16.vlgmr.msra.gmra.mxu1 %vm1323_vm6, %v19766_v47  ;;  %v16374_v47 = vld [vmem:[%s21907_s5 + $0x110] sm:$0xff]  }
 0xa5a   : > { %15381 = vmatprep.mubr.msk.bf16.mxu0 %vm1323_vm6, %v19814_v49  ;;  %15409 = vmatprep.mubr.msk.bf16.mxu1 %vm1323_vm6, %v19814_v49  ;;  %v16375_v49 = vld [vmem:[%s21908_s6 + $0x110] sm:$0xff]  }
 0xa5b   : > { %15418 = vmatpush3.bf16.msra.mxu0 %v8472_v26  ;;  %15446 = vmatpush3.bf16.msra.mxu1 %v8616_v14 }
 0xa5c   : > { %15419 = vmatprep.subr.bf16.mxu0 %v16370_v36  ;;  %15447 = vmatprep.subr.bf16.mxu1 %v16371_v25 }
 0xa5f   : > { %15420 = vmatpush3.bf16.msra.mxu0 %v16370_v36  ;;  %15448 = vmatpush3.bf16.msra.mxu1 %v16371_v25 }
 0xa60   : > { %15421 = vmatprep.subr.bf16.mxu0 %v16372_v59  ;;  %15449 = vmatprep.subr.bf16.mxu1 %v16373_v32 }
 0xa61   : > { %15382 = vmatmul.mubr.msk.bf16.gmra.mxu0 %vm1323_vm6, %v19864_v12  ;;  %15410 = vmatmul.mubr.msk.bf16.gmra.mxu1 %vm1323_vm6, %v19864_v12  ;;  %v16378_v12 = vld [vmem:[%s21907_s5 + $0x100] sm:$0xff]  }
 0xa62   : > { %15385 = vmatprep.mubr.msk.bf16.mxu0 %vm1323_vm6, %v19898_v11  ;;  %15413 = vmatprep.mubr.msk.bf16.mxu1 %vm1323_vm6, %v19898_v11  ;;  %v16379_v11 = vld [vmem:[%s21908_s6 + $0x100] sm:$0xff]  }
 0xa63   : > { %15422 = vmatpush3.bf16.msra.mxu0 %v16372_v59  ;;  %15450 = vmatpush3.bf16.msra.mxu1 %v16373_v32 }
 0xa64   : > { %15423 = vmatprep.subr.bf16.mxu0 %v16374_v47  ;;  %15451 = vmatprep.subr.bf16.mxu1 %v16375_v49 }
 0xa67   : > { %15424 = vmatpush3.bf16.msra.mxu0 %v16374_v47  ;;  %15452 = vmatpush3.bf16.msra.mxu1 %v16375_v49 }
 0xa68   : > { %15425 = vmatprep.subr.bf16.mxu0 %v16376_v2  ;;  %15453 = vmatprep.subr.bf16.mxu1 %v16377_v24 }
 0xa69   : > { %15386 = vmatmul.mubr.msk.bf16.gmra.mxu0 %vm1323_vm6, %v19941_v31  ;;  %15414 = vmatmul.mubr.msk.bf16.gmra.mxu1 %vm1323_vm6, %v19941_v31  ;;  %v16383_v31 = vld [vmem:[%s21908_s6 + $0xf0] sm:$0xff]  }
 0xa6a   : > { %15433 = vmatprep.mubr.msk.bf16.mxu0 %vm1323_vm6, %v19717_v16  ;;  %15461 = vmatprep.mubr.msk.bf16.mxu1 %vm1323_vm6, %v19717_v16  ;;  %v16382_v16 = vld [vmem:[%s21907_s5 + $0xf0] sm:$0xff]  }
 0xa6b   : > { %15426 = vmatpush3.bf16.msra.mxu0 %v16376_v2  ;;  %15454 = vmatpush3.bf16.msra.mxu1 %v16377_v24 }
 0xa6c   : > { %15427 = vmatprep.subr.bf16.mxu0 %v16378_v12  ;;  %15455 = vmatprep.subr.bf16.mxu1 %v16379_v11 }
 0xa6f   : > { %15428 = vmatpush3.bf16.msra.mxu0 %v16378_v12  ;;  %15456 = vmatpush3.bf16.msra.mxu1 %v16379_v11 }
 0xa70   : > { %15429 = vmatprep.subr.bf16.mxu0 %v16380_v57  ;;  %15457 = vmatprep.subr.bf16.mxu1 %v16381_v10 }
 0xa73   : > { %15430 = vmatpush3.bf16.msra.mxu0 %v16380_v57  ;;  %15458 = vmatpush3.bf16.msra.mxu1 %v16381_v10 }
 0xa74   : > { %15431 = vmatprep.subr.bf16.mxu0 %v16382_v16  ;;  %15459 = vmatprep.subr.bf16.mxu1 %v16383_v31 }
 0xa77   : > { %15432 = vmatpush3.bf16.msra.mxu0 %v16382_v16  ;;  %15460 = vmatpush3.bf16.msra.mxu1 %v16383_v31 }
 0xa78   : > { %15489 = vmatprep.subr.bf16.mxu1 %v22002_v8 }
 0xa7a   : > { %15434 = vmatmul.mubr.msk.bf16.vlgmr.msra.gmra.mxu0 %vm1323_vm6, %v19768_v7  ;;  %15462 = vmatmul.mubr.msk.bf16.vlgmr.msra.gmra.mxu1 %vm1323_vm6, %v19768_v7  ;;  %v16593_v7 = vld [vmem:[%s21910_s8] sm:$0xff]  }
 0xa7b   : > { %15437 = vmatprep.mubr.msk.bf16.mxu0 %vm1323_vm6, %v19841_v39  ;;  %15465 = vmatprep.mubr.msk.bf16.mxu1 %vm1323_vm6, %v19841_v39 }
 0xa82   : > { %15438 = vmatmul.mubr.msk.bf16.gmra.mxu0 %vm1323_vm6, %v19873_v40  ;;  %15466 = vmatmul.mubr.msk.bf16.gmra.mxu1 %vm1323_vm6, %v19873_v40 }
 0xa83   : > { %15441 = vmatprep.mubr.msk.bf16.mxu0 %vm1323_vm6, %v19935_v29  ;;  %15469 = vmatprep.mubr.msk.bf16.mxu1 %vm1323_vm6, %v19935_v29 }
 0xa8a   : > { %15442 = vmatmul.mubr.msk.bf16.gmra.mxu0 %vm1323_vm6, %v19949_v6  ;;  %15470 = vmatmul.mubr.msk.bf16.gmra.mxu1 %vm1323_vm6, %v19949_v6 }
 0xa8b   : > { %15485 = vmatprep.mubr.msk.bf16.mxu0 %vm3068_vm8, %v16593_v7  ;;  %15499 = vmatprep.mubr.msk.bf16.mxu1 %vm16629_vm9, %v22002_v8 }
 0xab4   : > { %v15211_v39 = vpop.f32.mrf.mxu0  ;;  %v15239_v40 = vpop.f32.mrf.mxu1 }
 0xab6   : > { %v7176_v52 = vpop.f32.mrf.mxu0  ;;  %v7320_v51 = vpop.f32.mrf.mxu1 }
 0xab8   : > { %v15212_v29 = vpop.f32.mrf.mxu0  ;;  %v15240_v56 = vpop.f32.mrf.mxu1 }
 0xaba   : > { %v20237_v5 = vpop.f32.mrf.mxu0  ;;  %v20239_v23 = vpop.f32.mrf.mxu1 }
 0xac4   : > { %v15215_v6 = vpop.f32.mrf.mxu0  ;;  %v15243_v21 = vpop.f32.mrf.mxu1 }
 0xac6   : > { %v7192_v44 = vpop.f32.mrf.mxu0  ;;  %v7336_v33 = vpop.f32.mrf.mxu1 }
 0xac8   : > { %v15216_v0 = vpop.f32.mrf.mxu0  ;;  %v15244_v17 = vpop.f32.mrf.mxu1 }
 0xaca   : > { %v20241_v45 = vpop.f32.mrf.mxu0  ;;  %v20243_v18 = vpop.f32.mrf.mxu1 }
 0xad0   : > { %v15219_v37 = vpop.f32.mrf.mxu0  ;;  %v15247_v19 = vpop.f32.mrf.mxu1 }
 0xad2   : > { %v7208_v22 = vpop.f32.mrf.mxu0  ;;  %v7352_v35 = vpop.f32.mrf.mxu1 }
 0xad4   : > { %v15220_v3 = vpop.f32.mrf.mxu0  ;;  %v15248_v28 = vpop.f32.mrf.mxu1 }
 0xad6   : > { %v20245_v42 = vpop.f32.mrf.mxu0  ;;  %v20247_v43 = vpop.f32.mrf.mxu1 }
 0xad8   : > { %v15267_v15 = vpop.f32.mrf.mxu0  ;;  %v15295_v30 = vpop.f32.mrf.mxu1 }
 0xad9   : > { %v7476_v34 = vadd.f32 %v15267_v15, %v15211_v39  ;;  %v7605_v61 = vadd.f32 %v15295_v30, %v15239_v40 }
 0xada   : > { %v7467_v48 = vpop.f32.mrf.mxu0  ;;  %v7596_v4 = vpop.f32.mrf.mxu1 }
 0xadb   : > { %v20249_v63 = vadd.f32 %v7467_v48, %v7176_v52  ;;  %v20251_v1 = vadd.f32 %v7596_v4, %v7320_v51 }
 0xadc   : > { %v15268_v41 = vpop.f32.mrf.mxu0  ;;  %v15296_v46 = vpop.f32.mrf.mxu1 }
 0xadd   : > { %v7479_v58 = vadd.f32 %v15268_v41, %v15212_v29  ;;  %v7608_v50 = vadd.f32 %v15296_v46, %v15240_v56  ;;  %v16387_v41 = vld [vmem:[%s21911_s9 + $0x10] sm:$0xff]  }
 0xade   : > { %v20253_v54 = vpop.f32.mrf.mxu0  ;;  %v20255_v53 = vpop.f32.mrf.mxu1 }
 0xae0   : > { %v15271_v62 = vpop.f32.mrf.mxu0  ;;  %v15299_v26 = vpop.f32.mrf.mxu1 }
 0xae1   : > { %v20257_v14 = vadd.f32 %v15271_v62, %v15215_v6  ;;  %v20259_v36 = vadd.f32 %v15299_v26, %v15243_v21 }
 0xae2   : > { %v7483_v25 = vpop.f32.mrf.mxu0  ;;  %v7612_v59 = vpop.f32.mrf.mxu1 }
 0xae3   : > { %v7484_v32 = vadd.f32 %v7483_v25, %v7192_v44  ;;  %v7613_v47 = vadd.f32 %v7612_v59, %v7336_v33 }
 0xae4   : > { %v15272_v49 = vpop.f32.mrf.mxu0  ;;  %v15300_v2 = vpop.f32.mrf.mxu1 }
 0xae5   : > { %v20261_v24 = vadd.f32 %v15272_v49, %v15216_v0  ;;  %v20263_v12 = vadd.f32 %v15300_v2, %v15244_v17 }
 0xae6   : > { %v20265_v11 = vpop.f32.mrf.mxu0  ;;  %v20267_v57 = vpop.f32.mrf.mxu1 }
 0xae8   : > { %v15275_v10 = vpop.f32.mrf.mxu0  ;;  %v15303_v16 = vpop.f32.mrf.mxu1 }
 0xae9   : > { %v20269_v31 = vadd.f32 %v15275_v10, %v15219_v37  ;;  %v20271_v7 = vadd.f32 %v15303_v16, %v15247_v19 }
 0xaea   : > { %v7499_v39 = vpop.f32.mrf.mxu0  ;;  %v7628_v40 = vpop.f32.mrf.mxu1 }
 0xaeb   : > { %22010 = vst [vmem:[#allocation9_spill] sm:$0xff] %v20269_v31  ;;  %22011 = vst [vmem:[#allocation10_spill] sm:$0xff] %v20271_v7  ;;  %v20273_v52 = vadd.f32 %v7499_v39, %v7208_v22  ;;  %v20275_v51 = vadd.f32 %v7628_v40, %v7352_v35  ;;  %v16384_v22 = vld [vmem:[%s21911_s9 + $0x20] sm:$0xff]  }
 0xaec   : > { %v15276_v29 = vpop.f32.mrf.mxu0  ;;  %v15304_v56 = vpop.f32.mrf.mxu1  ;;  %15490 = vmatpush3.bf16.msra.mxu1 %v16384_v22 }
 0xaed   : > { %22012 = vst [vmem:[#allocation11_spill] sm:$0xff] %v20273_v52  ;;  %22013 = vst [vmem:[#allocation12_spill] sm:$0xff] %v20275_v51  ;;  %v20277_v6 = vadd.f32 %v15276_v29, %v15220_v3  ;;  %v20279_v21 = vadd.f32 %v15304_v56, %v15248_v28  ;;  %v16385_v28 = vld [vmem:[%s21911_s9 + $0x18] sm:$0xff]   ;;  %15491 = vmatprep.subr.bf16.mxu1 %v22002_v8 }
 0xaee   : > { %v20281_v44 = vpop.f32.mrf.mxu0  ;;  %v20283_v33 = vpop.f32.mrf.mxu1 }
 0xaef   : > { %22014 = vst [vmem:[#allocation13_spill] sm:$0xff] %v20277_v6  ;;  %22015 = vst [vmem:[#allocation14_spill] sm:$0xff] %v20279_v21  ;;  %v7487_v21 = vadd.f32 %v20265_v11, %v20241_v45  ;;  %v7616_v6 = vadd.f32 %v20267_v57, %v20243_v18  ;;  %v7503_v51 = vadd.f32 %v20281_v44, %v20245_v42 }
 0xaf0   : > { %15492 = vmatpush3.bf16.msra.mxu1 %v16385_v28  ;;  %v7632_v52 = vadd.f32 %v20283_v33, %v20247_v43 }
 0xaf1   : > { %15493 = vmatprep.subr.bf16.mxu1 %v22002_v8 }
 0xaf2   : > { %v22022_v44 = vld [vmem:[#allocation9_spill] sm:$0xff] }
 0xaf4   : > { %15494 = vmatpush3.bf16.msra.mxu1 %v16387_v41 }
 0xaf5   : > { %15495 = vmatprep.subr.bf16.mxu1 %v22002_v8 }
 0xaf8   : > { %v15323_v0 = vpop.f32.mrf.mxu0  ;;  %v15351_v17 = vpop.f32.mrf.mxu1 }
 0xaf9   : > { %v20285_v37 = vadd.f32 %v15323_v0, %v7476_v34  ;;  %v20287_v19 = vadd.f32 %v15351_v17, %v7605_v61 }
 0xafa   : > { %v20292_v35 = vpop.f32.mrf.mxu0  ;;  %v20294_v3 = vpop.f32.mrf.mxu1 }
 0xafb   : > { %22016 = vst [vmem:[#allocation15_spill] sm:$0xff] %v20285_v37  ;;  %22017 = vst [vmem:[#allocation16_spill] sm:$0xff] %v20287_v19  ;;  %v7471_v19 = vadd.f32 %v20253_v54, %v20237_v5  ;;  %v7600_v37 = vadd.f32 %v20255_v53, %v20239_v23  ;;  %v7979_v5 = vadd.f32 %v20292_v35, %v20249_v63  ;;  %v22023_v35 = vld [vmem:[#allocation10_spill] sm:$0xff] }
 0xafc   : > { %v15324_v15 = vpop.f32.mrf.mxu0  ;;  %v15352_v30 = vpop.f32.mrf.mxu1  ;;  %v7991_v23 = vadd.f32 %v20294_v3, %v20251_v1  ;;  %v22024_v1 = vld [vmem:[#allocation11_spill] sm:$0xff] }
 0xafd   : > { %v20300_v34 = vadd.f32 %v15324_v15, %v7479_v58  ;;  %v20302_v61 = vadd.f32 %v15352_v30, %v7608_v50  ;;  %v16389_v58 = vld [vmem:[%s21911_s9 + $0x8] sm:$0xff]  }
 0xafe   : > { %v7791_v48 = vpop.f32.mrf.mxu0  ;;  %v7935_v4 = vpop.f32.mrf.mxu1  ;;  %15496 = vmatpush3.bf16.msra.mxu1 %v16389_v58 }
 0xaff   : > { %22018 = vst [vmem:[#allocation17_spill] sm:$0xff] %v20300_v34  ;;  %22019 = vst [vmem:[#allocation18_spill] sm:$0xff] %v20302_v61  ;;  %15497 = vmatprep.subr.bf16.mxu1 %v22002_v8  ;;  %v7980_v54 = vadd.f32 %v7791_v48, %v7471_v19  ;;  %v7992_v53 = vadd.f32 %v7935_v4, %v7600_v37  ;;  %v22025_v19 = vld [vmem:[#allocation12_spill] sm:$0xff]  ;;  %v22026_v4 = vld [vmem:[#allocation13_spill] sm:$0xff] }
 0xb00   : > { %v15327_v46 = vpop.f32.mrf.mxu0  ;;  %v15355_v62 = vpop.f32.mrf.mxu1 }
 0xb01   : > { %v7985_v45 = vadd.f32 %v15327_v46, %v20257_v14  ;;  %v7997_v18 = vadd.f32 %v15355_v62, %v20259_v36  ;;  %v22027_v14 = vld [vmem:[#allocation14_spill] sm:$0xff] }
 0xb02   : > { %v7804_v26 = vpop.f32.mrf.mxu0  ;;  %v7948_v25 = vpop.f32.mrf.mxu1 }
 0xb03   : > { %v20308_v59 = vadd.f32 %v7804_v26, %v7484_v32  ;;  %v20310_v49 = vadd.f32 %v7948_v25, %v7613_v47 }
 0xb04   : > { %v15328_v50 = vpop.f32.mrf.mxu0  ;;  %v15356_v2 = vpop.f32.mrf.mxu1 }
 0xb05   : > { %22020 = vst [vmem:[#allocation6_spill] sm:$0xff] %v20308_v59  ;;  %22021 = vst [vmem:[#allocation19_spill] sm:$0xff] %v20310_v49  ;;  %v7986_v11 = vadd.f32 %v15328_v50, %v20261_v24  ;;  %v7998_v42 = vadd.f32 %v15356_v2, %v20263_v12  ;;  %v22028_v2 = vld [vmem:[#allocation15_spill] sm:$0xff] }
 0xb06   : > { %v7807_v10 = vpop.f32.mrf.mxu0  ;;  %v7951_v16 = vpop.f32.mrf.mxu1 }
 0xb07   : > { %v7984_v57 = vadd.f32 %v7807_v10, %v7487_v21  ;;  %v7996_v43 = vadd.f32 %v7951_v16, %v7616_v6  ;;  %v22029_v21 = vld [vmem:[#allocation16_spill] sm:$0xff] }
 0xb08   : > { %v15331_v39 = vpop.f32.mrf.mxu0  ;;  %v15359_v40 = vpop.f32.mrf.mxu1 }
 0xb09   : > { %v7989_v33 = vadd.f32 %v15331_v39, %v22022_v44  ;;  %v8001_v63 = vadd.f32 %v15359_v40, %v22023_v35  ;;  %v22030_v39 = vld [vmem:[#allocation17_spill] sm:$0xff]  ;;  %v22031_v44 = vld [vmem:[#allocation18_spill] sm:$0xff] }
 0xb0a   : > { %v7820_v32 = vpop.f32.mrf.mxu0  ;;  %v7964_v29 = vpop.f32.mrf.mxu1 }
 0xb0b   : > { %v7987_v3 = vadd.f32 %v7820_v32, %v22024_v1  ;;  %v7999_v48 = vadd.f32 %v7964_v29, %v22025_v19 }
 0xb0c   : > { %v15332_v47 = vpop.f32.mrf.mxu0  ;;  %v15360_v56 = vpop.f32.mrf.mxu1 }
 0xb0d   : > { %v7990_v37 = vadd.f32 %v15332_v47, %v22026_v4  ;;  %v8002_v46 = vadd.f32 %v15360_v56, %v22027_v14  ;;  %v22032_v4 = vld [vmem:[#allocation6_spill] sm:$0xff] }
 0xb0e   : > { %v7823_v0 = vpop.f32.mrf.mxu0  ;;  %v7967_v17 = vpop.f32.mrf.mxu1 }
 0xb0f   : > { %v7988_v24 = vadd.f32 %v7823_v0, %v7503_v51  ;;  %v8000_v50 = vadd.f32 %v7967_v17, %v7632_v52  ;;  %v22033_v51 = vld [vmem:[#allocation19_spill] sm:$0xff] }
 0xb19   : > { %v15379_v22 = vpop.f32.mrf.mxu0  ;;  %v15407_v28 = vpop.f32.mrf.mxu1 }
 0xb1a   : > { %v8341_v12 = vadd.f32 %v15379_v22, %v22028_v2  ;;  %v8353_v6 = vadd.f32 %v15407_v28, %v22029_v21 }
 0xb1b   : > { %v8148_v15 = vpop.f32.mrf.mxu0  ;;  %v8292_v30 = vpop.f32.mrf.mxu1 }
 0xb1c   : > { %v8339_v10 = vadd.f32 %v8148_v15, %v7979_v5  ;;  %v8351_v16 = vadd.f32 %v8292_v30, %v7991_v23 }
 0xb1d   : > { %v15380_v41 = vpop.f32.mrf.mxu0  ;;  %v15408_v26 = vpop.f32.mrf.mxu1 }
 0xb1e   : > { %v8342_v40 = vadd.f32 %v15380_v41, %v22030_v39  ;;  %v8354_v32 = vadd.f32 %v15408_v26, %v22031_v44 }
 0xb1f   : > { %v8151_v25 = vpop.f32.mrf.mxu0  ;;  %v8295_v60 = vpop.f32.mrf.mxu1 }
 0xb20   : > { %v8340_v1 = vadd.f32 %v8151_v25, %v7980_v54  ;;  %v8352_v47 = vadd.f32 %v8295_v60, %v7992_v53 }
 0xb21   : > { %v15383_v55 = vpop.f32.mrf.mxu0  ;;  %v15411_v58 = vpop.f32.mrf.mxu1 }
 0xb22   : > { %v8345_v19 = vadd.f32 %v15383_v55, %v7985_v45  ;;  %v8357_v56 = vadd.f32 %v15411_v58, %v7997_v18 }
 0xb23   : > { %v8164_v27 = vpop.f32.mrf.mxu0  ;;  %v8308_v13 = vpop.f32.mrf.mxu1 }
 0xb24   : > { %v8343_v14 = vadd.f32 %v8164_v27, %v22032_v4  ;;  %v8355_v52 = vadd.f32 %v8308_v13, %v22033_v51 }
 0xb25   : > { %v15384_v9 = vpop.f32.mrf.mxu0  ;;  %v15412_v20 = vpop.f32.mrf.mxu1 }
 0xb26   : > { %v8346_v15 = vadd.f32 %v15384_v9, %v7986_v11  ;;  %v8358_v30 = vadd.f32 %v15412_v20, %v7998_v42 }
 0xb27   : > { %v8167_v8 = vpop.f32.mrf.mxu0  ;;  %v8311_v38 = vpop.f32.mrf.mxu1 }
 0xb28   : > { %v8344_v41 = vadd.f32 %v8167_v8, %v7984_v57  ;;  %v8356_v26 = vadd.f32 %v8311_v38, %v7996_v43 }
 0xb29   : > { %v15387_v49 = vpop.f32.mrf.mxu0  ;;  %v15415_v59 = vpop.f32.mrf.mxu1 }
 0xb2a   : > { %v20353_v5 = vadd.f32 %v15387_v49, %v7989_v33  ;;  %v20355_v25 = vadd.f32 %v15415_v59, %v8001_v63 }
 0xb2b   : > { %v8180_v61 = vpop.f32.mrf.mxu0  ;;  %v8324_v34 = vpop.f32.mrf.mxu1 }
 0xb2c   : > { %v20361_v58 = vadd.f32 %v8180_v61, %v7987_v3  ;;  %v20363_v23 = vadd.f32 %v8324_v34, %v7999_v48 }
 0xb2d   : > { %v15388_v7 = vpop.f32.mrf.mxu0  ;;  %v15416_v31 = vpop.f32.mrf.mxu1 }
 0xb2e   : > { %v20369_v8 = vadd.f32 %v15388_v7, %v7990_v37  ;;  %v20371_v38 = vadd.f32 %v15416_v31, %v8002_v46 }
 0xb2f   : > { %v8183_v36 = vpop.f32.mrf.mxu0  ;;  %v8327_v62 = vpop.f32.mrf.mxu1 }
 0xb30   : > { %v20377_v11 = vadd.f32 %v8183_v36, %v7988_v24  ;;  %v20379_v42 = vadd.f32 %v8327_v62, %v8000_v50 }
 0xb3a   : > { %v15435_v35 = vpop.f32.mrf.mxu0  ;;  %v15463_v29 = vpop.f32.mrf.mxu1 }
 0xb3b   : > { %v20349_v0 = vadd.f32 %v15435_v35, %v8341_v12  ;;  %v20351_v17 = vadd.f32 %v15463_v29, %v8353_v6 }
 0xb3c   : > { %v8508_v22 = vpop.f32.mrf.mxu0  ;;  %v8652_v28 = vpop.f32.mrf.mxu1 }
 0xb3d   : > { %v20357_v60 = vadd.f32 %v8508_v22, %v8339_v10  ;;  %v20359_v55 = vadd.f32 %v8652_v28, %v8351_v16  ;;  %v8725_v20 = vrot.slane %v20349_v0, 1  ;;  %v8761_v59 = vrot.slane %v20351_v17, 1 }
 0xb3e   : > { %v15436_v27 = vpop.f32.mrf.mxu0  ;;  %v15464_v13 = vpop.f32.mrf.mxu1 }
 0xb3f   : > { %v20365_v54 = vadd.f32 %v15436_v27, %v8342_v40  ;;  %v20367_v9 = vadd.f32 %v15464_v13, %v8354_v32  ;;  %v8723_v7 = vrot.slane %v20357_v60, 1  ;;  %v8759_v31 = vrot.slane %v20359_v55, 1 }
 0xb40   : > { %v8511_v49 = vpop.f32.mrf.mxu0  ;;  %v8655_v53 = vpop.f32.mrf.mxu1 }
 0xb41   : > { %v8726_v45 = vrot.slane %v20365_v54, 1  ;;  %v8762_v61 = vrot.slane %v20367_v9, 1  ;;  %v8700_v34 = vadd.f32 %v8511_v49, %v8340_v1  ;;  %v8712_v18 = vadd.f32 %v8655_v53, %v8352_v47 }
 0xb42   : > { %v15439_v57 = vpop.f32.mrf.mxu0  ;;  %v15467_v43 = vpop.f32.mrf.mxu1 }
 0xb43   : > { %v8743_v63 = vsel %vm1243_vm3, %v8725_v20, %v8726_v45  ;;  %v8779_v3 = vsel %vm1243_vm3, %v8761_v59, %v8762_v61  ;;  %v8724_v48 = vrot.slane %v8700_v34, 1  ;;  %v8760_v37 = vrot.slane %v8712_v18, 1 }
 0xb44   : > { %v8749_v46 = vmax.f32 %v20349_v0, %v8743_v63  ;;  %v8785_v36 = vmax.f32 %v20351_v17, %v8779_v3  ;;  %v20389_v62 = vadd.f32 %v15439_v57, %v8345_v19  ;;  %v20391_v24 = vadd.f32 %v15467_v43, %v8357_v56  ;;  %v8524_v50 = vpop.f32.mrf.mxu0  ;;  %v8668_v2 = vpop.f32.mrf.mxu1  ;;  %v20412_v56 = vld [vmem:[%s21909_s7] ss:$0 sm:$0xff] }
 0xb45   : > { %v8744_v12 = vsel %vm1243_vm3, %v8724_v48, %v8725_v20  ;;  %v8745_v21 = vsel %vm1243_vm3, %v8723_v7, %v8724_v48  ;;  %v8780_v6 = vsel %vm1243_vm3, %v8760_v37, %v8761_v59  ;;  %v8781_v10 = vsel %vm1243_vm3, %v8759_v31, %v8760_v37 }
 0xb46   : > { %v8747_v16 = vmax.f32 %v20357_v60, %v8745_v21  ;;  %v8748_v39 = vmax.f32 %v8700_v34, %v8744_v12  ;;  %v8783_v40 = vmax.f32 %v20359_v55, %v8781_v10  ;;  %v8784_v44 = vmax.f32 %v8712_v18, %v8780_v6  ;;  %v15440_v32 = vpop.f32.mrf.mxu0  ;;  %v15468_v35 = vpop.f32.mrf.mxu1 }
 0xb47   : > { %v8729_v29 = vrot.slane %v20389_v62, 1  ;;  %v8765_v1 = vrot.slane %v20391_v24, 1  ;;  %v8703_v47 = vadd.f32 %v8524_v50, %v8343_v14  ;;  %v8715_v19 = vadd.f32 %v8668_v2, %v8355_v52 }
 0xb48   : > { %v20414_v4 = vmax.f32 %v8748_v39, %v8784_v44  ;;  %v20416_v51 = vadd.f32 %v15440_v32, %v8346_v15  ;;  %v20418_v0 = vadd.f32 %v15468_v35, %v8358_v30  ;;  %v8527_v17 = vpop.f32.mrf.mxu0  ;;  %v8671_v22 = vpop.f32.mrf.mxu1  ;;  %v8797_v28 = vmax.f32 %v8749_v46, %v8785_v36 }
 0xb49   : > { %v8727_v27 = vrot.slane %v8703_v47, 1  ;;  %v8763_v13 = vrot.slane %v8715_v19, 1  ;;  %v8704_v20 = vadd.f32 %v8527_v17, %v8344_v41  ;;  %v8716_v59 = vadd.f32 %v8671_v22, %v8356_v26 }
 0xb4a   : > { %v8730_v14 = vrot.slane %v20416_v51, 1  ;;  %v8766_v52 = vrot.slane %v20418_v0, 1  ;;  %v15443_v49 = vpop.f32.mrf.mxu0  ;;  %v15471_v53 = vpop.f32.mrf.mxu1  ;;  %v20423_v34 = vadd.f32 %v20412_v56, %v8797_v28  ;;  %v20425_v15 = vmax.f32 %v8747_v16, %v8783_v40 }
 0xb4b   : > { %v20429_v30 = vsel %vm1243_vm3, %v8726_v45, %v8727_v27  ;;  %v20433_v18 = vsel %vm1243_vm3, %v8762_v61, %v8763_v13  ;;  %v8728_v41 = vrot.slane %v8704_v20, 1  ;;  %v8764_v26 = vrot.slane %v8716_v59, 1 }
 0xb4c   : > { %v8750_v57 = vmax.f32 %v20365_v54, %v20429_v30  ;;  %v8786_v43 = vmax.f32 %v20367_v9, %v20433_v18  ;;  %v8739_v63 = vsel %vm1243_vm3, %v8729_v29, %v8730_v14  ;;  %v8775_v3 = vsel %vm1243_vm3, %v8765_v1, %v8766_v52  ;;  %v8540_v45 = vpop.f32.mrf.mxu0  ;;  %v8684_v48 = vpop.f32.mrf.mxu1 }
 0xb4d   : > { %v8753_v37 = vmax.f32 %v20389_v62, %v8739_v63  ;;  %v8789_v61 = vmax.f32 %v20391_v24, %v8775_v3  ;;  %v8740_v46 = vsel %vm1243_vm3, %v8728_v41, %v8729_v29  ;;  %v8741_v54 = vsel %vm1243_vm3, %v8727_v27, %v8728_v41 }
 0xb4e   : > { %v8751_v36 = vmax.f32 %v8703_v47, %v8741_v54  ;;  %v8752_v9 = vmax.f32 %v8704_v20, %v8740_v46  ;;  %v8776_v50 = vsel %vm1243_vm3, %v8764_v26, %v8765_v1  ;;  %v8777_v2 = vsel %vm1243_vm3, %v8763_v13, %v8764_v26  ;;  %v15444_v12 = vpop.f32.mrf.mxu0  ;;  %v15472_v21 = vpop.f32.mrf.mxu1 }
 0xb4f   : > { %v8787_v6 = vmax.f32 %v8715_v19, %v8777_v2  ;;  %v8788_v62 = vmax.f32 %v8716_v59, %v8776_v50  ;;  %v8709_v24 = vadd.f32 %v15443_v49, %v20353_v5  ;;  %v8721_v10 = vadd.f32 %v15471_v53, %v20355_v25 }
 0xb50   : > { %v8707_v16 = vadd.f32 %v8540_v45, %v20361_v58  ;;  %v8719_v39 = vadd.f32 %v8684_v48, %v20363_v23  ;;  %v8710_v40 = vadd.f32 %v15444_v12, %v20369_v8  ;;  %v8722_v44 = vadd.f32 %v15472_v21, %v20371_v38  ;;  %v8543_v32 = vpop.f32.mrf.mxu0  ;;  %v8687_v35 = vpop.f32.mrf.mxu1 }
 0xb51   : > { %v8800_v29 = vmax.f32 %v8752_v9, %v8788_v62  ;;  %v8733_v1 = vrot.slane %v8709_v24, 1  ;;  %v8769_v47 = vrot.slane %v8721_v10, 1  ;;  %v8708_v19 = vadd.f32 %v8543_v32, %v20377_v11 }
 0xb52   : > { %v8731_v17 = vrot.slane %v8707_v16, 1  ;;  %v8767_v22 = vrot.slane %v8719_v39, 1  ;;  %v8734_v5 = vrot.slane %v8710_v40, 1  ;;  %v8770_v28 = vrot.slane %v8722_v44, 1 }
 0xb53   : > { %v8732_v25 = vrot.slane %v8708_v19, 1  ;;  %v8720_v58 = vadd.f32 %v8687_v35, %v20379_v42  ;;  %v8801_v27 = vmax.f32 %v8753_v37, %v8789_v61  ;;  %v8799_v23 = vmax.f32 %v8751_v36, %v8787_v6 }
 0xb54   : > { %v8738_v8 = vsel %vm1243_vm3, %v8730_v14, %v8731_v17  ;;  %v8774_v38 = vsel %vm1243_vm3, %v8766_v52, %v8767_v22  ;;  %v8735_v13 = vsel %vm1243_vm3, %v8733_v1, %v8734_v5  ;;  %v8746_v11 = vsel %vm1243_vm3, %v8734_v5, %v8723_v7 }
 0xb55   : > { %v8754_v20 = vmax.f32 %v20416_v51, %v8738_v8  ;;  %v8790_v42 = vmax.f32 %v20418_v0, %v8774_v38  ;;  %v8757_v59 = vmax.f32 %v8709_v24, %v8735_v13  ;;  %v8758_v49 = vmax.f32 %v8710_v40, %v8746_v11  ;;  %v16393_v8 = vld [vmem:[%s21911_s9 + $0x28] sm:$0xff]   ;;  %v16394_v11 = vld [vmem:[%s21911_s9 + $0x70] sm:$0xff]  }
 0xb56   : > { %v8771_v14 = vsel %vm1243_vm3, %v8769_v47, %v8770_v28  ;;  %v8782_v52 = vsel %vm1243_vm3, %v8770_v28, %v8759_v31  ;;  %v8736_v60 = vsel %vm1243_vm3, %v8732_v25, %v8733_v1  ;;  %v8737_v7 = vsel %vm1243_vm3, %v8731_v17, %v8732_v25  ;;  %v16388_v25 = vld [vmem:[%s21911_s9 + $0x40] sm:$0xff]  }
 0xb57   : > { %v8793_v53 = vmax.f32 %v8721_v10, %v8771_v14  ;;  %v8794_v51 = vmax.f32 %v8722_v44, %v8782_v52  ;;  %v8755_v30 = vmax.f32 %v8707_v16, %v8737_v7  ;;  %v8756_v0 = vmax.f32 %v8708_v19, %v8736_v60  ;;  %v16396_v14 = vld [vmem:[%s21911_s9 + $0x98] sm:$0xff]   ;;  %v16397_v60 = vld [vmem:[%s21911_s9 + $0x60] sm:$0xff]   ;;  %v16398_v7 = vld [vmem:[%s21911_s9 + $0x90] sm:$0xff]  }
 0xb58   : > { %v8768_v18 = vrot.slane %v8720_v58, 1  ;;  %v8802_v41 = vmax.f32 %v8754_v20, %v8790_v42  ;;  %v8820_v26 = vadd.f32 %v20412_v56, %v8801_v27  ;;  %v8818_v63 = vadd.f32 %v20412_v56, %v8799_v23  ;;  %v16391_v27 = vld [vmem:[%s21911_s9] sm:$0xff]   ;;  %v16392_v23 = vld [vmem:[%s21911_s9 + $0x30] sm:$0xff]  }
 0xb59   : > { %v8806_v55 = vmax.f32 %v8758_v49, %v8794_v51  ;;  %v8805_v3 = vmax.f32 %v8757_v59, %v8793_v53  ;;  %v8819_v31 = vadd.f32 %v20412_v56, %v8800_v29  ;;  %v8798_v45 = vmax.f32 %v8750_v57, %v8786_v43  ;;  %15498 = vmatpush3.bf16.msra.mxu1 %v16391_v27  ;;  %v16395_v49 = vld [vmem:[%s21911_s9 + $0x68] sm:$0xff]   ;;  %v16399_v53 = vld [vmem:[%s21911_s9 + $0x58] sm:$0xff]  }
 0xb5a   : > { %v8772_v48 = vsel %vm1243_vm3, %v8768_v18, %v8769_v47  ;;  %v8773_v37 = vsel %vm1243_vm3, %v8767_v22, %v8768_v18  ;;  %v8821_v61 = vadd.f32 %v20412_v56, %v8802_v41  ;;  %v8832_v46 = vmax.f32 %v8820_v26, 0.0  ;;  %v16400_v51 = vld [vmem:[%s21911_s9 + $0x88] sm:$0xff]   ;;  %v16403_v18 = vld [vmem:[%s21911_s9 + $0x78] sm:$0xff]  }
 0xb5b   : > { %v8791_v54 = vmax.f32 %v8719_v39, %v8773_v37  ;;  %v8792_v36 = vmax.f32 %v8720_v58, %v8772_v48  ;;  %v8824_v9 = vadd.f32 %v20412_v56, %v8805_v3  ;;  %v8825_v50 = vadd.f32 %v20412_v56, %v8806_v55  ;;  %v16390_v58 = vld [vmem:[%s21911_s9 + $0x38] sm:$0xff]   ;;  %v16595_v3 = vld [vmem:[%s21913_s11 + $0x10] sm:$0xff]   ;;  %v16599_v37 = vld [vmem:[%s21913_s11] sm:$0xff]  }
 0xb5c   : > { %v8833_v2 = vmax.f32 %v8821_v61, 0.0  ;;  %v8830_v12 = vmax.f32 %v8818_v63, 0.0  ;;  %v8831_v21 = vmax.f32 %v8819_v31, 0.0  ;;  %v8817_v57 = vadd.f32 %v20412_v56, %v8798_v45  ;;  %v22036_v26 = vld [vmem:[#allocation5_spill] sm:$0xff]  ;;  %v16597_v45 = vld [vmem:[%s21913_s11 + $0x8] sm:$0xff]   ;;  %v16598_v48 = vld [vmem:[%s21905_s3 + $0x30] sm:$0xff]  }
 0xb5d   : > { %v8804_v43 = vmax.f32 %v8756_v0, %v8792_v36  ;;  %v8836_v6 = vmax.f32 %v8824_v9, 0.0  ;;  %v8837_v62 = vmax.f32 %v8825_v50, 0.0  ;;  %v8803_v24 = vmax.f32 %v8755_v30, %v8791_v54  ;;  %v16401_v30 = vld [vmem:[%s21911_s9 + $0x50] sm:$0xff]   ;;  %v16402_v0 = vld [vmem:[%s21911_s9 + $0x80] sm:$0xff]   ;;  %v16596_v31 = vld [vmem:[%s21905_s3 + $0x38] sm:$0xff]  }
 0xb5e   : > { %v8841_v10 = vpack.c.bf16 %v8833_v2, %v8832_v46  ;;  %v8840_v16 = vpack.c.bf16 %v8831_v21, %v8830_v12  ;;  %v8828_v40 = vmax.f32 %v20423_v34, 0.0  ;;  %v8829_v44 = vmax.f32 %v8817_v57, 0.0  ;;  %v16600_v61 = vld [vmem:[%s21905_s3 + $0x28] sm:$0xff]   ;;  %v16601_v46 = vld [vmem:[%s21905_s3 + $0x20] sm:$0xff]   ;;  %v16602_v54 = vld [vmem:[%s21905_s3 + $0x18] sm:$0xff]  }
 0xb5f   : > { %v8843_v39 = vpack.c.bf16 %v8837_v62, %v8836_v6  ;;  %v8822_v32 = vadd.f32 %v20412_v56, %v8803_v24  ;;  %v8823_v35 = vadd.f32 %v20412_v56, %v8804_v43  ;;  %v8814_v29 = vadd.f32 %v20412_v56, %v20425_v15  ;;  %v16594_v15 = vld [vmem:[%s21910_s8 + $0x8] sm:$0xff]   ;;  %v16603_v36 = vld [vmem:[%s21905_s3 + $0x10] sm:$0xff]   ;;  %v16605_v50 = vld [vmem:[%s21905_s3] sm:$0xff]  }
 0xb60   : > { %v8839_v1 = vpack.c.bf16 %v8829_v44, %v8828_v40  ;;  %v8815_v47 = vadd.f32 %v20412_v56, %v20414_v4  ;;  %v16386_v56 = vld [vmem:[%s21911_s9 + $0x48] sm:$0xff]   ;;  %v22035_v4 = vmov 0.0   ;;  %v22037_v55 = vmov 0   ;;  %v20641_v57 = vld [vmem:[%s16784_s19 + $0x134] ss:$8 sps:$4 sm:$0xff]  }
 0xb61   : > { %15473 = vmatprep.subr.bf16.mxu0 %v8843_v39  ;;  %v8834_v19 = vmax.f32 %v8822_v32, 0.0  ;;  %v8835_v17 = vmax.f32 %v8823_v35, 0.0  ;;  %v8826_v22 = vmax.f32 %v8814_v29, 0.0  ;;  %15517 = vmatprep.subr.bf16.mxu1 %v22035_v4  ;;  %v16604_v9 = vld [vmem:[%s21905_s3 + $0x8] sm:$0xff]   ;;  %v20644_v43 = vld [vmem:[%s16784_s19 + $0x130] ss:$8 sps:$4 sm:$0xff]  }
 0xb62   : > { %15474 = vmatpush3.bf16.msra.mxu0 %v8843_v39  ;;  %v8827_v5 = vmax.f32 %v8815_v47, 0.0  ;;  %v22038_v2 = vld [vmem:[#allocation3_spill] sm:$0xff]  ;;  %v20663_v24 = vld [vmem:[%s16784_s19 + $0x154] ss:$8 sps:$4 sm:$0xff]   ;;  %v20688_v39 = vld [vmem:[%s16784_s19 + $0x170] ss:$8 sps:$4 sm:$0xff]  }
 0xb63   : > { %v8842_v34 = vpack.c.bf16 %v8835_v17, %v8834_v19  ;;  %v20631_v12 = vld [vmem:[%s16784_s19 + $0x120] ss:$8 sps:$4 sm:$0xff]   ;;  %v20634_v21 = vld [vmem:[%s16784_s19 + $0x124] ss:$8 sps:$4 sm:$0xff]   ;;  %v20685_v44 = vld [vmem:[%s16784_s19 + $0x174] ss:$8 sps:$4 sm:$0xff]  }
 0xb64   : > { %v8838_v28 = vpack.c.bf16 %v8827_v5, %v8826_v22  ;;  %v20652_v6 = vld [vmem:[%s16784_s19 + $0x144] ss:$8 sps:$4 sm:$0xff]   ;;  %v20655_v62 = vld [vmem:[%s16784_s19 + $0x140] ss:$8 sps:$4 sm:$0xff]   ;;  %v20703_v29 = vld [vmem:[%s16825_s16 + $0x134] ss:$8 sps:$4 sm:$0xff]  }
 0xb65   : > { %15475 = vmatprep.subr.bf16.mxu0 %v8842_v34  ;;  %v20677_v40 = vld [vmem:[%s16784_s19 + $0x160] ss:$8 sps:$4 sm:$0xff]   ;;  %v20697_v35 = vld [vmem:[%s16825_s16 + $0x124] ss:$8 sps:$4 sm:$0xff]   ;;  %v20721_v5 = vld [vmem:[%s16825_s16 + $0x154] ss:$8 sps:$4 sm:$0xff]  }
 0xb66   : > { %15476 = vmatpush3.bf16.msra.mxu0 %v8842_v34  ;;  %v20694_v32 = vld [vmem:[%s16825_s16 + $0x120] ss:$8 sps:$4 sm:$0xff]   ;;  %v20712_v47 = vld [vmem:[%s16825_s16 + $0x144] ss:$8 sps:$4 sm:$0xff]   ;;  %v20724_v34 = vld [vmem:[%s16825_s16 + $0x150] ss:$8 sps:$4 sm:$0xff]  }
 0xb67   : > { %15477 = vmatprep.subr.bf16.mxu0 %v8841_v10  ;;  %v20715_v19 = vld [vmem:[%s16825_s16 + $0x140] ss:$8 sps:$4 sm:$0xff]  }
 0xb6a   : > { %15478 = vmatpush3.bf16.msra.mxu0 %v8841_v10  ;;  %v20666_v10 = vld [vmem:[%s16784_s19 + $0x150] ss:$8 sps:$4 sm:$0xff]  }
 0xb6b   : > { %15479 = vmatprep.subr.bf16.mxu0 %v8840_v16 }
 0xb6e   : > { %15480 = vmatpush3.bf16.msra.mxu0 %v8840_v16  ;;  %v20674_v16 = vld [vmem:[%s16784_s19 + $0x164] ss:$8 sps:$4 sm:$0xff]  }
 0xb6f   : > { %15481 = vmatprep.subr.bf16.mxu0 %v8839_v1 }
 0xb72   : > { %15482 = vmatpush3.bf16.msra.mxu0 %v8839_v1  ;;  %v20706_v1 = vld [vmem:[%s16825_s16 + $0x130] ss:$8 sps:$4 sm:$0xff]  }
 0xb73   : > { %15483 = vmatprep.subr.bf16.mxu0 %v8838_v28 }
 0xb76   : > { %15484 = vmatpush3.bf16.msra.mxu0 %v8838_v28 }
 0xb77   : > { %15503 = vmatprep.subr.bf16.mxu0 %v22035_v4 }
 0xb79   : > { %15486 = vmatmul.mubr.msk.bf16.vlgmr.msra.gmra.mxu0 %vm3068_vm8, %v16594_v15 }
 0xb7a   : > { %15504 = vmatpush3.bf16.msra.mxu0 %v16386_v56  ;;  %15513 = vmatprep.mubr.msk.bf16.mxu0 %vm16629_vm9, %v22035_v4 }
 0xb7b   : > { %15505 = vmatprep.subr.bf16.mxu0 %v22035_v4 }
 0xb7e   : > { %15506 = vmatpush3.bf16.msra.mxu0 %v16388_v25 }
 0xb7f   : > { %15507 = vmatprep.subr.bf16.mxu0 %v22035_v4 }
 0xb82   : > { %15508 = vmatpush3.bf16.msra.mxu0 %v16390_v58 }
 0xb83   : > { %15509 = vmatprep.subr.bf16.mxu0 %v22035_v4 }
 0xb86   : > { %15510 = vmatpush3.bf16.msra.mxu0 %v16392_v23  ;;  %v20730_v23 = vld [vmem:[%s16825_s16 + $0x164] ss:$8 sps:$4 sm:$0xff]  }
 0xb87   : > { %15511 = vmatprep.subr.bf16.mxu0 %v22035_v4 }
 0xb8a   : > { %15512 = vmatpush3.bf16.msra.mxu0 %v16393_v8  ;;  %v20733_v8 = vld [vmem:[%s16825_s16 + $0x160] ss:$8 sps:$4 sm:$0xff]  }
 0xb8b   : > { %15531 = vmatprep.subr.bf16.mxu0 %v22035_v4 }
 0xc39   : > { %v15487_v38 = vpop.f32.mrf.mxu0 }
 0xc3a   : > { %v9070_v41 = vpack.c.bf16 %v15487_v38, %v15487_v38  ;;  %v13333_v38 = vld [vmem:[%s21912_s10] ss:$0 sm:$0xff] }
 0xc3b   : > { %v8878_v13 = vpop.f32.mrf.mxu0 }
 0xc3c   : > { %v8894_v20 = vpack.c.bf16 %v8878_v13, %v8878_v13 }
 0xc3d   : > { %v15488_v42 = vpop.f32.mrf.mxu0 }
 0xc3e   : > { %15500 = vmatmul.mubr.msk.bf16.vlgmr.msra.gmra.mxu1 %vm3166_vm10, %v8894_v20  ;;  %v9155_v63 = vpack.c.bf16 %v15488_v42, %v15488_v42  ;;  %v20745_v20 = vld [vmem:[%s16825_s16 + $0x170] ss:$8 sps:$4 sm:$0xff]  }
 0xc3f   : > { %15518 = vmatpush3.bf16.msra.mxu1 %v16394_v11  ;;  %v8881_v59 = vpop.f32.mrf.mxu0  ;;  %15527 = vmatprep.mubr.msk.bf16.mxu1 %vm16629_vm9, %v22035_v4  ;;  %v20742_v11 = vld [vmem:[%s16825_s16 + $0x174] ss:$8 sps:$4 sm:$0xff]  }
 0xc40   : > { %v8985_v52 = vpack.c.bf16 %v8881_v59, %v8881_v59  ;;  %15519 = vmatprep.subr.bf16.mxu1 %v22035_v4 }
 0xc42   : > { %15514 = vmatmul.mubr.msk.bf16.vlgmr.msra.gmra.mxu0 %vm3166_vm10, %v8985_v52 }
 0xc43   : > { %15520 = vmatpush3.bf16.msra.mxu1 %v16395_v49  ;;  %15532 = vmatpush3.bf16.msra.mxu0 %v16396_v14 }
 0xc44   : > { %15521 = vmatprep.subr.bf16.mxu1 %v22035_v4  ;;  %15533 = vmatprep.subr.bf16.mxu0 %v22035_v4 }
 0xc45   : > { %15541 = vmatprep.mubr.msk.bf16.mxu0 %vm16629_vm9, %v22035_v4 }
 0xc47   : > { %15522 = vmatpush3.bf16.msra.mxu1 %v16397_v60  ;;  %15534 = vmatpush3.bf16.msra.mxu0 %v16398_v7 }
 0xc48   : > { %15523 = vmatprep.subr.bf16.mxu1 %v22035_v4  ;;  %15535 = vmatprep.subr.bf16.mxu0 %v22035_v4 }
 0xc4b   : > { %15524 = vmatpush3.bf16.msra.mxu1 %v16399_v53  ;;  %15536 = vmatpush3.bf16.msra.mxu0 %v16400_v51 }
 0xc4c   : > { %15525 = vmatprep.subr.bf16.mxu1 %v22035_v4  ;;  %15537 = vmatprep.subr.bf16.mxu0 %v22035_v4 }
 0xc4f   : > { %15526 = vmatpush3.bf16.msra.mxu1 %v16401_v30  ;;  %15538 = vmatpush3.bf16.msra.mxu0 %v16402_v0 }
 0xc50   : > { %15539 = vmatprep.subr.bf16.mxu0 %v22035_v4  ;;  %15545 = vmatprep.subr.bf16.mxu1 %v22035_v4 }
 0xc52   : > { %15528 = vmatmul.mubr.msk.bf16.vlgmr.msra.gmra.mxu1 %vm3166_vm10, %v9070_v41 }
 0xc53   : > { %15540 = vmatpush3.bf16.msra.mxu0 %v16403_v18  ;;  %15546 = vmatpush3.bf16.msra.mxu1 %v22036_v26 }
 0xc54   : > { %15547 = vmatprep.subr.bf16.mxu1 %v22035_v4  ;;  %9482 = vmatprep.subr.bf16.mxu0 %v22037_v55 }
 0xc55   : > { %15553 = vmatprep.mubr.msk.bf16.mxu1 %vm16629_vm9, %v22035_v4 }
 0xc56   : > { %15542 = vmatmul.mubr.msk.bf16.vlgmr.msra.gmra.mxu0 %vm3166_vm10, %v9155_v63  ;;  %v16606_v63 = vld [vmem:[%s21904_s2 + $0x38] sm:$0xff]  }
 0xc57   : > { %15548 = vmatpush3.bf16.msra.mxu1 %v16595_v3  ;;  %9483 = vmatpush1.bf16.msra.mxu0 %v16596_v31  ;;  %v16607_v3 = vld [vmem:[%s21904_s2 + $0x30] sm:$0xff]  }
 0xc58   : > { %15549 = vmatprep.subr.bf16.mxu1 %v22035_v4  ;;  %9484 = vmatprep.subr.bf16.mxu0 %v22037_v55 }
 0xc59   : > { %13402 = vmatprep.mubr.msk.bf16.mxu0 %vm651_vm0, %v20634_v21 }
 0xc5b   : > { %15550 = vmatpush3.bf16.msra.mxu1 %v16597_v45  ;;  %9485 = vmatpush1.bf16.msra.mxu0 %v16598_v48  ;;  %v16609_v45 = vld [vmem:[%s21904_s2 + $0x20] sm:$0xff]  }
 0xc5c   : > { %15551 = vmatprep.subr.bf16.mxu1 %v22035_v4  ;;  %9486 = vmatprep.subr.bf16.mxu0 %v22037_v55 }
 0xc5f   : > { %15552 = vmatpush3.bf16.msra.mxu1 %v16599_v37  ;;  %9487 = vmatpush1.bf16.msra.mxu0 %v16600_v61  ;;  %v16611_v37 = vld [vmem:[%s21904_s2 + $0x10] sm:$0xff]  }
 0xc60   : > { %9401 = vmatprep.subr.bf16.mxu1 %v22037_v55  ;;  %9488 = vmatprep.subr.bf16.mxu0 %v22037_v55 }
 0xc63   : > { %9489 = vmatpush1.bf16.msra.mxu0 %v16601_v46 }
 0xc64   : > { %9490 = vmatprep.subr.bf16.mxu0 %v22037_v55 }
 0xc67   : > { %9491 = vmatpush1.bf16.msra.mxu0 %v16602_v54 }
 0xc68   : > { %9492 = vmatprep.subr.bf16.mxu0 %v22037_v55 }
 0xc6b   : > { %9493 = vmatpush1.bf16.msra.mxu0 %v16603_v36 }
 0xc6c   : > { %9494 = vmatprep.subr.bf16.mxu0 %v22037_v55 }
 0xc6f   : > { %9495 = vmatpush1.bf16.msra.mxu0 %v16604_v9 }
 0xc70   : > { %9496 = vmatprep.subr.bf16.mxu0 %v22037_v55 }
 0xc73   : > { %9497 = vmatpush1.bf16.msra.mxu0 %v16605_v50 }
 0xc74   : > { %9512 = vmatprep.subr.bf16.mxu0 %v22037_v55 }
 0xc77   : > { %9513 = vmatpush2.bf16.msra.mxu0 %v22038_v2 }
 0xc78   : > { %9740 = vmatprep.subr.bf16.mxu0 %v22037_v55 }
 0xc7a   : > { %9515 = vmatmul.mubr.bf16.vlgmr.msra.gmra.mxu0 %v20631_v12 }
 0xc7b   : > { %9741 = vmatpush1.bf16.msra.mxu0 %v16596_v31  ;;  %13403 = vmatprep.mubr.msk.bf16.mxu0 %vm651_vm0, %v20641_v57  ;;  %v16608_v31 = vld [vmem:[%s21904_s2 + $0x28] sm:$0xff]  }
 0xc7c   : > { %9742 = vmatprep.subr.bf16.mxu0 %v22037_v55 }
 0xc7f   : > { %9743 = vmatpush1.bf16.msra.mxu0 %v16598_v48  ;;  %v16610_v48 = vld [vmem:[%s21904_s2 + $0x18] sm:$0xff]  }
 0xc80   : > { %9744 = vmatprep.subr.bf16.mxu0 %v22037_v55 }
 0xc82   : > { %9523 = vmatmul.mubr.bf16.gmra.mxu0 %v20644_v43 }
 0xc83   : > { %9745 = vmatpush1.bf16.msra.mxu0 %v16600_v61  ;;  %13404 = vmatprep.mubr.msk.bf16.mxu0 %vm651_vm0, %v20652_v6  ;;  %v16612_v61 = vld [vmem:[%s21904_s2 + $0x8] sm:$0xff]  }
 0xc84   : > { %9746 = vmatprep.subr.bf16.mxu0 %v22037_v55 }
 0xc87   : > { %9747 = vmatpush1.bf16.msra.mxu0 %v16601_v46  ;;  %v16613_v46 = vld [vmem:[%s21904_s2] sm:$0xff]  }
 0xc88   : > { %9748 = vmatprep.subr.bf16.mxu0 %v22037_v55 }
 0xc8a   : > { %9531 = vmatmul.mubr.bf16.gmra.mxu0 %v20655_v62 }
 0xc8b   : > { %9749 = vmatpush1.bf16.msra.mxu0 %v16602_v54  ;;  %13405 = vmatprep.mubr.msk.bf16.mxu0 %vm651_vm0, %v20663_v24  ;;  %v22039_v54 = vld [vmem:[#allocation2_spill] sm:$0xff] }
 0xc8c   : > { %9750 = vmatprep.subr.bf16.mxu0 %v22037_v55 }
 0xc8f   : > { %9751 = vmatpush1.bf16.msra.mxu0 %v16603_v36 }
 0xc90   : > { %9752 = vmatprep.subr.bf16.mxu0 %v22037_v55 }
 0xc92   : > { %9539 = vmatmul.mubr.bf16.gmra.mxu0 %v20666_v10 }
 0xc93   : > { %9753 = vmatpush1.bf16.msra.mxu0 %v16604_v9  ;;  %13406 = vmatprep.mubr.msk.bf16.mxu0 %vm651_vm0, %v20674_v16 }
 0xc94   : > { %9754 = vmatprep.subr.bf16.mxu0 %v22037_v55 }
 0xc97   : > { %9755 = vmatpush1.bf16.msra.mxu0 %v16605_v50 }
 0xc98   : > { %9770 = vmatprep.subr.bf16.mxu0 %v22037_v55 }
 0xc9a   : > { %9547 = vmatmul.mubr.bf16.gmra.mxu0 %v20677_v40 }
 0xc9b   : > { %9771 = vmatpush2.bf16.msra.mxu0 %v22038_v2  ;;  %13407 = vmatprep.mubr.msk.bf16.mxu0 %vm651_vm0, %v20685_v44 }
 0xca2   : > { %9555 = vmatmul.mubr.bf16.gmra.mxu0 %v20688_v39 }
 0xca3   : > { %13426 = vmatprep.mubr.msk.bf16.mxu0 %vm651_vm0, %v20697_v35 }
 0xcaa   : > { %9773 = vmatmul.mubr.bf16.vlgmr.msra.gmra.mxu0 %v20694_v32 }
 0xcab   : > { %13427 = vmatprep.mubr.msk.bf16.mxu0 %vm651_vm0, %v20703_v29 }
 0xcb2   : > { %9781 = vmatmul.mubr.bf16.gmra.mxu0 %v20706_v1 }
 0xcb3   : > { %13428 = vmatprep.mubr.msk.bf16.mxu0 %vm651_vm0, %v20712_v47 }
 0xcba   : > { %9789 = vmatmul.mubr.bf16.gmra.mxu0 %v20715_v19 }
 0xcbb   : > { %13429 = vmatprep.mubr.msk.bf16.mxu0 %vm651_vm0, %v20721_v5 }
 0xcc2   : > { %9797 = vmatmul.mubr.bf16.gmra.mxu0 %v20724_v34 }
 0xcc3   : > { %13430 = vmatprep.mubr.msk.bf16.mxu0 %vm651_vm0, %v20730_v23 }
 0xcca   : > { %9805 = vmatmul.mubr.bf16.gmra.mxu0 %v20733_v8 }
 0xccb   : > { %13431 = vmatprep.mubr.msk.bf16.mxu0 %vm651_vm0, %v20742_v11 }
 0xcd2   : > { %9813 = vmatmul.mubr.bf16.gmra.mxu0 %v20745_v20 }
 0xcfe   : > { %v8972_v17 = vpop.f32.mrf.mxu1 }
 0xcff   : > { %v8984_v13 = vadd.f32 %v13333_v38, %v8972_v17 }
 0xd00   : > { %v15501_v22 = vpop.f32.mrf.mxu1 }
 0xd02   : > { %v8975_v28 = vpop.f32.mrf.mxu1  ;;  %v9063_v56 = vpop.f32.mrf.mxu0 }
 0xd03   : > { %v9069_v59 = vadd.f32 %v9063_v56, %v8984_v13  ;;  %v16442_v28 = vld [vmem:[%s21907_s5 + $0x6c] sm:$0xff]  }
 0xd04   : > { %v15502_v15 = vpop.f32.mrf.mxu1  ;;  %v15515_v25 = vpop.f32.mrf.mxu0  ;;  %v16443_v56 = vld [vmem:[%s21908_s6 + $0x6c] sm:$0xff]  }
 0xd06   : > { %v9066_v58 = vpop.f32.mrf.mxu0 }
 0xd07   : > { %v16444_v58 = vld [vmem:[%s21907_s5 + $0x64] sm:$0xff]  }
 0xd08   : > { %v15516_v27 = vpop.f32.mrf.mxu0 }
 0xd09   : > { %v16445_v27 = vld [vmem:[%s21908_s6 + $0x64] sm:$0xff]  }
 0xd12   : > { %v9148_v42 = vpop.f32.mrf.mxu1 }
 0xd13   : > { %v9154_v14 = vadd.f32 %v9148_v42, %v9069_v59 }
 0xd14   : > { %v15529_v49 = vpop.f32.mrf.mxu1 }
 0xd15   : > { %v16448_v49 = vld [vmem:[%s21907_s5 + $0x54] sm:$0xff]  }
 0xd16   : > { %v9151_v52 = vpop.f32.mrf.mxu1  ;;  %v9233_v60 = vpop.f32.mrf.mxu0 }
 0xd17   : > { %v9239_v7 = vadd.f32 %v9233_v60, %v9154_v14  ;;  %v16449_v14 = vld [vmem:[%s21908_s6 + $0x54] sm:$0xff]  }
 0xd18   : > { %v15530_v53 = vpop.f32.mrf.mxu1  ;;  %v15543_v51 = vpop.f32.mrf.mxu0 }
 0xd19   : > { %v9240_v30 = vmax.f32 %v9239_v7, 0.0  ;;  %v16450_v51 = vld [vmem:[%s21907_s5 + $0x4c] sm:$0xff]  }
 0xd1a   : > { %v9236_v0 = vpop.f32.mrf.mxu0 }
 0xd1b   : > { %v9241_v18 = vpack.c.bf16 %v9240_v30, %v9240_v30  ;;  %v16451_v30 = vld [vmem:[%s21908_s6 + $0x4c] sm:$0xff]  }
 0xd1c   : > { %v15544_v41 = vpop.f32.mrf.mxu0 }
 0xd1d   : > { %15554 = vmatmul.mubr.msk.bf16.vlgmr.msra.gmra.mxu1 %vm3505_vm12, %v9241_v18  ;;  %v16452_v18 = vld [vmem:[%s21907_s5 + $0x44] sm:$0xff]  }
 0xd1e   : > { %9402 = vmatpush1.bf16.msra.mxu1 %v16606_v63  ;;  %13396 = vmatprep.mubr.msk.bf16.mxu1 %vm651_vm0, %v20634_v21  ;;  %v16453_v41 = vld [vmem:[%s21908_s6 + $0x44] sm:$0xff]  }
 0xd1f   : > { %9403 = vmatprep.subr.bf16.mxu1 %v22037_v55 }
 0xd22   : > { %9404 = vmatpush1.bf16.msra.mxu1 %v16607_v3 }
 0xd23   : > { %9405 = vmatprep.subr.bf16.mxu1 %v22037_v55 }
 0xd26   : > { %9406 = vmatpush1.bf16.msra.mxu1 %v16608_v31 }
 0xd27   : > { %9407 = vmatprep.subr.bf16.mxu1 %v22037_v55 }
 0xd2a   : > { %9408 = vmatpush1.bf16.msra.mxu1 %v16609_v45 }
 0xd2b   : > { %9409 = vmatprep.subr.bf16.mxu1 %v22037_v55 }
 0xd2e   : > { %9410 = vmatpush1.bf16.msra.mxu1 %v16610_v48 }
 0xd2f   : > { %9411 = vmatprep.subr.bf16.mxu1 %v22037_v55 }
 0xd32   : > { %9412 = vmatpush1.bf16.msra.mxu1 %v16611_v37 }
 0xd33   : > { %9413 = vmatprep.subr.bf16.mxu1 %v22037_v55 }
 0xd36   : > { %9414 = vmatpush1.bf16.msra.mxu1 %v16612_v61 }
 0xd37   : > { %9415 = vmatprep.subr.bf16.mxu1 %v22037_v55 }
 0xd3a   : > { %9416 = vmatpush1.bf16.msra.mxu1 %v16613_v46 }
 0xd3b   : > { %9431 = vmatprep.subr.bf16.mxu1 %v22037_v55 }
 0xd3e   : > { %9432 = vmatpush2.bf16.msra.mxu1 %v22039_v54 }
 0xd3f   : > { %9647 = vmatprep.subr.bf16.mxu1 %v22037_v55 }
 0xd41   : > { %9434 = vmatmul.mubr.bf16.vlgmr.msra.gmra.mxu1 %v20631_v12 }
 0xd42   : > { %9648 = vmatpush1.bf16.msra.mxu1 %v16606_v63  ;;  %13397 = vmatprep.mubr.msk.bf16.mxu1 %vm651_vm0, %v20641_v57 }
 0xd43   : > { %9649 = vmatprep.subr.bf16.mxu1 %v22037_v55 }
 0xd46   : > { %9650 = vmatpush1.bf16.msra.mxu1 %v16607_v3  ;;  %v16454_v3 = vld [vmem:[%s21907_s5 + $0x3c] sm:$0xff]  }
 0xd47   : > { %9651 = vmatprep.subr.bf16.mxu1 %v22037_v55 }
 0xd49   : > { %9442 = vmatmul.mubr.bf16.gmra.mxu1 %v20644_v43 }
 0xd4a   : > { %9652 = vmatpush1.bf16.msra.mxu1 %v16608_v31  ;;  %13398 = vmatprep.mubr.msk.bf16.mxu1 %vm651_vm0, %v20652_v6  ;;  %v16455_v31 = vld [vmem:[%s21908_s6 + $0x3c] sm:$0xff]  }
 0xd4b   : > { %9653 = vmatprep.subr.bf16.mxu1 %v22037_v55 }
 0xd4e   : > { %9654 = vmatpush1.bf16.msra.mxu1 %v16609_v45 }
 0xd4f   : > { %9655 = vmatprep.subr.bf16.mxu1 %v22037_v55 }
 0xd51   : > { %9450 = vmatmul.mubr.bf16.gmra.mxu1 %v20655_v62 }
 0xd52   : > { %13399 = vmatprep.mubr.msk.bf16.mxu1 %vm651_vm0, %v20663_v24  ;;  %9656 = vmatpush1.bf16.msra.mxu1 %v16610_v48 }
 0xd53   : > { %9657 = vmatprep.subr.bf16.mxu1 %v22037_v55 }
 0xd56   : > { %9658 = vmatpush1.bf16.msra.mxu1 %v16611_v37 }
 0xd57   : > { %9659 = vmatprep.subr.bf16.mxu1 %v22037_v55 }
 0xd59   : > { %9458 = vmatmul.mubr.bf16.gmra.mxu1 %v20666_v10 }
 0xd5a   : > { %13400 = vmatprep.mubr.msk.bf16.mxu1 %vm651_vm0, %v20674_v16  ;;  %9660 = vmatpush1.bf16.msra.mxu1 %v16612_v61 }
 0xd5b   : > { %9661 = vmatprep.subr.bf16.mxu1 %v22037_v55 }
 0xd5e   : > { %9662 = vmatpush1.bf16.msra.mxu1 %v16613_v46  ;;  %v20927_v46 = vld [vmem:[%s21907_s5 + $0x38] ss:$0 sps:$4 sm:$0xff]  }
 0xd5f   : > { %9677 = vmatprep.subr.bf16.mxu1 %v22037_v55  ;;  %v20820_v55 = vpop.f32.mrf.mxu0 }
 0xd61   : > { %9466 = vmatmul.mubr.bf16.gmra.mxu1 %v20677_v40  ;;  %v9518_v36 = vpop.f32.mrf.mxu0 }
 0xd62   : > { %13401 = vmatprep.mubr.msk.bf16.mxu1 %vm651_vm0, %v20685_v44  ;;  %9678 = vmatpush2.bf16.msra.mxu1 %v22039_v54  ;;  %v20932_v54 = vld [vmem:[%s21908_s6 + $0x38] ss:$0 sps:$4 sm:$0xff]  }
 0xd63   : > { %v20825_v9 = vpop.f32.mrf.mxu0 }
 0xd65   : > { %v9521_v50 = vpop.f32.mrf.mxu0 }
 0xd66   : > { %v13382_v50 = vld [vmem:[%s21914_s12] ss:$0 sm:$0xff] }
 0xd67   : > { %v20827_v2 = vpop.f32.mrf.mxu0 }
 0xd69   : > { %9474 = vmatmul.mubr.bf16.gmra.mxu1 %v20688_v39  ;;  %v9526_v12 = vpop.f32.mrf.mxu0 }
 0xd6a   : > { %13420 = vmatprep.mubr.msk.bf16.mxu1 %vm651_vm0, %v20697_v35 }
 0xd6b   : > { %v20832_v21 = vpop.f32.mrf.mxu0 }
 0xd6d   : > { %v9529_v57 = vpop.f32.mrf.mxu0 }
 0xd6f   : > { %v20834_v43 = vpop.f32.mrf.mxu0 }
 0xd71   : > { %9680 = vmatmul.mubr.bf16.vlgmr.msra.gmra.mxu1 %v20694_v32  ;;  %v9534_v6 = vpop.f32.mrf.mxu0 }
 0xd72   : > { %13421 = vmatprep.mubr.msk.bf16.mxu1 %vm651_vm0, %v20703_v29  ;;  %v16440_v29 = vld [vmem:[%s21907_s5 + $0x74] ss:$0 sps:$4 sm:$0xff]  }
 0xd73   : > { %v20839_v62 = vpop.f32.mrf.mxu0  ;;  %15951 = vmatprep.subr.msk.bf16.mxu1 %vm1342_vm2, %v16440_v29 }
 0xd75   : > { %v9537_v24 = vpop.f32.mrf.mxu0 }
 0xd77   : > { %v20841_v10 = vpop.f32.mrf.mxu0 }
 0xd79   : > { %9688 = vmatmul.mubr.bf16.gmra.mxu1 %v20706_v1  ;;  %v9542_v16 = vpop.f32.mrf.mxu0  ;;  %v16441_v1 = vld [vmem:[%s21908_s6 + $0x74] ss:$0 sps:$4 sm:$0xff]  }
 0xd7a   : > { %13422 = vmatprep.mubr.msk.bf16.mxu1 %vm651_vm0, %v20712_v47  ;;  %15952 = vmatprep.subr.msk.bf16.mxu0 %vm1342_vm2, %v16441_v1  ;;  %v10153_v17 = vsel %vm1342_vm2, %v16441_v1, 0 }
 0xd7b   : > { %v20844_v40 = vpop.f32.mrf.mxu0  ;;  %15586 = vmatpush3.bf16.msra.mxu0 %v10153_v17 }
 0xd7c   : > { %15587 = vmatprep.subr.bf16.mxu0 %v16443_v56 }
 0xd7d   : > { %v9545_v44 = vpop.f32.mrf.mxu0 }
 0xd7f   : > { %v20846_v39 = vpop.f32.mrf.mxu0  ;;  %15588 = vmatpush3.bf16.msra.mxu0 %v16443_v56 }
 0xd80   : > { %15589 = vmatprep.subr.bf16.mxu0 %v16445_v27 }
 0xd81   : > { %9696 = vmatmul.mubr.bf16.gmra.mxu1 %v20715_v19  ;;  %v9550_v32 = vpop.f32.mrf.mxu0  ;;  %v10009_v19 = vsel %vm1342_vm2, %v16440_v29, 0 }
 0xd82   : > { %13423 = vmatprep.mubr.msk.bf16.mxu1 %vm651_vm0, %v20721_v5  ;;  %15558 = vmatpush3.bf16.msra.mxu1 %v10009_v19 }
 0xd83   : > { %v20848_v35 = vpop.f32.mrf.mxu0  ;;  %15559 = vmatprep.subr.bf16.mxu1 %v16442_v28  ;;  %15590 = vmatpush3.bf16.msra.mxu0 %v16445_v27 }
 0xd85   : > { %v9553_v47 = vpop.f32.mrf.mxu0 }
 0xd86   : > { %15560 = vmatpush3.bf16.msra.mxu1 %v16442_v28 }
 0xd87   : > { %v20860_v22 = vpop.f32.mrf.mxu0  ;;  %15561 = vmatprep.subr.bf16.mxu1 %v16444_v58 }
 0xd89   : > { %9704 = vmatmul.mubr.bf16.gmra.mxu1 %v20724_v34  ;;  %v9558_v5 = vpop.f32.mrf.mxu0 }
 0xd8a   : > { %13424 = vmatprep.mubr.msk.bf16.mxu1 %vm651_vm0, %v20730_v23  ;;  %15562 = vmatpush3.bf16.msra.mxu1 %v16444_v58 }
 0xd8b   : > { %v20862_v34 = vpop.f32.mrf.mxu0 }
 0xd8d   : > { %v9561_v15 = vpop.f32.mrf.mxu0 }
 0xd8f   : > { %v20870_v25 = vpop.f32.mrf.mxu0 }
 0xd91   : > { %9712 = vmatmul.mubr.bf16.gmra.mxu1 %v20733_v8  ;;  %v9776_v23 = vpop.f32.mrf.mxu0 }
 0xd92   : > { %13425 = vmatprep.mubr.msk.bf16.mxu1 %vm651_vm0, %v20742_v11  ;;  %v16446_v11 = vld [vmem:[%s21907_s5 + $0x5c] sm:$0xff]  }
 0xd93   : > { %v20878_v8 = vpop.f32.mrf.mxu0  ;;  %15563 = vmatprep.subr.bf16.mxu1 %v16446_v11 }
 0xd94   : > { %15564 = vmatpush3.bf16.msra.mxu1 %v16446_v11 }
 0xd95   : > { %v9779_v38 = vpop.f32.mrf.mxu0  ;;  %15565 = vmatprep.subr.bf16.mxu1 %v16448_v49 }
 0xd97   : > { %v20880_v13 = vpop.f32.mrf.mxu0 }
 0xd98   : > { %15566 = vmatpush3.bf16.msra.mxu1 %v16448_v49 }
 0xd99   : > { %9720 = vmatmul.mubr.bf16.gmra.mxu1 %v20745_v20  ;;  %v16447_v20 = vld [vmem:[%s21908_s6 + $0x5c] sm:$0xff]   ;;  %v9784_v42 = vpop.f32.mrf.mxu0  ;;  %15567 = vmatprep.subr.bf16.mxu1 %v16450_v51 }
 0xd9a   : > { %15591 = vmatprep.subr.bf16.mxu0 %v16447_v20 }
 0xd9b   : > { %15592 = vmatpush3.bf16.msra.mxu0 %v16447_v20  ;;  %v20888_v59 = vpop.f32.mrf.mxu0 }
 0xd9c   : > { %15593 = vmatprep.subr.bf16.mxu0 %v16449_v14  ;;  %15568 = vmatpush3.bf16.msra.mxu1 %v16450_v51 }
 0xd9d   : > { %v9787_v52 = vpop.f32.mrf.mxu0  ;;  %15569 = vmatprep.subr.bf16.mxu1 %v16452_v18 }
 0xd9f   : > { %15594 = vmatpush3.bf16.msra.mxu0 %v16449_v14  ;;  %v20896_v60 = vpop.f32.mrf.mxu0 }
 0xda0   : > { %15595 = vmatprep.subr.bf16.mxu0 %v16451_v30  ;;  %15570 = vmatpush3.bf16.msra.mxu1 %v16452_v18 }
 0xda1   : > { %v9792_v7 = vpop.f32.mrf.mxu0  ;;  %15571 = vmatprep.subr.bf16.mxu1 %v16454_v3 }
 0xda3   : > { %v20898_v53 = vpop.f32.mrf.mxu0  ;;  %15596 = vmatpush3.bf16.msra.mxu0 %v16451_v30 }
 0xda4   : > { %15597 = vmatprep.subr.bf16.mxu0 %v16453_v41  ;;  %15572 = vmatpush3.bf16.msra.mxu1 %v16454_v3 }
 0xda5   : > { %v9795_v0 = vpop.f32.mrf.mxu0  ;;  %15953 = vmatprep.subr.msk.bf16.mxu1 %vm1342_vm2, %v20927_v46 }
 0xda7   : > { %v20912_v63 = vpop.f32.mrf.mxu0  ;;  %15598 = vmatpush3.bf16.msra.mxu0 %v16453_v41 }
 0xda8   : > { %15599 = vmatprep.subr.bf16.mxu0 %v16455_v31 }
 0xda9   : > { %v9800_v45 = vpop.f32.mrf.mxu0 }
 0xdab   : > { %v20920_v48 = vpop.f32.mrf.mxu0  ;;  %15600 = vmatpush3.bf16.msra.mxu0 %v16455_v31 }
 0xdac   : > { %15954 = vmatprep.subr.msk.bf16.mxu0 %vm1342_vm2, %v20932_v54 }
 0xdad   : > { %v9803_v37 = vpop.f32.mrf.mxu0 }
 0xdaf   : > { %v20922_v61 = vpop.f32.mrf.mxu0 }
 0xdb1   : > { %v9808_v36 = vpop.f32.mrf.mxu0 }
 0xdb3   : > { %v20941_v12 = vpop.f32.mrf.mxu0 }
 0xdb5   : > { %v9811_v6 = vpop.f32.mrf.mxu0 }
 0xdb7   : > { %v20945_v44 = vpop.f32.mrf.mxu0 }
 0xdb9   : > { %v9816_v1 = vpop.f32.mrf.mxu0 }
 0xdbb   : > { %v20949_v19 = vpop.f32.mrf.mxu0 }
 0xdbd   : > { %v9819_v17 = vpop.f32.mrf.mxu0 }
 0xddd   : > { %v9286_v57 = vpop.f32.mrf.mxu1 }
 0xdde   : > { %v20943_v24 = vadd.f32 %v13382_v50, %v9286_v57 }
 0xddf   : > { %v15555_v16 = vpop.f32.mrf.mxu1 }
 0xde0   : > { %v9292_v32 = vsel %vm3553_vm13, %v20943_v24, -inf }
 0xde1   : > { %9293 = vmax.xlane.f32.xlu1 %v9292_v32  ;;  %v9289_v29 = vpop.f32.mrf.mxu1 }
 0xde2   : > { %v20971_v29 = vld [vmem:[%s21906_s4] ss:$0 sm:$0xff] }
 0xde3   : > { %v15556_v47 = vpop.f32.mrf.mxu1 }
 0xe01   : > { %v9435_v5 = vpop.f32.mrf.mxu1 }
 0xe02   : > { %v9563_v36 = vmax.f32 %v9435_v5, %v20820_v55 }
 0xe03   : > { %v9437_v28 = vpop.f32.mrf.mxu1 }
 0xe05   : > { %v9438_v56 = vpop.f32.mrf.mxu1 }
 0xe06   : > { %v9564_v16 = vmax.f32 %v9438_v56, %v20825_v9 }
 0xe07   : > { %v9440_v15 = vpop.f32.mrf.mxu1 }
 0xe09   : > { %v9443_v58 = vpop.f32.mrf.mxu1 }
 0xe0a   : > { %v9565_v15 = vmax.f32 %v9443_v58, %v20827_v2 }
 0xe0b   : > { %v9445_v27 = vpop.f32.mrf.mxu1 }
 0xe0d   : > { %v9446_v23 = vpop.f32.mrf.mxu1 }
 0xe0f   : > { %v9448_v38 = vpop.f32.mrf.mxu1 }
 0xe10   : > { %v9566_v38 = vmax.f32 %v9446_v23, %v20832_v21 }
 0xe11   : > { %v9451_v11 = vpop.f32.mrf.mxu1 }
 0xe13   : > { %v9453_v20 = vpop.f32.mrf.mxu1 }
 0xe15   : > { %v20951_v42 = vpop.f32.mrf.mxu1 }
 0xe17   : > { %v9456_v49 = vpop.f32.mrf.mxu1 }
 0xe19   : > { %v20953_v14 = vpop.f32.mrf.mxu1 }
 0xe1b   : > { %v9461_v52 = vpop.f32.mrf.mxu1 }
 0xe1d   : > { %v20955_v7 = vpop.f32.mrf.mxu1 }
 0xe1f   : > { %v9464_v51 = vpop.f32.mrf.mxu1 }
 0xe21   : > { %v20957_v30 = vpop.f32.mrf.mxu1 }
 0xe23   : > { %v9469_v0 = vpop.f32.mrf.mxu1 }
 0xe25   : > { %v20959_v18 = vpop.f32.mrf.mxu1 }
 0xe27   : > { %v9472_v41 = vpop.f32.mrf.mxu1 }
 0xe29   : > { %v20961_v3 = vpop.f32.mrf.mxu1 }
 0xe2b   : > { %v9477_v31 = vpop.f32.mrf.mxu1 }
 0xe2d   : > { %v20963_v45 = vpop.f32.mrf.mxu1 }
 0xe2f   : > { %v9480_v37 = vpop.f32.mrf.mxu1 }
 0xe30   : > { %v9567_v37 = vmax.f32 %v9451_v11, %v20834_v43 }
 0xe31   : > { %v9681_v50 = vpop.f32.mrf.mxu1 }
 0xe32   : > { %v9728_v57 = vmax.f32 %v9563_v36, %v9681_v50 }
 0xe33   : > { %v9683_v6 = vpop.f32.mrf.mxu1 }
 0xe34   : > { %v9821_v32 = vmax.f32 %v9728_v57, %v20870_v25 }
 0xe35   : > { %v9684_v1 = vpop.f32.mrf.mxu1 }
 0xe36   : > { %v9729_v47 = vmax.f32 %v9564_v16, %v9684_v1  ;;  %v9840_v17 = vadd.f32 %v20971_v29, %v9821_v32 }
 0xe37   : > { %v9686_v28 = vpop.f32.mrf.mxu1 }
 0xe38   : > { %v9822_v55 = vmax.f32 %v9729_v47, %v20878_v8  ;;  %v20977_v56 = vmax.f32 %v9840_v17, 0.0 }
 0xe39   : > { %v9689_v5 = vpop.f32.mrf.mxu1 }
 0xe3a   : > { %v9841_v27 = vadd.f32 %v20971_v29, %v9822_v55  ;;  %v9730_v9 = vmax.f32 %v9565_v15, %v9689_v5  ;;  %v10872_v8 = vrot.slane %v20977_v56, 3  ;;  %v11232_v41 = vrot.slane %v20977_v56, 4 }
 0xe3b   : > { %v9691_v25 = vpop.f32.mrf.mxu1  ;;  %v9900_v11 = vrot.slane %v20977_v56, 1  ;;  %v9568_v55 = vmax.f32 %v20951_v42, %v20839_v62 }
 0xe3c   : > { %v20980_v20 = vmax.f32 %v9841_v27, 0.0  ;;  %v9823_v49 = vmax.f32 %v9730_v9, %v20880_v13 }
 0xe3d   : > { %v9692_v52 = vpop.f32.mrf.mxu1 }
 0xe3e   : > { %v9842_v51 = vadd.f32 %v20971_v29, %v9823_v49  ;;  %v9731_v0 = vmax.f32 %v9566_v38, %v9692_v52  ;;  %v10873_v58 = vrot.slane %v20980_v20, 3  ;;  %v11233_v31 = vrot.slane %v20980_v20, 4 }
 0xe3f   : > { %v9694_v2 = vpop.f32.mrf.mxu1  ;;  %v9901_v13 = vrot.slane %v20980_v20, 1 }
 0xe40   : > { %v20989_v21 = vmax.f32 %v9842_v51, 0.0  ;;  %v9824_v23 = vmax.f32 %v9731_v0, %v20888_v59  ;;  %v10894_v50 = vsel %vm2223_vm4, %v10872_v8, %v10873_v58  ;;  %v11254_v57 = vsel %vm2586_vm5, %v11232_v41, %v11233_v31 }
 0xe41   : > { %v9697_v36 = vpop.f32.mrf.mxu1  ;;  %v9922_v15 = vsel %vm1243_vm3, %v9900_v11, %v9901_v13 }
 0xe42   : > { %v9843_v6 = vadd.f32 %v20971_v29, %v9824_v23  ;;  %v9732_v43 = vmax.f32 %v9567_v37, %v9697_v36  ;;  %v9902_v59 = vrot.slane %v20989_v21, 1  ;;  %v10874_v32 = vrot.slane %v20989_v21, 3 }
 0xe43   : > { %v9699_v16 = vpop.f32.mrf.mxu1  ;;  %v11234_v1 = vrot.slane %v20989_v21, 4  ;;  %v10300_v23 = vsel %vm1342_vm2, %v20927_v46, 0  ;;  %v9570_v36 = vmax.f32 %v20955_v7, %v20844_v40 }
 0xe44   : > { %v21006_v47 = vmax.f32 %v9843_v6, 0.0  ;;  %v9825_v17 = vmax.f32 %v9732_v43, %v20896_v60  ;;  %v9921_v28 = vsel %vm1243_vm3, %v9901_v13, %v9902_v59  ;;  %v10893_v9 = vsel %vm2223_vm4, %v10873_v58, %v10874_v32 }
 0xe45   : > { %v9700_v5 = vpop.f32.mrf.mxu1  ;;  %v9924_v27 = vpack.c.bf16 %v9921_v28, %v9922_v15  ;;  %v11253_v25 = vsel %vm2586_vm5, %v11233_v31, %v11234_v1  ;;  %v9569_v60 = vmax.f32 %v20953_v14, %v20841_v10  ;;  %v21028_v62 = vpack.c.bf16 %v10893_v9, %v10894_v50 }
 0xe46   : > { %v10875_v38 = vrot.slane %v21006_v47, 3  ;;  %v11235_v49 = vrot.slane %v21006_v47, 4  ;;  %v9844_v52 = vadd.f32 %v20971_v29, %v9825_v17  ;;  %v9733_v51 = vmax.f32 %v9568_v55, %v9700_v5 }
 0xe47   : > { %v9702_v0 = vpop.f32.mrf.mxu1  ;;  %15573 = vmatprep.mubr.msk.bf16.mxu1 %vm1323_vm6, %v9924_v27  ;;  %15601 = vmatprep.mubr.msk.bf16.mxu0 %vm1323_vm6, %v9924_v27  ;;  %v9903_v42 = vrot.slane %v21006_v47, 1  ;;  %v10515_v2 = vrot.slane %v21006_v47, 2  ;;  %v21034_v14 = vpack.c.bf16 %v11253_v25, %v11254_v57  ;;  %v10429_v6 = vsel %vm1342_vm2, %v20932_v54, 0  ;;  %v16458_v25 = vld [vmem:[%s21907_s5 + $0x30] sm:$0xff]  }
 0xe48   : > { %v10892_v10 = vsel %vm2223_vm4, %v10874_v32, %v10875_v38  ;;  %v21036_v58 = vmax.f32 %v9844_v52, 0.0  ;;  %v9826_v31 = vmax.f32 %v9733_v51, %v20898_v53  ;;  %v11252_v13 = vsel %vm2586_vm5, %v11234_v1, %v11235_v49 }
 0xe49   : > { %v9705_v37 = vpop.f32.mrf.mxu1  ;;  %v10514_v57 = vrot.slane %v20989_v21, 2  ;;  %v9920_v40 = vsel %vm1243_vm3, %v9902_v59, %v9903_v42  ;;  %v9571_v0 = vmax.f32 %v20957_v30, %v20846_v39  ;;  %v16461_v30 = vld [vmem:[%s21908_s6 + $0x28] sm:$0xff]  }
 0xe4a   : > { %v9734_v50 = vmax.f32 %v9569_v60, %v9705_v37  ;;  %v9904_v43 = vrot.slane %v21036_v58, 1  ;;  %v10516_v53 = vrot.slane %v21036_v58, 2  ;;  %v10876_v16 = vrot.slane %v21036_v58, 3  ;;  %v16459_v60 = vld [vmem:[%s21908_s6 + $0x30] sm:$0xff]  }
 0xe4b   : > { %v11236_v46 = vrot.slane %v21036_v58, 4  ;;  %v9707_v32 = vpop.f32.mrf.mxu1  ;;  %v9845_v1 = vadd.f32 %v20971_v29, %v9826_v31  ;;  %v10532_v54 = vsel %vm1860_vm7, %v10514_v57, %v10515_v2 }
 0xe4c   : > { %v9827_v7 = vmax.f32 %v9734_v50, %v20912_v63  ;;  %v9919_v17 = vsel %vm1243_vm3, %v9903_v42, %v9904_v43  ;;  %v10531_v15 = vsel %vm1860_vm7, %v10515_v2, %v10516_v53  ;;  %v10891_v55 = vsel %vm2223_vm4, %v10875_v38, %v10876_v16 }
 0xe4d   : > { %v9708_v28 = vpop.f32.mrf.mxu1  ;;  %v11251_v63 = vsel %vm2586_vm5, %v11235_v49, %v11236_v46  ;;  %v21072_v59 = vmax.f32 %v9845_v1, 0.0  ;;  %v9925_v5 = vpack.c.bf16 %v9919_v17, %v9920_v40  ;;  %v21081_v52 = vpack.c.bf16 %v10531_v15, %v10532_v54 }
 0xe4e   : > { %v9846_v27 = vadd.f32 %v20971_v29, %v9827_v7  ;;  %v9735_v9 = vmax.f32 %v9570_v36, %v9708_v28  ;;  %v21083_v51 = vpack.c.bf16 %v10891_v55, %v10892_v10  ;;  %v21085_v49 = vpack.c.bf16 %v11251_v63, %v11252_v13  ;;  %v16463_v55 = vld [vmem:[%s21908_s6 + $0x20] sm:$0xff]  }
 0xe4f   : > { %v9710_v38 = vpop.f32.mrf.mxu1  ;;  %15574 = vmatmul.mubr.msk.bf16.vlgmr.msra.gmra.mxu1 %vm1323_vm6, %v9925_v5  ;;  %15602 = vmatmul.mubr.msk.bf16.vlgmr.msra.gmra.mxu0 %vm1323_vm6, %v9925_v5  ;;  %v9905_v31 = vrot.slane %v21072_v59, 1  ;;  %v10877_v10 = vrot.slane %v21072_v59, 3  ;;  %v9573_v63 = vmax.f32 %v20961_v3, %v20860_v22 }
 0xe50   : > { %v21089_v42 = vmax.f32 %v9846_v27, 0.0  ;;  %v9828_v2 = vmax.f32 %v9735_v9, %v20920_v48  ;;  %15614 = vmatpush3.bf16.msra.mxu1 %v10300_v23  ;;  %15642 = vmatpush3.bf16.msra.mxu0 %v10429_v6  ;;  %v16460_v48 = vld [vmem:[%s21907_s5 + $0x28] sm:$0xff]   ;;  %v9572_v23 = vmax.f32 %v20959_v18, %v20848_v35 }
 0xe51   : > { %v9713_v37 = vpop.f32.mrf.mxu1  ;;  %15615 = vmatprep.subr.bf16.mxu1 %v16458_v25  ;;  %15643 = vmatprep.subr.bf16.mxu0 %v16459_v60  ;;  %v9918_v6 = vsel %vm1243_vm3, %v9904_v43, %v9905_v31  ;;  %v10890_v1 = vsel %vm2223_vm4, %v10876_v16, %v10877_v10  ;;  %v11237_v43 = vrot.slane %v21072_v59, 4 }
 0xe52   : > { %v9847_v13 = vadd.f32 %v20971_v29, %v9828_v2  ;;  %v9736_v36 = vmax.f32 %v9571_v0, %v9713_v37  ;;  %v9906_v39 = vrot.slane %v21089_v42, 1  ;;  %v10878_v32 = vrot.slane %v21089_v42, 3 }
 0xe53   : > { %v9715_v50 = vpop.f32.mrf.mxu1  ;;  %v11238_v17 = vrot.slane %v21089_v42, 4  ;;  %v11250_v3 = vsel %vm2586_vm5, %v11236_v46, %v11237_v43  ;;  %v16465_v46 = vld [vmem:[%s21908_s6 + $0x18] sm:$0xff]  }
 0xe54   : > { %v21111_v40 = vmax.f32 %v9847_v13, 0.0  ;;  %v9829_v7 = vmax.f32 %v9736_v36, %v20922_v61  ;;  %v9917_v54 = vsel %vm1243_vm3, %v9905_v31, %v9906_v39  ;;  %15616 = vmatpush3.bf16.msra.mxu1 %v16458_v25  ;;  %15644 = vmatpush3.bf16.msra.mxu0 %v16459_v60  ;;  %v10889_v18 = vsel %vm2223_vm4, %v10877_v10, %v10878_v32  ;;  %v16462_v61 = vld [vmem:[%s21907_s5 + $0x20] sm:$0xff]   ;;  %v16464_v36 = vld [vmem:[%s21907_s5 + $0x18] sm:$0xff]  }
 0xe55   : > { %v9716_v28 = vpop.f32.mrf.mxu1  ;;  %v9926_v35 = vpack.c.bf16 %v9917_v54, %v9918_v6  ;;  %15617 = vmatprep.subr.bf16.mxu1 %v16460_v48  ;;  %15645 = vmatprep.subr.bf16.mxu0 %v16461_v30  ;;  %v21131_v27 = vpack.c.bf16 %v10889_v18, %v10890_v1  ;;  %v11249_v0 = vsel %vm2586_vm5, %v11237_v43, %v11238_v17 }
 0xe56   : > { %v9848_v16 = vadd.f32 %v20971_v29, %v9829_v7  ;;  %v9737_v15 = vmax.f32 %v9572_v23, %v9716_v28  ;;  %v10879_v9 = vrot.slane %v21111_v40, 3  ;;  %v9907_v38 = vrot.slane %v21111_v40, 1 }
 0xe57   : > { %v9718_v5 = vpop.f32.mrf.mxu1  ;;  %15577 = vmatprep.mubr.msk.bf16.mxu1 %vm1323_vm6, %v9926_v35  ;;  %15605 = vmatprep.mubr.msk.bf16.mxu0 %vm1323_vm6, %v9926_v35  ;;  %v11239_v31 = vrot.slane %v21111_v40, 4  ;;  %v21158_v23 = vpack.c.bf16 %v11249_v0, %v11250_v3 }
 0xe58   : > { %v21134_v25 = vmax.f32 %v9848_v16, 0.0  ;;  %v9830_v60 = vmax.f32 %v9737_v15, %v20941_v12  ;;  %15618 = vmatpush3.bf16.msra.mxu1 %v16460_v48  ;;  %15646 = vmatpush3.bf16.msra.mxu0 %v16461_v30  ;;  %v10888_v22 = vsel %vm2223_vm4, %v10878_v32, %v10879_v9  ;;  %v9574_v12 = vmax.f32 %v20963_v45, %v20862_v34 }
 0xe59   : > { %v9721_v2 = vpop.f32.mrf.mxu1  ;;  %15619 = vmatprep.subr.bf16.mxu1 %v16462_v61  ;;  %15647 = vmatprep.subr.bf16.mxu0 %v16463_v55  ;;  %v11248_v45 = vsel %vm2586_vm5, %v11238_v17, %v11239_v31  ;;  %v9916_v1 = vsel %vm1243_vm3, %v9906_v39, %v9907_v38  ;;  %v16467_v39 = vld [vmem:[%s21908_s6 + $0x10] sm:$0xff]  }
 0xe5a   : > { %v9849_v37 = vadd.f32 %v20971_v29, %v9830_v60  ;;  %v9738_v10 = vmax.f32 %v9573_v63, %v9721_v2  ;;  %v9908_v13 = vrot.slane %v21134_v25, 1  ;;  %v10880_v30 = vrot.slane %v21134_v25, 3  ;;  %v16469_v2 = vld [vmem:[%s21908_s6 + $0x8] sm:$0xff]  }
 0xe5b   : > { %v9723_v48 = vpop.f32.mrf.mxu1  ;;  %v11240_v34 = vrot.slane %v21134_v25, 4 }
 0xe5c   : > { %v21163_v50 = vmax.f32 %v9849_v37, 0.0  ;;  %v9831_v6 = vmax.f32 %v9738_v10, %v20945_v44  ;;  %v9915_v32 = vsel %vm1243_vm3, %v9907_v38, %v9908_v13  ;;  %15620 = vmatpush3.bf16.msra.mxu1 %v16462_v61  ;;  %15648 = vmatpush3.bf16.msra.mxu0 %v16463_v55  ;;  %v10887_v28 = vsel %vm2223_vm4, %v10879_v9, %v10880_v30  ;;  %v16466_v44 = vld [vmem:[%s21907_s5 + $0x10] sm:$0xff]  }
 0xe5d   : > { %v9724_v7 = vpop.f32.mrf.mxu1  ;;  %v9927_v54 = vpack.c.bf16 %v9915_v32, %v9916_v1  ;;  %15621 = vmatprep.subr.bf16.mxu1 %v16464_v36  ;;  %15649 = vmatprep.subr.bf16.mxu0 %v16465_v46  ;;  %v21181_v43 = vpack.c.bf16 %v10887_v28, %v10888_v22  ;;  %v11247_v15 = vsel %vm2586_vm5, %v11239_v31, %v11240_v34 }
 0xe5e   : > { %v9850_v35 = vadd.f32 %v20971_v29, %v9831_v6  ;;  %v9739_v17 = vmax.f32 %v9574_v12, %v9724_v7  ;;  %v10881_v16 = vrot.slane %v21163_v50, 3  ;;  %v9909_v63 = vrot.slane %v21163_v50, 1 }
 0xe5f   : > { %v9726_v18 = vpop.f32.mrf.mxu1  ;;  %15578 = vmatmul.mubr.msk.bf16.gmra.mxu1 %vm1323_vm6, %v9927_v54  ;;  %15606 = vmatmul.mubr.msk.bf16.gmra.mxu0 %vm1323_vm6, %v9927_v54  ;;  %v21190_v5 = vpack.c.bf16 %v11247_v15, %v11248_v45  ;;  %v11241_v60 = vrot.slane %v21163_v50, 4  ;;  %v9864_v54 = vpack.c.bf16 %v20980_v20, %v20977_v56 }
 0xe60   : > { %v21186_v61 = vmax.f32 %v9850_v35, 0.0  ;;  %v9832_v55 = vmax.f32 %v9739_v17, %v20949_v19  ;;  %15622 = vmatpush3.bf16.msra.mxu1 %v16464_v36  ;;  %15650 = vmatpush3.bf16.msra.mxu0 %v16465_v46  ;;  %v10886_v9 = vsel %vm2223_vm4, %v10880_v30, %v10881_v16  ;;  %v16468_v19 = vld [vmem:[%s21907_s5 + $0x8] sm:$0xff]   ;;  %v9914_v37 = vsel %vm1243_vm3, %v9908_v13, %v9909_v63  ;;  %v16470_v30 = vld [vmem:[%s21907_s5] sm:$0xff]   ;;  %v16472_v17 = vld [vmem:[%s21907_s5 + $0xb0] ss:$0 sps:$4 sm:$0xff]  }
 0xe61   : > { %15623 = vmatprep.subr.bf16.mxu1 %v16466_v44  ;;  %15651 = vmatprep.subr.bf16.mxu0 %v16467_v39  ;;  %v11246_v31 = vsel %vm2586_vm5, %v11240_v34, %v11241_v60  ;;  %v16471_v13 = vld [vmem:[%s21908_s6] sm:$0xff]  }
 0xe62   : > { %v9851_v38 = vadd.f32 %v20971_v29, %v9832_v55  ;;  %v9910_v0 = vrot.slane %v21186_v61, 1  ;;  %v10882_v22 = vrot.slane %v21186_v61, 3  ;;  %v11242_v3 = vrot.slane %v21186_v61, 4 }
 0xe64   : > { %v21207_v29 = vmax.f32 %v9851_v38, 0.0  ;;  %v9913_v12 = vsel %vm1243_vm3, %v9909_v63, %v9910_v0  ;;  %v10885_v10 = vsel %vm2223_vm4, %v10881_v16, %v10882_v22  ;;  %15624 = vmatpush3.bf16.msra.mxu1 %v16466_v44  ;;  %15652 = vmatpush3.bf16.msra.mxu0 %v16467_v39  ;;  %v11245_v45 = vsel %vm2586_vm5, %v11241_v60, %v11242_v3  ;;  %v16474_v60 = vld [vmem:[%s21907_s5 + $0xa8] sm:$0xff]  }
 0xe65   : > { %v9928_v36 = vpack.c.bf16 %v9913_v12, %v9914_v37  ;;  %v21215_v46 = vpack.c.bf16 %v10885_v10, %v10886_v9  ;;  %15625 = vmatprep.subr.bf16.mxu1 %v16468_v19  ;;  %15653 = vmatprep.subr.bf16.mxu0 %v16469_v2  ;;  %v21250_v39 = vpack.c.bf16 %v11245_v45, %v11246_v31  ;;  %v16475_v38 = vld [vmem:[%s21908_s6 + $0xa8] sm:$0xff]   ;;  %v16480_v10 = vld [vmem:[%s21907_s5 + $0x90] sm:$0xff]  }
 0xe66   : > { %v9911_v48 = vrot.slane %v21207_v29, 1  ;;  %v10883_v34 = vrot.slane %v21207_v29, 3  ;;  %v11243_v6 = vrot.slane %v21207_v29, 4  ;;  %v9865_v63 = vpack.c.bf16 %v21006_v47, %v20989_v21  ;;  %v16476_v47 = vld [vmem:[%s21907_s5 + $0xa0] sm:$0xff]   ;;  %v16482_v45 = vld [vmem:[%s21907_s5 + $0x88] sm:$0xff]  }
 0xe67   : > { %15581 = vmatprep.mubr.msk.bf16.mxu1 %vm1323_vm6, %v9928_v36  ;;  %15609 = vmatprep.mubr.msk.bf16.mxu0 %vm1323_vm6, %v9928_v36  ;;  %v9868_v31 = vpack.c.bf16 %v21163_v50, %v21134_v25  ;;  %v16481_v36 = vld [vmem:[%s21908_s6 + $0x90] sm:$0xff]   ;;  %v16483_v21 = vld [vmem:[%s21908_s6 + $0x88] sm:$0xff]  }
 0xe68   : > { %v9912_v32 = vsel %vm1243_vm3, %v9910_v0, %v9911_v48  ;;  %v9923_v1 = vsel %vm1243_vm3, %v9911_v48, %v9900_v11  ;;  %15626 = vmatpush3.bf16.msra.mxu1 %v16468_v19  ;;  %15654 = vmatpush3.bf16.msra.mxu0 %v16469_v2  ;;  %v10884_v28 = vsel %vm2223_vm4, %v10882_v22, %v10883_v34  ;;  %v16473_v11 = vld [vmem:[%s21908_s6 + $0xb0] ss:$0 sps:$4 sm:$0xff]   ;;  %v16477_v19 = vld [vmem:[%s21908_s6 + $0xa0] sm:$0xff]   ;;  %v16478_v22 = vld [vmem:[%s21907_s5 + $0x98] sm:$0xff]   ;;  %v10513_v48 = vrot.slane %v20980_v20, 2 }
 0xe69   : > { %v9929_v7 = vpack.c.bf16 %v9923_v1, %v9912_v32  ;;  %15627 = vmatprep.subr.bf16.mxu1 %v16470_v30  ;;  %15655 = vmatprep.subr.bf16.mxu0 %v16471_v13  ;;  %v10895_v44 = vsel %vm2223_vm4, %v10883_v34, %v10872_v8  ;;  %v11244_v18 = vsel %vm2586_vm5, %v11242_v3, %v11243_v6  ;;  %v10765_v9 = vsel %vm1342_vm2, %v16473_v11, 0  ;;  %v16479_v3 = vld [vmem:[%s21908_s6 + $0x98] sm:$0xff]   ;;  %v16485_v32 = vld [vmem:[%s21908_s6 + $0x80] sm:$0xff]  }
 0xe6a   : > { %v9294_v35 = vpop.xlane.xlu1 %9293  ;;  %v21259_v15 = vpack.c.bf16 %v10895_v44, %v10884_v28  ;;  %v11255_v55 = vsel %vm2586_vm5, %v11243_v6, %v11232_v41  ;;  %v10621_v41 = vsel %vm1342_vm2, %v16472_v17, 0  ;;  %v9866_v0 = vpack.c.bf16 %v21072_v59, %v21036_v58  ;;  %v16484_v6 = vld [vmem:[%s21907_s5 + $0x80] sm:$0xff]   ;;  %v16486_v1 = vld [vmem:[%s21907_s5 + $0x78] sm:$0xff]   ;;  %v16488_v28 = vld [vmem:[%s21907_s5 + $0xec] ss:$0 sps:$4 sm:$0xff]  }
 0xe6b   : > { %v21255_v16 = vsub.f32 %v20943_v24, %v9294_v35  ;;  %15582 = vmatmul.mubr.msk.bf16.gmra.mxu1 %vm1323_vm6, %v9929_v7  ;;  %15610 = vmatmul.mubr.msk.bf16.gmra.mxu0 %vm1323_vm6, %v9929_v7  ;;  %v21267_v8 = vpack.c.bf16 %v11255_v55, %v11244_v18  ;;  %v9867_v2 = vpack.c.bf16 %v21111_v40, %v21089_v42  ;;  %v16487_v7 = vld [vmem:[%s21908_s6 + $0x78] sm:$0xff]   ;;  %v16489_v35 = vld [vmem:[%s21908_s6 + $0xec] ss:$0 sps:$4 sm:$0xff]   ;;  %v10981_v18 = vsel %vm1342_vm2, %v16488_v28, 0 }
 0xe6c   : > { %15629 = vmatprep.mubr.msk.bf16.mxu1 %vm1323_vm6, %v9864_v54  ;;  %15657 = vmatprep.mubr.msk.bf16.mxu0 %vm1323_vm6, %v9864_v54  ;;  %v9869_v34 = vpack.c.bf16 %v21207_v29, %v21186_v61  ;;  %v10518_v54 = vrot.slane %v21089_v42, 2  ;;  %v11125_v55 = vsel %vm1342_vm2, %v16489_v35, 0  ;;  %v10522_v58 = vrot.slane %v21186_v61, 2  ;;  %v16493_v61 = vld [vmem:[%s21908_s6 + $0xdc] sm:$0xff]  }
 0xe6d   : > { %22040 = vst [vmem:[#allocation9_spill] sm:$0xff] %v21255_v16  ;;  %v9296_v24 = vmul.f32 1.442695, %v21255_v16  ;;  %15628 = vmatpush3.bf16.msra.mxu1 %v16470_v30  ;;  %15656 = vmatpush3.bf16.msra.mxu0 %v16471_v13  ;;  %v10512_v30 = vrot.slane %v20977_v56, 2  ;;  %v10533_v13 = vsel %vm1860_vm7, %v10513_v48, %v10514_v57  ;;  %v16498_v56 = vld [vmem:[%s21907_s5 + $0xc4] sm:$0xff]  }
 0xe6e   : > { %15955 = vmatprep.subr.msk.bf16.mxu1 %vm1342_vm2, %v16472_v17  ;;  %15956 = vmatprep.subr.msk.bf16.mxu0 %vm1342_vm2, %v16473_v11  ;;  %v10517_v17 = vrot.slane %v21072_v59, 2  ;;  %v16490_v59 = vld [vmem:[%s21907_s5 + $0xe4] sm:$0xff]  }
 0xe6f   : > { %16544 = vpow2.f32 %v9296_v24  ;;  %v10534_v20 = vsel %vm1860_vm7, %v10512_v30, %v10513_v48  ;;  %v16491_v24 = vld [vmem:[%s21908_s6 + $0xe4] sm:$0xff]  }
 0xe70   : > { %v10536_v57 = vpack.c.bf16 %v10533_v13, %v10534_v20  ;;  %v10529_v11 = vsel %vm1860_vm7, %v10517_v17, %v10518_v54  ;;  %v10530_v42 = vsel %vm1860_vm7, %v10516_v53, %v10517_v17  ;;  %v10519_v53 = vrot.slane %v21111_v40, 2  ;;  %v16504_v48 = vld [vmem:[%s21907_s5 + $0x128] ss:$0 sps:$4 sm:$0xff]   ;;  %v16506_v20 = vld [vmem:[%s21907_s5 + $0x120] sm:$0xff]  }
 0xe71   : > { %v10538_v44 = vpack.c.bf16 %v10529_v11, %v10530_v42  ;;  %v11341_v13 = vsel %vm1342_vm2, %v16504_v48, 0 }
 0xe73   : > { %15630 = vmatmul.mubr.msk.bf16.vlgmr.msra.gmra.mxu1 %vm1323_vm6, %v9865_v63  ;;  %15658 = vmatmul.mubr.msk.bf16.vlgmr.msra.gmra.mxu0 %vm1323_vm6, %v9865_v63  ;;  %v10520_v63 = vrot.slane %v21134_v25, 2 }
 0xe74   : > { %15670 = vmatpush3.bf16.msra.mxu1 %v10621_v41  ;;  %15698 = vmatpush3.bf16.msra.mxu0 %v10765_v9  ;;  %v10521_v41 = vrot.slane %v21163_v50, 2  ;;  %v10528_v9 = vsel %vm1860_vm7, %v10518_v54, %v10519_v53 }
 0xe75   : > { %15633 = vmatprep.mubr.msk.bf16.mxu1 %vm1323_vm6, %v9866_v0  ;;  %15661 = vmatprep.mubr.msk.bf16.mxu0 %vm1323_vm6, %v9866_v0  ;;  %v10527_v25 = vsel %vm1860_vm7, %v10519_v53, %v10520_v63  ;;  %v16494_v0 = vld [vmem:[%s21907_s5 + $0xd4] sm:$0xff]  }
 0xe76   : > { %15671 = vmatprep.subr.bf16.mxu1 %v16474_v60  ;;  %15699 = vmatprep.subr.bf16.mxu0 %v16475_v38  ;;  %v10525_v40 = vsel %vm1860_vm7, %v10521_v41, %v10522_v58  ;;  %v10539_v50 = vpack.c.bf16 %v10527_v25, %v10528_v9 }
 0xe78   : > { %15672 = vmatpush3.bf16.msra.mxu1 %v16474_v60  ;;  %15700 = vmatpush3.bf16.msra.mxu0 %v16475_v38  ;;  %v10526_v60 = vsel %vm1860_vm7, %v10520_v63, %v10521_v41 }
 0xe79   : > { %15673 = vmatprep.subr.bf16.mxu1 %v16476_v47  ;;  %15701 = vmatprep.subr.bf16.mxu0 %v16477_v19  ;;  %v10540_v38 = vpack.c.bf16 %v10525_v40, %v10526_v60 }
 0xe7b   : > { %15634 = vmatmul.mubr.msk.bf16.gmra.mxu1 %vm1323_vm6, %v9867_v2  ;;  %15662 = vmatmul.mubr.msk.bf16.gmra.mxu0 %vm1323_vm6, %v9867_v2 }
 0xe7c   : > { %v16545_v12 = vpop.eup %16544  ;;  %15674 = vmatpush3.bf16.msra.mxu1 %v16476_v47  ;;  %15702 = vmatpush3.bf16.msra.mxu0 %v16477_v19  ;;  %v16495_v47 = vld [vmem:[%s21908_s6 + $0xd4] sm:$0xff]   ;;  %v10523_v19 = vrot.slane %v21207_v29, 2 }
 0xe7d   : > { %15637 = vmatprep.mubr.msk.bf16.mxu1 %vm1323_vm6, %v9868_v31  ;;  %15665 = vmatprep.mubr.msk.bf16.mxu0 %vm1323_vm6, %v9868_v31  ;;  %v9298_v37 = vsel %vm3553_vm13, %v16545_v12, 0.0  ;;  %v16499_v12 = vld [vmem:[%s21908_s6 + $0xc4] sm:$0xff]  }
 0xe7e   : > { %15675 = vmatprep.subr.bf16.mxu1 %v16478_v22  ;;  %15703 = vmatprep.subr.bf16.mxu0 %v16479_v3  ;;  %v10524_v2 = vsel %vm1860_vm7, %v10522_v58, %v10523_v19  ;;  %v10535_v29 = vsel %vm1860_vm7, %v10523_v19, %v10512_v30  ;;  %v16505_v30 = vld [vmem:[%s21908_s6 + $0x128] ss:$0 sps:$4 sm:$0xff]  }
 0xe7f   : > { %9299 = vadd.xlane.f32.xlu0 %v9298_v37  ;;  %v10541_v31 = vpack.c.bf16 %v10535_v29, %v10524_v2  ;;  %v16500_v37 = vld [vmem:[%s21907_s5 + $0xbc] sm:$0xff]  }
 0xe80   : > { %15676 = vmatpush3.bf16.msra.mxu1 %v16478_v22  ;;  %15704 = vmatpush3.bf16.msra.mxu0 %v16479_v3  ;;  %v16496_v22 = vld [vmem:[%s21907_s5 + $0xcc] sm:$0xff]  }
 0xe81   : > { %15677 = vmatprep.subr.bf16.mxu1 %v16480_v10  ;;  %15705 = vmatprep.subr.bf16.mxu0 %v16481_v36  ;;  %v16497_v3 = vld [vmem:[%s21908_s6 + $0xcc] sm:$0xff]  }
 0xe83   : > { %15638 = vmatmul.mubr.msk.bf16.gmra.mxu1 %vm1323_vm6, %v9869_v34  ;;  %15666 = vmatmul.mubr.msk.bf16.gmra.mxu0 %vm1323_vm6, %v9869_v34  ;;  %v11485_v34 = vsel %vm1342_vm2, %v16505_v30, 0 }
 0xe84   : > { %15678 = vmatpush3.bf16.msra.mxu1 %v16480_v10  ;;  %15706 = vmatpush3.bf16.msra.mxu0 %v16481_v36  ;;  %v16501_v10 = vld [vmem:[%s21908_s6 + $0xbc] sm:$0xff]   ;;  %v16503_v36 = vld [vmem:[%s21908_s6 + $0xb4] sm:$0xff]  }
 0xe85   : > { %15685 = vmatprep.mubr.msk.bf16.mxu1 %vm1323_vm6, %v10536_v57  ;;  %15713 = vmatprep.mubr.msk.bf16.mxu0 %vm1323_vm6, %v10536_v57  ;;  %v16509_v57 = vld [vmem:[%s21908_s6 + $0x118] sm:$0xff]  }
 0xe86   : > { %15679 = vmatprep.subr.bf16.mxu1 %v16482_v45  ;;  %15707 = vmatprep.subr.bf16.mxu0 %v16483_v21 }
 0xe88   : > { %15680 = vmatpush3.bf16.msra.mxu1 %v16482_v45  ;;  %15708 = vmatpush3.bf16.msra.mxu0 %v16483_v21  ;;  %v16507_v45 = vld [vmem:[%s21908_s6 + $0x120] sm:$0xff]   ;;  %v16508_v21 = vld [vmem:[%s21907_s5 + $0x118] sm:$0xff]  }
 0xe89   : > { %15681 = vmatprep.subr.bf16.mxu1 %v16484_v6  ;;  %15709 = vmatprep.subr.bf16.mxu0 %v16485_v32 }
 0xe8c   : > { %15682 = vmatpush3.bf16.msra.mxu1 %v16484_v6  ;;  %15710 = vmatpush3.bf16.msra.mxu0 %v16485_v32  ;;  %v16512_v6 = vld [vmem:[%s21907_s5 + $0x108] sm:$0xff]  }
 0xe8d   : > { %15683 = vmatprep.subr.bf16.mxu1 %v16486_v1  ;;  %15711 = vmatprep.subr.bf16.mxu0 %v16487_v7  ;;  %v16513_v32 = vld [vmem:[%s21908_s6 + $0x108] sm:$0xff]  }
 0xe90   : > { %15684 = vmatpush3.bf16.msra.mxu1 %v16486_v1  ;;  %15712 = vmatpush3.bf16.msra.mxu0 %v16487_v7  ;;  %v16516_v1 = vld [vmem:[%s21907_s5 + $0xf8] sm:$0xff]  }
 0xe91   : > { %15957 = vmatprep.subr.msk.bf16.mxu1 %vm1342_vm2, %v16488_v28  ;;  %15958 = vmatprep.subr.msk.bf16.mxu0 %vm1342_vm2, %v16489_v35  ;;  %v16517_v7 = vld [vmem:[%s21908_s6 + $0xf8] sm:$0xff]  }
 0xe93   : > { %15686 = vmatmul.mubr.msk.bf16.vlgmr.msra.gmra.mxu1 %vm1323_vm6, %v21081_v52  ;;  %15714 = vmatmul.mubr.msk.bf16.vlgmr.msra.gmra.mxu0 %vm1323_vm6, %v21081_v52  ;;  %v16492_v52 = vld [vmem:[%s21907_s5 + $0xdc] sm:$0xff]  }
 0xe94   : > { %15689 = vmatprep.mubr.msk.bf16.mxu1 %vm1323_vm6, %v10538_v44  ;;  %15717 = vmatprep.mubr.msk.bf16.mxu0 %vm1323_vm6, %v10538_v44 }
 0xe95   : > { %15726 = vmatpush3.bf16.msra.mxu1 %v10981_v18  ;;  %15754 = vmatpush3.bf16.msra.mxu0 %v11125_v55 }
 0xe96   : > { %15727 = vmatprep.subr.bf16.mxu1 %v16490_v59  ;;  %15755 = vmatprep.subr.bf16.mxu0 %v16491_v24 }
 0xe99   : > { %15728 = vmatpush3.bf16.msra.mxu1 %v16490_v59  ;;  %15756 = vmatpush3.bf16.msra.mxu0 %v16491_v24 }
 0xe9a   : > { %15729 = vmatprep.subr.bf16.mxu1 %v16492_v52  ;;  %15757 = vmatprep.subr.bf16.mxu0 %v16493_v61 }
 0xe9b   : > { %15690 = vmatmul.mubr.msk.bf16.gmra.mxu1 %vm1323_vm6, %v10539_v50  ;;  %15718 = vmatmul.mubr.msk.bf16.gmra.mxu0 %vm1323_vm6, %v10539_v50 }
 0xe9c   : > { %15693 = vmatprep.mubr.msk.bf16.mxu1 %vm1323_vm6, %v10540_v38  ;;  %15721 = vmatprep.mubr.msk.bf16.mxu0 %vm1323_vm6, %v10540_v38 }
 0xe9d   : > { %15730 = vmatpush3.bf16.msra.mxu1 %v16492_v52  ;;  %15758 = vmatpush3.bf16.msra.mxu0 %v16493_v61 }
 0xe9e   : > { %15731 = vmatprep.subr.bf16.mxu1 %v16494_v0  ;;  %15759 = vmatprep.subr.bf16.mxu0 %v16495_v47 }
 0xea1   : > { %15732 = vmatpush3.bf16.msra.mxu1 %v16494_v0  ;;  %15760 = vmatpush3.bf16.msra.mxu0 %v16495_v47 }
 0xea2   : > { %15733 = vmatprep.subr.bf16.mxu1 %v16496_v22  ;;  %15761 = vmatprep.subr.bf16.mxu0 %v16497_v3 }
 0xea3   : > { %15694 = vmatmul.mubr.msk.bf16.gmra.mxu1 %vm1323_vm6, %v10541_v31  ;;  %15722 = vmatmul.mubr.msk.bf16.gmra.mxu0 %vm1323_vm6, %v10541_v31 }
 0xea4   : > { %15741 = vmatprep.mubr.msk.bf16.mxu1 %vm1323_vm6, %v21028_v62  ;;  %15769 = vmatprep.mubr.msk.bf16.mxu0 %vm1323_vm6, %v21028_v62  ;;  %v16502_v62 = vld [vmem:[%s21907_s5 + $0xb4] sm:$0xff]  }
 0xea5   : > { %15734 = vmatpush3.bf16.msra.mxu1 %v16496_v22  ;;  %15762 = vmatpush3.bf16.msra.mxu0 %v16497_v3 }
 0xea6   : > { %15735 = vmatprep.subr.bf16.mxu1 %v16498_v56  ;;  %15763 = vmatprep.subr.bf16.mxu0 %v16499_v12 }
 0xea9   : > { %15736 = vmatpush3.bf16.msra.mxu1 %v16498_v56  ;;  %15764 = vmatpush3.bf16.msra.mxu0 %v16499_v12 }
 0xeaa   : > { %15737 = vmatprep.subr.bf16.mxu1 %v16500_v37  ;;  %15765 = vmatprep.subr.bf16.mxu0 %v16501_v10 }
 0xead   : > { %15738 = vmatpush3.bf16.msra.mxu1 %v16500_v37  ;;  %15766 = vmatpush3.bf16.msra.mxu0 %v16501_v10 }
 0xeae   : > { %15739 = vmatprep.subr.bf16.mxu1 %v16502_v62  ;;  %15767 = vmatprep.subr.bf16.mxu0 %v16503_v36 }
 0xeb1   : > { %15740 = vmatpush3.bf16.msra.mxu1 %v16502_v62  ;;  %15768 = vmatpush3.bf16.msra.mxu0 %v16503_v36 }
 0xeb2   : > { %15959 = vmatprep.subr.msk.bf16.mxu1 %vm1342_vm2, %v16504_v48  ;;  %15960 = vmatprep.subr.msk.bf16.mxu0 %vm1342_vm2, %v16505_v30 }
 0xeb4   : > { %15742 = vmatmul.mubr.msk.bf16.vlgmr.msra.gmra.mxu1 %vm1323_vm6, %v21083_v51  ;;  %15770 = vmatmul.mubr.msk.bf16.vlgmr.msra.gmra.mxu0 %vm1323_vm6, %v21083_v51  ;;  %v16510_v51 = vld [vmem:[%s21907_s5 + $0x110] sm:$0xff]  }
 0xeb5   : > { %15745 = vmatprep.mubr.msk.bf16.mxu1 %vm1323_vm6, %v21131_v27  ;;  %15773 = vmatprep.mubr.msk.bf16.mxu0 %vm1323_vm6, %v21131_v27  ;;  %v16511_v27 = vld [vmem:[%s21908_s6 + $0x110] sm:$0xff]  }
 0xeb6   : > { %15782 = vmatpush3.bf16.msra.mxu1 %v11341_v13  ;;  %15810 = vmatpush3.bf16.msra.mxu0 %v11485_v34 }
 0xeb7   : > { %15783 = vmatprep.subr.bf16.mxu1 %v16506_v20  ;;  %15811 = vmatprep.subr.bf16.mxu0 %v16507_v45 }
 0xeba   : > { %15784 = vmatpush3.bf16.msra.mxu1 %v16506_v20  ;;  %15812 = vmatpush3.bf16.msra.mxu0 %v16507_v45 }
 0xebb   : > { %15785 = vmatprep.subr.bf16.mxu1 %v16508_v21  ;;  %15813 = vmatprep.subr.bf16.mxu0 %v16509_v57 }
 0xebc   : > { %15746 = vmatmul.mubr.msk.bf16.gmra.mxu1 %vm1323_vm6, %v21181_v43  ;;  %15774 = vmatmul.mubr.msk.bf16.gmra.mxu0 %vm1323_vm6, %v21181_v43  ;;  %v16514_v43 = vld [vmem:[%s21907_s5 + $0x100] sm:$0xff]  }
 0xebd   : > { %15749 = vmatprep.mubr.msk.bf16.mxu1 %vm1323_vm6, %v21215_v46  ;;  %15777 = vmatprep.mubr.msk.bf16.mxu0 %vm1323_vm6, %v21215_v46  ;;  %v16515_v46 = vld [vmem:[%s21908_s6 + $0x100] sm:$0xff]  }
 0xebe   : > { %15786 = vmatpush3.bf16.msra.mxu1 %v16508_v21  ;;  %15814 = vmatpush3.bf16.msra.mxu0 %v16509_v57 }
 0xebf   : > { %15787 = vmatprep.subr.bf16.mxu1 %v16510_v51  ;;  %15815 = vmatprep.subr.bf16.mxu0 %v16511_v27 }
 0xec2   : > { %15788 = vmatpush3.bf16.msra.mxu1 %v16510_v51  ;;  %15816 = vmatpush3.bf16.msra.mxu0 %v16511_v27 }
 0xec3   : > { %15789 = vmatprep.subr.bf16.mxu1 %v16512_v6  ;;  %15817 = vmatprep.subr.bf16.mxu0 %v16513_v32 }
 0xec4   : > { %15750 = vmatmul.mubr.msk.bf16.gmra.mxu1 %vm1323_vm6, %v21259_v15  ;;  %15778 = vmatmul.mubr.msk.bf16.gmra.mxu0 %vm1323_vm6, %v21259_v15  ;;  %v16519_v15 = vld [vmem:[%s21908_s6 + $0xf0] sm:$0xff]  }
 0xec5   : > { %15797 = vmatprep.mubr.msk.bf16.mxu1 %vm1323_vm6, %v21034_v14  ;;  %15825 = vmatprep.mubr.msk.bf16.mxu0 %vm1323_vm6, %v21034_v14  ;;  %v16518_v14 = vld [vmem:[%s21907_s5 + $0xf0] sm:$0xff]  }
 0xec6   : > { %15790 = vmatpush3.bf16.msra.mxu1 %v16512_v6  ;;  %15818 = vmatpush3.bf16.msra.mxu0 %v16513_v32 }
 0xec7   : > { %15791 = vmatprep.subr.bf16.mxu1 %v16514_v43  ;;  %15819 = vmatprep.subr.bf16.mxu0 %v16515_v46 }
 0xeca   : > { %15792 = vmatpush3.bf16.msra.mxu1 %v16514_v43  ;;  %15820 = vmatpush3.bf16.msra.mxu0 %v16515_v46 }
 0xecb   : > { %15793 = vmatprep.subr.bf16.mxu1 %v16516_v1  ;;  %15821 = vmatprep.subr.bf16.mxu0 %v16517_v7 }
 0xece   : > { %15794 = vmatpush3.bf16.msra.mxu1 %v16516_v1  ;;  %15822 = vmatpush3.bf16.msra.mxu0 %v16517_v7 }
 0xecf   : > { %15795 = vmatprep.subr.bf16.mxu1 %v16518_v14  ;;  %15823 = vmatprep.subr.bf16.mxu0 %v16519_v15 }
 0xed2   : > { %15796 = vmatpush3.bf16.msra.mxu1 %v16518_v14  ;;  %15824 = vmatpush3.bf16.msra.mxu0 %v16519_v15 }
 0xed3   : > { %15853 = vmatprep.subr.bf16.mxu0 %v22035_v4 }
 0xed5   : > { %15798 = vmatmul.mubr.msk.bf16.vlgmr.msra.gmra.mxu1 %vm1323_vm6, %v21085_v49  ;;  %15826 = vmatmul.mubr.msk.bf16.vlgmr.msra.gmra.mxu0 %vm1323_vm6, %v21085_v49  ;;  %v16614_v49 = vld [vmem:[%s21910_s8] sm:$0xff]  }
 0xed6   : > { %15801 = vmatprep.mubr.msk.bf16.mxu1 %vm1323_vm6, %v21158_v23  ;;  %15829 = vmatprep.mubr.msk.bf16.mxu0 %vm1323_vm6, %v21158_v23 }
 0xedd   : > { %15802 = vmatmul.mubr.msk.bf16.gmra.mxu1 %vm1323_vm6, %v21190_v5  ;;  %15830 = vmatmul.mubr.msk.bf16.gmra.mxu0 %vm1323_vm6, %v21190_v5 }
 0xede   : > { %15805 = vmatprep.mubr.msk.bf16.mxu1 %vm1323_vm6, %v21250_v39  ;;  %15833 = vmatprep.mubr.msk.bf16.mxu0 %vm1323_vm6, %v21250_v39 }
 0xee5   : > { %15806 = vmatmul.mubr.msk.bf16.gmra.mxu1 %vm1323_vm6, %v21267_v8  ;;  %15834 = vmatmul.mubr.msk.bf16.gmra.mxu0 %vm1323_vm6, %v21267_v8 }
 0xee6   : > { %15849 = vmatprep.mubr.msk.bf16.mxu1 %vm3068_vm8, %v16614_v49  ;;  %15863 = vmatprep.mubr.msk.bf16.mxu0 %vm16629_vm9, %v22035_v4 }
 0xf0f   : > { %v15575_v23 = vpop.f32.mrf.mxu1  ;;  %v15603_v5 = vpop.f32.mrf.mxu0 }
 0xf11   : > { %v10045_v54 = vpop.f32.mrf.mxu1  ;;  %v10189_v28 = vpop.f32.mrf.mxu0 }
 0xf13   : > { %v15576_v39 = vpop.f32.mrf.mxu1  ;;  %v15604_v35 = vpop.f32.mrf.mxu0 }
 0xf15   : > { %v10048_v17 = vpop.f32.mrf.mxu1  ;;  %v10192_v11 = vpop.f32.mrf.mxu0 }
 0xf1f   : > { %v15579_v42 = vpop.f32.mrf.mxu1  ;;  %v15607_v44 = vpop.f32.mrf.mxu0 }
 0xf21   : > { %v10061_v8 = vpop.f32.mrf.mxu1  ;;  %v10205_v18 = vpop.f32.mrf.mxu0 }
 0xf23   : > { %v15580_v55 = vpop.f32.mrf.mxu1  ;;  %v15608_v59 = vpop.f32.mrf.mxu0 }
 0xf25   : > { %v10064_v24 = vpop.f32.mrf.mxu1  ;;  %v10208_v63 = vpop.f32.mrf.mxu0 }
 0xf2b   : > { %v15583_v58 = vpop.f32.mrf.mxu1  ;;  %v15611_v53 = vpop.f32.mrf.mxu0 }
 0xf2d   : > { %v10077_v41 = vpop.f32.mrf.mxu1  ;;  %v10221_v25 = vpop.f32.mrf.mxu0 }
 0xf2f   : > { %v15584_v52 = vpop.f32.mrf.mxu1  ;;  %v15612_v61 = vpop.f32.mrf.mxu0 }
 0xf31   : > { %v10080_v40 = vpop.f32.mrf.mxu1  ;;  %v10224_v9 = vpop.f32.mrf.mxu0 }
 0xf33   : > { %v15631_v50 = vpop.f32.mrf.mxu1  ;;  %v15659_v60 = vpop.f32.mrf.mxu0 }
 0xf34   : > { %v10345_v38 = vadd.f32 %v15631_v50, %v15575_v23  ;;  %v10474_v0 = vadd.f32 %v15659_v60, %v15603_v5 }
 0xf35   : > { %v10336_v47 = vpop.f32.mrf.mxu1  ;;  %v10465_v19 = vpop.f32.mrf.mxu0 }
 0xf36   : > { %v21547_v2 = vadd.f32 %v10336_v47, %v10045_v54  ;;  %v21549_v29 = vadd.f32 %v10465_v19, %v10189_v28  ;;  %v16523_v47 = vld [vmem:[%s21911_s9 + $0x10] sm:$0xff]  }
 0xf37   : > { %v15632_v22 = vpop.f32.mrf.mxu1  ;;  %v15660_v3 = vpop.f32.mrf.mxu0 }
 0xf38   : > { %v10348_v31 = vadd.f32 %v15632_v22, %v15576_v39  ;;  %v10477_v56 = vadd.f32 %v15660_v3, %v15604_v35 }
 0xf39   : > { %v10339_v12 = vpop.f32.mrf.mxu1  ;;  %v10468_v37 = vpop.f32.mrf.mxu0 }
 0xf3a   : > { %v10340_v10 = vadd.f32 %v10339_v12, %v10048_v17  ;;  %v10469_v62 = vadd.f32 %v10468_v37, %v10192_v11  ;;  %v16525_v37 = vld [vmem:[%s21911_s9 + $0x8] sm:$0xff]  }
 0xf3b   : > { %v15635_v36 = vpop.f32.mrf.mxu1  ;;  %v15663_v48 = vpop.f32.mrf.mxu0 }
 0xf3c   : > { %v21551_v30 = vadd.f32 %v15635_v36, %v15579_v42  ;;  %v21553_v13 = vadd.f32 %v15663_v48, %v15607_v44 }
 0xf3d   : > { %v10352_v34 = vpop.f32.mrf.mxu1  ;;  %v10481_v20 = vpop.f32.mrf.mxu0 }
 0xf3e   : > { %v10353_v45 = vadd.f32 %v10352_v34, %v10061_v8  ;;  %v10482_v21 = vadd.f32 %v10481_v20, %v10205_v18 }
 0xf3f   : > { %v15636_v57 = vpop.f32.mrf.mxu1  ;;  %v15664_v51 = vpop.f32.mrf.mxu0 }
 0xf40   : > { %v21555_v27 = vadd.f32 %v15636_v57, %v15580_v55  ;;  %v21557_v6 = vadd.f32 %v15664_v51, %v15608_v59 }
 0xf41   : > { %v10355_v32 = vpop.f32.mrf.mxu1  ;;  %v10484_v43 = vpop.f32.mrf.mxu0 }
 0xf42   : > { %v21559_v46 = vadd.f32 %v10355_v32, %v10064_v24  ;;  %v21561_v1 = vadd.f32 %v10484_v43, %v10208_v63 }
 0xf43   : > { %v15639_v7 = vpop.f32.mrf.mxu1  ;;  %v15667_v14 = vpop.f32.mrf.mxu0 }
 0xf44   : > { %v21563_v15 = vadd.f32 %v15639_v7, %v15583_v58  ;;  %v21565_v49 = vadd.f32 %v15667_v14, %v15611_v53  ;;  %v16520_v58 = vld [vmem:[%s21911_s9 + $0x20] sm:$0xff]  }
 0xf45   : > { %v10368_v23 = vpop.f32.mrf.mxu1  ;;  %v10497_v5 = vpop.f32.mrf.mxu0  ;;  %15854 = vmatpush3.bf16.msra.mxu0 %v16520_v58 }
 0xf46   : > { %v21567_v54 = vadd.f32 %v10368_v23, %v10077_v41  ;;  %v21569_v28 = vadd.f32 %v10497_v5, %v10221_v25  ;;  %v16521_v25 = vld [vmem:[%s21911_s9 + $0x18] sm:$0xff]   ;;  %15855 = vmatprep.subr.bf16.mxu0 %v22035_v4 }
 0xf47   : > { %v15640_v39 = vpop.f32.mrf.mxu1  ;;  %v15668_v35 = vpop.f32.mrf.mxu0 }
 0xf48   : > { %v21571_v17 = vadd.f32 %v15640_v39, %v15584_v52  ;;  %v21573_v11 = vadd.f32 %v15668_v35, %v15612_v61 }
 0xf49   : > { %v10371_v42 = vpop.f32.mrf.mxu1  ;;  %v10500_v44 = vpop.f32.mrf.mxu0  ;;  %15856 = vmatpush3.bf16.msra.mxu0 %v16521_v25 }
 0xf4a   : > { %v21575_v8 = vadd.f32 %v10371_v42, %v10080_v40  ;;  %v21577_v18 = vadd.f32 %v10500_v44, %v10224_v9  ;;  %15857 = vmatprep.subr.bf16.mxu0 %v22035_v4 }
 0xf4d   : > { %15858 = vmatpush3.bf16.msra.mxu0 %v16523_v47 }
 0xf4e   : > { %15859 = vmatprep.subr.bf16.mxu0 %v22035_v4 }
 0xf51   : > { %15860 = vmatpush3.bf16.msra.mxu0 %v16525_v37 }
 0xf52   : > { %15861 = vmatprep.subr.bf16.mxu0 %v22035_v4 }
 0xf53   : > { %v15687_v55 = vpop.f32.mrf.mxu1  ;;  %v15715_v59 = vpop.f32.mrf.mxu0 }
 0xf54   : > { %v21579_v24 = vadd.f32 %v15687_v55, %v10345_v38  ;;  %v21581_v63 = vadd.f32 %v15715_v59, %v10474_v0 }
 0xf55   : > { %v10657_v53 = vpop.f32.mrf.mxu1  ;;  %v10801_v41 = vpop.f32.mrf.mxu0 }
 0xf56   : > { %22041 = vst [vmem:[#allocation10_spill] sm:$0xff] %v21579_v24  ;;  %22042 = vst [vmem:[#allocation11_spill] sm:$0xff] %v21581_v63  ;;  %v10848_v4 = vadd.f32 %v10657_v53, %v21547_v2  ;;  %v10860_v33 = vadd.f32 %v10801_v41, %v21549_v29 }
 0xf57   : > { %v15688_v52 = vpop.f32.mrf.mxu1  ;;  %v15716_v61 = vpop.f32.mrf.mxu0 }
 0xf58   : > { %v21590_v40 = vadd.f32 %v15688_v52, %v10348_v31  ;;  %v21592_v9 = vadd.f32 %v15716_v61, %v10477_v56 }
 0xf59   : > { %v10660_v50 = vpop.f32.mrf.mxu1  ;;  %v10804_v60 = vpop.f32.mrf.mxu0 }
 0xf5a   : > { %22043 = vst [vmem:[#allocation12_spill] sm:$0xff] %v21590_v40  ;;  %22044 = vst [vmem:[#allocation13_spill] sm:$0xff] %v21592_v9  ;;  %v21594_v38 = vadd.f32 %v10660_v50, %v10340_v10  ;;  %v21596_v0 = vadd.f32 %v10804_v60, %v10469_v62 }
 0xf5b   : > { %v15691_v19 = vpop.f32.mrf.mxu1  ;;  %v15719_v22 = vpop.f32.mrf.mxu0 }
 0xf5c   : > { %22045 = vst [vmem:[#allocation14_spill] sm:$0xff] %v21594_v38  ;;  %22046 = vst [vmem:[#allocation15_spill] sm:$0xff] %v21596_v0 }
 0xf5d   : > { %v10673_v3 = vpop.f32.mrf.mxu1  ;;  %v10817_v31 = vpop.f32.mrf.mxu0  ;;  %v22049_v41 = vld [vmem:[#allocation10_spill] sm:$0xff] }
 0xf5e   : > { %v21602_v12 = vadd.f32 %v10673_v3, %v10353_v45  ;;  %v21604_v56 = vadd.f32 %v10817_v31, %v10482_v21 }
 0xf5f   : > { %v15692_v10 = vpop.f32.mrf.mxu1  ;;  %v15720_v62 = vpop.f32.mrf.mxu0 }
 0xf60   : > { %22047 = vst [vmem:[#allocation16_spill] sm:$0xff] %v21602_v12  ;;  %22048 = vst [vmem:[#allocation17_spill] sm:$0xff] %v21604_v56  ;;  %v10854_v56 = vadd.f32 %v15691_v19, %v21551_v30  ;;  %v10866_v12 = vadd.f32 %v15719_v22, %v21553_v13  ;;  %v10855_v0 = vadd.f32 %v15692_v10, %v21555_v27  ;;  %v22050_v19 = vld [vmem:[#allocation11_spill] sm:$0xff] }
 0xf61   : > { %v10676_v36 = vpop.f32.mrf.mxu1  ;;  %v10820_v48 = vpop.f32.mrf.mxu0  ;;  %v10867_v38 = vadd.f32 %v15720_v62, %v21557_v6  ;;  %v22051_v10 = vld [vmem:[#allocation12_spill] sm:$0xff]  ;;  %v22052_v62 = vld [vmem:[#allocation13_spill] sm:$0xff] }
 0xf62   : > { %v10853_v9 = vadd.f32 %v10676_v36, %v21559_v46  ;;  %v10865_v40 = vadd.f32 %v10820_v48, %v21561_v1 }
 0xf63   : > { %v15695_v34 = vpop.f32.mrf.mxu1  ;;  %v15723_v20 = vpop.f32.mrf.mxu0  ;;  %v22053_v48 = vld [vmem:[#allocation14_spill] sm:$0xff] }
 0xf64   : > { %v10858_v63 = vadd.f32 %v15695_v34, %v21563_v15  ;;  %v10870_v24 = vadd.f32 %v15723_v20, %v21565_v49  ;;  %v22054_v34 = vld [vmem:[#allocation15_spill] sm:$0xff] }
 0xf65   : > { %v10689_v45 = vpop.f32.mrf.mxu1  ;;  %v10833_v57 = vpop.f32.mrf.mxu0 }
 0xf66   : > { %v10856_v2 = vadd.f32 %v10689_v45, %v21567_v54  ;;  %v10868_v29 = vadd.f32 %v10833_v57, %v21569_v28 }
 0xf67   : > { %v15696_v21 = vpop.f32.mrf.mxu1  ;;  %v15724_v51 = vpop.f32.mrf.mxu0  ;;  %v22055_v57 = vld [vmem:[#allocation16_spill] sm:$0xff] }
 0xf68   : > { %v10859_v30 = vadd.f32 %v15696_v21, %v21571_v17  ;;  %v10871_v13 = vadd.f32 %v15724_v51, %v21573_v11  ;;  %v22056_v21 = vld [vmem:[#allocation17_spill] sm:$0xff] }
 0xf69   : > { %v10692_v32 = vpop.f32.mrf.mxu1  ;;  %v10836_v43 = vpop.f32.mrf.mxu0 }
 0xf6a   : > { %v10857_v6 = vadd.f32 %v10692_v32, %v21575_v8  ;;  %v10869_v46 = vadd.f32 %v10836_v43, %v21577_v18 }
 0xf74   : > { %v15743_v7 = vpop.f32.mrf.mxu1  ;;  %v15771_v14 = vpop.f32.mrf.mxu0 }
 0xf75   : > { %v11210_v1 = vadd.f32 %v15743_v7, %v22049_v41  ;;  %v11222_v15 = vadd.f32 %v15771_v14, %v22050_v19 }
 0xf76   : > { %v11017_v23 = vpop.f32.mrf.mxu1  ;;  %v11161_v5 = vpop.f32.mrf.mxu0 }
 0xf77   : > { %v11208_v22 = vadd.f32 %v11017_v23, %v10848_v4  ;;  %v11220_v49 = vadd.f32 %v11161_v5, %v10860_v33 }
 0xf78   : > { %v15744_v39 = vpop.f32.mrf.mxu1  ;;  %v15772_v35 = vpop.f32.mrf.mxu0 }
 0xf79   : > { %v11211_v54 = vadd.f32 %v15744_v39, %v22051_v10  ;;  %v11223_v28 = vadd.f32 %v15772_v35, %v22052_v62 }
 0xf7a   : > { %v11020_v42 = vpop.f32.mrf.mxu1  ;;  %v11164_v44 = vpop.f32.mrf.mxu0 }
 0xf7b   : > { %v11209_v11 = vadd.f32 %v11020_v42, %v22053_v48  ;;  %v11221_v20 = vadd.f32 %v11164_v44, %v22054_v34 }
 0xf7c   : > { %v15747_v55 = vpop.f32.mrf.mxu1  ;;  %v15775_v59 = vpop.f32.mrf.mxu0 }
 0xf7d   : > { %v11214_v45 = vadd.f32 %v15747_v55, %v10854_v56  ;;  %v11226_v8 = vadd.f32 %v15775_v59, %v10866_v12 }
 0xf7e   : > { %v11033_v58 = vpop.f32.mrf.mxu1  ;;  %v11177_v25 = vpop.f32.mrf.mxu0 }
 0xf7f   : > { %v11212_v18 = vadd.f32 %v11033_v58, %v22055_v57  ;;  %v11224_v51 = vadd.f32 %v11177_v25, %v22056_v21 }
 0xf80   : > { %v15748_v52 = vpop.f32.mrf.mxu1  ;;  %v15776_v61 = vpop.f32.mrf.mxu0 }
 0xf81   : > { %v11215_v7 = vadd.f32 %v15748_v52, %v10855_v0  ;;  %v11227_v14 = vadd.f32 %v15776_v61, %v10867_v38 }
 0xf82   : > { %v11036_v50 = vpop.f32.mrf.mxu1  ;;  %v11180_v60 = vpop.f32.mrf.mxu0 }
 0xf83   : > { %v11213_v23 = vadd.f32 %v11036_v50, %v10853_v9  ;;  %v11225_v5 = vadd.f32 %v11180_v60, %v10865_v40 }
 0xf84   : > { %v15751_v47 = vpop.f32.mrf.mxu1  ;;  %v15779_v3 = vpop.f32.mrf.mxu0 }
 0xf85   : > { %v21639_v39 = vadd.f32 %v15751_v47, %v10858_v63  ;;  %v21641_v35 = vadd.f32 %v15779_v3, %v10870_v24 }
 0xf86   : > { %v11049_v31 = vpop.f32.mrf.mxu1  ;;  %v11193_v37 = vpop.f32.mrf.mxu0 }
 0xf87   : > { %v21647_v55 = vadd.f32 %v11049_v31, %v10856_v2  ;;  %v21649_v59 = vadd.f32 %v11193_v37, %v10868_v29 }
 0xf88   : > { %v15752_v16 = vpop.f32.mrf.mxu1  ;;  %v15780_v26 = vpop.f32.mrf.mxu0 }
 0xf89   : > { %v21655_v9 = vadd.f32 %v15752_v16, %v10859_v30  ;;  %v21657_v63 = vadd.f32 %v15780_v26, %v10871_v13 }
 0xf8a   : > { %v11052_v53 = vpop.f32.mrf.mxu1  ;;  %v11196_v27 = vpop.f32.mrf.mxu0 }
 0xf8b   : > { %v21663_v47 = vadd.f32 %v11052_v53, %v10857_v6  ;;  %v21665_v3 = vadd.f32 %v11196_v27, %v10869_v46 }
 0xf95   : > { %v15799_v36 = vpop.f32.mrf.mxu1  ;;  %v15827_v17 = vpop.f32.mrf.mxu0 }
 0xf96   : > { %v21635_v32 = vadd.f32 %v15799_v36, %v11210_v1  ;;  %v21637_v4 = vadd.f32 %v15827_v17, %v11222_v15 }
 0xf97   : > { %v11377_v33 = vpop.f32.mrf.mxu1  ;;  %v11521_v43 = vpop.f32.mrf.mxu0 }
 0xf98   : > { %v21643_v56 = vadd.f32 %v11377_v33, %v11208_v22  ;;  %v21645_v12 = vadd.f32 %v11521_v43, %v11220_v49  ;;  %v11594_v24 = vrot.slane %v21635_v32, 1  ;;  %v11630_v40 = vrot.slane %v21637_v4, 1 }
 0xf99   : > { %v15800_v42 = vpop.f32.mrf.mxu1  ;;  %v15828_v44 = vpop.f32.mrf.mxu0 }
 0xf9a   : > { %v21651_v58 = vadd.f32 %v15800_v42, %v11211_v54  ;;  %v21653_v0 = vadd.f32 %v15828_v44, %v11223_v28  ;;  %v11592_v16 = vrot.slane %v21643_v56, 1  ;;  %v11628_v26 = vrot.slane %v21645_v12, 1 }
 0xf9b   : > { %v11380_v38 = vpop.f32.mrf.mxu1  ;;  %v11524_v25 = vpop.f32.mrf.mxu0 }
 0xf9c   : > { %v11595_v52 = vrot.slane %v21651_v58, 1  ;;  %v11631_v61 = vrot.slane %v21653_v0, 1  ;;  %v11569_v50 = vadd.f32 %v11380_v38, %v11209_v11  ;;  %v11581_v60 = vadd.f32 %v11524_v25, %v11221_v20 }
 0xf9d   : > { %v15803_v31 = vpop.f32.mrf.mxu1  ;;  %v15831_v37 = vpop.f32.mrf.mxu0 }
 0xf9e   : > { %v11612_v29 = vsel %vm1243_vm3, %v11594_v24, %v11595_v52  ;;  %v11648_v30 = vsel %vm1243_vm3, %v11630_v40, %v11631_v61  ;;  %v11593_v13 = vrot.slane %v11569_v50, 1  ;;  %v11629_v41 = vrot.slane %v11581_v60, 1 }
 0xf9f   : > { %v11618_v1 = vmax.f32 %v21635_v32, %v11612_v29  ;;  %v11654_v53 = vmax.f32 %v21637_v4, %v11648_v30  ;;  %v21675_v27 = vadd.f32 %v15803_v31, %v11214_v45  ;;  %v21677_v6 = vadd.f32 %v15831_v37, %v11226_v8  ;;  %v11393_v46 = vpop.f32.mrf.mxu1  ;;  %v11537_v19 = vpop.f32.mrf.mxu0  ;;  %v21698_v8 = vld [vmem:[%s21909_s7] ss:$0 sm:$0xff] }
 0xfa0   : > { %v11613_v15 = vsel %vm1243_vm3, %v11593_v13, %v11594_v24  ;;  %v11614_v22 = vsel %vm1243_vm3, %v11592_v16, %v11593_v13  ;;  %v11649_v49 = vsel %vm1243_vm3, %v11629_v41, %v11630_v40  ;;  %v11650_v10 = vsel %vm1243_vm3, %v11628_v26, %v11629_v41 }
 0xfa1   : > { %v11616_v54 = vmax.f32 %v21643_v56, %v11614_v22  ;;  %v11617_v62 = vmax.f32 %v11569_v50, %v11613_v15  ;;  %v11652_v28 = vmax.f32 %v21645_v12, %v11650_v10  ;;  %v11653_v36 = vmax.f32 %v11581_v60, %v11649_v49  ;;  %v15804_v17 = vpop.f32.mrf.mxu1  ;;  %v15832_v48 = vpop.f32.mrf.mxu0 }
 0xfa2   : > { %v11598_v11 = vrot.slane %v21675_v27, 1  ;;  %v11634_v34 = vrot.slane %v21677_v6, 1  ;;  %v11572_v20 = vadd.f32 %v11393_v46, %v11212_v18  ;;  %v11584_v45 = vadd.f32 %v11537_v19, %v11224_v51 }
 0xfa3   : > { %v21700_v57 = vmax.f32 %v11617_v62, %v11653_v36  ;;  %v21702_v21 = vadd.f32 %v15804_v17, %v11215_v7  ;;  %v21704_v32 = vadd.f32 %v15832_v48, %v11227_v14  ;;  %v11396_v4 = vpop.f32.mrf.mxu1  ;;  %v11540_v33 = vpop.f32.mrf.mxu0  ;;  %v11666_v43 = vmax.f32 %v11618_v1, %v11654_v53 }
 0xfa4   : > { %v11596_v42 = vrot.slane %v11572_v20, 1  ;;  %v11632_v44 = vrot.slane %v11584_v45, 1  ;;  %v11573_v24 = vadd.f32 %v11396_v4, %v11213_v23  ;;  %v11585_v40 = vadd.f32 %v11540_v33, %v11225_v5 }
 0xfa5   : > { %v11599_v18 = vrot.slane %v21702_v21, 1  ;;  %v11635_v51 = vrot.slane %v21704_v32, 1  ;;  %v15807_v38 = vpop.f32.mrf.mxu1  ;;  %v15835_v25 = vpop.f32.mrf.mxu0  ;;  %v21709_v50 = vadd.f32 %v21698_v8, %v11666_v43  ;;  %v21711_v7 = vmax.f32 %v11616_v54, %v11652_v28 }
 0xfa6   : > { %v21715_v14 = vsel %vm1243_vm3, %v11595_v52, %v11596_v42  ;;  %v21719_v60 = vsel %vm1243_vm3, %v11631_v61, %v11632_v44  ;;  %v11597_v23 = vrot.slane %v11573_v24, 1  ;;  %v11633_v5 = vrot.slane %v11585_v40, 1 }
 0xfa7   : > { %v11619_v31 = vmax.f32 %v21651_v58, %v21715_v14  ;;  %v11655_v37 = vmax.f32 %v21653_v0, %v21719_v60  ;;  %v11608_v29 = vsel %vm1243_vm3, %v11598_v11, %v11599_v18  ;;  %v11644_v30 = vsel %vm1243_vm3, %v11634_v34, %v11635_v51  ;;  %v11409_v52 = vpop.f32.mrf.mxu1  ;;  %v11553_v13 = vpop.f32.mrf.mxu0 }
 0xfa8   : > { %v11622_v41 = vmax.f32 %v21675_v27, %v11608_v29  ;;  %v11658_v61 = vmax.f32 %v21677_v6, %v11644_v30  ;;  %v11609_v1 = vsel %vm1243_vm3, %v11597_v23, %v11598_v11  ;;  %v11610_v58 = vsel %vm1243_vm3, %v11596_v42, %v11597_v23 }
 0xfa9   : > { %v11620_v53 = vmax.f32 %v11572_v20, %v11610_v58  ;;  %v11621_v0 = vmax.f32 %v11573_v24, %v11609_v1  ;;  %v11645_v46 = vsel %vm1243_vm3, %v11633_v5, %v11634_v34  ;;  %v11646_v19 = vsel %vm1243_vm3, %v11632_v44, %v11633_v5  ;;  %v15808_v15 = vpop.f32.mrf.mxu1  ;;  %v15836_v22 = vpop.f32.mrf.mxu0 }
 0xfaa   : > { %v11656_v49 = vmax.f32 %v11584_v45, %v11646_v19  ;;  %v11657_v27 = vmax.f32 %v11585_v40, %v11645_v46  ;;  %v11578_v6 = vadd.f32 %v15807_v38, %v21639_v39  ;;  %v11590_v10 = vadd.f32 %v15835_v25, %v21641_v35 }
 0xfab   : > { %v11576_v54 = vadd.f32 %v11409_v52, %v21647_v55  ;;  %v11588_v62 = vadd.f32 %v11553_v13, %v21649_v59  ;;  %v11579_v28 = vadd.f32 %v15808_v15, %v21655_v9  ;;  %v11591_v36 = vadd.f32 %v15836_v22, %v21657_v63  ;;  %v11412_v17 = vpop.f32.mrf.mxu1  ;;  %v11556_v48 = vpop.f32.mrf.mxu0 }
 0xfac   : > { %v11669_v11 = vmax.f32 %v11621_v0, %v11657_v27  ;;  %v11602_v34 = vrot.slane %v11578_v6, 1  ;;  %v11638_v20 = vrot.slane %v11590_v10, 1  ;;  %v11577_v45 = vadd.f32 %v11412_v17, %v21663_v47 }
 0xfad   : > { %v11600_v4 = vrot.slane %v11576_v54, 1  ;;  %v11636_v33 = vrot.slane %v11588_v62, 1  ;;  %v11603_v39 = vrot.slane %v11579_v28, 1  ;;  %v11639_v43 = vrot.slane %v11591_v36, 1 }
 0xfae   : > { %v11601_v35 = vrot.slane %v11577_v45, 1  ;;  %v11589_v55 = vadd.f32 %v11556_v48, %v21665_v3  ;;  %v11670_v42 = vmax.f32 %v11622_v41, %v11658_v61  ;;  %v11668_v59 = vmax.f32 %v11620_v53, %v11656_v49 }
 0xfaf   : > { %v11607_v9 = vsel %vm1243_vm3, %v11599_v18, %v11600_v4  ;;  %v11643_v63 = vsel %vm1243_vm3, %v11635_v51, %v11636_v33  ;;  %v11604_v44 = vsel %vm1243_vm3, %v11602_v34, %v11603_v39  ;;  %v11615_v47 = vsel %vm1243_vm3, %v11603_v39, %v11592_v16 }
 0xfb0   : > { %v11623_v24 = vmax.f32 %v21702_v21, %v11607_v9  ;;  %v11659_v3 = vmax.f32 %v21704_v32, %v11643_v63  ;;  %v11626_v40 = vmax.f32 %v11578_v6, %v11604_v44  ;;  %v11627_v38 = vmax.f32 %v11579_v28, %v11615_v47  ;;  %v16530_v44 = vld [vmem:[%s21911_s9 + $0x70] sm:$0xff]  }
 0xfb1   : > { %v11640_v18 = vsel %vm1243_vm3, %v11638_v20, %v11639_v43  ;;  %v11651_v51 = vsel %vm1243_vm3, %v11639_v43, %v11628_v26  ;;  %v11605_v56 = vsel %vm1243_vm3, %v11601_v35, %v11602_v34  ;;  %v11606_v16 = vsel %vm1243_vm3, %v11600_v4, %v11601_v35  ;;  %v16524_v43 = vld [vmem:[%s21911_s9 + $0x40] sm:$0xff]   ;;  %v16526_v35 = vld [vmem:[%s21911_s9 + $0x38] sm:$0xff]  }
 0xfb2   : > { %v11662_v25 = vmax.f32 %v11590_v10, %v11640_v18  ;;  %v11663_v21 = vmax.f32 %v11591_v36, %v11651_v51  ;;  %v11624_v14 = vmax.f32 %v11576_v54, %v11606_v16  ;;  %v11625_v32 = vmax.f32 %v11577_v45, %v11605_v56  ;;  %v16533_v51 = vld [vmem:[%s21911_s9 + $0x60] sm:$0xff]   ;;  %v16534_v56 = vld [vmem:[%s21911_s9 + $0x90] sm:$0xff]   ;;  %v16535_v16 = vld [vmem:[%s21911_s9 + $0x58] sm:$0xff]  }
 0xfb3   : > { %v11637_v60 = vrot.slane %v11589_v55, 1  ;;  %v11671_v23 = vmax.f32 %v11623_v24, %v11659_v3  ;;  %v11689_v5 = vadd.f32 %v21698_v8, %v11670_v42  ;;  %v11687_v29 = vadd.f32 %v21698_v8, %v11668_v59  ;;  %v16528_v42 = vld [vmem:[%s21911_s9 + $0x30] sm:$0xff]   ;;  %v16529_v59 = vld [vmem:[%s21911_s9 + $0x28] sm:$0xff]  }
 0xfb4   : > { %v11675_v12 = vmax.f32 %v11627_v38, %v11663_v21  ;;  %v11674_v30 = vmax.f32 %v11626_v40, %v11662_v25  ;;  %v11688_v26 = vadd.f32 %v21698_v8, %v11669_v11  ;;  %v11667_v52 = vmax.f32 %v11619_v31, %v11655_v37  ;;  %v16531_v40 = vld [vmem:[%s21911_s9 + $0x68] sm:$0xff]   ;;  %v16532_v38 = vld [vmem:[%s21911_s9 + $0x98] sm:$0xff]   ;;  %v16537_v21 = vld [vmem:[%s21911_s9 + $0x50] sm:$0xff]  }
 0xfb5   : > { %v11641_v13 = vsel %vm1243_vm3, %v11637_v60, %v11638_v20  ;;  %v11642_v41 = vsel %vm1243_vm3, %v11636_v33, %v11637_v60  ;;  %v11690_v61 = vadd.f32 %v21698_v8, %v11671_v23  ;;  %v11701_v1 = vmax.f32 %v11689_v5, 0.0  ;;  %v16536_v25 = vld [vmem:[%s21911_s9 + $0x88] sm:$0xff]   ;;  %v22059_v23 = vld [vmem:[#allocation5_spill] sm:$0xff] }
 0xfb6   : > { %v11660_v58 = vmax.f32 %v11588_v62, %v11642_v41  ;;  %v11661_v53 = vmax.f32 %v11589_v55, %v11641_v13  ;;  %v11693_v0 = vadd.f32 %v21698_v8, %v11674_v30  ;;  %v11694_v46 = vadd.f32 %v21698_v8, %v11675_v12  ;;  %v16527_v55 = vld [vmem:[%s21911_s9] sm:$0xff]   ;;  %v16617_v12 = vld [vmem:[%s21913_s11 + $0x8] sm:$0xff]  }
 0xfb7   : > { %v11702_v19 = vmax.f32 %v11690_v61, 0.0  ;;  %v11699_v15 = vmax.f32 %v11687_v29, 0.0  ;;  %v11700_v22 = vmax.f32 %v11688_v26, 0.0  ;;  %v11686_v31 = vadd.f32 %v21698_v8, %v11667_v52  ;;  %15862 = vmatpush3.bf16.msra.mxu0 %v16527_v55  ;;  %v16616_v29 = vld [vmem:[%s21913_s11 + $0x10] sm:$0xff]   ;;  %v16618_v30 = vld [vmem:[%s21913_s11] sm:$0xff]  }
 0xfb8   : > { %v11673_v37 = vmax.f32 %v11625_v32, %v11661_v53  ;;  %v11705_v49 = vmax.f32 %v11693_v0, 0.0  ;;  %v11706_v27 = vmax.f32 %v11694_v46, 0.0  ;;  %v11672_v6 = vmax.f32 %v11624_v14, %v11660_v58  ;;  %v16538_v14 = vld [vmem:[%s21911_s9 + $0x80] sm:$0xff]   ;;  %v16539_v32 = vld [vmem:[%s21911_s9 + $0x78] sm:$0xff]  }
 0xfb9   : > { %v11710_v2 = vpack.c.bf16 %v11702_v19, %v11701_v1  ;;  %v11709_v10 = vpack.c.bf16 %v11700_v22, %v11699_v15  ;;  %v11697_v54 = vmax.f32 %v21709_v50, 0.0  ;;  %v11698_v28 = vmax.f32 %v11686_v31, 0.0  ;;  %v13702_v0 = vld [vmem:[%s21912_s10] ss:$0 sm:$0xff] }
 0xfba   : > { %v11712_v62 = vpack.c.bf16 %v11706_v27, %v11705_v49  ;;  %v11691_v36 = vadd.f32 %v21698_v8, %v11672_v6  ;;  %v11692_v17 = vadd.f32 %v21698_v8, %v11673_v37  ;;  %v11683_v48 = vadd.f32 %v21698_v8, %v21711_v7  ;;  %v16615_v7 = vld [vmem:[%s21910_s8 + $0x8] sm:$0xff]  }
 0xfbb   : > { %v11708_v11 = vpack.c.bf16 %v11698_v28, %v11697_v54  ;;  %v11684_v34 = vadd.f32 %v21698_v8, %v21700_v57  ;;  %v16522_v8 = vld [vmem:[%s21911_s9 + $0x48] sm:$0xff]   ;;  %v22058_v57 = vmov 0.0  }
 0xfbc   : > { %15837 = vmatprep.subr.bf16.mxu1 %v11712_v62  ;;  %v11703_v20 = vmax.f32 %v11691_v36, 0.0  ;;  %v11704_v45 = vmax.f32 %v11692_v17, 0.0  ;;  %v11695_v4 = vmax.f32 %v11683_v48, 0.0  ;;  %15881 = vmatprep.subr.bf16.mxu0 %v22058_v57  ;;  %v22060_v36 = vld [vmem:[#allocation8_spill] sm:$0xff]  ;;  %v22061_v17 = vld [vmem:[#allocation7_spill] sm:$0xff] }
 0xfbd   : > { %15838 = vmatpush3.bf16.msra.mxu1 %v11712_v62  ;;  %v11696_v33 = vmax.f32 %v11684_v34, 0.0  ;;  %v6426_v48 = vsub.f32 %v22061_v17, %v22060_v36  ;;  %v13751_v34 = vld [vmem:[%s21914_s12] ss:$0 sm:$0xff] }
 0xfbe   : > { %v11711_v50 = vpack.c.bf16 %v11704_v45, %v11703_v20 }
 0xfbf   : > { %v11707_v39 = vpack.c.bf16 %v11696_v33, %v11695_v4 }
 0xfc0   : > { %15839 = vmatprep.subr.bf16.mxu1 %v11711_v50 }
 0xfc1   : > { %15840 = vmatpush3.bf16.msra.mxu1 %v11711_v50 }
 0xfc2   : > { %15841 = vmatprep.subr.bf16.mxu1 %v11710_v2 }
 0xfc5   : > { %15842 = vmatpush3.bf16.msra.mxu1 %v11710_v2 }
 0xfc6   : > { %15843 = vmatprep.subr.bf16.mxu1 %v11709_v10 }
 0xfc9   : > { %15844 = vmatpush3.bf16.msra.mxu1 %v11709_v10 }
 0xfca   : > { %15845 = vmatprep.subr.bf16.mxu1 %v11708_v11 }
 0xfcd   : > { %15846 = vmatpush3.bf16.msra.mxu1 %v11708_v11  ;;  %v6427_v11 = vmul.f32 1.442695, %v6426_v48 }
 0xfce   : > { %15847 = vmatprep.subr.bf16.mxu1 %v11707_v39 }
 0xfcf   : > { %16546 = vpow2.f32 %v6427_v11 }
 0xfd1   : > { %15848 = vmatpush3.bf16.msra.mxu1 %v11707_v39 }
 0xfd2   : > { %15867 = vmatprep.subr.bf16.mxu1 %v22058_v57 }
 0xfd4   : > { %15850 = vmatmul.mubr.msk.bf16.vlgmr.msra.gmra.mxu1 %vm3068_vm8, %v16615_v7  ;;  %v9300_v7 = vpop.xlane.xlu0 %9299 }
 0xfd5   : > { %15868 = vmatpush3.bf16.msra.mxu1 %v16522_v8  ;;  %15877 = vmatprep.mubr.msk.bf16.mxu1 %vm16629_vm9, %v22058_v57  ;;  %16548 = vlog2.f32 %v9300_v7 }
 0xfd6   : > { %15869 = vmatprep.subr.bf16.mxu1 %v22058_v57 }
 0xfd9   : > { %15870 = vmatpush3.bf16.msra.mxu1 %v16524_v43 }
 0xfda   : > { %15871 = vmatprep.subr.bf16.mxu1 %v22058_v57 }
 0xfdc   : > { %v16547_v50 = vpop.eup %16546 }
 0xfdd   : > { %15872 = vmatpush3.bf16.msra.mxu1 %v16526_v35 }
 0xfde   : > { %15873 = vmatprep.subr.bf16.mxu1 %v22058_v57 }
 0xfe1   : > { %15874 = vmatpush3.bf16.msra.mxu1 %v16528_v42 }
 0xfe2   : > { %15875 = vmatprep.subr.bf16.mxu1 %v22058_v57 }
 0xfe5   : > { %15876 = vmatpush3.bf16.msra.mxu1 %v16529_v59  ;;  %v16549_v59 = vpop.eup %16548 }
 0xfe6   : > { %15895 = vmatprep.subr.bf16.mxu1 %v22058_v57 }
0x1094   : > { %v15851_v9 = vpop.f32.mrf.mxu1 }
0x1095   : > { %v11939_v60 = vpack.c.bf16 %v15851_v9, %v15851_v9 }
0x1096   : > { %v11747_v63 = vpop.f32.mrf.mxu1 }
0x1097   : > { %v11763_v47 = vpack.c.bf16 %v11747_v63, %v11747_v63 }
0x1098   : > { %v15852_v24 = vpop.f32.mrf.mxu1 }
0x1099   : > { %15864 = vmatmul.mubr.msk.bf16.vlgmr.msra.gmra.mxu0 %vm3166_vm10, %v11763_v47  ;;  %v12024_v5 = vpack.c.bf16 %v15852_v24, %v15852_v24 }
0x109a   : > { %15882 = vmatpush3.bf16.msra.mxu0 %v16530_v44  ;;  %v11750_v3 = vpop.f32.mrf.mxu1  ;;  %15891 = vmatprep.mubr.msk.bf16.mxu0 %vm16629_vm9, %v22058_v57  ;;  %v9302_v44 = vmul.f32 0.6931472, %v16549_v59 }
0x109b   : > { %v11854_v18 = vpack.c.bf16 %v11750_v3, %v11750_v3  ;;  %15883 = vmatprep.subr.bf16.mxu0 %v22058_v57 }
0x109d   : > { %15878 = vmatmul.mubr.msk.bf16.vlgmr.msra.gmra.mxu1 %vm3166_vm10, %v11854_v18 }
0x109e   : > { %15884 = vmatpush3.bf16.msra.mxu0 %v16531_v40  ;;  %15896 = vmatpush3.bf16.msra.mxu1 %v16532_v38  ;;  %v22062_v40 = vld [vmem:[#allocation9_spill] sm:$0xff] }
0x109f   : > { %15885 = vmatprep.subr.bf16.mxu0 %v22058_v57  ;;  %15897 = vmatprep.subr.bf16.mxu1 %v22058_v57  ;;  %v9303_v38 = vsub.f32 %v22062_v40, %v9302_v44 }
0x10a0   : > { %15905 = vmatprep.mubr.msk.bf16.mxu1 %vm16629_vm9, %v22058_v57 }
0x10a1   : > { %9304 = vst.msk [vmem:[%s20001_s17 + $0x10] sm:$0xff] %vm3553_vm13, %v9303_v38 }
0x10a2   : > { %15886 = vmatpush3.bf16.msra.mxu0 %v16533_v51  ;;  %15898 = vmatpush3.bf16.msra.mxu1 %v16534_v56 }
0x10a3   : > { %15887 = vmatprep.subr.bf16.mxu0 %v22058_v57  ;;  %15899 = vmatprep.subr.bf16.mxu1 %v22058_v57 }
0x10a6   : > { %15888 = vmatpush3.bf16.msra.mxu0 %v16535_v16  ;;  %15900 = vmatpush3.bf16.msra.mxu1 %v16536_v25 }
0x10a7   : > { %15889 = vmatprep.subr.bf16.mxu0 %v22058_v57  ;;  %15901 = vmatprep.subr.bf16.mxu1 %v22058_v57 }
0x10aa   : > { %15890 = vmatpush3.bf16.msra.mxu0 %v16537_v21  ;;  %15902 = vmatpush3.bf16.msra.mxu1 %v16538_v14 }
0x10ab   : > { %15903 = vmatprep.subr.bf16.mxu1 %v22058_v57  ;;  %15909 = vmatprep.subr.bf16.mxu0 %v22058_v57 }
0x10ad   : > { %15892 = vmatmul.mubr.msk.bf16.vlgmr.msra.gmra.mxu0 %vm3166_vm10, %v11939_v60 }
0x10ae   : > { %15904 = vmatpush3.bf16.msra.mxu1 %v16539_v32  ;;  %15910 = vmatpush3.bf16.msra.mxu0 %v22059_v23 }
0x10af   : > { %15911 = vmatprep.subr.bf16.mxu0 %v22058_v57  ;;  %15917 = vmatprep.mubr.msk.bf16.mxu0 %vm16629_vm9, %v22058_v57 }
0x10b1   : > { %15906 = vmatmul.mubr.msk.bf16.vlgmr.msra.gmra.mxu1 %vm3166_vm10, %v12024_v5 }
0x10b2   : > { %15912 = vmatpush3.bf16.msra.mxu0 %v16616_v29 }
0x10b3   : > { %15913 = vmatprep.subr.bf16.mxu0 %v22058_v57 }
0x10b6   : > { %15914 = vmatpush3.bf16.msra.mxu0 %v16617_v12 }
0x10b7   : > { %15915 = vmatprep.subr.bf16.mxu0 %v22058_v57  ;;  %v6429_v57 = vsel %vm3553_vm13, %v16547_v50, 0.0 }
0x10ba   : > { %15916 = vmatpush3.bf16.msra.mxu0 %v16618_v30 }
0x1159   : > { %v11841_v26 = vpop.f32.mrf.mxu0 }
0x115a   : > { %v11853_v46 = vadd.f32 %v13702_v0, %v11841_v26 }
0x115b   : > { %v15865_v52 = vpop.f32.mrf.mxu0 }
0x115d   : > { %v11844_v13 = vpop.f32.mrf.mxu0  ;;  %v11932_v41 = vpop.f32.mrf.mxu1 }
0x115e   : > { %v11938_v15 = vadd.f32 %v11932_v41, %v11853_v46 }
0x115f   : > { %v15866_v61 = vpop.f32.mrf.mxu0  ;;  %v15879_v1 = vpop.f32.mrf.mxu1 }
0x1161   : > { %v11935_v58 = vpop.f32.mrf.mxu1 }
0x1163   : > { %v15880_v53 = vpop.f32.mrf.mxu1 }
0x116d   : > { %v12017_v19 = vpop.f32.mrf.mxu0 }
0x116e   : > { %v12023_v31 = vadd.f32 %v12017_v19, %v11938_v15 }
0x116f   : > { %v15893_v22 = vpop.f32.mrf.mxu0 }
0x1171   : > { %v12020_v37 = vpop.f32.mrf.mxu0  ;;  %v12102_v49 = vpop.f32.mrf.mxu1 }
0x1172   : > { %v12108_v27 = vadd.f32 %v12102_v49, %v12023_v31 }
0x1173   : > { %v15894_v6 = vpop.f32.mrf.mxu0  ;;  %v15907_v2 = vpop.f32.mrf.mxu1 }
0x1174   : > { %v12109_v10 = vmax.f32 %v12108_v27, 0.0 }
0x1175   : > { %v12105_v54 = vpop.f32.mrf.mxu1 }
0x1176   : > { %v12110_v28 = vpack.c.bf16 %v12109_v10, %v12109_v10 }
0x1177   : > { %v15908_v62 = vpop.f32.mrf.mxu1 }
0x1178   : > { %15918 = vmatmul.mubr.msk.bf16.vlgmr.msra.gmra.mxu0 %vm3505_vm12, %v12110_v28 }
0x1238   : > { %v12155_v20 = vpop.f32.mrf.mxu0 }
0x1239   : > { %v12156_v45 = vadd.f32 %v13751_v34, %v12155_v20 }
0x123a   : > { %v15919_v4 = vpop.f32.mrf.mxu0 }
0x123b   : > { %v12161_v33 = vsel %vm3553_vm13, %v12156_v45, -inf }
0x123c   : > { %12162 = vmax.xlane.f32.xlu1 %v12161_v33  ;;  %v12158_v39 = vpop.f32.mrf.mxu0 }
0x123e   : > { %v15920_v8 = vpop.f32.mrf.mxu0 }
0x1240   : > { %6430 = vadd.xlane.f32.xlu1 %v6429_v57 }
0x12c5   : > { %v12163_v43 = vpop.xlane.xlu1 %12162 }
0x12c6   : > { %v12164_v35 = vsub.f32 %v12156_v45, %v12163_v43 }
0x12c8   : > { %v12165_v55 = vmul.f32 1.442695, %v12164_v35 }
0x12c9   : > { %v6431_v42 = vpop.xlane.xlu1 %6430 }
0x12ca   : > { %16550 = vpow2.f32 %v12165_v55 }
0x12cb   : > { %16552 = vlog2.f32 %v6431_v42 }
0x12d7   : > { %v16551_v9 = vpop.eup %16550 }
0x12d8   : > { %v16553_v63 = vpop.eup %16552  ;;  %v12167_v47 = vsel %vm3553_vm13, %v16551_v9, 0.0 }
0x12d9   : > { %v6433_v24 = vmul.f32 0.6931472, %v16553_v63  ;;  %12168 = vadd.xlane.f32.xlu1 %v12167_v47 }
0x12db   : > { %v6434_v3 = vsub.f32 %v6426_v48, %v6433_v24 }
0x12dd   : > { %6435 = vst.msk [vmem:[%s20001_s17 + $0x8] sm:$0xff] %vm3553_vm13, %v6434_v3 }
0x1362   : > { %v12169_v18 = vpop.xlane.xlu1 %12168 }
0x1363   : > { %16554 = vlog2.f32 %v12169_v18 }
0x1370   : > { %v16555_v51 = vpop.eup %16554 }
0x1371   : > { %v12171_v56 = vmul.f32 0.6931472, %v16555_v51 }
0x1373   : > { %v12172_v16 = vsub.f32 %v12164_v35, %v12171_v56 }
0x1375   : > { %12173 = vst.msk [vmem:[%s20001_s17 + $0x18] sm:$0xff] %vm3553_vm13, %v12172_v16 }
0x1376 PF: > { %s23_s25 = sadd.s32 1, %s16625_s25  }
0x1377   : > { %p20_p5 = scmp.ge.s32.totalorder %s23_s25, 4  }
0x1379   :  { %22 = sbr.rel (!%p20_p5) target bundleno = 1 (0x1), region = 116 }

</bundles_post_ra>
